<compile_context>
chip_gen: v7x
topology: tpu7x:2x2x1
jax: 0.10.0
libtpu: 0.0.40
codegen_flags: <defaults>
</compile_context>

<pallas_src>
from functools import partial

import jax
import jax.numpy as jnp
from jax.experimental import pallas as pl
from jax.experimental.pallas import tpu as pltpu


# ----------------------------------------------------------------------------
# Fused Pallas kernel (whole network, one sample per grid step)
# ----------------------------------------------------------------------------

def titanet_kernel(x_ref, *refs, kp, kmb, ke, n_mega, n_sub, eps):
    (p_w, p_b, p_s, p_sh,                     # prolog conv (im2col) + folded BN
     sk_w, sk_b, sk_s, sk_sh,                 # skip 1x1 conv + BN   [stacked over mega blocks]
     dw_w, dw_b, pw_w, pw_b, sb_s, sb_sh,     # sub blocks           [stacked over mega*sub]
     se_w1, se_b1, se_w2, se_b2,              # squeeze-excitation   [stacked over mega blocks]
     e_w, e_b, e_s, e_sh,                     # epilog conv (im2col) + BN
     dl_wt, dl_b, dl_s, dl_sh,                # decoder linear + BN
     po_wint, po_bin, po_woutt, po_bout, po_s, po_sh,   # attentive pooling + BN(2DE)
     o_ref) = refs

    def shift_time(v, offset):
        # u[:, t] = v[:, t + offset]; positions outside [0, T) are zero.
        # Static lane slice + zero concat on a vreg/VMEM-resident value
        # (Mosaic lowers this to lane shifts/selects; pltpu.roll+mask is equivalent).
        if offset == 0:
            return v
        c = v.shape[0]
        z = jnp.zeros((c, abs(offset)), v.dtype)
        if offset > 0:
            return jnp.concatenate([v[:, offset:], z], axis=1)
        return jnp.concatenate([z, v[:, :offset]], axis=1)

    def conv_bn(v, w2, b, s, sh, k, relu):
        # 'same' Conv1d as ONE im2col MXU matmul: [Cout, k*Cin] x [k*Cin, T].
        pad = (k - 1) // 2
        if k == 1:
            cols = v
        else:
            cols = jnp.concatenate([shift_time(v, j - pad) for j in range(k)], axis=0)
        y = jnp.dot(w2[...], cols, preferred_element_type=jnp.float32) + b[...]
        y = y * s[...] + sh[...]                                  # folded BatchNorm (eval)
        return jnp.maximum(y, 0.0) if relu else y

    x = x_ref[0].astype(jnp.float32)                              # [M, T]

    # --- Encoder prolog: ConvBlock1d(M -> H) ---
    h = conv_bn(x, p_w, p_b, p_s, p_sh, kp, True)                 # [H, T]

    # --- Mega blocks ---
    pad_mb = (kmb - 1) // 2
    for m in range(n_mega):
        # skip connection: Conv1d(1x1) + BN
        skip = jnp.dot(sk_w[m], h, preferred_element_type=jnp.float32) + sk_b[m]
        skip = skip * sk_s[m] + sk_sh[m]
        # time-channel separable sub blocks
        sub = h
        for si in range(n_sub):
            l = m * n_sub + si
            acc = dw_w[0, l] * shift_time(sub, -pad_mb)           # depthwise taps (VPU)
            for j in range(1, kmb):
                acc = acc + dw_w[j, l] * shift_time(sub, j - pad_mb)
            hd = acc + dw_b[l]
            y = jnp.dot(pw_w[l], hd, preferred_element_type=jnp.float32) + pw_b[l]
            y = y * sb_s[l] + sb_sh[l]
            sub = jnp.maximum(y, 0.0)
        # squeeze-excitation
        pooled = jnp.mean(sub, axis=1, keepdims=True)             # [H, 1]
        z = jnp.maximum(
            jnp.dot(se_w1[m], pooled, preferred_element_type=jnp.float32) + se_b1[m], 0.0)
        gate = jax.nn.sigmoid(
            jnp.dot(se_w2[m], z, preferred_element_type=jnp.float32) + se_b2[m])
        # merge: relu(skip + SE(sub)); dropout = identity (eval)
        h = jnp.maximum(skip + sub * gate, 0.0)

    # --- Encoder epilog: ConvBlock1d(H -> DE) ---
    enc = conv_bn(h, e_w, e_b, e_s, e_sh, ke, True)               # [DE, T]

    # --- Decoder `linear`: Linear(2*DE -> E) along time, then BatchNorm1d(E) ---
    y = jnp.dot(enc, dl_wt[...], preferred_element_type=jnp.float32) + dl_b[...]   # [DE, E]
    y = y * dl_s[...] + dl_sh[...]

    # --- Decoder `pool`: AttentiveStatsPooling + BatchNorm1d(2*DE) + L2 norm ---
    yt = y.T                                                      # [T2, DE], T2 == E
    hh = jnp.tanh(jnp.dot(yt, po_wint[...], preferred_element_type=jnp.float32) + po_bin[...])
    en = jnp.dot(hh, po_woutt[...], preferred_element_type=jnp.float32) + po_bout[...]  # [T2, DE]
    en_max = jnp.max(en, axis=0, keepdims=True)
    pexp = jnp.exp(en - en_max)
    alphas = pexp / jnp.sum(pexp, axis=0, keepdims=True)          # softmax over time
    means = jnp.sum(alphas * yt, axis=0, keepdims=True)           # [1, DE]
    resid = jnp.sum(alphas * yt * yt, axis=0, keepdims=True) - means * means
    stds = jnp.sqrt(jnp.maximum(resid, eps))
    stats = jnp.concatenate([means, stds], axis=1)                # [1, 2*DE]
    stats = stats * po_s[...] + po_sh[...]                        # BN(2*DE) eval affine
    nrm = jnp.maximum(jnp.sqrt(jnp.sum(stats * stats, axis=1, keepdims=True)), 1e-12)
    o_ref[0] = (stats / nrm).astype(o_ref.dtype)


# ----------------------------------------------------------------------------
# pallas_call wrapper
# ----------------------------------------------------------------------------

def build_forward(cfg):
    kp, kmb, ke = cfg["prolog_kernel"], cfg["mega_kernel"], cfg["epilog_kernel"]
    n_mega, n_sub = cfg["n_mega_blocks"], cfg["n_sub_blocks"]
    DE = cfg["enc_out"]

    def fwd(x, packed):
        B, M, T = x.shape
        kernel = partial(titanet_kernel, kp=kp, kmb=kmb, ke=ke,
                         n_mega=n_mega, n_sub=n_sub, eps=1e-6)
        in_specs = [pl.BlockSpec((1, M, T), lambda i: (i, 0, 0))]
        for a in packed:  # grid-invariant params: full array, constant block index
            in_specs.append(pl.BlockSpec(a.shape, lambda i, _n=a.ndim: (0,) * _n))
        out = pl.pallas_call(
            kernel,
            out_shape=jax.ShapeDtypeStruct((B, 1, 2 * DE), jnp.float32),
            grid=(B,),
            in_specs=in_specs,
            out_specs=pl.BlockSpec((1, 1, 2 * DE), lambda i: (i, 0, 0)),
            compiler_params=pltpu.CompilerParams(
                dimension_semantics=("parallel",)),
        )(x, *packed)
        return out[:, 0, :]

    return jax.jit(fwd)


# ----------------------------------------------------------------------------
# Parameters: raw (PyTorch layout) init, packing for the kernel
# ----------------------------------------------------------------------------

def init_raw_params(key, cfg):
    M, H, DE, E = cfg["n_mels"], cfg["hidden"], cfg["enc_out"], cfg["emb"]
    K, AH, R = cfg["mega_kernel"], cfg["attn_hidden"], cfg["se_reduction"]
    kp, ke = cfg["prolog_kernel"], cfg["epilog_kernel"]
    keys = iter(jax.random.split(key, 256))

    def nrm(shape, s=0.1):
        return s * jax.random.normal(next(keys), shape, jnp.float32)

    def bn(c):
        return dict(gamma=jax.random.uniform(next(keys), (c,), jnp.float32, 0.5, 1.5),
                    beta=nrm((c,)), mean=nrm((c,)),
                    var=jax.random.uniform(next(keys), (c,), jnp.float32, 0.5, 1.5))

    raw = dict(
        prolog=dict(w=nrm((H, M, kp)), b=nrm((H,)), bn=bn(H)),
        mega_blocks=[],
        epilog=dict(w=nrm((DE, H, ke)), b=nrm((DE,)), bn=bn(DE)),
        dec_linear=dict(w=nrm((E, 2 * DE)), b=nrm((E,)), bn=bn(E)),
        pool=dict(w_in=nrm((AH, DE)), b_in=nrm((AH,)),
                  w_out=nrm((DE, AH)), b_out=nrm((DE,)), bn=bn(2 * DE)),
    )
    for _ in range(cfg["n_mega_blocks"]):
        subs = [dict(dw_w=nrm((H, 1, K)), dw_b=nrm((H,)),
                     pw_w=nrm((H, H, 1)), pw_b=nrm((H,)), bn=bn(H))
                for _ in range(cfg["n_sub_blocks"])]
        se = dict(w1=nrm((H // R, H)), b1=nrm((H // R,)),
                  w2=nrm((H, H // R)), b2=nrm((H,)))
        skip = dict(w=nrm((H, H, 1)), b=nrm((H,)), bn=bn(H))
        raw["mega_blocks"].append(dict(sub=subs, se=se, skip=skip))
    return raw


def pack_params(raw, cfg):
    K = cfg["mega_kernel"]

    def fold(bn):  # BatchNorm1d eval folded to scale/shift
        scale = bn["gamma"] * jax.lax.rsqrt(bn["var"] + 1e-5)
        shift = bn["beta"] - bn["mean"] * scale
        return scale, shift

    def col(v):
        return v.reshape(-1, 1)

    def row(v):
        return v.reshape(1, -1)

    def im2col(w):  # [Cout, Cin, k] -> [Cout, k*Cin] matching in-kernel tap concat order
        return jnp.transpose(w, (0, 2, 1)).reshape(w.shape[0], -1)

    p, e = raw["prolog"], raw["epilog"]
    dl, po = raw["dec_linear"], raw["pool"]
    ps, psh = fold(p["bn"])
    es, esh = fold(e["bn"])
    dls, dlsh = fold(dl["bn"])
    pos, posh = fold(po["bn"])

    mbs = raw["mega_blocks"]
    subs = [sb for mb in mbs for sb in mb["sub"]]
    sk_fold = [fold(mb["skip"]["bn"]) for mb in mbs]
    sb_fold = [fold(sb["bn"]) for sb in subs]

    packed = (
        # prolog
        im2col(p["w"]), col(p["b"]), col(ps), col(psh),
        # skip connections (stacked over mega blocks)
        jnp.stack([mb["skip"]["w"][:, :, 0] for mb in mbs]),
        jnp.stack([col(mb["skip"]["b"]) for mb in mbs]),
        jnp.stack([col(s) for s, _ in sk_fold]),
        jnp.stack([col(sh) for _, sh in sk_fold]),
        # sub blocks (stacked over n_mega*n_sub); depthwise taps split as [K, L, H, 1]
        jnp.stack([jnp.stack([col(sb["dw_w"][:, 0, j]) for sb in subs]) for j in range(K)]),
        jnp.stack([col(sb["dw_b"]) for sb in subs]),
        jnp.stack([sb["pw_w"][:, :, 0] for sb in subs]),
        jnp.stack([col(sb["pw_b"]) for sb in subs]),
        jnp.stack([col(s) for s, _ in sb_fold]),
        jnp.stack([col(sh) for _, sh in sb_fold]),
        # squeeze-excitation (stacked over mega blocks)
        jnp.stack([mb["se"]["w1"] for mb in mbs]),
        jnp.stack([col(mb["se"]["b1"]) for mb in mbs]),
        jnp.stack([mb["se"]["w2"] for mb in mbs]),
        jnp.stack([col(mb["se"]["b2"]) for mb in mbs]),
        # epilog
        im2col(e["w"]), col(e["b"]), col(es), col(esh),
        # decoder linear (+ BN(E); valid since DE == E per the reference's constraint)
        dl["w"].T, row(dl["b"]), col(dls), col(dlsh),
        # pool
        po["w_in"].T, row(po["b_in"]), po["w_out"].T, row(po["b_out"]),
        row(pos), row(posh),
    )
    return packed


# ----------------------------------------------------------------------------
# Pure-JAX reference (independent math path, for correctness checking)
# ----------------------------------------------------------------------------

_HI = jax.lax.Precision.HIGHEST


def _bn_eval(x, bn, axis):
    shp = [1] * x.ndim
    shp[axis] = -1
    inv = jax.lax.rsqrt(bn["var"] + 1e-5)
    return ((x - bn["mean"].reshape(shp)) * (bn["gamma"] * inv).reshape(shp)
            + bn["beta"].reshape(shp))


def _conv1d(x, w, b, groups=1):
    k = w.shape[-1]
    pad = (k - 1) // 2
    y = jax.lax.conv_general_dilated(
        x, w, window_strides=(1,), padding=[(pad, pad)],
        dimension_numbers=("NCH", "OIH", "NCH"),
        feature_group_count=groups, precision=_HI)
    return y + b[None, :, None]


def titanet_reference(x, raw):
    relu = jax.nn.relu
    p = raw["prolog"]
    h = relu(_bn_eval(_conv1d(x, p["w"], p["b"]), p["bn"], 1))
    for mb in raw["mega_blocks"]:
        sk = mb["skip"]
        skip = _bn_eval(_conv1d(h, sk["w"], sk["b"]), sk["bn"], 1)
        sub = h
        for sb in mb["sub"]:
            d = _conv1d(sub, sb["dw_w"], sb["dw_b"], groups=sub.shape[1])
            pw = _conv1d(d, sb["pw_w"], sb["pw_b"])
            sub = relu(_bn_eval(pw, sb["bn"], 1))
        se = mb["se"]
        pooled = jnp.mean(sub, axis=2)
        z = relu(jnp.einsum("bh,rh->br", pooled, se["w1"], precision=_HI) + se["b1"])
        g = jax.nn.sigmoid(jnp.einsum("br,hr->bh", z, se["w2"], precision=_HI) + se["b2"])
        h = relu(skip + sub * g[:, :, None])
    ep = raw["epilog"]
    enc = relu(_bn_eval(_conv1d(h, ep["w"], ep["b"]), ep["bn"], 1))        # [B, DE, T]
    dl = raw["dec_linear"]
    y = jnp.einsum("bdt,et->bde", enc, dl["w"], precision=_HI) + dl["b"][None, None, :]
    y = _bn_eval(y, dl["bn"], 1)                                           # [B, DE, E]
    po = raw["pool"]
    yt = jnp.swapaxes(y, 1, 2)                                             # [B, T2, DE]
    hh = jnp.tanh(jnp.einsum("btd,ad->bta", yt, po["w_in"], precision=_HI) + po["b_in"])
    en = jnp.einsum("bta,da->btd", hh, po["w_out"], precision=_HI) + po["b_out"]
    al = jax.nn.softmax(en, axis=1)
    means = jnp.sum(al * yt, axis=1)
    resid = jnp.sum(al * yt * yt, axis=1) - means ** 2
    stds = jnp.sqrt(jnp.maximum(resid, 1e-6))
    stats = jnp.concatenate([means, stds], axis=1)
    stats = _bn_eval(stats, po["bn"], 1)
    nrm = jnp.maximum(jnp.linalg.norm(stats, axis=1, keepdims=True), 1e-12)
    return stats / nrm


# ----------------------------------------------------------------------------
# Demo / self-check
# ----------------------------------------------------------------------------

if __name__ == "__main__":
    # Lane/sublane-friendly small config: channels multiples of 8, time = 128.
    cfg = dict(n_mels=64, hidden=128, enc_out=64, emb=64,
               n_mega_blocks=2, n_sub_blocks=2,
               mega_kernel=3, prolog_kernel=3, epilog_kernel=1,
               attn_hidden=64, se_reduction=16)
    B = 2
    T = 2 * cfg["enc_out"]            # Decoder `linear` (applied first) requires T == 2*DE
    assert cfg["emb"] == cfg["enc_out"]   # ... and BatchNorm1d(E) on [B, DE, E] requires DE == E

    key = jax.random.PRNGKey(0)
    pkey, xkey = jax.random.split(key)
    raw = init_raw_params(pkey, cfg)
    packed = pack_params(raw, cfg)
    spectrograms = jax.random.normal(xkey, (B, cfg["n_mels"], T), jnp.float32)

    fwd = build_forward(cfg)
    out = jax.block_until_ready(fwd(spectrograms, packed))

    assert out.shape == (B, 2 * cfg["enc_out"]), out.shape
    assert bool(jnp.all(jnp.isfinite(out)))
    norms = jnp.sqrt(jnp.sum(out * out, axis=1))
    assert float(jnp.max(jnp.abs(norms - 1.0))) < 1e-3       # final F.normalize(p=2, dim=1)

    ref = titanet_reference(spectrograms, raw)
    err = float(jnp.max(jnp.abs(out - ref)))
    assert err < 5e-3, f"kernel vs reference mismatch: max abs err = {err}"

    print("KERNEL_OK")
</pallas_src>

<mosaic_0001>
module attributes {stable_mosaic.version = 11 : i64} {
  func.func @titanet_kernel(%arg0: i32, %arg1: memref<1x64x128xf32, #tpu.memory_space<vmem>>, %arg2: memref<128x192xf32, #tpu.memory_space<vmem>>, %arg3: memref<128x1xf32, #tpu.memory_space<vmem>>, %arg4: memref<128x1xf32, #tpu.memory_space<vmem>>, %arg5: memref<128x1xf32, #tpu.memory_space<vmem>>, %arg6: memref<2x128x128xf32, #tpu.memory_space<vmem>>, %arg7: memref<2x128x1xf32, #tpu.memory_space<vmem>>, %arg8: memref<2x128x1xf32, #tpu.memory_space<vmem>>, %arg9: memref<2x128x1xf32, #tpu.memory_space<vmem>>, %arg10: memref<3x4x128x1xf32, #tpu.memory_space<vmem>>, %arg11: memref<4x128x1xf32, #tpu.memory_space<vmem>>, %arg12: memref<4x128x128xf32, #tpu.memory_space<vmem>>, %arg13: memref<4x128x1xf32, #tpu.memory_space<vmem>>, %arg14: memref<4x128x1xf32, #tpu.memory_space<vmem>>, %arg15: memref<4x128x1xf32, #tpu.memory_space<vmem>>, %arg16: memref<2x8x128xf32, #tpu.memory_space<vmem>>, %arg17: memref<2x8x1xf32, #tpu.memory_space<vmem>>, %arg18: memref<2x128x8xf32, #tpu.memory_space<vmem>>, %arg19: memref<2x128x1xf32, #tpu.memory_space<vmem>>, %arg20: memref<64x128xf32, #tpu.memory_space<vmem>>, %arg21: memref<64x1xf32, #tpu.memory_space<vmem>>, %arg22: memref<64x1xf32, #tpu.memory_space<vmem>>, %arg23: memref<64x1xf32, #tpu.memory_space<vmem>>, %arg24: memref<128x64xf32, #tpu.memory_space<vmem>>, %arg25: memref<1x64xf32, #tpu.memory_space<vmem>>, %arg26: memref<64x1xf32, #tpu.memory_space<vmem>>, %arg27: memref<64x1xf32, #tpu.memory_space<vmem>>, %arg28: memref<64x64xf32, #tpu.memory_space<vmem>>, %arg29: memref<1x64xf32, #tpu.memory_space<vmem>>, %arg30: memref<64x64xf32, #tpu.memory_space<vmem>>, %arg31: memref<1x64xf32, #tpu.memory_space<vmem>>, %arg32: memref<1x128xf32, #tpu.memory_space<vmem>>, %arg33: memref<1x128xf32, #tpu.memory_space<vmem>>, %arg34: memref<1x1x128xf32, #tpu.memory_space<vmem>>) attributes {dimension_semantics = [#tpu.dimension_semantics<parallel>], iteration_bounds = array<i64: 2>, scalar_prefetch = 0 : i64, scratch_operands = 0 : i64, tpu.core_type = #tpu.core_type<tc>, window_params = [{transform_indices = @transform_0, window_bounds = array<i64: 1, 64, 128>}, {pipeline_mode = #tpu.pipeline_mode<synchronous>, transform_indices = @transform_1, window_bounds = array<i64: 128, 192>}, {pipeline_mode = #tpu.pipeline_mode<synchronous>, transform_indices = @transform_2, window_bounds = array<i64: 128, 1>}, {pipeline_mode = #tpu.pipeline_mode<synchronous>, transform_indices = @transform_3, window_bounds = array<i64: 128, 1>}, {pipeline_mode = #tpu.pipeline_mode<synchronous>, transform_indices = @transform_4, window_bounds = array<i64: 128, 1>}, {pipeline_mode = #tpu.pipeline_mode<synchronous>, transform_indices = @transform_5, window_bounds = array<i64: 2, 128, 128>}, {pipeline_mode = #tpu.pipeline_mode<synchronous>, transform_indices = @transform_6, window_bounds = array<i64: 2, 128, 1>}, {pipeline_mode = #tpu.pipeline_mode<synchronous>, transform_indices = @transform_7, window_bounds = array<i64: 2, 128, 1>}, {pipeline_mode = #tpu.pipeline_mode<synchronous>, transform_indices = @transform_8, window_bounds = array<i64: 2, 128, 1>}, {pipeline_mode = #tpu.pipeline_mode<synchronous>, transform_indices = @transform_9, window_bounds = array<i64: 3, 4, 128, 1>}, {pipeline_mode = #tpu.pipeline_mode<synchronous>, transform_indices = @transform_10, window_bounds = array<i64: 4, 128, 1>}, {pipeline_mode = #tpu.pipeline_mode<synchronous>, transform_indices = @transform_11, window_bounds = array<i64: 4, 128, 128>}, {pipeline_mode = #tpu.pipeline_mode<synchronous>, transform_indices = @transform_12, window_bounds = array<i64: 4, 128, 1>}, {pipeline_mode = #tpu.pipeline_mode<synchronous>, transform_indices = @transform_13, window_bounds = array<i64: 4, 128, 1>}, {pipeline_mode = #tpu.pipeline_mode<synchronous>, transform_indices = @transform_14, window_bounds = array<i64: 4, 128, 1>}, {pipeline_mode = #tpu.pipeline_mode<synchronous>, transform_indices = @transform_15, window_bounds = array<i64: 2, 8, 128>}, {pipeline_mode = #tpu.pipeline_mode<synchronous>, transform_indices = @transform_16, window_bounds = array<i64: 2, 8, 1>}, {pipeline_mode = #tpu.pipeline_mode<synchronous>, transform_indices = @transform_17, window_bounds = array<i64: 2, 128, 8>}, {pipeline_mode = #tpu.pipeline_mode<synchronous>, transform_indices = @transform_18, window_bounds = array<i64: 2, 128, 1>}, {pipeline_mode = #tpu.pipeline_mode<synchronous>, transform_indices = @transform_19, window_bounds = array<i64: 64, 128>}, {pipeline_mode = #tpu.pipeline_mode<synchronous>, transform_indices = @transform_20, window_bounds = array<i64: 64, 1>}, {pipeline_mode = #tpu.pipeline_mode<synchronous>, transform_indices = @transform_21, window_bounds = array<i64: 64, 1>}, {pipeline_mode = #tpu.pipeline_mode<synchronous>, transform_indices = @transform_22, window_bounds = array<i64: 64, 1>}, {pipeline_mode = #tpu.pipeline_mode<synchronous>, transform_indices = @transform_23, window_bounds = array<i64: 128, 64>}, {pipeline_mode = #tpu.pipeline_mode<synchronous>, transform_indices = @transform_24, window_bounds = array<i64: 1, 64>}, {pipeline_mode = #tpu.pipeline_mode<synchronous>, transform_indices = @transform_25, window_bounds = array<i64: 64, 1>}, {pipeline_mode = #tpu.pipeline_mode<synchronous>, transform_indices = @transform_26, window_bounds = array<i64: 64, 1>}, {pipeline_mode = #tpu.pipeline_mode<synchronous>, transform_indices = @transform_27, window_bounds = array<i64: 64, 64>}, {pipeline_mode = #tpu.pipeline_mode<synchronous>, transform_indices = @transform_28, window_bounds = array<i64: 1, 64>}, {pipeline_mode = #tpu.pipeline_mode<synchronous>, transform_indices = @transform_29, window_bounds = array<i64: 64, 64>}, {pipeline_mode = #tpu.pipeline_mode<synchronous>, transform_indices = @transform_30, window_bounds = array<i64: 1, 64>}, {pipeline_mode = #tpu.pipeline_mode<synchronous>, transform_indices = @transform_31, window_bounds = array<i64: 1, 128>}, {pipeline_mode = #tpu.pipeline_mode<synchronous>, transform_indices = @transform_32, window_bounds = array<i64: 1, 128>}, {transform_indices = @transform_33, window_bounds = array<i64: 1, 1, 128>}]} {
    %c0 = arith.constant 0 : index
    %c0_0 = arith.constant 0 : index
    %c0_1 = arith.constant 0 : index
    %0 = vector.load %arg1[%c0, %c0_0, %c0_1] : memref<1x64x128xf32, #tpu.memory_space<vmem>>, vector<1x64x128xf32>
    %1 = vector.shape_cast %0 : vector<1x64x128xf32> to vector<64x128xf32>
    %cst = arith.constant 0.000000e+00 : f32
    %2 = vector.broadcast %cst : f32 to vector<64x1xf32>
    %3 = vector.extract_strided_slice %1 {offsets = [0, 0], sizes = [64, 127], strides = [1, 1]} : vector<64x128xf32> to vector<64x127xf32>
    %4 = tpu.concatenate %2, %3 in 1 : vector<64x1xf32>, vector<64x127xf32> -> vector<64x128xf32>
    %cst_2 = arith.constant 0.000000e+00 : f32
    %5 = vector.broadcast %cst_2 : f32 to vector<64x1xf32>
    %6 = vector.extract_strided_slice %1 {offsets = [0, 1], sizes = [64, 127], strides = [1, 1]} : vector<64x128xf32> to vector<64x127xf32>
    %7 = tpu.concatenate %6, %5 in 1 : vector<64x127xf32>, vector<64x1xf32> -> vector<64x128xf32>
    %8 = tpu.concatenate %4, %1, %7 in 0 : vector<64x128xf32>, vector<64x128xf32>, vector<64x128xf32> -> vector<192x128xf32>
    %c0_3 = arith.constant 0 : index
    %c0_4 = arith.constant 0 : index
    %9 = vector.load %arg2[%c0_3, %c0_4] : memref<128x192xf32, #tpu.memory_space<vmem>>, vector<128x192xf32>
    %cst_5 = arith.constant dense<0.000000e+00> : vector<128x128xf32>
    %10 = tpu.matmul %9, %8, %cst_5 {dimension_numbers = #tpu.dot_dimension_numbers<[1], [0], [0], [1], [0, 0, 1, 1], [], []>} : vector<128x192xf32>, vector<192x128xf32>, vector<128x128xf32> -> vector<128x128xf32>
    %c0_6 = arith.constant 0 : index
    %c0_7 = arith.constant 0 : index
    %11 = vector.load %arg3[%c0_6, %c0_7] : memref<128x1xf32, #tpu.memory_space<vmem>>, vector<128x1xf32>
    %12 = vector.broadcast %11 : vector<128x1xf32> to vector<128x128xf32>
    %13 = arith.addf %10, %12 : vector<128x128xf32>
    %c0_8 = arith.constant 0 : index
    %c0_9 = arith.constant 0 : index
    %14 = vector.load %arg4[%c0_8, %c0_9] : memref<128x1xf32, #tpu.memory_space<vmem>>, vector<128x1xf32>
    %15 = vector.broadcast %14 : vector<128x1xf32> to vector<128x128xf32>
    %16 = arith.mulf %13, %15 : vector<128x128xf32>
    %c0_10 = arith.constant 0 : index
    %c0_11 = arith.constant 0 : index
    %17 = vector.load %arg5[%c0_10, %c0_11] : memref<128x1xf32, #tpu.memory_space<vmem>>, vector<128x1xf32>
    %18 = vector.broadcast %17 : vector<128x1xf32> to vector<128x128xf32>
    %19 = arith.addf %16, %18 : vector<128x128xf32>
    %cst_12 = arith.constant 0.000000e+00 : f32
    %20 = vector.broadcast %cst_12 : f32 to vector<128x128xf32>
    %21 = arith.maximumf %19, %20 : vector<128x128xf32>
    %c0_13 = arith.constant 0 : index
    %c0_14 = arith.constant 0 : index
    %c0_15 = arith.constant 0 : index
    %22 = vector.load %arg6[%c0_13, %c0_14, %c0_15] : memref<2x128x128xf32, #tpu.memory_space<vmem>>, vector<1x128x128xf32>
    %23 = vector.shape_cast %22 : vector<1x128x128xf32> to vector<128x128xf32>
    %cst_16 = arith.constant dense<0.000000e+00> : vector<128x128xf32>
    %24 = tpu.matmul %23, %21, %cst_16 {dimension_numbers = #tpu.dot_dimension_numbers<[1], [0], [0], [1], [0, 0, 1, 1], [], []>} : vector<128x128xf32>, vector<128x128xf32>, vector<128x128xf32> -> vector<128x128xf32>
    %c0_17 = arith.constant 0 : index
    %c0_18 = arith.constant 0 : index
    %c0_19 = arith.constant 0 : index
    %25 = vector.load %arg7[%c0_17, %c0_18, %c0_19] : memref<2x128x1xf32, #tpu.memory_space<vmem>>, vector<1x128x1xf32>
    %26 = vector.shape_cast %25 : vector<1x128x1xf32> to vector<128x1xf32>
    %27 = vector.broadcast %26 : vector<128x1xf32> to vector<128x128xf32>
    %28 = arith.addf %24, %27 : vector<128x128xf32>
    %c0_20 = arith.constant 0 : index
    %c0_21 = arith.constant 0 : index
    %c0_22 = arith.constant 0 : index
    %29 = vector.load %arg8[%c0_20, %c0_21, %c0_22] : memref<2x128x1xf32, #tpu.memory_space<vmem>>, vector<1x128x1xf32>
    %30 = vector.shape_cast %29 : vector<1x128x1xf32> to vector<128x1xf32>
    %31 = vector.broadcast %30 : vector<128x1xf32> to vector<128x128xf32>
    %32 = arith.mulf %28, %31 : vector<128x128xf32>
    %c0_23 = arith.constant 0 : index
    %c0_24 = arith.constant 0 : index
    %c0_25 = arith.constant 0 : index
    %33 = vector.load %arg9[%c0_23, %c0_24, %c0_25] : memref<2x128x1xf32, #tpu.memory_space<vmem>>, vector<1x128x1xf32>
    %34 = vector.shape_cast %33 : vector<1x128x1xf32> to vector<128x1xf32>
    %35 = vector.broadcast %34 : vector<128x1xf32> to vector<128x128xf32>
    %36 = arith.addf %32, %35 : vector<128x128xf32>
    %c0_26 = arith.constant 0 : index
    %c0_27 = arith.constant 0 : index
    %c0_28 = arith.constant 0 : index
    %c0_29 = arith.constant 0 : index
    %37 = vector.load %arg10[%c0_26, %c0_27, %c0_28, %c0_29] : memref<3x4x128x1xf32, #tpu.memory_space<vmem>>, vector<1x1x128x1xf32>
    %38 = vector.shape_cast %37 : vector<1x1x128x1xf32> to vector<128x1xf32>
    %cst_30 = arith.constant 0.000000e+00 : f32
    %39 = vector.broadcast %cst_30 : f32 to vector<128x1xf32>
    %40 = vector.extract_strided_slice %21 {offsets = [0, 0], sizes = [128, 127], strides = [1, 1]} : vector<128x128xf32> to vector<128x127xf32>
    %41 = tpu.concatenate %39, %40 in 1 : vector<128x1xf32>, vector<128x127xf32> -> vector<128x128xf32>
    %42 = vector.broadcast %38 : vector<128x1xf32> to vector<128x128xf32>
    %43 = arith.mulf %42, %41 : vector<128x128xf32>
    %c1 = arith.constant 1 : index
    %c0_31 = arith.constant 0 : index
    %c0_32 = arith.constant 0 : index
    %c0_33 = arith.constant 0 : index
    %44 = vector.load %arg10[%c1, %c0_31, %c0_32, %c0_33] : memref<3x4x128x1xf32, #tpu.memory_space<vmem>>, vector<1x1x128x1xf32>
    %45 = vector.shape_cast %44 : vector<1x1x128x1xf32> to vector<128x1xf32>
    %46 = vector.broadcast %45 : vector<128x1xf32> to vector<128x128xf32>
    %47 = arith.mulf %46, %21 : vector<128x128xf32>
    %48 = arith.addf %43, %47 : vector<128x128xf32>
    %c2 = arith.constant 2 : index
    %c0_34 = arith.constant 0 : index
    %c0_35 = arith.constant 0 : index
    %c0_36 = arith.constant 0 : index
    %49 = vector.load %arg10[%c2, %c0_34, %c0_35, %c0_36] : memref<3x4x128x1xf32, #tpu.memory_space<vmem>>, vector<1x1x128x1xf32>
    %50 = vector.shape_cast %49 : vector<1x1x128x1xf32> to vector<128x1xf32>
    %cst_37 = arith.constant 0.000000e+00 : f32
    %51 = vector.broadcast %cst_37 : f32 to vector<128x1xf32>
    %52 = vector.extract_strided_slice %21 {offsets = [0, 1], sizes = [128, 127], strides = [1, 1]} : vector<128x128xf32> to vector<128x127xf32>
    %53 = tpu.concatenate %52, %51 in 1 : vector<128x127xf32>, vector<128x1xf32> -> vector<128x128xf32>
    %54 = vector.broadcast %50 : vector<128x1xf32> to vector<128x128xf32>
    %55 = arith.mulf %54, %53 : vector<128x128xf32>
    %56 = arith.addf %48, %55 : vector<128x128xf32>
    %c0_38 = arith.constant 0 : index
    %c0_39 = arith.constant 0 : index
    %c0_40 = arith.constant 0 : index
    %57 = vector.load %arg11[%c0_38, %c0_39, %c0_40] : memref<4x128x1xf32, #tpu.memory_space<vmem>>, vector<1x128x1xf32>
    %58 = vector.shape_cast %57 : vector<1x128x1xf32> to vector<128x1xf32>
    %59 = vector.broadcast %58 : vector<128x1xf32> to vector<128x128xf32>
    %60 = arith.addf %56, %59 : vector<128x128xf32>
    %c0_41 = arith.constant 0 : index
    %c0_42 = arith.constant 0 : index
    %c0_43 = arith.constant 0 : index
    %61 = vector.load %arg12[%c0_41, %c0_42, %c0_43] : memref<4x128x128xf32, #tpu.memory_space<vmem>>, vector<1x128x128xf32>
    %62 = vector.shape_cast %61 : vector<1x128x128xf32> to vector<128x128xf32>
    %cst_44 = arith.constant dense<0.000000e+00> : vector<128x128xf32>
    %63 = tpu.matmul %62, %60, %cst_44 {dimension_numbers = #tpu.dot_dimension_numbers<[1], [0], [0], [1], [0, 0, 1, 1], [], []>} : vector<128x128xf32>, vector<128x128xf32>, vector<128x128xf32> -> vector<128x128xf32>
    %c0_45 = arith.constant 0 : index
    %c0_46 = arith.constant 0 : index
    %c0_47 = arith.constant 0 : index
    %64 = vector.load %arg13[%c0_45, %c0_46, %c0_47] : memref<4x128x1xf32, #tpu.memory_space<vmem>>, vector<1x128x1xf32>
    %65 = vector.shape_cast %64 : vector<1x128x1xf32> to vector<128x1xf32>
    %66 = vector.broadcast %65 : vector<128x1xf32> to vector<128x128xf32>
    %67 = arith.addf %63, %66 : vector<128x128xf32>
    %c0_48 = arith.constant 0 : index
    %c0_49 = arith.constant 0 : index
    %c0_50 = arith.constant 0 : index
    %68 = vector.load %arg14[%c0_48, %c0_49, %c0_50] : memref<4x128x1xf32, #tpu.memory_space<vmem>>, vector<1x128x1xf32>
    %69 = vector.shape_cast %68 : vector<1x128x1xf32> to vector<128x1xf32>
    %70 = vector.broadcast %69 : vector<128x1xf32> to vector<128x128xf32>
    %71 = arith.mulf %67, %70 : vector<128x128xf32>
    %c0_51 = arith.constant 0 : index
    %c0_52 = arith.constant 0 : index
    %c0_53 = arith.constant 0 : index
    %72 = vector.load %arg15[%c0_51, %c0_52, %c0_53] : memref<4x128x1xf32, #tpu.memory_space<vmem>>, vector<1x128x1xf32>
    %73 = vector.shape_cast %72 : vector<1x128x1xf32> to vector<128x1xf32>
    %74 = vector.broadcast %73 : vector<128x1xf32> to vector<128x128xf32>
    %75 = arith.addf %71, %74 : vector<128x128xf32>
    %cst_54 = arith.constant 0.000000e+00 : f32
    %76 = vector.broadcast %cst_54 : f32 to vector<128x128xf32>
    %77 = arith.maximumf %75, %76 : vector<128x128xf32>
    %c0_55 = arith.constant 0 : index
    %c1_56 = arith.constant 1 : index
    %c0_57 = arith.constant 0 : index
    %c0_58 = arith.constant 0 : index
    %78 = vector.load %arg10[%c0_55, %c1_56, %c0_57, %c0_58] : memref<3x4x128x1xf32, #tpu.memory_space<vmem>>, vector<1x1x128x1xf32>
    %79 = vector.shape_cast %78 : vector<1x1x128x1xf32> to vector<128x1xf32>
    %cst_59 = arith.constant 0.000000e+00 : f32
    %80 = vector.broadcast %cst_59 : f32 to vector<128x1xf32>
    %81 = vector.extract_strided_slice %77 {offsets = [0, 0], sizes = [128, 127], strides = [1, 1]} : vector<128x128xf32> to vector<128x127xf32>
    %82 = tpu.concatenate %80, %81 in 1 : vector<128x1xf32>, vector<128x127xf32> -> vector<128x128xf32>
    %83 = vector.broadcast %79 : vector<128x1xf32> to vector<128x128xf32>
    %84 = arith.mulf %83, %82 : vector<128x128xf32>
    %c1_60 = arith.constant 1 : index
    %c1_61 = arith.constant 1 : index
    %c0_62 = arith.constant 0 : index
    %c0_63 = arith.constant 0 : index
    %85 = vector.load %arg10[%c1_60, %c1_61, %c0_62, %c0_63] : memref<3x4x128x1xf32, #tpu.memory_space<vmem>>, vector<1x1x128x1xf32>
    %86 = vector.shape_cast %85 : vector<1x1x128x1xf32> to vector<128x1xf32>
    %87 = vector.broadcast %86 : vector<128x1xf32> to vector<128x128xf32>
    %88 = arith.mulf %87, %77 : vector<128x128xf32>
    %89 = arith.addf %84, %88 : vector<128x128xf32>
    %c2_64 = arith.constant 2 : index
    %c1_65 = arith.constant 1 : index
    %c0_66 = arith.constant 0 : index
    %c0_67 = arith.constant 0 : index
    %90 = vector.load %arg10[%c2_64, %c1_65, %c0_66, %c0_67] : memref<3x4x128x1xf32, #tpu.memory_space<vmem>>, vector<1x1x128x1xf32>
    %91 = vector.shape_cast %90 : vector<1x1x128x1xf32> to vector<128x1xf32>
    %cst_68 = arith.constant 0.000000e+00 : f32
    %92 = vector.broadcast %cst_68 : f32 to vector<128x1xf32>
    %93 = vector.extract_strided_slice %77 {offsets = [0, 1], sizes = [128, 127], strides = [1, 1]} : vector<128x128xf32> to vector<128x127xf32>
    %94 = tpu.concatenate %93, %92 in 1 : vector<128x127xf32>, vector<128x1xf32> -> vector<128x128xf32>
    %95 = vector.broadcast %91 : vector<128x1xf32> to vector<128x128xf32>
    %96 = arith.mulf %95, %94 : vector<128x128xf32>
    %97 = arith.addf %89, %96 : vector<128x128xf32>
    %c1_69 = arith.constant 1 : index
    %c0_70 = arith.constant 0 : index
    %c0_71 = arith.constant 0 : index
    %98 = vector.load %arg11[%c1_69, %c0_70, %c0_71] : memref<4x128x1xf32, #tpu.memory_space<vmem>>, vector<1x128x1xf32>
    %99 = vector.shape_cast %98 : vector<1x128x1xf32> to vector<128x1xf32>
    %100 = vector.broadcast %99 : vector<128x1xf32> to vector<128x128xf32>
    %101 = arith.addf %97, %100 : vector<128x128xf32>
    %c1_72 = arith.constant 1 : index
    %c0_73 = arith.constant 0 : index
    %c0_74 = arith.constant 0 : index
    %102 = vector.load %arg12[%c1_72, %c0_73, %c0_74] : memref<4x128x128xf32, #tpu.memory_space<vmem>>, vector<1x128x128xf32>
    %103 = vector.shape_cast %102 : vector<1x128x128xf32> to vector<128x128xf32>
    %cst_75 = arith.constant dense<0.000000e+00> : vector<128x128xf32>
    %104 = tpu.matmul %103, %101, %cst_75 {dimension_numbers = #tpu.dot_dimension_numbers<[1], [0], [0], [1], [0, 0, 1, 1], [], []>} : vector<128x128xf32>, vector<128x128xf32>, vector<128x128xf32> -> vector<128x128xf32>
    %c1_76 = arith.constant 1 : index
    %c0_77 = arith.constant 0 : index
    %c0_78 = arith.constant 0 : index
    %105 = vector.load %arg13[%c1_76, %c0_77, %c0_78] : memref<4x128x1xf32, #tpu.memory_space<vmem>>, vector<1x128x1xf32>
    %106 = vector.shape_cast %105 : vector<1x128x1xf32> to vector<128x1xf32>
    %107 = vector.broadcast %106 : vector<128x1xf32> to vector<128x128xf32>
    %108 = arith.addf %104, %107 : vector<128x128xf32>
    %c1_79 = arith.constant 1 : index
    %c0_80 = arith.constant 0 : index
    %c0_81 = arith.constant 0 : index
    %109 = vector.load %arg14[%c1_79, %c0_80, %c0_81] : memref<4x128x1xf32, #tpu.memory_space<vmem>>, vector<1x128x1xf32>
    %110 = vector.shape_cast %109 : vector<1x128x1xf32> to vector<128x1xf32>
    %111 = vector.broadcast %110 : vector<128x1xf32> to vector<128x128xf32>
    %112 = arith.mulf %108, %111 : vector<128x128xf32>
    %c1_82 = arith.constant 1 : index
    %c0_83 = arith.constant 0 : index
    %c0_84 = arith.constant 0 : index
    %113 = vector.load %arg15[%c1_82, %c0_83, %c0_84] : memref<4x128x1xf32, #tpu.memory_space<vmem>>, vector<1x128x1xf32>
    %114 = vector.shape_cast %113 : vector<1x128x1xf32> to vector<128x1xf32>
    %115 = vector.broadcast %114 : vector<128x1xf32> to vector<128x128xf32>
    %116 = arith.addf %112, %115 : vector<128x128xf32>
    %cst_85 = arith.constant 0.000000e+00 : f32
    %117 = vector.broadcast %cst_85 : f32 to vector<128x128xf32>
    %118 = arith.maximumf %116, %117 : vector<128x128xf32>
    %cst_86 = arith.constant dense<0.000000e+00> : vector<128xf32>
    %119 = vector.multi_reduction <add>, %118, %cst_86 [1] : vector<128x128xf32> to vector<128xf32>
    %120 = vector.shape_cast %119 : vector<128xf32> to vector<128x1xf32>
    %cst_87 = arith.constant 1.280000e+02 : f32
    %121 = vector.broadcast %cst_87 : f32 to vector<128x1xf32>
    %122 = arith.divf %120, %121 : vector<128x1xf32>
    %c0_88 = arith.constant 0 : index
    %c0_89 = arith.constant 0 : index
    %c0_90 = arith.constant 0 : index
    %123 = vector.load %arg16[%c0_88, %c0_89, %c0_90] : memref<2x8x128xf32, #tpu.memory_space<vmem>>, vector<1x8x128xf32>
    %124 = vector.shape_cast %123 : vector<1x8x128xf32> to vector<8x128xf32>
    %cst_91 = arith.constant dense<0.000000e+00> : vector<8x1xf32>
    %125 = tpu.matmul %124, %122, %cst_91 {dimension_numbers = #tpu.dot_dimension_numbers<[1], [0], [0], [1], [0, 0, 1, 1], [], []>} : vector<8x128xf32>, vector<128x1xf32>, vector<8x1xf32> -> vector<8x1xf32>
    %c0_92 = arith.constant 0 : index
    %c0_93 = arith.constant 0 : index
    %c0_94 = arith.constant 0 : index
    %126 = vector.load %arg17[%c0_92, %c0_93, %c0_94] : memref<2x8x1xf32, #tpu.memory_space<vmem>>, vector<1x8x1xf32>
    %127 = vector.shape_cast %126 : vector<1x8x1xf32> to vector<8x1xf32>
    %128 = arith.addf %125, %127 : vector<8x1xf32>
    %cst_95 = arith.constant 0.000000e+00 : f32
    %129 = vector.broadcast %cst_95 : f32 to vector<8x1xf32>
    %130 = arith.maximumf %128, %129 : vector<8x1xf32>
    %c0_96 = arith.constant 0 : index
    %c0_97 = arith.constant 0 : index
    %c0_98 = arith.constant 0 : index
    %131 = vector.load %arg18[%c0_96, %c0_97, %c0_98] : memref<2x128x8xf32, #tpu.memory_space<vmem>>, vector<1x128x8xf32>
    %132 = vector.shape_cast %131 : vector<1x128x8xf32> to vector<128x8xf32>
    %cst_99 = arith.constant dense<0.000000e+00> : vector<128x1xf32>
    %133 = tpu.matmul %132, %130, %cst_99 {dimension_numbers = #tpu.dot_dimension_numbers<[1], [0], [0], [1], [0, 0, 1, 1], [], []>} : vector<128x8xf32>, vector<8x1xf32>, vector<128x1xf32> -> vector<128x1xf32>
    %c0_100 = arith.constant 0 : index
    %c0_101 = arith.constant 0 : index
    %c0_102 = arith.constant 0 : index
    %134 = vector.load %arg19[%c0_100, %c0_101, %c0_102] : memref<2x128x1xf32, #tpu.memory_space<vmem>>, vector<1x128x1xf32>
    %135 = vector.shape_cast %134 : vector<1x128x1xf32> to vector<128x1xf32>
    %136 = arith.addf %133, %135 : vector<128x1xf32>
    %137 = arith.negf %136 : vector<128x1xf32>
    %138 = math.exp %137 : vector<128x1xf32>
    %cst_103 = arith.constant 1.000000e+00 : f32
    %139 = vector.broadcast %cst_103 : f32 to vector<128x1xf32>
    %140 = arith.addf %139, %138 : vector<128x1xf32>
    %141 = arith.divf %139, %140 : vector<128x1xf32>
    %142 = vector.broadcast %141 : vector<128x1xf32> to vector<128x128xf32>
    %143 = arith.mulf %118, %142 : vector<128x128xf32>
    %144 = arith.addf %36, %143 : vector<128x128xf32>
    %cst_104 = arith.constant 0.000000e+00 : f32
    %145 = vector.broadcast %cst_104 : f32 to vector<128x128xf32>
    %146 = arith.maximumf %144, %145 : vector<128x128xf32>
    %c1_105 = arith.constant 1 : index
    %c0_106 = arith.constant 0 : index
    %c0_107 = arith.constant 0 : index
    %147 = vector.load %arg6[%c1_105, %c0_106, %c0_107] : memref<2x128x128xf32, #tpu.memory_space<vmem>>, vector<1x128x128xf32>
    %148 = vector.shape_cast %147 : vector<1x128x128xf32> to vector<128x128xf32>
    %cst_108 = arith.constant dense<0.000000e+00> : vector<128x128xf32>
    %149 = tpu.matmul %148, %146, %cst_108 {dimension_numbers = #tpu.dot_dimension_numbers<[1], [0], [0], [1], [0, 0, 1, 1], [], []>} : vector<128x128xf32>, vector<128x128xf32>, vector<128x128xf32> -> vector<128x128xf32>
    %c1_109 = arith.constant 1 : index
    %c0_110 = arith.constant 0 : index
    %c0_111 = arith.constant 0 : index
    %150 = vector.load %arg7[%c1_109, %c0_110, %c0_111] : memref<2x128x1xf32, #tpu.memory_space<vmem>>, vector<1x128x1xf32>
    %151 = vector.shape_cast %150 : vector<1x128x1xf32> to vector<128x1xf32>
    %152 = vector.broadcast %151 : vector<128x1xf32> to vector<128x128xf32>
    %153 = arith.addf %149, %152 : vector<128x128xf32>
    %c1_112 = arith.constant 1 : index
    %c0_113 = arith.constant 0 : index
    %c0_114 = arith.constant 0 : index
    %154 = vector.load %arg8[%c1_112, %c0_113, %c0_114] : memref<2x128x1xf32, #tpu.memory_space<vmem>>, vector<1x128x1xf32>
    %155 = vector.shape_cast %154 : vector<1x128x1xf32> to vector<128x1xf32>
    %156 = vector.broadcast %155 : vector<128x1xf32> to vector<128x128xf32>
    %157 = arith.mulf %153, %156 : vector<128x128xf32>
    %c1_115 = arith.constant 1 : index
    %c0_116 = arith.constant 0 : index
    %c0_117 = arith.constant 0 : index
    %158 = vector.load %arg9[%c1_115, %c0_116, %c0_117] : memref<2x128x1xf32, #tpu.memory_space<vmem>>, vector<1x128x1xf32>
    %159 = vector.shape_cast %158 : vector<1x128x1xf32> to vector<128x1xf32>
    %160 = vector.broadcast %159 : vector<128x1xf32> to vector<128x128xf32>
    %161 = arith.addf %157, %160 : vector<128x128xf32>
    %c0_118 = arith.constant 0 : index
    %c2_119 = arith.constant 2 : index
    %c0_120 = arith.constant 0 : index
    %c0_121 = arith.constant 0 : index
    %162 = vector.load %arg10[%c0_118, %c2_119, %c0_120, %c0_121] : memref<3x4x128x1xf32, #tpu.memory_space<vmem>>, vector<1x1x128x1xf32>
    %163 = vector.shape_cast %162 : vector<1x1x128x1xf32> to vector<128x1xf32>
    %cst_122 = arith.constant 0.000000e+00 : f32
    %164 = vector.broadcast %cst_122 : f32 to vector<128x1xf32>
    %165 = vector.extract_strided_slice %146 {offsets = [0, 0], sizes = [128, 127], strides = [1, 1]} : vector<128x128xf32> to vector<128x127xf32>
    %166 = tpu.concatenate %164, %165 in 1 : vector<128x1xf32>, vector<128x127xf32> -> vector<128x128xf32>
    %167 = vector.broadcast %163 : vector<128x1xf32> to vector<128x128xf32>
    %168 = arith.mulf %167, %166 : vector<128x128xf32>
    %c1_123 = arith.constant 1 : index
    %c2_124 = arith.constant 2 : index
    %c0_125 = arith.constant 0 : index
    %c0_126 = arith.constant 0 : index
    %169 = vector.load %arg10[%c1_123, %c2_124, %c0_125, %c0_126] : memref<3x4x128x1xf32, #tpu.memory_space<vmem>>, vector<1x1x128x1xf32>
    %170 = vector.shape_cast %169 : vector<1x1x128x1xf32> to vector<128x1xf32>
    %171 = vector.broadcast %170 : vector<128x1xf32> to vector<128x128xf32>
    %172 = arith.mulf %171, %146 : vector<128x128xf32>
    %173 = arith.addf %168, %172 : vector<128x128xf32>
    %c2_127 = arith.constant 2 : index
    %c2_128 = arith.constant 2 : index
    %c0_129 = arith.constant 0 : index
    %c0_130 = arith.constant 0 : index
    %174 = vector.load %arg10[%c2_127, %c2_128, %c0_129, %c0_130] : memref<3x4x128x1xf32, #tpu.memory_space<vmem>>, vector<1x1x128x1xf32>
    %175 = vector.shape_cast %174 : vector<1x1x128x1xf32> to vector<128x1xf32>
    %cst_131 = arith.constant 0.000000e+00 : f32
    %176 = vector.broadcast %cst_131 : f32 to vector<128x1xf32>
    %177 = vector.extract_strided_slice %146 {offsets = [0, 1], sizes = [128, 127], strides = [1, 1]} : vector<128x128xf32> to vector<128x127xf32>
    %178 = tpu.concatenate %177, %176 in 1 : vector<128x127xf32>, vector<128x1xf32> -> vector<128x128xf32>
    %179 = vector.broadcast %175 : vector<128x1xf32> to vector<128x128xf32>
    %180 = arith.mulf %179, %178 : vector<128x128xf32>
    %181 = arith.addf %173, %180 : vector<128x128xf32>
    %c2_132 = arith.constant 2 : index
    %c0_133 = arith.constant 0 : index
    %c0_134 = arith.constant 0 : index
    %182 = vector.load %arg11[%c2_132, %c0_133, %c0_134] : memref<4x128x1xf32, #tpu.memory_space<vmem>>, vector<1x128x1xf32>
    %183 = vector.shape_cast %182 : vector<1x128x1xf32> to vector<128x1xf32>
    %184 = vector.broadcast %183 : vector<128x1xf32> to vector<128x128xf32>
    %185 = arith.addf %181, %184 : vector<128x128xf32>
    %c2_135 = arith.constant 2 : index
    %c0_136 = arith.constant 0 : index
    %c0_137 = arith.constant 0 : index
    %186 = vector.load %arg12[%c2_135, %c0_136, %c0_137] : memref<4x128x128xf32, #tpu.memory_space<vmem>>, vector<1x128x128xf32>
    %187 = vector.shape_cast %186 : vector<1x128x128xf32> to vector<128x128xf32>
    %cst_138 = arith.constant dense<0.000000e+00> : vector<128x128xf32>
    %188 = tpu.matmul %187, %185, %cst_138 {dimension_numbers = #tpu.dot_dimension_numbers<[1], [0], [0], [1], [0, 0, 1, 1], [], []>} : vector<128x128xf32>, vector<128x128xf32>, vector<128x128xf32> -> vector<128x128xf32>
    %c2_139 = arith.constant 2 : index
    %c0_140 = arith.constant 0 : index
    %c0_141 = arith.constant 0 : index
    %189 = vector.load %arg13[%c2_139, %c0_140, %c0_141] : memref<4x128x1xf32, #tpu.memory_space<vmem>>, vector<1x128x1xf32>
    %190 = vector.shape_cast %189 : vector<1x128x1xf32> to vector<128x1xf32>
    %191 = vector.broadcast %190 : vector<128x1xf32> to vector<128x128xf32>
    %192 = arith.addf %188, %191 : vector<128x128xf32>
    %c2_142 = arith.constant 2 : index
    %c0_143 = arith.constant 0 : index
    %c0_144 = arith.constant 0 : index
    %193 = vector.load %arg14[%c2_142, %c0_143, %c0_144] : memref<4x128x1xf32, #tpu.memory_space<vmem>>, vector<1x128x1xf32>
    %194 = vector.shape_cast %193 : vector<1x128x1xf32> to vector<128x1xf32>
    %195 = vector.broadcast %194 : vector<128x1xf32> to vector<128x128xf32>
    %196 = arith.mulf %192, %195 : vector<128x128xf32>
    %c2_145 = arith.constant 2 : index
    %c0_146 = arith.constant 0 : index
    %c0_147 = arith.constant 0 : index
    %197 = vector.load %arg15[%c2_145, %c0_146, %c0_147] : memref<4x128x1xf32, #tpu.memory_space<vmem>>, vector<1x128x1xf32>
    %198 = vector.shape_cast %197 : vector<1x128x1xf32> to vector<128x1xf32>
    %199 = vector.broadcast %198 : vector<128x1xf32> to vector<128x128xf32>
    %200 = arith.addf %196, %199 : vector<128x128xf32>
    %cst_148 = arith.constant 0.000000e+00 : f32
    %201 = vector.broadcast %cst_148 : f32 to vector<128x128xf32>
    %202 = arith.maximumf %200, %201 : vector<128x128xf32>
    %c0_149 = arith.constant 0 : index
    %c3 = arith.constant 3 : index
    %c0_150 = arith.constant 0 : index
    %c0_151 = arith.constant 0 : index
    %203 = vector.load %arg10[%c0_149, %c3, %c0_150, %c0_151] : memref<3x4x128x1xf32, #tpu.memory_space<vmem>>, vector<1x1x128x1xf32>
    %204 = vector.shape_cast %203 : vector<1x1x128x1xf32> to vector<128x1xf32>
    %cst_152 = arith.constant 0.000000e+00 : f32
    %205 = vector.broadcast %cst_152 : f32 to vector<128x1xf32>
    %206 = vector.extract_strided_slice %202 {offsets = [0, 0], sizes = [128, 127], strides = [1, 1]} : vector<128x128xf32> to vector<128x127xf32>
    %207 = tpu.concatenate %205, %206 in 1 : vector<128x1xf32>, vector<128x127xf32> -> vector<128x128xf32>
    %208 = vector.broadcast %204 : vector<128x1xf32> to vector<128x128xf32>
    %209 = arith.mulf %208, %207 : vector<128x128xf32>
    %c1_153 = arith.constant 1 : index
    %c3_154 = arith.constant 3 : index
    %c0_155 = arith.constant 0 : index
    %c0_156 = arith.constant 0 : index
    %210 = vector.load %arg10[%c1_153, %c3_154, %c0_155, %c0_156] : memref<3x4x128x1xf32, #tpu.memory_space<vmem>>, vector<1x1x128x1xf32>
    %211 = vector.shape_cast %210 : vector<1x1x128x1xf32> to vector<128x1xf32>
    %212 = vector.broadcast %211 : vector<128x1xf32> to vector<128x128xf32>
    %213 = arith.mulf %212, %202 : vector<128x128xf32>
    %214 = arith.addf %209, %213 : vector<128x128xf32>
    %c2_157 = arith.constant 2 : index
    %c3_158 = arith.constant 3 : index
    %c0_159 = arith.constant 0 : index
    %c0_160 = arith.constant 0 : index
    %215 = vector.load %arg10[%c2_157, %c3_158, %c0_159, %c0_160] : memref<3x4x128x1xf32, #tpu.memory_space<vmem>>, vector<1x1x128x1xf32>
    %216 = vector.shape_cast %215 : vector<1x1x128x1xf32> to vector<128x1xf32>
    %cst_161 = arith.constant 0.000000e+00 : f32
    %217 = vector.broadcast %cst_161 : f32 to vector<128x1xf32>
    %218 = vector.extract_strided_slice %202 {offsets = [0, 1], sizes = [128, 127], strides = [1, 1]} : vector<128x128xf32> to vector<128x127xf32>
    %219 = tpu.concatenate %218, %217 in 1 : vector<128x127xf32>, vector<128x1xf32> -> vector<128x128xf32>
    %220 = vector.broadcast %216 : vector<128x1xf32> to vector<128x128xf32>
    %221 = arith.mulf %220, %219 : vector<128x128xf32>
    %222 = arith.addf %214, %221 : vector<128x128xf32>
    %c3_162 = arith.constant 3 : index
    %c0_163 = arith.constant 0 : index
    %c0_164 = arith.constant 0 : index
    %223 = vector.load %arg11[%c3_162, %c0_163, %c0_164] : memref<4x128x1xf32, #tpu.memory_space<vmem>>, vector<1x128x1xf32>
    %224 = vector.shape_cast %223 : vector<1x128x1xf32> to vector<128x1xf32>
    %225 = vector.broadcast %224 : vector<128x1xf32> to vector<128x128xf32>
    %226 = arith.addf %222, %225 : vector<128x128xf32>
    %c3_165 = arith.constant 3 : index
    %c0_166 = arith.constant 0 : index
    %c0_167 = arith.constant 0 : index
    %227 = vector.load %arg12[%c3_165, %c0_166, %c0_167] : memref<4x128x128xf32, #tpu.memory_space<vmem>>, vector<1x128x128xf32>
    %228 = vector.shape_cast %227 : vector<1x128x128xf32> to vector<128x128xf32>
    %cst_168 = arith.constant dense<0.000000e+00> : vector<128x128xf32>
    %229 = tpu.matmul %228, %226, %cst_168 {dimension_numbers = #tpu.dot_dimension_numbers<[1], [0], [0], [1], [0, 0, 1, 1], [], []>} : vector<128x128xf32>, vector<128x128xf32>, vector<128x128xf32> -> vector<128x128xf32>
    %c3_169 = arith.constant 3 : index
    %c0_170 = arith.constant 0 : index
    %c0_171 = arith.constant 0 : index
    %230 = vector.load %arg13[%c3_169, %c0_170, %c0_171] : memref<4x128x1xf32, #tpu.memory_space<vmem>>, vector<1x128x1xf32>
    %231 = vector.shape_cast %230 : vector<1x128x1xf32> to vector<128x1xf32>
    %232 = vector.broadcast %231 : vector<128x1xf32> to vector<128x128xf32>
    %233 = arith.addf %229, %232 : vector<128x128xf32>
    %c3_172 = arith.constant 3 : index
    %c0_173 = arith.constant 0 : index
    %c0_174 = arith.constant 0 : index
    %234 = vector.load %arg14[%c3_172, %c0_173, %c0_174] : memref<4x128x1xf32, #tpu.memory_space<vmem>>, vector<1x128x1xf32>
    %235 = vector.shape_cast %234 : vector<1x128x1xf32> to vector<128x1xf32>
    %236 = vector.broadcast %235 : vector<128x1xf32> to vector<128x128xf32>
    %237 = arith.mulf %233, %236 : vector<128x128xf32>
    %c3_175 = arith.constant 3 : index
    %c0_176 = arith.constant 0 : index
    %c0_177 = arith.constant 0 : index
    %238 = vector.load %arg15[%c3_175, %c0_176, %c0_177] : memref<4x128x1xf32, #tpu.memory_space<vmem>>, vector<1x128x1xf32>
    %239 = vector.shape_cast %238 : vector<1x128x1xf32> to vector<128x1xf32>
    %240 = vector.broadcast %239 : vector<128x1xf32> to vector<128x128xf32>
    %241 = arith.addf %237, %240 : vector<128x128xf32>
    %cst_178 = arith.constant 0.000000e+00 : f32
    %242 = vector.broadcast %cst_178 : f32 to vector<128x128xf32>
    %243 = arith.maximumf %241, %242 : vector<128x128xf32>
    %cst_179 = arith.constant dense<0.000000e+00> : vector<128xf32>
    %244 = vector.multi_reduction <add>, %243, %cst_179 [1] : vector<128x128xf32> to vector<128xf32>
    %245 = vector.shape_cast %244 : vector<128xf32> to vector<128x1xf32>
    %cst_180 = arith.constant 1.280000e+02 : f32
    %246 = vector.broadcast %cst_180 : f32 to vector<128x1xf32>
    %247 = arith.divf %245, %246 : vector<128x1xf32>
    %c1_181 = arith.constant 1 : index
    %c0_182 = arith.constant 0 : index
    %c0_183 = arith.constant 0 : index
    %248 = vector.load %arg16[%c1_181, %c0_182, %c0_183] : memref<2x8x128xf32, #tpu.memory_space<vmem>>, vector<1x8x128xf32>
    %249 = vector.shape_cast %248 : vector<1x8x128xf32> to vector<8x128xf32>
    %cst_184 = arith.constant dense<0.000000e+00> : vector<8x1xf32>
    %250 = tpu.matmul %249, %247, %cst_184 {dimension_numbers = #tpu.dot_dimension_numbers<[1], [0], [0], [1], [0, 0, 1, 1], [], []>} : vector<8x128xf32>, vector<128x1xf32>, vector<8x1xf32> -> vector<8x1xf32>
    %c1_185 = arith.constant 1 : index
    %c0_186 = arith.constant 0 : index
    %c0_187 = arith.constant 0 : index
    %251 = vector.load %arg17[%c1_185, %c0_186, %c0_187] : memref<2x8x1xf32, #tpu.memory_space<vmem>>, vector<1x8x1xf32>
    %252 = vector.shape_cast %251 : vector<1x8x1xf32> to vector<8x1xf32>
    %253 = arith.addf %250, %252 : vector<8x1xf32>
    %cst_188 = arith.constant 0.000000e+00 : f32
    %254 = vector.broadcast %cst_188 : f32 to vector<8x1xf32>
    %255 = arith.maximumf %253, %254 : vector<8x1xf32>
    %c1_189 = arith.constant 1 : index
    %c0_190 = arith.constant 0 : index
    %c0_191 = arith.constant 0 : index
    %256 = vector.load %arg18[%c1_189, %c0_190, %c0_191] : memref<2x128x8xf32, #tpu.memory_space<vmem>>, vector<1x128x8xf32>
    %257 = vector.shape_cast %256 : vector<1x128x8xf32> to vector<128x8xf32>
    %cst_192 = arith.constant dense<0.000000e+00> : vector<128x1xf32>
    %258 = tpu.matmul %257, %255, %cst_192 {dimension_numbers = #tpu.dot_dimension_numbers<[1], [0], [0], [1], [0, 0, 1, 1], [], []>} : vector<128x8xf32>, vector<8x1xf32>, vector<128x1xf32> -> vector<128x1xf32>
    %c1_193 = arith.constant 1 : index
    %c0_194 = arith.constant 0 : index
    %c0_195 = arith.constant 0 : index
    %259 = vector.load %arg19[%c1_193, %c0_194, %c0_195] : memref<2x128x1xf32, #tpu.memory_space<vmem>>, vector<1x128x1xf32>
    %260 = vector.shape_cast %259 : vector<1x128x1xf32> to vector<128x1xf32>
    %261 = arith.addf %258, %260 : vector<128x1xf32>
    %262 = arith.negf %261 : vector<128x1xf32>
    %263 = math.exp %262 : vector<128x1xf32>
    %cst_196 = arith.constant 1.000000e+00 : f32
    %264 = vector.broadcast %cst_196 : f32 to vector<128x1xf32>
    %265 = arith.addf %264, %263 : vector<128x1xf32>
    %266 = arith.divf %264, %265 : vector<128x1xf32>
    %267 = vector.broadcast %266 : vector<128x1xf32> to vector<128x128xf32>
    %268 = arith.mulf %243, %267 : vector<128x128xf32>
    %269 = arith.addf %161, %268 : vector<128x128xf32>
    %cst_197 = arith.constant 0.000000e+00 : f32
    %270 = vector.broadcast %cst_197 : f32 to vector<128x128xf32>
    %271 = arith.maximumf %269, %270 : vector<128x128xf32>
    %c0_198 = arith.constant 0 : index
    %c0_199 = arith.constant 0 : index
    %272 = vector.load %arg20[%c0_198, %c0_199] : memref<64x128xf32, #tpu.memory_space<vmem>>, vector<64x128xf32>
    %cst_200 = arith.constant dense<0.000000e+00> : vector<64x128xf32>
    %273 = tpu.matmul %272, %271, %cst_200 {dimension_numbers = #tpu.dot_dimension_numbers<[1], [0], [0], [1], [0, 0, 1, 1], [], []>} : vector<64x128xf32>, vector<128x128xf32>, vector<64x128xf32> -> vector<64x128xf32>
    %c0_201 = arith.constant 0 : index
    %c0_202 = arith.constant 0 : index
    %274 = vector.load %arg21[%c0_201, %c0_202] : memref<64x1xf32, #tpu.memory_space<vmem>>, vector<64x1xf32>
    %275 = vector.broadcast %274 : vector<64x1xf32> to vector<64x128xf32>
    %276 = arith.addf %273, %275 : vector<64x128xf32>
    %c0_203 = arith.constant 0 : index
    %c0_204 = arith.constant 0 : index
    %277 = vector.load %arg22[%c0_203, %c0_204] : memref<64x1xf32, #tpu.memory_space<vmem>>, vector<64x1xf32>
    %278 = vector.broadcast %277 : vector<64x1xf32> to vector<64x128xf32>
    %279 = arith.mulf %276, %278 : vector<64x128xf32>
    %c0_205 = arith.constant 0 : index
    %c0_206 = arith.constant 0 : index
    %280 = vector.load %arg23[%c0_205, %c0_206] : memref<64x1xf32, #tpu.memory_space<vmem>>, vector<64x1xf32>
    %281 = vector.broadcast %280 : vector<64x1xf32> to vector<64x128xf32>
    %282 = arith.addf %279, %281 : vector<64x128xf32>
    %cst_207 = arith.constant 0.000000e+00 : f32
    %283 = vector.broadcast %cst_207 : f32 to vector<64x128xf32>
    %284 = arith.maximumf %282, %283 : vector<64x128xf32>
    %c0_208 = arith.constant 0 : index
    %c0_209 = arith.constant 0 : index
    %285 = vector.load %arg24[%c0_208, %c0_209] : memref<128x64xf32, #tpu.memory_space<vmem>>, vector<128x64xf32>
    %cst_210 = arith.constant dense<0.000000e+00> : vector<64x64xf32>
    %286 = tpu.matmul %284, %285, %cst_210 {dimension_numbers = #tpu.dot_dimension_numbers<[1], [0], [0], [1], [0, 0, 1, 1], [], []>} : vector<64x128xf32>, vector<128x64xf32>, vector<64x64xf32> -> vector<64x64xf32>
    %c0_211 = arith.constant 0 : index
    %c0_212 = arith.constant 0 : index
    %287 = vector.load %arg25[%c0_211, %c0_212] : memref<1x64xf32, #tpu.memory_space<vmem>>, vector<1x64xf32>
    %288 = vector.broadcast %287 : vector<1x64xf32> to vector<64x64xf32>
    %289 = arith.addf %286, %288 : vector<64x64xf32>
    %c0_213 = arith.constant 0 : index
    %c0_214 = arith.constant 0 : index
    %290 = vector.load %arg26[%c0_213, %c0_214] : memref<64x1xf32, #tpu.memory_space<vmem>>, vector<64x1xf32>
    %291 = vector.broadcast %290 : vector<64x1xf32> to vector<64x64xf32>
    %292 = arith.mulf %289, %291 : vector<64x64xf32>
    %c0_215 = arith.constant 0 : index
    %c0_216 = arith.constant 0 : index
    %293 = vector.load %arg27[%c0_215, %c0_216] : memref<64x1xf32, #tpu.memory_space<vmem>>, vector<64x1xf32>
    %294 = vector.broadcast %293 : vector<64x1xf32> to vector<64x64xf32>
    %295 = arith.addf %292, %294 : vector<64x64xf32>
    %296 = tpu.transpose %295, [1, 0] : vector<64x64xf32> -> vector<64x64xf32>
    %c0_217 = arith.constant 0 : index
    %c0_218 = arith.constant 0 : index
    %297 = vector.load %arg28[%c0_217, %c0_218] : memref<64x64xf32, #tpu.memory_space<vmem>>, vector<64x64xf32>
    %cst_219 = arith.constant dense<0.000000e+00> : vector<64x64xf32>
    %298 = tpu.matmul %296, %297, %cst_219 {dimension_numbers = #tpu.dot_dimension_numbers<[1], [0], [0], [1], [0, 0, 1, 1], [], []>} : vector<64x64xf32>, vector<64x64xf32>, vector<64x64xf32> -> vector<64x64xf32>
    %c0_220 = arith.constant 0 : index
    %c0_221 = arith.constant 0 : index
    %299 = vector.load %arg29[%c0_220, %c0_221] : memref<1x64xf32, #tpu.memory_space<vmem>>, vector<1x64xf32>
    %300 = vector.broadcast %299 : vector<1x64xf32> to vector<64x64xf32>
    %301 = arith.addf %298, %300 : vector<64x64xf32>
    %302 = math.tanh %301 : vector<64x64xf32>
    %c0_222 = arith.constant 0 : index
    %c0_223 = arith.constant 0 : index
    %303 = vector.load %arg30[%c0_222, %c0_223] : memref<64x64xf32, #tpu.memory_space<vmem>>, vector<64x64xf32>
    %cst_224 = arith.constant dense<0.000000e+00> : vector<64x64xf32>
    %304 = tpu.matmul %302, %303, %cst_224 {dimension_numbers = #tpu.dot_dimension_numbers<[1], [0], [0], [1], [0, 0, 1, 1], [], []>} : vector<64x64xf32>, vector<64x64xf32>, vector<64x64xf32> -> vector<64x64xf32>
    %c0_225 = arith.constant 0 : index
    %c0_226 = arith.constant 0 : index
    %305 = vector.load %arg31[%c0_225, %c0_226] : memref<1x64xf32, #tpu.memory_space<vmem>>, vector<1x64xf32>
    %306 = vector.broadcast %305 : vector<1x64xf32> to vector<64x64xf32>
    %307 = arith.addf %304, %306 : vector<64x64xf32>
    %cst_227 = arith.constant dense<0xFF800000> : vector<64xf32>
    %308 = vector.multi_reduction <maximumf>, %307, %cst_227 [0] : vector<64x64xf32> to vector<64xf32>
    %309 = vector.shape_cast %308 : vector<64xf32> to vector<1x64xf32>
    %310 = vector.broadcast %309 : vector<1x64xf32> to vector<64x64xf32>
    %311 = arith.subf %307, %310 : vector<64x64xf32>
    %312 = math.exp %311 : vector<64x64xf32>
    %cst_228 = arith.constant dense<0.000000e+00> : vector<64xf32>
    %313 = vector.multi_reduction <add>, %312, %cst_228 [0] : vector<64x64xf32> to vector<64xf32>
    %314 = vector.shape_cast %313 : vector<64xf32> to vector<1x64xf32>
    %315 = vector.broadcast %314 : vector<1x64xf32> to vector<64x64xf32>
    %316 = arith.divf %312, %315 : vector<64x64xf32>
    %317 = arith.mulf %316, %296 : vector<64x64xf32>
    %cst_229 = arith.constant dense<0.000000e+00> : vector<64xf32>
    %318 = vector.multi_reduction <add>, %317, %cst_229 [0] : vector<64x64xf32> to vector<64xf32>
    %319 = vector.shape_cast %318 : vector<64xf32> to vector<1x64xf32>
    %320 = arith.mulf %316, %296 : vector<64x64xf32>
    %321 = arith.mulf %320, %296 : vector<64x64xf32>
    %cst_230 = arith.constant dense<0.000000e+00> : vector<64xf32>
    %322 = vector.multi_reduction <add>, %321, %cst_230 [0] : vector<64x64xf32> to vector<64xf32>
    %323 = vector.shape_cast %322 : vector<64xf32> to vector<1x64xf32>
    %324 = arith.mulf %319, %319 : vector<1x64xf32>
    %325 = arith.subf %323, %324 : vector<1x64xf32>
    %cst_231 = arith.constant 9.99999997E-7 : f32
    %326 = vector.broadcast %cst_231 : f32 to vector<1x64xf32>
    %327 = arith.maximumf %325, %326 : vector<1x64xf32>
    %328 = math.sqrt %327 : vector<1x64xf32>
    %329 = tpu.concatenate %319, %328 in 1 : vector<1x64xf32>, vector<1x64xf32> -> vector<1x128xf32>
    %c0_232 = arith.constant 0 : index
    %c0_233 = arith.constant 0 : index
    %330 = vector.load %arg32[%c0_232, %c0_233] : memref<1x128xf32, #tpu.memory_space<vmem>>, vector<1x128xf32>
    %331 = arith.mulf %329, %330 : vector<1x128xf32>
    %c0_234 = arith.constant 0 : index
    %c0_235 = arith.constant 0 : index
    %332 = vector.load %arg33[%c0_234, %c0_235] : memref<1x128xf32, #tpu.memory_space<vmem>>, vector<1x128xf32>
    %333 = arith.addf %331, %332 : vector<1x128xf32>
    %334 = arith.mulf %333, %333 : vector<1x128xf32>
    %cst_236 = arith.constant dense<0.000000e+00> : vector<1xf32>
    %335 = vector.multi_reduction <add>, %334, %cst_236 [1] : vector<1x128xf32> to vector<1xf32>
    %336 = vector.shape_cast %335 : vector<1xf32> to vector<1x1xf32>
    %337 = math.sqrt %336 : vector<1x1xf32>
    %cst_237 = arith.constant 9.99999996E-13 : f32
    %338 = vector.broadcast %cst_237 : f32 to vector<1x1xf32>
    %339 = arith.maximumf %337, %338 : vector<1x1xf32>
    %340 = vector.broadcast %339 : vector<1x1xf32> to vector<1x128xf32>
    %341 = arith.divf %333, %340 : vector<1x128xf32>
    %c0_238 = arith.constant 0 : index
    %c0_239 = arith.constant 0 : index
    %c0_240 = arith.constant 0 : index
    %342 = vector.load %arg34[%c0_238, %c0_239, %c0_240] : memref<1x1x128xf32, #tpu.memory_space<vmem>>, vector<1x1x128xf32>
    %343 = vector.shape_cast %342 : vector<1x1x128xf32> to vector<1x128xf32>
    %344 = vector.shape_cast %341 : vector<1x128xf32> to vector<1x1x128xf32>
    tpu.vector_store %arg34[%c0_238, %c0_239, %c0_240], %344 {strides = array<i32>} : memref<1x1x128xf32, #tpu.memory_space<vmem>>, vector<1x1x128xf32>,
    return
  }
  func.func @transform_0(%arg0: i32) -> (i32, i32, i32) {
    %c0_i32 = arith.constant 0 : i32
    %c0_i32_0 = arith.constant 0 : i32
    %c0_i32_1 = arith.constant 0 : i32
    return %arg0, %c0_i32, %c0_i32_0 : i32, i32, i32
  }
  func.func @transform_1(%arg0: i32) -> (i32, i32) {
    %c0_i32 = arith.constant 0 : i32
    %c0_i32_0 = arith.constant 0 : i32
    %c0_i32_1 = arith.constant 0 : i32
    return %c0_i32, %c0_i32_0 : i32, i32
  }
  func.func @transform_2(%arg0: i32) -> (i32, i32) {
    %c0_i32 = arith.constant 0 : i32
    %c0_i32_0 = arith.constant 0 : i32
    %c0_i32_1 = arith.constant 0 : i32
    return %c0_i32, %c0_i32_0 : i32, i32
  }
  func.func @transform_3(%arg0: i32) -> (i32, i32) {
    %c0_i32 = arith.constant 0 : i32
    %c0_i32_0 = arith.constant 0 : i32
    %c0_i32_1 = arith.constant 0 : i32
    return %c0_i32, %c0_i32_0 : i32, i32
  }
  func.func @transform_4(%arg0: i32) -> (i32, i32) {
    %c0_i32 = arith.constant 0 : i32
    %c0_i32_0 = arith.constant 0 : i32
    %c0_i32_1 = arith.constant 0 : i32
    return %c0_i32, %c0_i32_0 : i32, i32
  }
  func.func @transform_5(%arg0: i32) -> (i32, i32, i32) {
    %c0_i32 = arith.constant 0 : i32
    %c0_i32_0 = arith.constant 0 : i32
    %c0_i32_1 = arith.constant 0 : i32
    %c0_i32_2 = arith.constant 0 : i32
    return %c0_i32, %c0_i32_0, %c0_i32_1 : i32, i32, i32
  }
  func.func @transform_6(%arg0: i32) -> (i32, i32, i32) {
    %c0_i32 = arith.constant 0 : i32
    %c0_i32_0 = arith.constant 0 : i32
    %c0_i32_1 = arith.constant 0 : i32
    %c0_i32_2 = arith.constant 0 : i32
    return %c0_i32, %c0_i32_0, %c0_i32_1 : i32, i32, i32
  }
  func.func @transform_7(%arg0: i32) -> (i32, i32, i32) {
    %c0_i32 = arith.constant 0 : i32
    %c0_i32_0 = arith.constant 0 : i32
    %c0_i32_1 = arith.constant 0 : i32
    %c0_i32_2 = arith.constant 0 : i32
    return %c0_i32, %c0_i32_0, %c0_i32_1 : i32, i32, i32
  }
  func.func @transform_8(%arg0: i32) -> (i32, i32, i32) {
    %c0_i32 = arith.constant 0 : i32
    %c0_i32_0 = arith.constant 0 : i32
    %c0_i32_1 = arith.constant 0 : i32
    %c0_i32_2 = arith.constant 0 : i32
    return %c0_i32, %c0_i32_0, %c0_i32_1 : i32, i32, i32
  }
  func.func @transform_9(%arg0: i32) -> (i32, i32, i32, i32) {
    %c0_i32 = arith.constant 0 : i32
    %c0_i32_0 = arith.constant 0 : i32
    %c0_i32_1 = arith.constant 0 : i32
    %c0_i32_2 = arith.constant 0 : i32
    %c0_i32_3 = arith.constant 0 : i32
    return %c0_i32, %c0_i32_0, %c0_i32_1, %c0_i32_2 : i32, i32, i32, i32
  }
  func.func @transform_10(%arg0: i32) -> (i32, i32, i32) {
    %c0_i32 = arith.constant 0 : i32
    %c0_i32_0 = arith.constant 0 : i32
    %c0_i32_1 = arith.constant 0 : i32
    %c0_i32_2 = arith.constant 0 : i32
    return %c0_i32, %c0_i32_0, %c0_i32_1 : i32, i32, i32
  }
  func.func @transform_11(%arg0: i32) -> (i32, i32, i32) {
    %c0_i32 = arith.constant 0 : i32
    %c0_i32_0 = arith.constant 0 : i32
    %c0_i32_1 = arith.constant 0 : i32
    %c0_i32_2 = arith.constant 0 : i32
    return %c0_i32, %c0_i32_0, %c0_i32_1 : i32, i32, i32
  }
  func.func @transform_12(%arg0: i32) -> (i32, i32, i32) {
    %c0_i32 = arith.constant 0 : i32
    %c0_i32_0 = arith.constant 0 : i32
    %c0_i32_1 = arith.constant 0 : i32
    %c0_i32_2 = arith.constant 0 : i32
    return %c0_i32, %c0_i32_0, %c0_i32_1 : i32, i32, i32
  }
  func.func @transform_13(%arg0: i32) -> (i32, i32, i32) {
    %c0_i32 = arith.constant 0 : i32
    %c0_i32_0 = arith.constant 0 : i32
    %c0_i32_1 = arith.constant 0 : i32
    %c0_i32_2 = arith.constant 0 : i32
    return %c0_i32, %c0_i32_0, %c0_i32_1 : i32, i32, i32
  }
  func.func @transform_14(%arg0: i32) -> (i32, i32, i32) {
    %c0_i32 = arith.constant 0 : i32
    %c0_i32_0 = arith.constant 0 : i32
    %c0_i32_1 = arith.constant 0 : i32
    %c0_i32_2 = arith.constant 0 : i32
    return %c0_i32, %c0_i32_0, %c0_i32_1 : i32, i32, i32
  }
  func.func @transform_15(%arg0: i32) -> (i32, i32, i32) {
    %c0_i32 = arith.constant 0 : i32
    %c0_i32_0 = arith.constant 0 : i32
    %c0_i32_1 = arith.constant 0 : i32
    %c0_i32_2 = arith.constant 0 : i32
    return %c0_i32, %c0_i32_0, %c0_i32_1 : i32, i32, i32
  }
  func.func @transform_16(%arg0: i32) -> (i32, i32, i32) {
    %c0_i32 = arith.constant 0 : i32
    %c0_i32_0 = arith.constant 0 : i32
    %c0_i32_1 = arith.constant 0 : i32
    %c0_i32_2 = arith.constant 0 : i32
    return %c0_i32, %c0_i32_0, %c0_i32_1 : i32, i32, i32
  }
  func.func @transform_17(%arg0: i32) -> (i32, i32, i32) {
    %c0_i32 = arith.constant 0 : i32
    %c0_i32_0 = arith.constant 0 : i32
    %c0_i32_1 = arith.constant 0 : i32
    %c0_i32_2 = arith.constant 0 : i32
    return %c0_i32, %c0_i32_0, %c0_i32_1 : i32, i32, i32
  }
  func.func @transform_18(%arg0: i32) -> (i32, i32, i32) {
    %c0_i32 = arith.constant 0 : i32
    %c0_i32_0 = arith.constant 0 : i32
    %c0_i32_1 = arith.constant 0 : i32
    %c0_i32_2 = arith.constant 0 : i32
    return %c0_i32, %c0_i32_0, %c0_i32_1 : i32, i32, i32
  }
  func.func @transform_19(%arg0: i32) -> (i32, i32) {
    %c0_i32 = arith.constant 0 : i32
    %c0_i32_0 = arith.constant 0 : i32
    %c0_i32_1 = arith.constant 0 : i32
    return %c0_i32, %c0_i32_0 : i32, i32
  }
  func.func @transform_20(%arg0: i32) -> (i32, i32) {
    %c0_i32 = arith.constant 0 : i32
    %c0_i32_0 = arith.constant 0 : i32
    %c0_i32_1 = arith.constant 0 : i32
    return %c0_i32, %c0_i32_0 : i32, i32
  }
  func.func @transform_21(%arg0: i32) -> (i32, i32) {
    %c0_i32 = arith.constant 0 : i32
    %c0_i32_0 = arith.constant 0 : i32
    %c0_i32_1 = arith.constant 0 : i32
    return %c0_i32, %c0_i32_0 : i32, i32
  }
  func.func @transform_22(%arg0: i32) -> (i32, i32) {
    %c0_i32 = arith.constant 0 : i32
    %c0_i32_0 = arith.constant 0 : i32
    %c0_i32_1 = arith.constant 0 : i32
    return %c0_i32, %c0_i32_0 : i32, i32
  }
  func.func @transform_23(%arg0: i32) -> (i32, i32) {
    %c0_i32 = arith.constant 0 : i32
    %c0_i32_0 = arith.constant 0 : i32
    %c0_i32_1 = arith.constant 0 : i32
    return %c0_i32, %c0_i32_0 : i32, i32
  }
  func.func @transform_24(%arg0: i32) -> (i32, i32) {
    %c0_i32 = arith.constant 0 : i32
    %c0_i32_0 = arith.constant 0 : i32
    %c0_i32_1 = arith.constant 0 : i32
    return %c0_i32, %c0_i32_0 : i32, i32
  }
  func.func @transform_25(%arg0: i32) -> (i32, i32) {
    %c0_i32 = arith.constant 0 : i32
    %c0_i32_0 = arith.constant 0 : i32
    %c0_i32_1 = arith.constant 0 : i32
    return %c0_i32, %c0_i32_0 : i32, i32
  }
  func.func @transform_26(%arg0: i32) -> (i32, i32) {
    %c0_i32 = arith.constant 0 : i32
    %c0_i32_0 = arith.constant 0 : i32
    %c0_i32_1 = arith.constant 0 : i32
    return %c0_i32, %c0_i32_0 : i32, i32
  }
  func.func @transform_27(%arg0: i32) -> (i32, i32) {
    %c0_i32 = arith.constant 0 : i32
    %c0_i32_0 = arith.constant 0 : i32
    %c0_i32_1 = arith.constant 0 : i32
    return %c0_i32, %c0_i32_0 : i32, i32
  }
  func.func @transform_28(%arg0: i32) -> (i32, i32) {
    %c0_i32 = arith.constant 0 : i32
    %c0_i32_0 = arith.constant 0 : i32
    %c0_i32_1 = arith.constant 0 : i32
    return %c0_i32, %c0_i32_0 : i32, i32
  }
  func.func @transform_29(%arg0: i32) -> (i32, i32) {
    %c0_i32 = arith.constant 0 : i32
    %c0_i32_0 = arith.constant 0 : i32
    %c0_i32_1 = arith.constant 0 : i32
    return %c0_i32, %c0_i32_0 : i32, i32
  }
  func.func @transform_30(%arg0: i32) -> (i32, i32) {
    %c0_i32 = arith.constant 0 : i32
    %c0_i32_0 = arith.constant 0 : i32
    %c0_i32_1 = arith.constant 0 : i32
    return %c0_i32, %c0_i32_0 : i32, i32
  }
  func.func @transform_31(%arg0: i32) -> (i32, i32) {
    %c0_i32 = arith.constant 0 : i32
    %c0_i32_0 = arith.constant 0 : i32
    %c0_i32_1 = arith.constant 0 : i32
    return %c0_i32, %c0_i32_0 : i32, i32
  }
  func.func @transform_32(%arg0: i32) -> (i32, i32) {
    %c0_i32 = arith.constant 0 : i32
    %c0_i32_0 = arith.constant 0 : i32
    %c0_i32_1 = arith.constant 0 : i32
    return %c0_i32, %c0_i32_0 : i32, i32
  }
  func.func @transform_33(%arg0: i32) -> (i32, i32, i32) {
    %c0_i32 = arith.constant 0 : i32
    %c0_i32_0 = arith.constant 0 : i32
    %c0_i32_1 = arith.constant 0 : i32
    return %arg0, %c0_i32, %c0_i32_0 : i32, i32, i32
  }
}

</mosaic_0001>

<bundles_post_ra>
// kernel: fwd.1
= control target key start
LH: loop header
LB: loop body
LE: loop exit
PB: predicated region body
PF: predicated region fallthrough
CT: control target
= control target key end

     0   :  { %s11726_s6 = smov 1   ;;  %s11727_s10 = smov 2   ;;  %s15634_s0 = inlined_call_operand.smem [shape: u32[34], index: -1, kind: input, shape index: {}] }
   0x1   :  { %s11775_s5 = sld [smem:[%s15634_s0]]   ;;  %s11728_s14 = smov 3  }
   0x2   :  { %s11780_s9 = sld [smem:[%s15634_s0 + %s11726_s6]]   ;;  %s11729_s18 = smov 4  }
   0x3   :  { %s11785_s13 = sld [smem:[%s15634_s0 + %s11727_s10]]   ;;  %s11730_s22 = smov 5  }
   0x4   :  { %s11790_s17 = sld [smem:[%s15634_s0 + %s11728_s14]]   ;;  %s11731_s26 = smov 6  }
   0x5   :  { %s11795_s21 = sld [smem:[%s15634_s0 + %s11729_s18]]   ;;  %s11732_s30 = smov 7  }
   0x6   :  { %s11800_s25 = sld [smem:[%s15634_s0 + %s11730_s22]]   ;;  %s11733_s4 = smov 8  }
   0x7   :  { %15720 = sst [smem:[#allocation5_spill]] %s11775_s5  ;;  %s11734_s10 = smov 9  }
   0x8   :  { %15721 = sst [smem:[#allocation6_spill]] %s11780_s9  ;;  %s11735_s15 = smov 10  }
   0x9   :  { %15722 = sst [smem:[#allocation7_spill]] %s11785_s13  ;;  %s11736_s20 = smov 11  }
   0xa   :  { %s11805_s29 = sld [smem:[%s15634_s0 + %s11731_s26]]   ;;  %s11737_s26 = smov 12  }
   0xb   :  { %s11810_s3 = sld [smem:[%s15634_s0 + %s11732_s30]]   ;;  %s11738_s1 = smov 13  }
   0xc   :  { %s11815_s8 = sld [smem:[%s15634_s0 + %s11733_s4]]   ;;  %s11739_s7 = smov 14  }
   0xd   :  { %s11820_s14 = sld [smem:[%s15634_s0 + %s11734_s10]]   ;;  %s11741_s22 = smov 16  }
   0xe   :  { %s11825_s19 = sld [smem:[%s15634_s0 + %s11735_s15]]   ;;  %s11740_s15 = smov 15  }
   0xf   :  { %s11830_s24 = sld [smem:[%s15634_s0 + %s11736_s20]]   ;;  %s11742_s28 = smov 17  }
  0x10   :  { %s11835_s30 = sld [smem:[%s15634_s0 + %s11737_s26]]  }
  0x11   :  { %15723 = sst [smem:[#allocation8_spill]] %s11810_s3 }
  0x12   :  { %15724 = sst [smem:[#allocation9_spill]] %s11815_s8 }
  0x13   :  { %15725 = sst [smem:[#allocation10_spill]] %s11820_s14 }
  0x14   :  { %s11840_s6 = sld [smem:[%s15634_s0 + %s11738_s1]]  }
  0x15   :  { %s11845_s12 = sld [smem:[%s15634_s0 + %s11739_s7]]   ;;  %s11743_s7 = smov 18  }
  0x16   :  { %s11850_s20 = sld [smem:[%s15634_s0 + %s11740_s15]]   ;;  %s11744_s15 = smov 19  }
  0x17   :  { %s11855_s27 = sld [smem:[%s15634_s0 + %s11741_s22]]   ;;  %s11745_s22 = smov 20  }
  0x18   :  { %s11860_s4 = sld [smem:[%s15634_s0 + %s11742_s28]]   ;;  %s11746_s28 = smov 21  }
  0x19   :  { %s11865_s8 = sld [smem:[%s15634_s0 + %s11743_s7]]   ;;  %s11747_s7 = smov 22  }
  0x1a   :  { %15726 = sst [smem:[#allocation11_spill]] %s11840_s6 }
  0x1b   :  { %15727 = sst [smem:[#allocation12_spill]] %s11845_s12 }
  0x1c   :  { %15728 = sst [smem:[#allocation13_spill]] %s11850_s20 }
  0x1d   :  { %15729 = sst [smem:[#allocation14_spill]] %s11855_s27 }
  0x1e   :  { %15730 = sst [smem:[#allocation15_spill]] %s11860_s4 }
  0x1f   :  { %15731 = sst [smem:[#allocation16_spill]] %s11865_s8 }
  0x20   :  { %s11870_s20 = sld [smem:[%s15634_s0 + %s11744_s15]]   ;;  %s11748_s15 = smov 23  }
  0x21   :  { %s11875_s27 = sld [smem:[%s15634_s0 + %s11745_s22]]   ;;  %s11749_s22 = smov 24  }
  0x22   :  { %s11880_s4 = sld [smem:[%s15634_s0 + %s11746_s28]]   ;;  %s11750_s28 = smov 25  }
  0x23   :  { %s11885_s8 = sld [smem:[%s15634_s0 + %s11747_s7]]   ;;  %s11751_s7 = smov 26  }
  0x26   :  { %15732 = sst [smem:[#allocation17_spill]] %s11870_s20 }
  0x27   :  { %15733 = sst [smem:[#allocation18_spill]] %s11875_s27 }
  0x28   :  { %15734 = sst [smem:[#allocation19_spill]] %s11880_s4 }
  0x29   :  { %15735 = sst [smem:[#allocation20_spill]] %s11885_s8 }
  0x2a   :  { %s11890_s20 = sld [smem:[%s15634_s0 + %s11748_s15]]   ;;  %s11752_s15 = smov 27  }
  0x2b   :  { %s11895_s27 = sld [smem:[%s15634_s0 + %s11749_s22]]   ;;  %s11753_s22 = smov 28  }
  0x2c   :  { %s11900_s4 = sld [smem:[%s15634_s0 + %s11750_s28]]   ;;  %s11754_s28 = smov 29  }
  0x2d   :  { %s11905_s8 = sld [smem:[%s15634_s0 + %s11751_s7]]   ;;  %s11755_s7 = smov 30  }
  0x30   :  { %15736 = sst [smem:[#allocation21_spill]] %s11890_s20 }
  0x31   :  { %15737 = sst [smem:[#allocation22_spill]] %s11895_s27 }
  0x32   :  { %15738 = sst [smem:[#allocation23_spill]] %s11900_s4 }
  0x33   :  { %15739 = sst [smem:[#allocation24_spill]] %s11905_s8 }
  0x34   :  { %s11910_s20 = sld [smem:[%s15634_s0 + %s11752_s15]]   ;;  %s11756_s15 = smov 31  }
  0x35   :  { %s11915_s27 = sld [smem:[%s15634_s0 + %s11753_s22]]   ;;  %s11757_s22 = smov 32  }
  0x36   :  { %s11920_s4 = sld [smem:[%s15634_s0 + %s11754_s28]]   ;;  %s11758_s28 = smov 33  }
  0x37   :  { %s11925_s8 = sld [smem:[%s15634_s0 + %s11755_s7]]  }
  0x3a   :  { %15740 = sst [smem:[#allocation25_spill]] %s11910_s20 }
  0x3b   :  { %15741 = sst [smem:[#allocation26_spill]] %s11915_s27 }
  0x3c   :  { %15742 = sst [smem:[#allocation27_spill]] %s11920_s4 }
  0x3d   :  { %15743 = sst [smem:[#allocation28_spill]] %s11925_s8 }
  0x3e   :  { %s11930_s20 = sld [smem:[%s15634_s0 + %s11756_s15]]  }
  0x3f   :  { %s11935_s27 = sld [smem:[%s15634_s0 + %s11757_s22]]  }
  0x40   :  { %s11940_s4 = sld [smem:[%s15634_s0 + %s11758_s28]]  }
  0x41   :  { %72 = vsyncpa [#allocation3], 0 }
  0x42   :  { %74 = vsyncpa [#allocation3 + $0x1], 0  ;;  %s11942_s7 = smov 0   ;;  %s11944_s10 = smov 0  }
  0x43   :  { %s11946_s11 = smov 0   ;;  %s11948_s15 = smov 0  }
  0x44 LB: > { %s15744_s14 = sld [smem:[#allocation10_spill]]  ;;  %s15745_s12 = sld [smem:[#allocation12_spill]]  ;;  %s11716_s10 = sphi %s11944_s10, %s16207_s10   ;;  %s11712_s7 = sphi %s11942_s7, %s16206_s7   ;;  %s11724_s15 = sphi %s11948_s15, %s16209_s15   ;;  %s11720_s11 = sphi %s11946_s11, %s16208_s11  }
  0x45   : > { %s15746_s6 = sld [smem:[#allocation11_spill]]  ;;  %s15747_s3 = sld [smem:[#allocation8_spill]] }
  0x46   : > { %s15748_s13 = sld [smem:[#allocation7_spill]]  ;;  %s15749_s9 = sld [smem:[#allocation6_spill]] }
  0x47   : > { %s11963_s0 = sadd.s32 4294967295, %s11724_s15   ;;  %s9396_s16 = sadd.s32 4294967294, %s11724_s15  }
  0x48   : > { %s11967_s18 = sadd.s32 1, %s11724_s15   ;;  %s785_s22 = sadd.s32 1, %s11720_s11 }
  0x49   : > { %s782_s23 = ssub.s32 %s11724_s15, %s11967_s18  ;;  %p795_p0 = scmp.ne.s32.totalorder %s11720_s11, %s11716_s10 }
  0x4a   : > { %p783_p1 = scmp.eq.s32.totalorder %s782_s23, 0  ;;  %p796_p2 = scmp.eq.s32.totalorder %s11963_s0, 1 }
  0x4b   : > { %p801_p3 = scmp.ne.s32.totalorder %s11716_s10, %s11712_s7  ;;  %p802_p4 = scmp.eq.s32.totalorder %s9396_s16, 1 }
  0x4c   : > { %s11978_s26 = scalar_select %p783_p1, %s11720_s11, %s785_s22  }
  0x4d   : > { %p11980_p5 = por %p796_p2, %p795_p0  ;;  %p11984_p6 = por %p802_p4, %p801_p3 }
  0x4e   : > { %p9399_p7 = scmp.ge.s32.totalorder %s11724_s15, 1  ;;  %p924_p8 = scmp.lt.s32.totalorder %s11724_s15, 3 }
  0x50   : > { %p925_p9 = pnand %p9399_p7, %p924_p8 }
  0x52   : > { %928 = sbr.rel (%p925_p9) target bundleno = 5178 (0x143a), region = 152 }
  0x59   : > { %s15752_s5 = sld [smem:[#allocation5_spill]]  ;;  %p1007_p10 = scmp.lt.s32.totalorder %s11963_s0, 1  ;;  %v11759_v0 = vmov 0   ;;  %v15649_v1 = vmov 0.0|0.0   ;;  %v1127_v16 = vld [vmem:[%s15748_s13 + $0x8] sm:$0xff]  ;;  %v1126_v17 = vld [vmem:[%s15748_s13] sm:$0xff] }
  0x5a   : > { %11493 = vset.pattern.permute.xlu1 %v11759_v0  ;;  %11492 = vset.pattern.permute.xlu0 %v11759_v0  ;;  %s15657_s23 = smov 1   ;;  %v1416_v19 = vld [vmem:[%s11790_s17] sm:$0xff]  ;;  %v1417_v20 = vld [vmem:[%s11790_s17 + $0x8] sm:$0xff]  ;;  %v1128_v22 = vld [vmem:[%s15748_s13 + $0x10] sm:$0xff]  ;;  %vm1222_vm0 = vcmask 523264   ;;  %vm1052_vm1 = vcmask 7168  }
  0x5b   : > { %s1008_s2 = scalar_select %p1007_p10, %s11963_s0, 1  ;;  %10985 = vmatprep.subr.bf16.mxu0 %v15649_v1  ;;  %v1129_v23 = vld [vmem:[%s15748_s13 + $0x18] sm:$0xff]  ;;  %v1528_v24 = vld [vmem:[%s11795_s21] sm:$0xff]  ;;  %v1529_v25 = vld [vmem:[%s11795_s21 + $0x8] sm:$0xff]  ;;  %vm1085_vm4 = vcmask 1039360   ;;  %vm11763_vm6 = vmmov 0  }
  0x5c   : > { %v1418_v26 = vld [vmem:[%s11790_s17 + $0x10] sm:$0xff]  ;;  %v1419_v27 = vld [vmem:[%s11790_s17 + $0x18] sm:$0xff]  ;;  %v1130_v28 = vld [vmem:[%s15748_s13 + $0x20] sm:$0xff]  ;;  %vm4543_vm7 = vcmask 64512   ;;  %s16205_s8 = sld [smem:[#allocation28_spill]]  ;;  %vm9280_vm10 = vcmask 1040384  }
  0x5d   : > { %s10042_s16 = sshll.u32 %s1008_s2, 6  ;;  %s15655_s2 = smov 127   ;;  %v1131_v29 = vld [vmem:[%s15748_s13 + $0x28] sm:$0xff]  ;;  %v1530_v30 = vld [vmem:[%s11795_s21 + $0x10] sm:$0xff]  ;;  %v1531_v32 = vld [vmem:[%s11795_s21 + $0x18] sm:$0xff] }
  0x5e   : > { %v1095_v31 = vld [vmem:[%s15749_s9 + $0x8] sm:$0xff]  ;;  %v1420_v33 = vld [vmem:[%s11790_s17 + $0x20] sm:$0xff]  ;;  %v1132_v35 = vld [vmem:[%s15748_s13 + $0x30] sm:$0xff] }
  0x5f   : > { %s1011_s22 = scalar_lea.vmem %s15752_s5, %s10042_s16  ;;  %9426 = vmatprep.mubr.msk.f32.mxu0 %vm1222_vm0, %v1095_v31  ;;  %v1421_v34 = vld [vmem:[%s11790_s17 + $0x28] sm:$0xff]  ;;  %v1133_v36 = vld [vmem:[%s15748_s13 + $0x38] sm:$0xff]  ;;  %v1532_v37 = vld [vmem:[%s11795_s21 + $0x20] sm:$0xff]  ;;  %s15913_s16 = sld [smem:[#allocation9_spill]] }
  0x60   : > { %v11994_v2 = vld [vmem:[%s1011_s22 + $0x20] sm:$0xff]  ;;  %v11996_v3 = vld [vmem:[%s1011_s22 + $0x28] sm:$0xff]  ;;  %v12004_v7 = vld [vmem:[%s1011_s22 + $0x30] sm:$0xff]  ;;  %s15924_s5 = sld [smem:[#allocation16_spill]] }
  0x61   : > { %v11998_v4 = vld [vmem:[%s1011_s22] sm:$0xff]  ;;  %v11462_v5 = vpack.i.bf16 %v11996_v3, %v11994_v2  ;;  %v12002_v6 = vld [vmem:[%s1011_s22 + $0x8] sm:$0xff]  ;;  %v12006_v8 = vld [vmem:[%s1011_s22 + $0x38] sm:$0xff]  ;;  %v11008_v18 = vpack.c.bf16 %v11996_v3, %v11994_v2 }
  0x62   : > { %v11452_v9 = vpack.i.bf16 %v12002_v6, %v11998_v4  ;;  %v12010_v10 = vld [vmem:[%s1011_s22 + $0x10] sm:$0xff]  ;;  %v12012_v11 = vld [vmem:[%s1011_s22 + $0x18] sm:$0xff]  ;;  %v11467_v12 = vpack.i.bf16 %v12006_v8, %v12004_v7  ;;  %v11002_v14 = vpack.c.bf16 %v12002_v6, %v11998_v4  ;;  %v11011_v21 = vpack.c.bf16 %v12006_v8, %v12004_v7  ;;  %v1533_v38 = vld [vmem:[%s11795_s21 + $0x28] sm:$0xff]  ;;  %s15915_s22 = sld [smem:[#allocation13_spill]] }
  0x63   : > { %11463 = vrot.lane.b32.xlu1 %v11462_v5, %s15657_s23  ;;  %v11457_v13 = vpack.i.bf16 %v12012_v11, %v12010_v10  ;;  %v11005_v15 = vpack.c.bf16 %v12012_v11, %v12010_v10  ;;  %v1422_v39 = vld [vmem:[%s11790_s17 + $0x30] sm:$0xff]  ;;  %v1423_v40 = vld [vmem:[%s11790_s17 + $0x38] sm:$0xff]  ;;  %v1134_v41 = vld [vmem:[%s15748_s13 + $0x40] sm:$0xff] }
  0x64   : > { %11453 = vrot.lane.b32.xlu0 %v11452_v9, %s15657_s23  ;;  %v1135_v42 = vld [vmem:[%s15748_s13 + $0x48] sm:$0xff]  ;;  %v1534_v43 = vld [vmem:[%s11795_s21 + $0x30] sm:$0xff]  ;;  %v1535_v44 = vld [vmem:[%s11795_s21 + $0x38] sm:$0xff] }
  0x65   : > { %v1424_v45 = vld [vmem:[%s11790_s17 + $0x40] sm:$0xff]  ;;  %v1425_v46 = vld [vmem:[%s11790_s17 + $0x48] sm:$0xff]  ;;  %v1136_v47 = vld [vmem:[%s15748_s13 + $0x50] sm:$0xff] }
  0x66   : > { %v1137_v48 = vld [vmem:[%s15748_s13 + $0x58] sm:$0xff]  ;;  %v1536_v49 = vld [vmem:[%s11795_s21 + $0x40] sm:$0xff]  ;;  %v1537_v50 = vld [vmem:[%s11795_s21 + $0x48] sm:$0xff] }
  0x67   : > { %11468 = vrot.lane.b32.xlu1 %v11467_v12, %s15657_s23  ;;  %v1426_v51 = vld [vmem:[%s11790_s17 + $0x50] sm:$0xff]  ;;  %v1427_v52 = vld [vmem:[%s11790_s17 + $0x58] sm:$0xff]  ;;  %v1138_v53 = vld [vmem:[%s15748_s13 + $0x60] sm:$0xff] }
  0x68   : > { %11458 = vrot.lane.b32.xlu0 %v11457_v13, %s15657_s23  ;;  %v1139_v54 = vld [vmem:[%s15748_s13 + $0x68] sm:$0xff]  ;;  %v1538_v55 = vld [vmem:[%s11795_s21 + $0x50] sm:$0xff]  ;;  %v1539_v56 = vld [vmem:[%s11795_s21 + $0x58] sm:$0xff] }
  0x69   : > { %v1428_v57 = vld [vmem:[%s11790_s17 + $0x60] sm:$0xff]  ;;  %v1429_v58 = vld [vmem:[%s11790_s17 + $0x68] sm:$0xff]  ;;  %v1140_v59 = vld [vmem:[%s15748_s13 + $0x70] sm:$0xff] }
  0x6a   : > { %v1141_v60 = vld [vmem:[%s15748_s13 + $0x78] sm:$0xff]  ;;  %v1540_v61 = vld [vmem:[%s11795_s21 + $0x60] sm:$0xff]  ;;  %v1541_v62 = vld [vmem:[%s11795_s21 + $0x68] sm:$0xff]  ;;  %s15998_s13 = smov 127  }
  0x6b   : > { %11478 = vrot.lane.b32.xlu1 %v11457_v13, %s15655_s2  ;;  %v1430_v63 = vld [vmem:[%s11790_s17 + $0x70] sm:$0xff]  ;;  %v1431_v0 = vld [vmem:[%s11790_s17 + $0x78] sm:$0xff]  ;;  %v2138_v13 = vld [vmem:[%s15744_s14 + $0x8] sm:$0xff] }
  0x6c   : > { %11473 = vrot.lane.b32.xlu0 %v11452_v9, %s15655_s2  ;;  %v1543_v9 = vld [vmem:[%s11795_s21 + $0x78] sm:$0xff]  ;;  %vm9402_vm2 = vmneg %vm1052_vm1  ;;  %v9462_v10 = vld [vmem:[%s15744_s14 + $0x420] sm:$0xff] }
  0x6d   : > { %vm12089_vm3 = vmpackc.low %vm9402_vm2, %vm9402_vm2  ;;  %v9463_v11 = vld [vmem:[%s15744_s14 + $0x428] sm:$0xff]  ;;  %v2653_v3 = vld [vmem:[%s11825_s19 + $0x10] sm:$0xff] }
  0x6e   : > { %vm12139_vm5 = vmpackc.low %vm1085_vm4, %vm1085_vm4  ;;  %v2143_v8 = vld [vmem:[%s15744_s14 + $0x30] sm:$0xff]  ;;  %v1113_v2 = vld [vmem:[%s15749_s9 + $0x98] sm:$0xff] }
  0x6f   : > { %11488 = vrot.lane.b32.xlu1 %v11467_v12, %s15655_s2  ;;  %v2137_v12 = vld [vmem:[%s15744_s14] sm:$0xff] }
  0x70   : > { %11483 = vrot.lane.b32.xlu0 %v11462_v5, %s15655_s2  ;;  %v1542_v5 = vld [vmem:[%s11795_s21 + $0x70] sm:$0xff] }
  0x73   : > { %1149 = vperm.xlu1 %11493, %v1127_v16   ;;  %v9442_v16 = vld [vmem:[%s15744_s14 + $0x200] sm:$0xff] }
  0x74   : > { %1144 = vperm.xlu0 %11492, %v1126_v17   ;;  %v9443_v17 = vld [vmem:[%s15744_s14 + $0x208] sm:$0xff] }
  0x77   : > { %1434 = vperm.xlu1 %11493, %v1416_v19  }
  0x78   : > { %1439 = vperm.xlu0 %11492, %v1417_v20  }
  0x7b   : > { %1154 = vperm.xlu1 %11493, %v1128_v22  }
  0x7c   : > { %1159 = vperm.xlu0 %11492, %v1129_v23  }
  0x7f   : > { %1546 = vperm.xlu1 %11493, %v1528_v24  }
  0x80   : > { %1551 = vperm.xlu0 %11492, %v1529_v25   ;;  %v9458_v25 = vld [vmem:[%s15744_s14 + $0x400] sm:$0xff] }
  0x83   : > { %1444 = vperm.xlu1 %11493, %v1418_v26  }
  0x84   : > { %1449 = vperm.xlu0 %11492, %v1419_v27   ;;  %v9459_v27 = vld [vmem:[%s15744_s14 + $0x408] sm:$0xff] }
  0x87   : > { %1164 = vperm.xlu1 %11493, %v1130_v28  }
  0x88   : > { %1169 = vperm.xlu0 %11492, %v1131_v29  }
  0x8b   : > { %1556 = vperm.xlu1 %11493, %v1530_v30  }
  0x8c   : > { %1561 = vperm.xlu0 %11492, %v1531_v32  }
  0x8f   : > { %1454 = vperm.xlu1 %11493, %v1420_v33   ;;  %v2139_v33 = vld [vmem:[%s15744_s14 + $0x10] sm:$0xff] }
  0x90   : > { %1459 = vperm.xlu0 %11492, %v1421_v34  }
  0x93   : > { %1174 = vperm.xlu1 %11493, %v1132_v35  }
  0x94   : > { %1179 = vperm.xlu0 %11492, %v1133_v36   ;;  %v2140_v36 = vld [vmem:[%s15744_s14 + $0x18] sm:$0xff] }
  0x97   : > { %1566 = vperm.xlu1 %11493, %v1532_v37  }
  0x98   : > { %1571 = vperm.xlu0 %11492, %v1533_v38  }
  0x9b   : > { %1464 = vperm.xlu1 %11493, %v1422_v39  }
  0x9c   : > { %1469 = vperm.xlu0 %11492, %v1423_v40   ;;  %v9444_v40 = vld [vmem:[%s15744_s14 + $0x210] sm:$0xff] }
  0x9f   : > { %1184 = vperm.xlu1 %11493, %v1134_v41   ;;  %v9445_v41 = vld [vmem:[%s15744_s14 + $0x218] sm:$0xff] }
  0xa0   : > { %1189 = vperm.xlu0 %11492, %v1135_v42  }
  0xa3   : > { %1576 = vperm.xlu1 %11493, %v1534_v43   ;;  %v9460_v43 = vld [vmem:[%s15744_s14 + $0x410] sm:$0xff] }
  0xa4   : > { %1581 = vperm.xlu0 %11492, %v1535_v44   ;;  %v9461_v44 = vld [vmem:[%s15744_s14 + $0x418] sm:$0xff] }
  0xa7   : > { %1474 = vperm.xlu1 %11493, %v1424_v45   ;;  %v2651_v45 = vld [vmem:[%s11825_s19] sm:$0xff] }
  0xa8   : > { %1479 = vperm.xlu0 %11492, %v1425_v46   ;;  %v2652_v46 = vld [vmem:[%s11825_s19 + $0x8] sm:$0xff] }
  0xab   : > { %1194 = vperm.xlu1 %11493, %v1136_v47   ;;  %v2141_v47 = vld [vmem:[%s15744_s14 + $0x20] sm:$0xff] }
  0xac   : > { %1199 = vperm.xlu0 %11492, %v1137_v48   ;;  %v2142_v48 = vld [vmem:[%s15744_s14 + $0x28] sm:$0xff] }
  0xaf   : > { %1586 = vperm.xlu1 %11493, %v1536_v49   ;;  %v9446_v49 = vld [vmem:[%s15744_s14 + $0x220] sm:$0xff] }
  0xb0   : > { %1591 = vperm.xlu0 %11492, %v1537_v50   ;;  %v9447_v50 = vld [vmem:[%s15744_s14 + $0x228] sm:$0xff] }
  0xb3   : > { %1484 = vperm.xlu1 %11493, %v1426_v51  }
  0xb4   : > { %1489 = vperm.xlu0 %11492, %v1427_v52  }
  0xb7   : > { %1204 = vperm.xlu1 %11493, %v1138_v53  }
  0xb8   : > { %1209 = vperm.xlu0 %11492, %v1139_v54  }
  0xbb   : > { %1596 = vperm.xlu1 %11493, %v1538_v55  }
  0xbc   : > { %1601 = vperm.xlu0 %11492, %v1539_v56  }
  0xbf   : > { %1494 = vperm.xlu1 %11493, %v1428_v57  }
  0xc0   : > { %1499 = vperm.xlu0 %11492, %v1429_v58  }
  0xc3   : > { %1214 = vperm.xlu1 %11493, %v1140_v59  }
  0xc4   : > { %1219 = vperm.xlu0 %11492, %v1141_v60  }
  0xc7   : > { %1606 = vperm.xlu1 %11493, %v1540_v61   ;;  %v9448_v61 = vld [vmem:[%s15744_s14 + $0x230] sm:$0xff] }
  0xc8   : > { %1611 = vperm.xlu0 %11492, %v1541_v62   ;;  %v9449_v62 = vld [vmem:[%s15744_s14 + $0x238] sm:$0xff] }
  0xcb   : > { %1504 = vperm.xlu1 %11493, %v1430_v63  }
  0xcc   : > { %1509 = vperm.xlu0 %11492, %v1431_v0   ;;  %v9464_v0 = vld [vmem:[%s15744_s14 + $0x430] sm:$0xff] }
  0xcf   : > { %1616 = vperm.xlu1 %11493, %v1542_v5   ;;  %v9465_v5 = vld [vmem:[%s15744_s14 + $0x438] sm:$0xff] }
  0xd0   : > { %1621 = vperm.xlu0 %11492, %v1543_v9   ;;  %v1094_v9 = vld [vmem:[%s15749_s9] sm:$0xff] }
  0xd3   : > { %2235 = vperm.xlu1 %11493, %v2137_v12   ;;  %v2655_v12 = vld [vmem:[%s11825_s19 + $0x20] sm:$0xff] }
  0xd4   : > { %2240 = vperm.xlu0 %11492, %v2138_v13   ;;  %v1097_v13 = vld [vmem:[%s15749_s9 + $0x18] sm:$0xff] }
  0xd5   : > { %v11464_v20 = vpop.permute.xlu1 %11463 }
  0xd6   : > { %v11454_v19 = vpop.permute.xlu0 %11453  ;;  %v11466_v31 = vunpack.i.h.bf16 %v11464_v20  ;;  %v11465_v32 = vunpack.i.l.bf16 %v11464_v20  ;;  %v2145_v20 = vld [vmem:[%s15744_s14 + $0x40] sm:$0xff] }
  0xd7   : > { %v11456_v22 = vunpack.i.h.bf16 %v11454_v19  ;;  %v11455_v23 = vunpack.i.l.bf16 %v11454_v19  ;;  %2348 = vperm.xlu1 %11493, %v9442_v16   ;;  %v2656_v16 = vld [vmem:[%s11825_s19 + $0x28] sm:$0xff]  ;;  %v1096_v19 = vld [vmem:[%s15749_s9 + $0x10] sm:$0xff] }
  0xd8   : > { %2353 = vperm.xlu0 %11492, %v9443_v17   ;;  %v10994_v37 = vpack.c.bf16 %v11466_v31, %v11465_v32  ;;  %v9466_v32 = vld [vmem:[%s15744_s14 + $0x440] sm:$0xff] }
  0xd9   : > { %v10986_v26 = vpack.c.bf16 %v11456_v22, %v11455_v23  ;;  %v11469_v34 = vpop.permute.xlu1 %11468  ;;  %v1099_v22 = vld [vmem:[%s15749_s9 + $0x28] sm:$0xff] }
  0xda   : > { %v11459_v28 = vpop.permute.xlu0 %11458  ;;  %v11471_v38 = vunpack.i.h.bf16 %v11469_v34  ;;  %v11470_v39 = vunpack.i.l.bf16 %v11469_v34  ;;  %v2146_v23 = vld [vmem:[%s15744_s14 + $0x48] sm:$0xff] }
  0xdb   : > { %v11461_v29 = vunpack.i.h.bf16 %v11459_v28  ;;  %v11460_v30 = vunpack.i.l.bf16 %v11459_v28  ;;  %10988 = vmatpush1.bf16.msk.msra.mxu0 %vm12089_vm3, %v10986_v26  ;;  %2541 = vperm.xlu1 %11493, %v9458_v25   ;;  %v1098_v25 = vld [vmem:[%s15749_s9 + $0x20] sm:$0xff]  ;;  %v1101_v28 = vld [vmem:[%s15749_s9 + $0x38] sm:$0xff]  ;;  %v9467_v34 = vld [vmem:[%s15744_s14 + $0x448] sm:$0xff] }
  0xdc   : > { %2546 = vperm.xlu0 %11492, %v9459_v27   ;;  %10989 = vmatprep.subr.bf16.mxu0 %v15649_v1  ;;  %v10998_v42 = vpack.c.bf16 %v11471_v38, %v11470_v39  ;;  %v9450_v27 = vld [vmem:[%s15744_s14 + $0x240] sm:$0xff]  ;;  %v1105_v38 = vld [vmem:[%s15749_s9 + $0x58] sm:$0xff] }
  0xdd   : > { %v10990_v35 = vpack.c.bf16 %v11461_v29, %v11460_v30  ;;  %v9451_v29 = vld [vmem:[%s15744_s14 + $0x248] sm:$0xff]  ;;  %v1100_v30 = vld [vmem:[%s15749_s9 + $0x30] sm:$0xff]  ;;  %v2658_v39 = vld [vmem:[%s11825_s19 + $0x38] sm:$0xff] }
  0xde   : > { %v11474_v4 = vpop.permute.xlu0 %11473 }
  0xdf   : > { %10992 = vmatpush1.bf16.msk.msra.mxu0 %vm12089_vm3, %v10990_v35  ;;  %2245 = vperm.xlu1 %11493, %v2139_v33   ;;  %v11476_v6 = vunpack.i.h.bf16 %v11474_v4  ;;  %v1103_v33 = vld [vmem:[%s15749_s9 + $0x48] sm:$0xff] }
  0xe0   : > { %2250 = vperm.xlu0 %11492, %v2140_v36   ;;  %10993 = vmatprep.subr.bf16.mxu0 %v15649_v1  ;;  %v1102_v36 = vld [vmem:[%s15749_s9 + $0x40] sm:$0xff] }
  0xe2   : > { %v11484_v54 = vpop.permute.xlu0 %11483 }
  0xe3   : > { %10996 = vmatpush1.bf16.msk.msra.mxu0 %vm12089_vm3, %v10994_v37  ;;  %2358 = vperm.xlu1 %11493, %v9444_v40   ;;  %v11486_v56 = vunpack.i.h.bf16 %v11484_v54  ;;  %v11485_v7 = vunpack.i.l.bf16 %v11484_v54  ;;  %v2657_v37 = vld [vmem:[%s11825_s19 + $0x30] sm:$0xff] }
  0xe4   : > { %2363 = vperm.xlu0 %11492, %v9445_v41   ;;  %10997 = vmatprep.subr.bf16.mxu0 %v15649_v1  ;;  %v1104_v41 = vld [vmem:[%s15749_s9 + $0x50] sm:$0xff] }
  0xe5   : > { %v11022_v60 = vpack.c.bf16 %v11486_v56, %v11485_v7  ;;  %v1115_v56 = vld [vmem:[%s15749_s9 + $0xa8] sm:$0xff] }
  0xe6   : > { %v2150_v7 = vld [vmem:[%s15744_s14 + $0x68] sm:$0xff] }
  0xe7   : > { %11000 = vmatpush1.bf16.msk.msra.mxu0 %vm12089_vm3, %v10998_v42  ;;  %2551 = vperm.xlu1 %11493, %v9460_v43   ;;  %v2147_v43 = vld [vmem:[%s15744_s14 + $0x50] sm:$0xff] }
  0xe8   : > { %2556 = vperm.xlu0 %11492, %v9461_v44   ;;  %11001 = vmatprep.subr.bf16.mxu0 %v15649_v1  ;;  %v1107_v44 = vld [vmem:[%s15749_s9 + $0x68] sm:$0xff] }
  0xeb   : > { %11003 = vmatpush1.bf16.msra.mxu0 %v11002_v14  ;;  %2669 = vperm.xlu1 %11493, %v2651_v45   ;;  %v11475_v14 = vunpack.i.l.bf16 %v11474_v4  ;;  %v2148_v45 = vld [vmem:[%s15744_s14 + $0x58] sm:$0xff] }
  0xec   : > { %2674 = vperm.xlu0 %11492, %v2652_v46   ;;  %11004 = vmatprep.subr.bf16.mxu0 %v15649_v1  ;;  %v1106_v46 = vld [vmem:[%s15749_s9 + $0x60] sm:$0xff] }
  0xed   : > { %v11014_v53 = vpack.c.bf16 %v11476_v6, %v11475_v14  ;;  %v1108_v6 = vld [vmem:[%s15749_s9 + $0x70] sm:$0xff] }
  0xee   : > { %v9468_v14 = vld [vmem:[%s15744_s14 + $0x450] sm:$0xff] }
  0xef   : > { %11006 = vmatpush1.bf16.msra.mxu0 %v11005_v15  ;;  %2255 = vperm.xlu1 %11493, %v2141_v47   ;;  %v11479_v15 = vpop.permute.xlu1 %11478 }
  0xf0   : > { %2260 = vperm.xlu0 %11492, %v2142_v48   ;;  %11007 = vmatprep.subr.bf16.mxu0 %v15649_v1  ;;  %v11481_v51 = vunpack.i.h.bf16 %v11479_v15  ;;  %v11480_v52 = vunpack.i.l.bf16 %v11479_v15  ;;  %v9452_v48 = vld [vmem:[%s15744_s14 + $0x250] sm:$0xff] }
  0xf2   : > { %v11018_v55 = vpack.c.bf16 %v11481_v51, %v11480_v52  ;;  %v1110_v51 = vld [vmem:[%s15749_s9 + $0x80] sm:$0xff] }
  0xf3   : > { %11009 = vmatpush1.bf16.msra.mxu0 %v11008_v18  ;;  %2368 = vperm.xlu1 %11493, %v9446_v49   ;;  %v2654_v18 = vld [vmem:[%s11825_s19 + $0x18] sm:$0xff]  ;;  %v11489_v57 = vpop.permute.xlu1 %11488  ;;  %v12174_v24 = vpop.permute.xlu0 %1144 }
  0xf4   : > { %2373 = vperm.xlu0 %11492, %v9447_v50   ;;  %11010 = vmatprep.subr.bf16.mxu0 %v15649_v1  ;;  %v11491_v58 = vunpack.i.h.bf16 %v11489_v57  ;;  %v11490_v59 = vunpack.i.l.bf16 %v11489_v57  ;;  %v1109_v49 = vld [vmem:[%s15749_s9 + $0x78] sm:$0xff]  ;;  %v9454_v57 = vld [vmem:[%s15744_s14 + $0x260] sm:$0xff] }
  0xf5   : > { %v9453_v50 = vld [vmem:[%s15744_s14 + $0x258] sm:$0xff] }
  0xf6   : > { %v11026_v63 = vpack.c.bf16 %v11491_v58, %v11490_v59  ;;  %v1117_v58 = vld [vmem:[%s15749_s9 + $0xb8] sm:$0xff]  ;;  %v9455_v59 = vld [vmem:[%s15744_s14 + $0x268] sm:$0xff] }
  0xf7   : > { %11012 = vmatpush1.bf16.msra.mxu0 %v11011_v21  ;;  %2561 = vperm.xlu1 %11493, %v9462_v10   ;;  %v2144_v21 = vld [vmem:[%s15744_s14 + $0x38] sm:$0xff]  ;;  %v12167_v17 = vpop.permute.xlu1 %1149  ;;  %v12185_v31 = vpop.permute.xlu0 %1439  ;;  %v1111_v10 = vld [vmem:[%s15749_s9 + $0x88] sm:$0xff] }
  0xf8   : > { %2566 = vperm.xlu0 %11492, %v9463_v11   ;;  %11013 = vmatprep.subr.bf16.mxu0 %v15649_v1  ;;  %v9469_v11 = vld [vmem:[%s15744_s14 + $0x458] sm:$0xff] }
  0xfb   : > { %11016 = vmatpush1.bf16.msk.msra.mxu0 %vm12139_vm5, %v11014_v53  ;;  %2679 = vperm.xlu1 %11493, %v2653_v3   ;;  %v12178_v26 = vpop.permute.xlu1 %1434  ;;  %v12197_v40 = vpop.permute.xlu0 %1159  ;;  %v2659_v53 = vld [vmem:[%s11825_s19 + $0x40] sm:$0xff]  ;;  %v2660_v3 = vld [vmem:[%s11825_s19 + $0x48] sm:$0xff] }
  0xfc   : > { %2684 = vperm.xlu0 %11492, %v2654_v18   ;;  %11017 = vmatprep.subr.bf16.mxu0 %v15649_v1  ;;  %v1112_v18 = vld [vmem:[%s15749_s9 + $0x90] sm:$0xff] }
  0xff   : > { %11020 = vmatpush1.bf16.msk.msra.mxu0 %vm12139_vm5, %v11018_v55  ;;  %2265 = vperm.xlu1 %11493, %v2143_v8   ;;  %v12190_v35 = vpop.permute.xlu1 %1154  ;;  %v12208_v47 = vpop.permute.xlu0 %1551  ;;  %v2149_v55 = vld [vmem:[%s15744_s14 + $0x60] sm:$0xff] }
 0x100   : > { %2270 = vperm.xlu0 %11492, %v2144_v21   ;;  %11021 = vmatprep.subr.bf16.mxu0 %v15649_v1  ;;  %v1114_v21 = vld [vmem:[%s15749_s9 + $0xa0] sm:$0xff] }
 0x103   : > { %11024 = vmatpush1.bf16.msk.msra.mxu0 %vm12139_vm5, %v11022_v60  ;;  %2378 = vperm.xlu1 %11493, %v9448_v61   ;;  %v12201_v42 = vpop.permute.xlu1 %1546  ;;  %v12220_v15 = vpop.permute.xlu0 %1449  ;;  %v1116_v61 = vld [vmem:[%s15749_s9 + $0xb0] sm:$0xff] }
 0x104   : > { %2383 = vperm.xlu0 %11492, %v9449_v62   ;;  %11025 = vmatprep.subr.bf16.mxu0 %v15649_v1 }
 0x107   : > { %11028 = vmatpush1.bf16.msk.msra.mxu0 %vm12139_vm5, %v11026_v63  ;;  %2571 = vperm.xlu1 %11493, %v9464_v0   ;;  %v12213_v4 = vpop.permute.xlu1 %1444  ;;  %v12231_v54 = vpop.permute.xlu0 %1169  ;;  %v9470_v63 = vld [vmem:[%s15744_s14 + $0x460] sm:$0xff]  ;;  %v1119_v0 = vld [vmem:[%s15749_s9 + $0xc8] sm:$0xff] }
 0x108   : > { %2576 = vperm.xlu0 %11492, %v9465_v5   ;;  %11125 = vmatprep.subr.bf16.mxu0 %v15649_v1  ;;  %v9471_v5 = vld [vmem:[%s15744_s14 + $0x468] sm:$0xff] }
 0x10a   : > { %1336 = vmatmul.mubr.f32.vlgmr.msra.gmra.mrb[0].mxu0 %v1094_v9  ;;  %v1118_v9 = vld [vmem:[%s15749_s9 + $0xc0] sm:$0xff] }
 0x10b   : > { %2689 = vperm.xlu1 %11493, %v2655_v12   ;;  %9427 = vmatprep.mubr.msk.f32.mxu0 %vm1222_vm0, %v1097_v13  ;;  %v12224_v52 = vpop.permute.xlu1 %1164  ;;  %v12243_v60 = vpop.permute.xlu0 %1561  ;;  %v2661_v13 = vld [vmem:[%s11825_s19 + $0x50] sm:$0xff] }
 0x10c   : > { %2694 = vperm.xlu0 %11492, %v2656_v16   ;;  %v1121_v16 = vld [vmem:[%s15749_s9 + $0xd8] sm:$0xff] }
 0x10e   : > { %1341 = vmatmul.mubr.f32.gmra.mrb[2].mxu0 %v1096_v19  ;;  %v2662_v19 = vld [vmem:[%s11825_s19 + $0x58] sm:$0xff] }
 0x10f   : > { %2275 = vperm.xlu1 %11493, %v2145_v20   ;;  %9428 = vmatprep.mubr.msk.f32.mxu0 %vm1222_vm0, %v1099_v22  ;;  %v12236_v8 = vpop.permute.xlu1 %1556  ;;  %v12254_v12 = vpop.permute.xlu0 %1459  ;;  %v1120_v22 = vld [vmem:[%s15749_s9 + $0xd0] sm:$0xff] }
 0x110   : > { %2280 = vperm.xlu0 %11492, %v2146_v23   ;;  %v2151_v23 = vld [vmem:[%s15744_s14 + $0x70] sm:$0xff] }
 0x112   : > { %1346 = vmatmul.mubr.f32.gmra.mrb[4].mxu0 %v1098_v25  ;;  %v1123_v25 = vld [vmem:[%s15749_s9 + $0xe8] sm:$0xff] }
 0x113   : > { %2388 = vperm.xlu1 %11493, %v9450_v27   ;;  %9429 = vmatprep.mubr.msk.f32.mxu0 %vm1222_vm0, %v1101_v28  ;;  %v12247_v62 = vpop.permute.xlu1 %1454  ;;  %v2152_v27 = vld [vmem:[%s15744_s14 + $0x78] sm:$0xff]  ;;  %v12266_v28 = vpop.permute.xlu0 %1179 }
 0x114   : > { %2393 = vperm.xlu0 %11492, %v9451_v29   ;;  %v1122_v29 = vld [vmem:[%s15749_s9 + $0xe0] sm:$0xff] }
 0x116   : > { %1351 = vmatmul.mubr.f32.gmra.mrb[6].mxu0 %v1100_v30 }
 0x117   : > { %2581 = vperm.xlu1 %11493, %v9466_v32   ;;  %9430 = vmatprep.mubr.msk.f32.mxu0 %vm1222_vm0, %v1103_v33  ;;  %v12259_v20 = vpop.permute.xlu1 %1174  ;;  %v9456_v32 = vld [vmem:[%s15744_s14 + $0x270] sm:$0xff]  ;;  %v1125_v33 = vld [vmem:[%s15749_s9 + $0xf8] sm:$0xff] }
 0x118   : > { %2586 = vperm.xlu0 %11492, %v9467_v34   ;;  %v9457_v34 = vld [vmem:[%s15744_s14 + $0x278] sm:$0xff] }
 0x11a   : > { %1356 = vmatmul.mubr.f32.gmra.mrb[8].mxu0 %v1102_v36  ;;  %v1124_v36 = vld [vmem:[%s15749_s9 + $0xf0] sm:$0xff]  ;;  %s15994_s9 = smov 1  }
 0x11b   : > { %2699 = vperm.xlu1 %11493, %v2657_v37   ;;  %9431 = vmatprep.mubr.msk.f32.mxu0 %vm1222_vm0, %v1105_v38  ;;  %v12270_v30 = vpop.permute.xlu1 %1566  ;;  %v12277_v37 = vpop.permute.xlu0 %1571  ;;  %v9472_v38 = vld [vmem:[%s15744_s14 + $0x470] sm:$0xff] }
 0x11c   : > { %2704 = vperm.xlu0 %11492, %v2658_v39   ;;  %v9473_v39 = vld [vmem:[%s15744_s14 + $0x478] sm:$0xff] }
 0x11e   : > { %1361 = vmatmul.mubr.f32.gmra.mrb[10].mxu0 %v1104_v41 }
 0x11f   : > { %2285 = vperm.xlu1 %11493, %v2147_v43   ;;  %9432 = vmatprep.mubr.msk.f32.mxu0 %vm1222_vm0, %v1107_v44  ;;  %v12281_v41 = vpop.permute.xlu1 %1464  ;;  %v2663_v43 = vld [vmem:[%s11825_s19 + $0x60] sm:$0xff]  ;;  %v2664_v44 = vld [vmem:[%s11825_s19 + $0x68] sm:$0xff] }
 0x120   : > { %2290 = vperm.xlu0 %11492, %v2148_v45   ;;  %v12285_v45 = vpop.permute.xlu0 %1469 }
 0x122   : > { %1366 = vmatmul.mubr.f32.gmra.mrb[12].mxu0 %v1106_v46 }
 0x123   : > { %2398 = vperm.xlu1 %11493, %v9452_v48   ;;  %9433 = vmatprep.mubr.msk.f32.mxu0 %vm1222_vm0, %v1109_v49  ;;  %v12287_v46 = vpop.permute.xlu1 %1184  ;;  %v2665_v48 = vld [vmem:[%s11825_s19 + $0x70] sm:$0xff]  ;;  %v2666_v49 = vld [vmem:[%s11825_s19 + $0x78] sm:$0xff] }
 0x124   : > { %2403 = vperm.xlu0 %11492, %v9453_v50   ;;  %v12291_v50 = vpop.permute.xlu0 %1189 }
 0x126   : > { %1371 = vmatmul.mubr.f32.gmra.mrb[14].mxu0 %v1108_v6 }
 0x127   : > { %2591 = vperm.xlu1 %11493, %v9468_v14   ;;  %9434 = vmatprep.mubr.msk.f32.mxu0 %vm1222_vm0, %v1111_v10  ;;  %v12293_v6 = vpop.permute.xlu1 %1576 }
 0x128   : > { %2596 = vperm.xlu0 %11492, %v9469_v11   ;;  %v12295_v14 = vpop.permute.xlu0 %1581 }
 0x12a   : > { %1376 = vmatmul.mubr.f32.gmra.mrb[16].mxu0 %v1110_v51 }
 0x12b   : > { %2709 = vperm.xlu1 %11493, %v2659_v53   ;;  %9435 = vmatprep.mubr.msk.f32.mxu0 %vm1222_vm0, %v1113_v2  ;;  %v12297_v10 = vpop.permute.xlu1 %1474 }
 0x12c   : > { %2714 = vperm.xlu0 %11492, %v2660_v3   ;;  %v12299_v11 = vpop.permute.xlu0 %1479 }
 0x12e   : > { %1381 = vmatmul.mubr.f32.gmra.mrb[18].mxu0 %v1112_v18 }
 0x12f   : > { %2295 = vperm.xlu1 %11493, %v2149_v55   ;;  %9436 = vmatprep.mubr.msk.f32.mxu0 %vm1222_vm0, %v1115_v56  ;;  %v12301_v51 = vpop.permute.xlu1 %1194 }
 0x130   : > { %2300 = vperm.xlu0 %11492, %v2150_v7   ;;  %v12303_v53 = vpop.permute.xlu0 %1199 }
 0x132   : > { %1386 = vmatmul.mubr.f32.gmra.mrb[20].mxu0 %v1114_v21 }
 0x133   : > { %2408 = vperm.xlu1 %11493, %v9454_v57   ;;  %9437 = vmatprep.mubr.msk.f32.mxu0 %vm1222_vm0, %v1117_v58  ;;  %v12305_v2 = vpop.permute.xlu1 %1586 }
 0x134   : > { %2413 = vperm.xlu0 %11492, %v9455_v59   ;;  %v12307_v3 = vpop.permute.xlu0 %1591 }
 0x136   : > { %1391 = vmatmul.mubr.f32.gmra.mrb[22].mxu0 %v1116_v61 }
 0x137   : > { %2601 = vperm.xlu1 %11493, %v9470_v63   ;;  %9438 = vmatprep.mubr.msk.f32.mxu0 %vm1222_vm0, %v1119_v0  ;;  %v12309_v18 = vpop.permute.xlu1 %1484 }
 0x138   : > { %2606 = vperm.xlu0 %11492, %v9471_v5   ;;  %v12311_v55 = vpop.permute.xlu0 %1489 }
 0x13a   : > { %1396 = vmatmul.mubr.f32.gmra.mrb[24].mxu0 %v1118_v9 }
 0x13b   : > { %2719 = vperm.xlu1 %11493, %v2661_v13   ;;  %9439 = vmatprep.mubr.msk.f32.mxu0 %vm1222_vm0, %v1121_v16  ;;  %v12313_v56 = vpop.permute.xlu1 %1204 }
 0x13c   : > { %2724 = vperm.xlu0 %11492, %v2662_v19   ;;  %v12315_v7 = vpop.permute.xlu0 %1209 }
 0x13e   : > { %1401 = vmatmul.mubr.f32.gmra.mrb[26].mxu0 %v1120_v22 }
 0x13f   : > { %2305 = vperm.xlu1 %11493, %v2151_v23   ;;  %9440 = vmatprep.mubr.msk.f32.mxu0 %vm1222_vm0, %v1123_v25  ;;  %v12317_v21 = vpop.permute.xlu1 %1596 }
 0x140   : > { %2310 = vperm.xlu0 %11492, %v2152_v27   ;;  %v12319_v57 = vpop.permute.xlu0 %1601 }
 0x142   : > { %1406 = vmatmul.mubr.f32.gmra.mrb[28].mxu0 %v1122_v29 }
 0x143   : > { %2418 = vperm.xlu1 %11493, %v9456_v32   ;;  %9441 = vmatprep.mubr.msk.f32.mxu0 %vm1222_vm0, %v1125_v33  ;;  %v12321_v58 = vpop.permute.xlu1 %1494 }
 0x144   : > { %2423 = vperm.xlu0 %11492, %v9457_v34   ;;  %v12323_v59 = vpop.permute.xlu0 %1499 }
 0x146   : > { %1411 = vmatmul.mubr.f32.gmra.mrb[30].mxu0 %v1124_v36 }
 0x147   : > { %2611 = vperm.xlu1 %11493, %v9472_v38   ;;  %v12325_v61 = vpop.permute.xlu1 %1214 }
 0x148   : > { %2616 = vperm.xlu0 %11492, %v9473_v39   ;;  %v12327_v63 = vpop.permute.xlu0 %1219 }
 0x14b   : > { %2729 = vperm.xlu1 %11493, %v2663_v43   ;;  %v12329_v0 = vpop.permute.xlu1 %1606 }
 0x14c   : > { %2734 = vperm.xlu0 %11492, %v2664_v44   ;;  %v12331_v5 = vpop.permute.xlu0 %1611 }
 0x14f   : > { %2739 = vperm.xlu1 %11493, %v2665_v48   ;;  %v12333_v9 = vpop.permute.xlu1 %1504 }
 0x150   : > { %2744 = vperm.xlu0 %11492, %v2666_v49   ;;  %v12335_v13 = vpop.permute.xlu0 %1509 }
 0x153   : > { %v12337_v16 = vpop.permute.xlu1 %1616 }
 0x154   : > { %v12339_v19 = vpop.permute.xlu0 %1621 }
 0x157   : > { %v12341_v22 = vpop.permute.xlu1 %2235 }
 0x158   : > { %v12343_v23 = vpop.permute.xlu0 %2240 }
 0x15b   : > { %v12345_v25 = vpop.permute.xlu1 %2348 }
 0x15c   : > { %v12347_v27 = vpop.permute.xlu0 %2353 }
 0x15d   : > { %15757 = vst [vmem:[#allocation29_spill] sm:$0xff] %v12347_v27 }
 0x15f   : > { %v12349_v29 = vpop.permute.xlu1 %2541 }
 0x160   : > { %15758 = vst [vmem:[#allocation30_spill] sm:$0xff] %v12349_v29  ;;  %v12351_v32 = vpop.permute.xlu0 %2546 }
 0x161   : > { %15759 = vst [vmem:[#allocation31_spill] sm:$0xff] %v12351_v32 }
 0x163   : > { %v12353_v33 = vpop.permute.xlu1 %2245 }
 0x164   : > { %15760 = vst [vmem:[#allocation32_spill] sm:$0xff] %v12353_v33  ;;  %v12355_v34 = vpop.permute.xlu0 %2250 }
 0x165   : > { %15761 = vst [vmem:[#allocation33_spill] sm:$0xff] %v12355_v34 }
 0x167   : > { %v12357_v36 = vpop.permute.xlu1 %2358 }
 0x168   : > { %15762 = vst [vmem:[#allocation34_spill] sm:$0xff] %v12357_v36  ;;  %v12359_v38 = vpop.permute.xlu0 %2363 }
 0x169   : > { %15763 = vst [vmem:[#allocation35_spill] sm:$0xff] %v12359_v38 }
 0x16b   : > { %v12361_v39 = vpop.permute.xlu1 %2551 }
 0x16c   : > { %15764 = vst [vmem:[#allocation36_spill] sm:$0xff] %v12361_v39  ;;  %v12363_v43 = vpop.permute.xlu0 %2556 }
 0x16d   : > { %15765 = vst [vmem:[#allocation37_spill] sm:$0xff] %v12363_v43 }
 0x16f   : > { %v12365_v44 = vpop.permute.xlu1 %2669 }
 0x170   : > { %15766 = vst [vmem:[#allocation38_spill] sm:$0xff] %v12365_v44  ;;  %v12367_v48 = vpop.permute.xlu0 %2674 }
 0x171   : > { %15767 = vst [vmem:[#allocation39_spill] sm:$0xff] %v12367_v48 }
 0x173   : > { %v12369_v49 = vpop.permute.xlu1 %2255 }
 0x174   : > { %15768 = vst [vmem:[#allocation40_spill] sm:$0xff] %v12369_v49  ;;  %v12371_v1 = vpop.permute.xlu0 %2260 }
 0x175   : > { %15769 = vst [vmem:[#allocation41_spill] sm:$0xff] %v12371_v1 }
 0x177   : > { %v12373_v32 = vpop.permute.xlu1 %2368 }
 0x178   : > { %15770 = vst [vmem:[#allocation42_spill] sm:$0xff] %v12373_v32  ;;  %v12375_v33 = vpop.permute.xlu0 %2373 }
 0x179   : > { %15771 = vst [vmem:[#allocation43_spill] sm:$0xff] %v12375_v33 }
 0x17b   : > { %v12377_v34 = vpop.permute.xlu1 %2561 }
 0x17c   : > { %15772 = vst [vmem:[#allocation44_spill] sm:$0xff] %v12377_v34  ;;  %v12379_v36 = vpop.permute.xlu0 %2566 }
 0x17d   : > { %15773 = vst [vmem:[#allocation45_spill] sm:$0xff] %v12379_v36 }
 0x17f   : > { %v12381_v38 = vpop.permute.xlu1 %2679 }
 0x180   : > { %15774 = vst [vmem:[#allocation46_spill] sm:$0xff] %v12381_v38  ;;  %v12383_v39 = vpop.permute.xlu0 %2684 }
 0x181   : > { %15775 = vst [vmem:[#allocation47_spill] sm:$0xff] %v12383_v39 }
 0x183   : > { %v12385_v43 = vpop.permute.xlu1 %2265 }
 0x184   : > { %15776 = vst [vmem:[#allocation48_spill] sm:$0xff] %v12385_v43  ;;  %v12388_v27 = vpop.permute.xlu0 %2270 }
 0x187   : > { %v12391_v33 = vpop.permute.xlu1 %2378 }
 0x1dd   : > { %v1337_v44 = vpop.f32.mrb[0].mxu0 }
 0x1de   : > { %v1338_v48 = vadd.f32 %v1337_v44, %v12174_v24  ;;  %v1339_v49 = vpop.f32.mrb[1].mxu0  ;;  %v12398_v24 = vpop.permute.xlu0 %2383 }
 0x1e0   : > { %v1512_v1 = vmul.f32 %v12178_v26, %v1338_v48 }
 0x1e1   : > { %v1342_v32 = vpop.f32.mrb[2].mxu0 }
 0x1e2   : > { %v1624_v34 = vadd.f32 %v12201_v42, %v1512_v1  ;;  %v1343_v36 = vadd.f32 %v1342_v32, %v12167_v17  ;;  %v1344_v38 = vpop.f32.mrb[3].mxu0  ;;  %v12404_v1 = vpop.permute.xlu1 %2571 }
 0x1e3   : > { %v12418_v38 = vpop.permute.xlu0 %2576 }
 0x1e4   : > { %v12395_v29 = vmax.f32 %v1624_v34, 0.0  ;;  %v1513_v43 = vmul.f32 %v12185_v31, %v1343_v36 }
 0x1e5   : > { %v1347_v39 = vpop.f32.mrb[4].mxu0 }
 0x1e6   : > { %v1625_v44 = vadd.f32 %v12208_v47, %v1513_v43  ;;  %v1348_v26 = vadd.f32 %v1347_v39, %v12190_v35  ;;  %v1349_v48 = vpop.f32.mrb[5].mxu0  ;;  %2169 = vrot.lane.b32.xlu1 %v12395_v29, %s15657_s23  ;;  %v1656_v47 = vld [vmem:[%s11800_s25] sm:$0xff]  ;;  %v12423_v39 = vpop.permute.xlu1 %2689 }
 0x1e7   : > { %10415 = vmatprep.mubr.f32.mxu1 %v1656_v47 }
 0x1e8   : > { %v12406_v17 = vmax.f32 %v1625_v44, 0.0  ;;  %v1514_v42 = vmul.f32 %v12213_v4, %v1348_v26 }
 0x1e9   : > { %v1352_v32 = vpop.f32.mrb[6].mxu0 }
 0x1ea   : > { %v1626_v31 = vadd.f32 %v12236_v8, %v1514_v42  ;;  %v1353_v34 = vadd.f32 %v1352_v32, %v12197_v40  ;;  %v1354_v36 = vpop.f32.mrb[7].mxu0  ;;  %2171 = vrot.lane.b32.xlu0 %v12406_v17, %s15657_s23  ;;  %2475 = vrot.lane.b32.xlu1 %v12395_v29, %s15655_s2  ;;  %v11029_v35 = vpack.c.bf16 %v12406_v17, %v12395_v29  ;;  %v12434_v42 = vpop.permute.xlu0 %2694 }
 0x1ec   : > { %v12420_v4 = vmax.f32 %v1626_v31, 0.0  ;;  %v1515_v8 = vmul.f32 %v12220_v15, %v1353_v34  ;;  %11030 = vmatprep.subr.bf16.mxu1 %v11029_v35  ;;  %v12444_v34 = vpop.permute.xlu1 %2275 }
 0x1ed   : > { %v1357_v40 = vpop.f32.mrb[8].mxu0  ;;  %11032 = vmatpush3.bf16.msra.mxu1 %v11029_v35 }
 0x1ee   : > { %v1627_v43 = vadd.f32 %v12243_v60, %v1515_v8  ;;  %v1358_v49 = vadd.f32 %v1357_v40, %v12224_v52  ;;  %v1359_v44 = vpop.f32.mrb[9].mxu0  ;;  %2477 = vrot.lane.b32.xlu0 %v12406_v17, %s15655_s2  ;;  %2173 = vrot.lane.b32.xlu1 %v12420_v4, %s15657_s23  ;;  %v12455_v8 = vpop.permute.xlu0 %2280 }
 0x1f0   : > { %v12431_v26 = vmax.f32 %v1627_v43, 0.0  ;;  %v1516_v15 = vmul.f32 %v12247_v62, %v1358_v49  ;;  %v12460_v49 = vpop.permute.xlu1 %2388 }
 0x1f1   : > { %v1362_v48 = vpop.f32.mrb[10].mxu0 }
 0x1f2   : > { %v1628_v32 = vadd.f32 %v12270_v30, %v1516_v15  ;;  %v1363_v60 = vadd.f32 %v1362_v48, %v12231_v54  ;;  %v1364_v31 = vpop.f32.mrb[11].mxu0  ;;  %2175 = vrot.lane.b32.xlu0 %v12431_v26, %s15657_s23  ;;  %2479 = vrot.lane.b32.xlu1 %v12420_v4, %s15655_s2  ;;  %v11033_v52 = vpack.c.bf16 %v12431_v26, %v12420_v4 }
 0x1f4   : > { %v12446_v62 = vmax.f32 %v1628_v32, 0.0  ;;  %v1517_v36 = vmul.f32 %v12254_v12, %v1363_v60  ;;  %11034 = vmatprep.subr.bf16.mxu1 %v11033_v52 }
 0x1f5   : > { %v1367_v30 = vpop.f32.mrb[12].mxu0  ;;  %11036 = vmatpush3.bf16.msra.mxu1 %v11033_v52  ;;  %v12481_v52 = vpop.permute.xlu1 %2581 }
 0x1f6   : > { %v1629_v54 = vadd.f32 %v12277_v37, %v1517_v36  ;;  %v1368_v35 = vadd.f32 %v1367_v30, %v12259_v20  ;;  %v1369_v47 = vpop.f32.mrb[13].mxu0  ;;  %2481 = vrot.lane.b32.xlu0 %v12431_v26, %s15655_s2  ;;  %2177 = vrot.lane.b32.xlu1 %v12446_v62, %s15657_s23 }
 0x1f8   : > { %v12457_v40 = vmax.f32 %v1629_v54, 0.0  ;;  %v1518_v12 = vmul.f32 %v12281_v41, %v1368_v35 }
 0x1f9   : > { %v1372_v43 = vpop.f32.mrb[14].mxu0 }
 0x1fa   : > { %v1630_v37 = vadd.f32 %v12293_v6, %v1518_v12  ;;  %v1373_v20 = vadd.f32 %v1372_v43, %v12266_v28  ;;  %v1374_v44 = vpop.f32.mrb[15].mxu0  ;;  %2179 = vrot.lane.b32.xlu0 %v12457_v40, %s15657_s23  ;;  %2483 = vrot.lane.b32.xlu1 %v12446_v62, %s15655_s2  ;;  %v11037_v15 = vpack.c.bf16 %v12457_v40, %v12446_v62  ;;  %v12473_v6 = vpop.permute.xlu0 %2393 }
 0x1fc   : > { %v12470_v48 = vmax.f32 %v1630_v37, 0.0  ;;  %v1519_v41 = vmul.f32 %v12285_v45, %v1373_v20  ;;  %11038 = vmatprep.subr.bf16.mxu1 %v11037_v15 }
 0x1fd   : > { %v1377_v32 = vpop.f32.mrb[16].mxu0  ;;  %11040 = vmatpush3.bf16.msra.mxu1 %v11037_v15 }
 0x1fe   : > { %v1631_v28 = vadd.f32 %v12295_v14, %v1519_v41  ;;  %v1378_v60 = vadd.f32 %v1377_v32, %v12287_v46  ;;  %v1379_v31 = vpop.f32.mrb[17].mxu0  ;;  %2485 = vrot.lane.b32.xlu0 %v12457_v40, %s15655_s2  ;;  %2181 = vrot.lane.b32.xlu1 %v12470_v48, %s15657_s23  ;;  %v12494_v47 = vpop.permute.xlu0 %2586 }
 0x200   : > { %v12483_v36 = vmax.f32 %v1631_v28, 0.0  ;;  %v1520_v45 = vmul.f32 %v12297_v10, %v1378_v60 }
 0x201   : > { %v1382_v30 = vpop.f32.mrb[18].mxu0 }
 0x202   : > { %v1632_v54 = vadd.f32 %v12305_v2, %v1520_v45  ;;  %v1383_v14 = vadd.f32 %v1382_v30, %v12291_v50  ;;  %v1384_v35 = vpop.f32.mrb[19].mxu0  ;;  %2183 = vrot.lane.b32.xlu0 %v12483_v36, %s15657_s23  ;;  %2487 = vrot.lane.b32.xlu1 %v12470_v48, %s15655_s2  ;;  %v11041_v46 = vpack.c.bf16 %v12483_v36, %v12470_v48  ;;  %v12499_v50 = vpop.permute.xlu1 %2699 }
 0x203   : > { %v12510_v41 = vpop.permute.xlu0 %2704 }
 0x204   : > { %v12496_v12 = vmax.f32 %v1632_v54, 0.0  ;;  %v1521_v10 = vmul.f32 %v12299_v11, %v1383_v14  ;;  %11042 = vmatprep.subr.bf16.mxu1 %v11041_v46 }
 0x205   : > { %v1387_v2 = vpop.f32.mrb[20].mxu0  ;;  %11044 = vmatpush3.bf16.msra.mxu1 %v11041_v46 }
 0x206   : > { %v1633_v43 = vadd.f32 %v12307_v3, %v1521_v10  ;;  %v1388_v37 = vadd.f32 %v1387_v2, %v12301_v51  ;;  %v1389_v20 = vpop.f32.mrb[21].mxu0  ;;  %2489 = vrot.lane.b32.xlu0 %v12483_v36, %s15655_s2  ;;  %2185 = vrot.lane.b32.xlu1 %v12496_v12, %s15657_s23  ;;  %v12520_v60 = vpop.permute.xlu1 %2285 }
 0x207   : > { %v12531_v54 = vpop.permute.xlu0 %2290 }
 0x208   : > { %v12507_v44 = vmax.f32 %v1633_v43, 0.0  ;;  %v1522_v11 = vmul.f32 %v12309_v18, %v1388_v37 }
 0x209   : > { %v1392_v15 = vpop.f32.mrb[22].mxu0 }
 0x20a   : > { %v1634_v32 = vadd.f32 %v12317_v21, %v1522_v11  ;;  %v1393_v3 = vadd.f32 %v1392_v15, %v12303_v53  ;;  %v1394_v28 = vpop.f32.mrb[23].mxu0  ;;  %2187 = vrot.lane.b32.xlu0 %v12507_v44, %s15657_s23  ;;  %2491 = vrot.lane.b32.xlu1 %v12496_v12, %s15655_s2  ;;  %v11045_v51 = vpack.c.bf16 %v12507_v44, %v12496_v12  ;;  %v12536_v46 = vpop.permute.xlu1 %2398 }
 0x20c   : > { %v12522_v18 = vmax.f32 %v1634_v32, 0.0  ;;  %v1523_v31 = vmul.f32 %v12311_v55, %v1393_v3  ;;  %11046 = vmatprep.subr.bf16.mxu1 %v11045_v51 }
 0x20d   : > { %v1397_v21 = vpop.f32.mrb[24].mxu0  ;;  %11048 = vmatpush3.bf16.msra.mxu1 %v11045_v51 }
 0x20e   : > { %v1635_v53 = vadd.f32 %v12319_v57, %v1523_v31  ;;  %v1398_v45 = vadd.f32 %v1397_v21, %v12313_v56  ;;  %v1399_v30 = vpop.f32.mrb[25].mxu0  ;;  %2493 = vrot.lane.b32.xlu0 %v12507_v44, %s15655_s2  ;;  %2189 = vrot.lane.b32.xlu1 %v12522_v18, %s15657_s23  ;;  %v12557_v15 = vpop.permute.xlu1 %2591 }
 0x210   : > { %v12533_v14 = vmax.f32 %v1635_v53, 0.0  ;;  %v1524_v55 = vmul.f32 %v12321_v58, %v1398_v45 }
 0x211   : > { %v1402_v35 = vpop.f32.mrb[26].mxu0 }
 0x212   : > { %v1636_v57 = vadd.f32 %v12329_v0, %v1524_v55  ;;  %v1403_v56 = vadd.f32 %v1402_v35, %v12315_v7  ;;  %v1404_v10 = vpop.f32.mrb[27].mxu0  ;;  %2191 = vrot.lane.b32.xlu0 %v12533_v14, %s15657_s23  ;;  %2495 = vrot.lane.b32.xlu1 %v12522_v18, %s15655_s2  ;;  %v11049_v2 = vpack.c.bf16 %v12533_v14, %v12522_v18  ;;  %v12549_v0 = vpop.permute.xlu0 %2403  ;;  %v1657_v55 = vld [vmem:[%s11800_s25 + $0x8] sm:$0xff]  ;;  %v1658_v35 = vld [vmem:[%s11800_s25 + $0x10] sm:$0xff] }
 0x214   : > { %v12546_v43 = vmax.f32 %v1636_v57, 0.0  ;;  %v1525_v58 = vmul.f32 %v12323_v59, %v1403_v56  ;;  %11050 = vmatprep.subr.bf16.mxu1 %v11049_v2  ;;  %v2780_v57 = vld [vmem:[%s11835_s30 + $0x8] sm:$0xff]  ;;  %v3020_v56 = vld [vmem:[%s15746_s6] sm:$0xff] }
 0x215   : > { %v1407_v37 = vpop.f32.mrb[28].mxu0  ;;  %11052 = vmatpush3.bf16.msra.mxu1 %v11049_v2  ;;  %v1659_v2 = vld [vmem:[%s11800_s25 + $0x18] sm:$0xff] }
 0x216   : > { %v1637_v7 = vadd.f32 %v12331_v5, %v1525_v58  ;;  %v1408_v20 = vadd.f32 %v1407_v37, %v12325_v61  ;;  %v1409_v11 = vpop.f32.mrb[29].mxu0  ;;  %2497 = vrot.lane.b32.xlu0 %v12533_v14, %s15655_s2  ;;  %2193 = vrot.lane.b32.xlu1 %v12546_v43, %s15657_s23  ;;  %v12570_v31 = vpop.permute.xlu0 %2596  ;;  %v1660_v37 = vld [vmem:[%s11800_s25 + $0x20] sm:$0xff] }
 0x217   : > { %v1661_v11 = vld [vmem:[%s11800_s25 + $0x28] sm:$0xff] }
 0x218   : > { %v12559_v32 = vmax.f32 %v1637_v7, 0.0  ;;  %v1526_v59 = vmul.f32 %v12333_v9, %v1408_v20  ;;  %v3021_v7 = vld [vmem:[%s15746_s6 + $0x8] sm:$0xff]  ;;  %v2781_v20 = vld [vmem:[%s11835_s30 + $0x10] sm:$0xff] }
 0x219   : > { %v1412_v3 = vpop.f32.mrb[30].mxu0 }
 0x21a   : > { %v1638_v28 = vadd.f32 %v12337_v16, %v1526_v59  ;;  %v1413_v5 = vadd.f32 %v1412_v3, %v12327_v63  ;;  %v1414_v51 = vpop.f32.mrb[31].mxu0  ;;  %2195 = vrot.lane.b32.xlu0 %v12559_v32, %s15657_s23  ;;  %2499 = vrot.lane.b32.xlu1 %v12546_v43, %s15655_s2  ;;  %v11053_v61 = vpack.c.bf16 %v12559_v32, %v12546_v43  ;;  %v12575_v63 = vpop.permute.xlu1 %2709  ;;  %v1662_v3 = vld [vmem:[%s11800_s25 + $0x30] sm:$0xff] }
 0x21b   : > { %v12584_v45 = vpop.permute.xlu0 %2714 }
 0x21c   : > { %v12572_v21 = vmax.f32 %v1638_v28, 0.0  ;;  %v1527_v9 = vmul.f32 %v12335_v13, %v1413_v5  ;;  %11054 = vmatprep.subr.bf16.mxu1 %v11053_v61  ;;  %v2782_v28 = vld [vmem:[%s11835_s30 + $0x18] sm:$0xff]  ;;  %v3132_v5 = vld [vmem:[%s15745_s12] sm:$0xff] }
 0x21d   : > { %11056 = vmatpush3.bf16.msra.mxu1 %v11053_v61  ;;  %v1663_v61 = vld [vmem:[%s11800_s25 + $0x38] sm:$0xff] }
 0x21e   : > { %15777 = vst [vmem:[#allocation49_spill] sm:$0xff] %v12572_v21  ;;  %v1639_v16 = vadd.f32 %v12339_v19, %v1527_v9  ;;  %2501 = vrot.lane.b32.xlu0 %v12559_v32, %s15655_s2  ;;  %2197 = vrot.lane.b32.xlu1 %v12572_v21, %s15657_s23  ;;  %v2779_v19 = vld [vmem:[%s11835_s30] sm:$0xff]  ;;  %v12593_v30 = vpop.permute.xlu1 %2295 }
 0x21f   : > { %v12601_v10 = vpop.permute.xlu0 %2300  ;;  %v1664_v9 = vld [vmem:[%s11800_s25 + $0x40] sm:$0xff] }
 0x220   : > { %v12582_v53 = vmax.f32 %v1639_v16, 0.0  ;;  %v3133_v16 = vld [vmem:[%s15745_s12 + $0x8] sm:$0xff] }
 0x222   : > { %15778 = vst [vmem:[#allocation50_spill] sm:$0xff] %v12582_v53  ;;  %2199 = vrot.lane.b32.xlu0 %v12582_v53, %s15657_s23  ;;  %2503 = vrot.lane.b32.xlu1 %v12572_v21, %s15655_s2  ;;  %v11057_v13 = vpack.c.bf16 %v12582_v53, %v12572_v21  ;;  %v12604_v58 = vpop.permute.xlu1 %2408 }
 0x223   : > { %v12610_v59 = vpop.permute.xlu0 %2413 }
 0x224   : > { %11058 = vmatprep.subr.bf16.mxu1 %v11057_v13  ;;  %15779 = vst [vmem:[#allocation51_spill] sm:$0xff] %v12610_v59 }
 0x225   : > { %11060 = vmatpush3.bf16.msra.mxu1 %v11057_v13  ;;  %v3022_v13 = vld [vmem:[%s15746_s6 + $0x10] sm:$0xff] }
 0x226   : > { %2505 = vrot.lane.b32.xlu0 %v12582_v53, %s15655_s2  ;;  %2797 = vperm.xlu1 %11493, %v2779_v19   ;;  %v12615_v51 = vpop.permute.xlu1 %2601  ;;  %v3139_v53 = vld [vmem:[%s15745_s12 + $0x38] sm:$0xff] }
 0x227   : > { %v12621_v19 = vpop.permute.xlu0 %2606 }
 0x228   : > { %10416 = vmatmul.mubr.f32.vlgmr.msra.gmra.mrb[0].mxu1 %v1657_v55  ;;  %15780 = vst [vmem:[#allocation52_spill] sm:$0xff] %v12621_v19  ;;  %v1665_v55 = vld [vmem:[%s11800_s25 + $0x48] sm:$0xff]  ;;  %v2791_v19 = vld [vmem:[%s11835_s30 + $0x60] sm:$0xff] }
 0x229   : > { %10418 = vmatprep.mubr.f32.mxu1 %v1658_v35 }
 0x22a   : > { %2802 = vperm.xlu0 %11492, %v2780_v57   ;;  %3038 = vperm.xlu1 %11493, %v3020_v56   ;;  %v12624_v35 = vpop.permute.xlu1 %2719  ;;  %v1666_v57 = vld [vmem:[%s11800_s25 + $0x50] sm:$0xff]  ;;  %v3023_v56 = vld [vmem:[%s15746_s6 + $0x18] sm:$0xff] }
 0x22c   : > { %10419 = vmatmul.mubr.f32.gmra.mrb[2].mxu1 %v1659_v2  ;;  %v2783_v2 = vld [vmem:[%s11835_s30 + $0x20] sm:$0xff] }
 0x22d   : > { %10421 = vmatprep.mubr.f32.mxu1 %v1660_v37  ;;  %v1667_v37 = vld [vmem:[%s11800_s25 + $0x58] sm:$0xff] }
 0x22e   : > { %3043 = vperm.xlu0 %11492, %v3021_v7   ;;  %2807 = vperm.xlu1 %11493, %v2781_v20   ;;  %v12630_v7 = vpop.permute.xlu0 %2724  ;;  %v1668_v20 = vld [vmem:[%s11800_s25 + $0x60] sm:$0xff] }
 0x230   : > { %10422 = vmatmul.mubr.f32.gmra.mrb[4].mxu1 %v1661_v11  ;;  %v2784_v11 = vld [vmem:[%s11835_s30 + $0x28] sm:$0xff] }
 0x231   : > { %10424 = vmatprep.mubr.f32.mxu1 %v1662_v3  ;;  %v3134_v3 = vld [vmem:[%s15745_s12 + $0x10] sm:$0xff] }
 0x232   : > { %2812 = vperm.xlu0 %11492, %v2782_v28   ;;  %3150 = vperm.xlu1 %11493, %v3132_v5   ;;  %v12635_v28 = vpop.permute.xlu1 %2305  ;;  %v1669_v5 = vld [vmem:[%s11800_s25 + $0x68] sm:$0xff] }
 0x233   : > { %15781 = vst [vmem:[#allocation53_spill] sm:$0xff] %v12635_v28 }
 0x234   : > { %10425 = vmatmul.mubr.f32.gmra.mrb[6].mxu1 %v1663_v61  ;;  %v1670_v61 = vld [vmem:[%s11800_s25 + $0x70] sm:$0xff] }
 0x235   : > { %10427 = vmatprep.mubr.f32.mxu1 %v1664_v9  ;;  %v3135_v9 = vld [vmem:[%s15745_s12 + $0x18] sm:$0xff] }
 0x236   : > { %3155 = vperm.xlu0 %11492, %v3133_v16   ;;  %3048 = vperm.xlu1 %11493, %v3022_v13   ;;  %v3024_v16 = vld [vmem:[%s15746_s6 + $0x20] sm:$0xff]  ;;  %v12641_v13 = vpop.permute.xlu0 %2310 }
 0x237   : > { %15782 = vst [vmem:[#allocation54_spill] sm:$0xff] %v12641_v13 }
 0x238   : > { %10428 = vmatmul.mubr.f32.gmra.mrb[8].mxu1 %v1665_v55  ;;  %v1671_v55 = vld [vmem:[%s11800_s25 + $0x78] sm:$0xff] }
 0x239   : > { %10430 = vmatprep.mubr.f32.mxu1 %v1666_v57  ;;  %v12644_v57 = vpop.permute.xlu1 %2418 }
 0x23a   : > { %3053 = vperm.xlu0 %11492, %v3023_v56   ;;  %2817 = vperm.xlu1 %11493, %v2783_v2   ;;  %15783 = vst [vmem:[#allocation55_spill] sm:$0xff] %v12644_v57  ;;  %v2763_v56 = vld [vmem:[%s11830_s24] sm:$0xff]  ;;  %v3025_v2 = vld [vmem:[%s15746_s6 + $0x28] sm:$0xff] }
 0x23c   : > { %10431 = vmatmul.mubr.f32.gmra.mrb[10].mxu1 %v1667_v37  ;;  %v2785_v37 = vld [vmem:[%s11835_s30 + $0x30] sm:$0xff] }
 0x23d   : > { %10433 = vmatprep.mubr.f32.mxu1 %v1668_v20  ;;  %v12649_v20 = vpop.permute.xlu0 %2423 }
 0x23e   : > { %2822 = vperm.xlu0 %11492, %v2784_v11   ;;  %3160 = vperm.xlu1 %11493, %v3134_v3   ;;  %15784 = vst [vmem:[#allocation56_spill] sm:$0xff] %v12649_v20  ;;  %v2786_v11 = vld [vmem:[%s11835_s30 + $0x38] sm:$0xff]  ;;  %v3136_v3 = vld [vmem:[%s15745_s12 + $0x20] sm:$0xff] }
 0x240   : > { %10434 = vmatmul.mubr.f32.gmra.mrb[12].mxu1 %v1669_v5  ;;  %v12653_v5 = vpop.permute.xlu1 %2611 }
 0x241   : > { %10436 = vmatprep.mubr.f32.mxu1 %v1670_v61  ;;  %15785 = vst [vmem:[#allocation57_spill] sm:$0xff] %v12653_v5  ;;  %v3137_v61 = vld [vmem:[%s15745_s12 + $0x28] sm:$0xff] }
 0x242   : > { %3165 = vperm.xlu0 %11492, %v3135_v9   ;;  %3058 = vperm.xlu1 %11493, %v3024_v16   ;;  %v3026_v9 = vld [vmem:[%s15746_s6 + $0x30] sm:$0xff]  ;;  %v12657_v16 = vpop.permute.xlu0 %2616 }
 0x243   : > { %15786 = vst [vmem:[#allocation58_spill] sm:$0xff] %v12657_v16  ;;  %v3028_v16 = vld [vmem:[%s15746_s6 + $0x40] sm:$0xff] }
 0x244   : > { %10437 = vmatmul.mubr.f32.gmra.mrb[14].mxu1 %v1671_v55  ;;  %v12659_v55 = vpop.permute.xlu1 %2729 }
 0x245   : > { %10471 = vmatprep.mubr.f32.mxu1 %v2763_v56  ;;  %15787 = vst [vmem:[#allocation59_spill] sm:$0xff] %v12659_v55  ;;  %v3027_v56 = vld [vmem:[%s15746_s6 + $0x38] sm:$0xff] }
 0x246   : > { %3063 = vperm.xlu0 %11492, %v3025_v2   ;;  %2827 = vperm.xlu1 %11493, %v2785_v37   ;;  %v2787_v2 = vld [vmem:[%s11835_s30 + $0x40] sm:$0xff]  ;;  %v12663_v37 = vpop.permute.xlu0 %2734 }
 0x247   : > { %15788 = vst [vmem:[#allocation60_spill] sm:$0xff] %v12663_v37  ;;  %v2789_v37 = vld [vmem:[%s11835_s30 + $0x50] sm:$0xff] }
 0x248   : > { %v12667_v20 = vpop.permute.xlu1 %2739 }
 0x249   : > { %15789 = vst [vmem:[#allocation61_spill] sm:$0xff] %v12667_v20 }
 0x24a   : > { %2832 = vperm.xlu0 %11492, %v2786_v11   ;;  %3170 = vperm.xlu1 %11493, %v3136_v3   ;;  %v2788_v11 = vld [vmem:[%s11835_s30 + $0x48] sm:$0xff]  ;;  %v3138_v3 = vld [vmem:[%s15745_s12 + $0x30] sm:$0xff]  ;;  %v12671_v5 = vpop.permute.xlu0 %2744 }
 0x24b   : > { %15790 = vst [vmem:[#allocation62_spill] sm:$0xff] %v12671_v5 }
 0x24e   : > { %3175 = vperm.xlu0 %11492, %v3137_v61   ;;  %3068 = vperm.xlu1 %11493, %v3026_v9  }
 0x252   : > { %3073 = vperm.xlu0 %11492, %v3027_v56   ;;  %2837 = vperm.xlu1 %11493, %v2787_v2   ;;  %v3029_v2 = vld [vmem:[%s15746_s6 + $0x48] sm:$0xff] }
 0x256   : > { %2842 = vperm.xlu0 %11492, %v2788_v11   ;;  %3180 = vperm.xlu1 %11493, %v3138_v3   ;;  %v2426_v11 = vmul.f32 %v12345_v25, %v12395_v29 }
 0x258   : > { %v2170_v61 = vpop.permute.xlu1 %2169 }
 0x259   : > { %v2217_v9 = vsel %vm1052_vm1, 0.0, %v2170_v61  ;;  %v15791_v61 = vld [vmem:[#allocation30_spill] sm:$0xff] }
 0x25a   : > { %3185 = vperm.xlu0 %11492, %v3139_v53   ;;  %3078 = vperm.xlu1 %11493, %v3028_v16   ;;  %v2313_v56 = vmul.f32 %v12341_v22, %v2217_v9  ;;  %v2790_v53 = vld [vmem:[%s11835_s30 + $0x58] sm:$0xff]  ;;  %v3140_v16 = vld [vmem:[%s15745_s12 + $0x40] sm:$0xff] }
 0x25b   : > { %v15792_v9 = vld [vmem:[#allocation29_spill] sm:$0xff] }
 0x25c   : > { %v2172_v13 = vpop.permute.xlu0 %2171  ;;  %v2476_v55 = vpop.permute.xlu1 %2475  ;;  %v2442_v22 = vadd.f32 %v2426_v11, %v2313_v56  ;;  %v2427_v21 = vmul.f32 %v15792_v9, %v12406_v17  ;;  %v3141_v56 = vld [vmem:[%s15745_s12 + $0x48] sm:$0xff]  ;;  %v3030_v11 = vld [vmem:[%s15746_s6 + $0x50] sm:$0xff] }
 0x25d   : > { %v2218_v3 = vsel %vm1052_vm1, 0.0, %v2172_v13  ;;  %v2523_v5 = vsel %vm1085_vm4, %v2476_v55, 0.0 }
 0x25e   : > { %v2314_v20 = vmul.f32 %v12343_v23, %v2218_v3  ;;  %v2619_v57 = vmul.f32 %v15791_v61, %v2523_v5  ;;  %3083 = vperm.xlu0 %11492, %v3029_v2   ;;  %2847 = vperm.xlu1 %11493, %v2789_v37   ;;  %v15793_v3 = vld [vmem:[#allocation31_spill] sm:$0xff]  ;;  %v15794_v37 = vld [vmem:[#allocation32_spill] sm:$0xff] }
 0x260   : > { %v2478_v28 = vpop.permute.xlu0 %2477  ;;  %v2174_v25 = vpop.permute.xlu1 %2173  ;;  %v2635_v29 = vadd.f32 %v2619_v57, %v2442_v22  ;;  %v2443_v23 = vadd.f32 %v2427_v21, %v2314_v20  ;;  %v15795_v57 = vld [vmem:[#allocation34_spill] sm:$0xff] }
 0x261   : > { %v2524_v13 = vsel %vm1085_vm4, %v2478_v28, 0.0  ;;  %v2219_v55 = vsel %vm1052_vm1, 0.0, %v2174_v25  ;;  %v2428_v22 = vmul.f32 %v15795_v57, %v12420_v4  ;;  %v15796_v20 = vld [vmem:[#allocation38_spill] sm:$0xff]  ;;  %v15800_v4 = vld [vmem:[#allocation35_spill] sm:$0xff] }
 0x262   : > { %v2620_v5 = vmul.f32 %v15793_v3, %v2524_v13  ;;  %2852 = vperm.xlu0 %11492, %v2790_v53   ;;  %3190 = vperm.xlu1 %11493, %v3140_v16   ;;  %v2315_v2 = vmul.f32 %v15794_v37, %v2219_v55  ;;  %v2747_v25 = vadd.f32 %v15796_v20, %v2635_v29  ;;  %v15797_v53 = vld [vmem:[#allocation33_spill] sm:$0xff]  ;;  %v15798_v13 = vld [vmem:[#allocation36_spill] sm:$0xff]  ;;  %v15799_v3 = vld [vmem:[#allocation39_spill] sm:$0xff] }
 0x264   : > { %v2636_v61 = vadd.f32 %v2620_v5, %v2443_v23  ;;  %v2176_v17 = vpop.permute.xlu0 %2175  ;;  %v2480_v9 = vpop.permute.xlu1 %2479  ;;  %v2444_v23 = vadd.f32 %v2428_v22, %v2315_v2  ;;  %v3031_v5 = vld [vmem:[%s15746_s6 + $0x58] sm:$0xff]  ;;  %v2792_v22 = vld [vmem:[%s11835_s30 + $0x68] sm:$0xff] }
 0x265   : > { %v2220_v28 = vsel %vm1052_vm1, 0.0, %v2176_v17  ;;  %v2525_v21 = vsel %vm1085_vm4, %v2480_v9, 0.0  ;;  %v2429_v17 = vmul.f32 %v15800_v4, %v12431_v26  ;;  %v15802_v2 = vld [vmem:[#allocation40_spill] sm:$0xff] }
 0x266   : > { %v2316_v16 = vmul.f32 %v15797_v53, %v2220_v28  ;;  %v2621_v55 = vmul.f32 %v15798_v13, %v2525_v21  ;;  %3195 = vperm.xlu0 %11492, %v3141_v56   ;;  %3088 = vperm.xlu1 %11493, %v3030_v11   ;;  %v2748_v37 = vadd.f32 %v15799_v3, %v2636_v61  ;;  %v15801_v11 = vld [vmem:[#allocation37_spill] sm:$0xff]  ;;  %v3142_v53 = vld [vmem:[%s15745_s12 + $0x50] sm:$0xff] }
 0x268   : > { %v2482_v57 = vpop.permute.xlu0 %2481  ;;  %v2178_v9 = vpop.permute.xlu1 %2177  ;;  %v11061_v59 = vpack.c.bf16 %v2748_v37, %v2747_v25  ;;  %v2637_v29 = vadd.f32 %v2621_v55, %v2444_v23  ;;  %v2445_v56 = vadd.f32 %v2429_v17, %v2316_v16  ;;  %v15803_v55 = vld [vmem:[#allocation42_spill] sm:$0xff]  ;;  %v15806_v17 = vld [vmem:[#allocation44_spill] sm:$0xff] }
 0x269   : > { %v2526_v28 = vsel %vm1085_vm4, %v2482_v57, 0.0  ;;  %v2221_v21 = vsel %vm1052_vm1, 0.0, %v2178_v9  ;;  %v2430_v3 = vmul.f32 %v15803_v55, %v12446_v62  ;;  %v15804_v23 = vld [vmem:[#allocation46_spill] sm:$0xff]  ;;  %v15807_v9 = vld [vmem:[#allocation47_spill] sm:$0xff] }
 0x26a   : > { %v2622_v20 = vmul.f32 %v15801_v11, %v2526_v28  ;;  %3093 = vperm.xlu0 %11492, %v3031_v5   ;;  %2857 = vperm.xlu1 %11493, %v2791_v19   ;;  %v2317_v61 = vmul.f32 %v15802_v2, %v2221_v21  ;;  %v2749_v19 = vadd.f32 %v15804_v23, %v2637_v29  ;;  %v15805_v5 = vld [vmem:[#allocation41_spill] sm:$0xff]  ;;  %v3143_v21 = vld [vmem:[%s15745_s12 + $0x58] sm:$0xff] }
 0x26b   : > { %11062 = vmatprep.subr.bf16.mxu1 %v11061_v59  ;;  %v15808_v62 = vld [vmem:[#allocation43_spill] sm:$0xff] }
 0x26c   : > { %v2638_v26 = vadd.f32 %v2622_v20, %v2445_v56  ;;  %11064 = vmatpush3.bf16.msra.mxu1 %v11061_v59  ;;  %v2180_v25 = vpop.permute.xlu0 %2179  ;;  %v2484_v13 = vpop.permute.xlu1 %2483  ;;  %v2446_v59 = vadd.f32 %v2430_v3, %v2317_v61  ;;  %v3032_v56 = vld [vmem:[%s15746_s6 + $0x60] sm:$0xff]  ;;  %v2431_v11 = vmul.f32 %v15808_v62, %v12457_v40  ;;  %v3033_v3 = vld [vmem:[%s15746_s6 + $0x68] sm:$0xff] }
 0x26d   : > { %v2222_v16 = vsel %vm1052_vm1, 0.0, %v2180_v25  ;;  %v2527_v37 = vsel %vm1085_vm4, %v2484_v13, 0.0  ;;  %v15810_v61 = vld [vmem:[#allocation48_spill] sm:$0xff] }
 0x26e   : > { %v2318_v4 = vmul.f32 %v15805_v5, %v2222_v16  ;;  %v2623_v57 = vmul.f32 %v15806_v17, %v2527_v37  ;;  %2862 = vperm.xlu0 %11492, %v2792_v22   ;;  %3200 = vperm.xlu1 %11493, %v3142_v53   ;;  %v2750_v28 = vadd.f32 %v15807_v9, %v2638_v26  ;;  %v15809_v53 = vld [vmem:[#allocation45_spill] sm:$0xff]  ;;  %v2793_v37 = vld [vmem:[%s11835_s30 + $0x70] sm:$0xff] }
 0x26f   : > { %v2432_v5 = vmul.f32 %v12391_v33, %v12470_v48  ;;  %v3144_v62 = vld [vmem:[%s15745_s12 + $0x60] sm:$0xff]  ;;  %v2433_v33 = vmul.f32 %v12398_v24, %v12483_v36 }
 0x270   : > { %v2486_v20 = vpop.permute.xlu0 %2485  ;;  %v2182_v2 = vpop.permute.xlu1 %2181  ;;  %v11065_v25 = vpack.c.bf16 %v2750_v28, %v2749_v19  ;;  %v2639_v29 = vadd.f32 %v2623_v57, %v2446_v59  ;;  %v2447_v22 = vadd.f32 %v2431_v11, %v2318_v4 }
 0x271   : > { %v2528_v13 = vsel %vm1085_vm4, %v2486_v20, 0.0  ;;  %v2223_v55 = vsel %vm1052_vm1, 0.0, %v2182_v2 }
 0x272   : > { %v2624_v16 = vmul.f32 %v15809_v53, %v2528_v13  ;;  %3205 = vperm.xlu0 %11492, %v3143_v21   ;;  %3098 = vperm.xlu1 %11493, %v3032_v56   ;;  %v2319_v26 = vmul.f32 %v15810_v61, %v2223_v55  ;;  %v2751_v57 = vadd.f32 %v12423_v39, %v2639_v29  ;;  %v2794_v56 = vld [vmem:[%s11835_s30 + $0x78] sm:$0xff]  ;;  %v3145_v29 = vld [vmem:[%s15745_s12 + $0x68] sm:$0xff]  ;;  %v3034_v13 = vld [vmem:[%s15746_s6 + $0x70] sm:$0xff] }
 0x273   : > { %11066 = vmatprep.subr.bf16.mxu1 %v11065_v25 }
 0x274   : > { %v2640_v40 = vadd.f32 %v2624_v16, %v2447_v22  ;;  %11068 = vmatpush3.bf16.msra.mxu1 %v11065_v25  ;;  %v2184_v23 = vpop.permute.xlu0 %2183  ;;  %v2488_v19 = vpop.permute.xlu1 %2487  ;;  %v2448_v21 = vadd.f32 %v2432_v5, %v2319_v26  ;;  %v2434_v22 = vmul.f32 %v12460_v49, %v12496_v12  ;;  %v2435_v49 = vmul.f32 %v12473_v6, %v12507_v44 }
 0x275   : > { %v2224_v4 = vsel %vm1052_vm1, 0.0, %v2184_v23  ;;  %v2529_v17 = vsel %vm1085_vm4, %v2488_v19, 0.0 }
 0x276   : > { %v2320_v9 = vmul.f32 %v12388_v27, %v2224_v4  ;;  %v2625_v28 = vmul.f32 %v12404_v1, %v2529_v17  ;;  %3103 = vperm.xlu0 %11492, %v3033_v3   ;;  %2867 = vperm.xlu1 %11493, %v2793_v37   ;;  %v2752_v59 = vadd.f32 %v12434_v42, %v2640_v40  ;;  %v3035_v37 = vld [vmem:[%s15746_s6 + $0x78] sm:$0xff]  ;;  %v3146_v40 = vld [vmem:[%s15745_s12 + $0x70] sm:$0xff] }
 0x277   : > { %v3147_v17 = vld [vmem:[%s15745_s12 + $0x78] sm:$0xff] }
 0x278   : > { %v2490_v48 = vpop.permute.xlu0 %2489  ;;  %v2186_v11 = vpop.permute.xlu1 %2185  ;;  %v11069_v20 = vpack.c.bf16 %v2752_v59, %v2751_v57  ;;  %v2641_v39 = vadd.f32 %v2625_v28, %v2448_v21  ;;  %v2449_v2 = vadd.f32 %v2433_v33, %v2320_v9  ;;  %v9474_v57 = vld [vmem:[%s15744_s14 + $0x80] sm:$0xff]  ;;  %v2436_v28 = vmul.f32 %v12536_v46, %v12522_v18 }
 0x279   : > { %v2530_v27 = vsel %vm1085_vm4, %v2490_v48, 0.0  ;;  %v2225_v1 = vsel %vm1052_vm1, 0.0, %v2186_v11  ;;  %v9475_v48 = vld [vmem:[%s15744_s14 + $0x88] sm:$0xff]  ;;  %v9490_v11 = vld [vmem:[%s15744_s14 + $0x280] sm:$0xff]  ;;  %v2437_v18 = vmul.f32 %v12549_v0, %v12533_v14 }
 0x27a   : > { %v2626_v25 = vmul.f32 %v12418_v38, %v2530_v27  ;;  %2872 = vperm.xlu0 %11492, %v2794_v56   ;;  %3210 = vperm.xlu1 %11493, %v3144_v62   ;;  %v2321_v42 = vmul.f32 %v12444_v34, %v2225_v1  ;;  %v2753_v16 = vadd.f32 %v12499_v50, %v2641_v39 }
 0x27b   : > { %11070 = vmatprep.subr.bf16.mxu1 %v11069_v20 }
 0x27c   : > { %v2642_v24 = vadd.f32 %v2626_v25, %v2449_v2  ;;  %11072 = vmatpush3.bf16.msra.mxu1 %v11069_v20  ;;  %v2188_v36 = vpop.permute.xlu0 %2187  ;;  %v2492_v55 = vpop.permute.xlu1 %2491  ;;  %v2450_v3 = vadd.f32 %v2434_v22, %v2321_v42  ;;  %v9491_v2 = vld [vmem:[%s15744_s14 + $0x288] sm:$0xff]  ;;  %v9506_v25 = vld [vmem:[%s15744_s14 + $0x480] sm:$0xff] }
 0x27d   : > { %v2226_v53 = vsel %vm1052_vm1, 0.0, %v2188_v36  ;;  %v2531_v38 = vsel %vm1085_vm4, %v2492_v55, 0.0 }
 0x27e   : > { %v2322_v34 = vmul.f32 %v12455_v8, %v2226_v53  ;;  %v2627_v61 = vmul.f32 %v12481_v52, %v2531_v38  ;;  %3215 = vperm.xlu0 %11492, %v3145_v29   ;;  %3108 = vperm.xlu1 %11493, %v3034_v13   ;;  %v2754_v26 = vadd.f32 %v12510_v41, %v2642_v24  ;;  %v9507_v53 = vld [vmem:[%s15744_s14 + $0x488] sm:$0xff]  ;;  %v9476_v38 = vld [vmem:[%s15744_s14 + $0x90] sm:$0xff] }
 0x27f   : > { %v2438_v29 = vmul.f32 %v12604_v58, %v12546_v43  ;;  %v15811_v43 = vld [vmem:[#allocation51_spill] sm:$0xff] }
 0x280   : > { %v2494_v12 = vpop.permute.xlu0 %2493  ;;  %v2190_v23 = vpop.permute.xlu1 %2189  ;;  %v11073_v19 = vpack.c.bf16 %v2754_v26, %v2753_v16  ;;  %v2643_v50 = vadd.f32 %v2627_v61, %v2450_v3  ;;  %v2451_v5 = vadd.f32 %v2435_v49, %v2322_v34  ;;  %v2439_v58 = vmul.f32 %v15811_v43, %v12559_v32  ;;  %v15812_v3 = vld [vmem:[#allocation52_spill] sm:$0xff]  ;;  %v15813_v32 = vld [vmem:[#allocation53_spill] sm:$0xff] }
 0x281   : > { %v2532_v8 = vsel %vm1085_vm4, %v2494_v12, 0.0  ;;  %v2227_v52 = vsel %vm1052_vm1, 0.0, %v2190_v23  ;;  %v9511_v43 = vld [vmem:[%s15744_s14 + $0x4a8] sm:$0xff] }
 0x282   : > { %v2628_v4 = vmul.f32 %v12494_v47, %v2532_v8  ;;  %3113 = vperm.xlu0 %11492, %v3035_v37   ;;  %3220 = vperm.xlu1 %11493, %v3146_v40   ;;  %v2323_v41 = vmul.f32 %v12520_v60, %v2227_v52  ;;  %v2755_v21 = vadd.f32 %v12575_v63, %v2643_v50  ;;  %v9492_v40 = vld [vmem:[%s15744_s14 + $0x290] sm:$0xff]  ;;  %v15814_v50 = vld [vmem:[#allocation49_spill] sm:$0xff] }
 0x283   : > { %11074 = vmatprep.subr.bf16.mxu1 %v11073_v19  ;;  %v15815_v8 = vld [vmem:[#allocation55_spill] sm:$0xff] }
 0x284   : > { %v2644_v6 = vadd.f32 %v2628_v4, %v2451_v5  ;;  %11076 = vmatpush3.bf16.msra.mxu1 %v11073_v19  ;;  %v2192_v44 = vpop.permute.xlu0 %2191  ;;  %v2496_v9 = vpop.permute.xlu1 %2495  ;;  %v2452_v33 = vadd.f32 %v2436_v28, %v2323_v41  ;;  %v2440_v52 = vmul.f32 %v15815_v8, %v15814_v50  ;;  %v15816_v41 = vld [vmem:[#allocation59_spill] sm:$0xff]  ;;  %v15819_v28 = vld [vmem:[#allocation60_spill] sm:$0xff] }
 0x285   : > { %v2228_v59 = vsel %vm1052_vm1, 0.0, %v2192_v44  ;;  %v2533_v47 = vsel %vm1085_vm4, %v2496_v9, 0.0  ;;  %v15818_v44 = vld [vmem:[#allocation57_spill] sm:$0xff]  ;;  %v2774_v50 = vld [vmem:[%s11830_s24 + $0x58] sm:$0xff] }
 0x286   : > { %v2324_v60 = vmul.f32 %v12531_v54, %v2228_v59  ;;  %v2629_v56 = vmul.f32 %v12557_v15, %v2533_v47  ;;  %3225 = vperm.xlu0 %11492, %v3147_v17   ;;  %3359 = vperm.xlu1 %11493, %v9474_v57   ;;  %v2756_v62 = vadd.f32 %v12584_v45, %v2644_v6  ;;  %v15817_v57 = vld [vmem:[#allocation54_spill] sm:$0xff]  ;;  %v9493_v47 = vld [vmem:[%s15744_s14 + $0x298] sm:$0xff] }
 0x288   : > { %v2498_v46 = vpop.permute.xlu0 %2497  ;;  %v2194_v20 = vpop.permute.xlu1 %2193  ;;  %v11077_v39 = vpack.c.bf16 %v2756_v62, %v2755_v21  ;;  %v2645_v63 = vadd.f32 %v2629_v56, %v2452_v33  ;;  %v2453_v27 = vadd.f32 %v2437_v18, %v2324_v60  ;;  %v9508_v21 = vld [vmem:[%s15744_s14 + $0x490] sm:$0xff]  ;;  %v15821_v62 = vld [vmem:[#allocation56_spill] sm:$0xff] }
 0x289   : > { %v2534_v54 = vsel %vm1085_vm4, %v2498_v46, 0.0  ;;  %v2229_v15 = vsel %vm1052_vm1, 0.0, %v2194_v20  ;;  %v15820_v56 = vld [vmem:[#allocation50_spill] sm:$0xff] }
 0x28a   : > { %v2630_v1 = vmul.f32 %v12570_v31, %v2534_v54  ;;  %3364 = vperm.xlu0 %11492, %v9475_v48   ;;  %3472 = vperm.xlu1 %11493, %v9490_v11   ;;  %v2325_v45 = vmul.f32 %v12593_v30, %v2229_v15  ;;  %v2757_v24 = vadd.f32 %v12624_v35, %v2645_v63  ;;  %v9509_v54 = vld [vmem:[%s15744_s14 + $0x498] sm:$0xff]  ;;  %v9522_v15 = vld [vmem:[%s11825_s19 + $0x80] sm:$0xff] }
 0x28b   : > { %11078 = vmatprep.subr.bf16.mxu1 %v11077_v39  ;;  %v2441_v33 = vmul.f32 %v15821_v62, %v15820_v56  ;;  %v9499_v62 = vld [vmem:[%s15744_s14 + $0x2c8] sm:$0xff] }
 0x28c   : > { %v2646_v14 = vadd.f32 %v2630_v1, %v2453_v27  ;;  %11080 = vmatpush3.bf16.msra.mxu1 %v11077_v39  ;;  %v2196_v0 = vpop.permute.xlu0 %2195  ;;  %v2500_v42 = vpop.permute.xlu1 %2499  ;;  %v2454_v22 = vadd.f32 %v2438_v29, %v2325_v45  ;;  %v15822_v39 = vld [vmem:[#allocation58_spill] sm:$0xff]  ;;  %v15823_v1 = vld [vmem:[#allocation61_spill] sm:$0xff] }
 0x28d   : > { %v2230_v13 = vsel %vm1052_vm1, 0.0, %v2196_v0  ;;  %v2535_v31 = vsel %vm1085_vm4, %v2500_v42, 0.0  ;;  %v9478_v0 = vld [vmem:[%s15744_s14 + $0xa0] sm:$0xff]  ;;  %v9479_v29 = vld [vmem:[%s15744_s14 + $0xa8] sm:$0xff] }
 0x28e   : > { %v2326_v30 = vmul.f32 %v12601_v10, %v2230_v13  ;;  %v2631_v36 = vmul.f32 %v12615_v51, %v2535_v31  ;;  %3477 = vperm.xlu0 %11492, %v9491_v2   ;;  %3665 = vperm.xlu1 %11493, %v9506_v25   ;;  %v2758_v55 = vadd.f32 %v12630_v7, %v2646_v14  ;;  %v9477_v7 = vld [vmem:[%s15744_s14 + $0x98] sm:$0xff]  ;;  %v15824_v2 = vld [vmem:[#allocation62_spill] sm:$0xff]  ;;  %v9494_v13 = vld [vmem:[%s15744_s14 + $0x2a0] sm:$0xff] }
 0x28f   : > { %v9523_v14 = vld [vmem:[%s11825_s19 + $0x88] sm:$0xff] }
 0x290   : > { %v2502_v16 = vpop.permute.xlu0 %2501  ;;  %v2198_v34 = vpop.permute.xlu1 %2197  ;;  %v11081_v61 = vpack.c.bf16 %v2758_v55, %v2757_v24  ;;  %v2647_v35 = vadd.f32 %v2631_v36, %v2454_v22  ;;  %v2455_v26 = vadd.f32 %v2439_v58, %v2326_v30  ;;  %v2764_v31 = vld [vmem:[%s11830_s24 + $0x8] sm:$0xff]  ;;  %v2765_v24 = vld [vmem:[%s11830_s24 + $0x10] sm:$0xff]  ;;  %v9510_v36 = vld [vmem:[%s15744_s14 + $0x4a0] sm:$0xff] }
 0x291   : > { %v2536_v10 = vsel %vm1085_vm4, %v2502_v16, 0.0  ;;  %v2231_v51 = vsel %vm1052_vm1, 0.0, %v2198_v34  ;;  %v9495_v30 = vld [vmem:[%s15744_s14 + $0x2a8] sm:$0xff]  ;;  %v2766_v22 = vld [vmem:[%s11830_s24 + $0x18] sm:$0xff]  ;;  %v9524_v58 = vld [vmem:[%s11825_s19 + $0x90] sm:$0xff] }
 0x292   : > { %v2632_v37 = vmul.f32 %v15812_v3, %v2536_v10  ;;  %3670 = vperm.xlu0 %11492, %v9507_v53   ;;  %3369 = vperm.xlu1 %11493, %v9476_v38   ;;  %v2327_v12 = vmul.f32 %v15813_v32, %v2231_v51  ;;  %v2759_v17 = vadd.f32 %v15816_v41, %v2647_v35  ;;  %v2767_v38 = vld [vmem:[%s11830_s24 + $0x20] sm:$0xff]  ;;  %v2768_v16 = vld [vmem:[%s11830_s24 + $0x28] sm:$0xff]  ;;  %v9525_v10 = vld [vmem:[%s11825_s19 + $0x98] sm:$0xff] }
 0x293   : > { %11082 = vmatprep.subr.bf16.mxu1 %v11081_v61  ;;  %v9480_v51 = vld [vmem:[%s15744_s14 + $0xb0] sm:$0xff]  ;;  %v2771_v3 = vld [vmem:[%s11830_s24 + $0x40] sm:$0xff]  ;;  %v2772_v32 = vld [vmem:[%s11830_s24 + $0x48] sm:$0xff] }
 0x294   : > { %v2648_v49 = vadd.f32 %v2632_v37, %v2455_v26  ;;  %11084 = vmatpush3.bf16.msra.mxu1 %v11081_v61  ;;  %v2200_v23 = vpop.permute.xlu0 %2199  ;;  %v2504_v19 = vpop.permute.xlu1 %2503  ;;  %v2456_v60 = vadd.f32 %v2440_v52, %v2327_v12  ;;  %v2769_v61 = vld [vmem:[%s11830_s24 + $0x30] sm:$0xff]  ;;  %v2770_v26 = vld [vmem:[%s11830_s24 + $0x38] sm:$0xff]  ;;  %v2775_v52 = vld [vmem:[%s11830_s24 + $0x60] sm:$0xff] }
 0x295   : > { %v2232_v5 = vsel %vm1052_vm1, 0.0, %v2200_v23  ;;  %v2537_v4 = vsel %vm1085_vm4, %v2504_v19, 0.0  ;;  %v2773_v12 = vld [vmem:[%s11830_s24 + $0x50] sm:$0xff]  ;;  %v9497_v23 = vld [vmem:[%s15744_s14 + $0x2b8] sm:$0xff]  ;;  %v9526_v41 = vld [vmem:[%s11825_s19 + $0xa0] sm:$0xff] }
 0x296   : > { %v2328_v6 = vmul.f32 %v15817_v57, %v2232_v5  ;;  %v2633_v9 = vmul.f32 %v15818_v44, %v2537_v4  ;;  %3374 = vperm.xlu0 %11492, %v9477_v7   ;;  %3482 = vperm.xlu1 %11493, %v9492_v40   ;;  %v2760_v59 = vadd.f32 %v15819_v28, %v2648_v49  ;;  %v9481_v7 = vld [vmem:[%s15744_s14 + $0xb8] sm:$0xff]  ;;  %v9496_v40 = vld [vmem:[%s15744_s14 + $0x2b0] sm:$0xff]  ;;  %v9527_v44 = vld [vmem:[%s11825_s19 + $0xa8] sm:$0xff] }
 0x297   : > { %v9512_v19 = vld [vmem:[%s15744_s14 + $0x4b0] sm:$0xff]  ;;  %v9513_v4 = vld [vmem:[%s15744_s14 + $0x4b8] sm:$0xff] }
 0x298   : > { %v2506_v48 = vpop.permute.xlu0 %2505  ;;  %v11085_v11 = vpack.c.bf16 %v2760_v59, %v2759_v17  ;;  %v2457_v46 = vadd.f32 %v2441_v33, %v2328_v6  ;;  %v2649_v20 = vadd.f32 %v2633_v9, %v2456_v60  ;;  %v2776_v17 = vld [vmem:[%s11830_s24 + $0x68] sm:$0xff]  ;;  %v2777_v57 = vld [vmem:[%s11830_s24 + $0x70] sm:$0xff]  ;;  %v9482_v9 = vld [vmem:[%s15744_s14 + $0xc0] sm:$0xff] }
 0x299   : > { %v2538_v18 = vsel %vm1085_vm4, %v2506_v48, 0.0  ;;  %v2778_v59 = vld [vmem:[%s11830_s24 + $0x78] sm:$0xff]  ;;  %v9514_v33 = vld [vmem:[%s15744_s14 + $0x4c0] sm:$0xff] }
 0x29a   : > { %v2634_v63 = vmul.f32 %v15822_v39, %v2538_v18  ;;  %3487 = vperm.xlu0 %11492, %v9493_v47   ;;  %3675 = vperm.xlu1 %11493, %v9508_v21   ;;  %v2761_v45 = vadd.f32 %v15823_v1, %v2649_v20  ;;  %v9483_v47 = vld [vmem:[%s15744_s14 + $0xc8] sm:$0xff]  ;;  %v9498_v21 = vld [vmem:[%s15744_s14 + $0x2c0] sm:$0xff]  ;;  %v9528_v18 = vld [vmem:[%s11825_s19 + $0xb0] sm:$0xff] }
 0x29b   : > { %11086 = vmatprep.subr.bf16.mxu1 %v11085_v11  ;;  %v9529_v20 = vld [vmem:[%s11825_s19 + $0xb8] sm:$0xff]  ;;  %v9484_v39 = vld [vmem:[%s15744_s14 + $0xd0] sm:$0xff] }
 0x29c   : > { %v2650_v27 = vadd.f32 %v2634_v63, %v2457_v46  ;;  %11088 = vmatpush3.bf16.msra.mxu1 %v11085_v11  ;;  %v9515_v11 = vld [vmem:[%s15744_s14 + $0x4c8] sm:$0xff] }
 0x29e   : > { %3680 = vperm.xlu0 %11492, %v9509_v54   ;;  %3794 = vperm.xlu1 %11493, %v9522_v15   ;;  %v2762_v25 = vadd.f32 %v15824_v2, %v2650_v27  ;;  %v9485_v15 = vld [vmem:[%s15744_s14 + $0xd8] sm:$0xff]  ;;  %v9500_v27 = vld [vmem:[%s15744_s14 + $0x2d0] sm:$0xff] }
 0x29f   : > { %v9516_v2 = vld [vmem:[%s15744_s14 + $0x4d0] sm:$0xff] }
 0x2a0   : > { %v11089_v42 = vpack.c.bf16 %v2762_v25, %v2761_v45  ;;  %v9501_v45 = vld [vmem:[%s15744_s14 + $0x2d8] sm:$0xff] }
 0x2a2   : > { %3799 = vperm.xlu0 %11492, %v9523_v14   ;;  %3379 = vperm.xlu1 %11493, %v9478_v0   ;;  %v9517_v14 = vld [vmem:[%s15744_s14 + $0x4d8] sm:$0xff]  ;;  %v9530_v0 = vld [vmem:[%s11825_s19 + $0xc0] sm:$0xff] }
 0x2a3   : > { %11090 = vmatprep.subr.bf16.mxu1 %v11089_v42 }
 0x2a4   : > { %11092 = vmatpush3.bf16.msra.mxu1 %v11089_v42 }
 0x2a5   : > { %v12827_v55 = vpop.permute.xlu1 %2797 }
 0x2a6   : > { %3384 = vperm.xlu0 %11492, %v9479_v29   ;;  %3492 = vperm.xlu1 %11493, %v9494_v13   ;;  %v9531_v13 = vld [vmem:[%s11825_s19 + $0xc8] sm:$0xff] }
 0x2a7   : > { %10472 = vmatmul.mubr.f32.vlgmr.msra.gmra.mrb[16].mxu1 %v2764_v31  ;;  %v9486_v31 = vld [vmem:[%s15744_s14 + $0xe0] sm:$0xff] }
 0x2a8   : > { %10474 = vmatprep.mubr.f32.mxu1 %v2765_v24 }
 0x2a9   : > { %v12830_v53 = vpop.permute.xlu0 %2802  ;;  %v12839_v35 = vpop.permute.xlu1 %3038 }
 0x2aa   : > { %3497 = vperm.xlu0 %11492, %v9495_v30   ;;  %3685 = vperm.xlu1 %11493, %v9510_v36   ;;  %v9487_v30 = vld [vmem:[%s15744_s14 + $0xe8] sm:$0xff]  ;;  %v9502_v36 = vld [vmem:[%s15744_s14 + $0x2e0] sm:$0xff] }
 0x2ab   : > { %10475 = vmatmul.mubr.f32.gmra.mrb[18].mxu1 %v2766_v22 }
 0x2ac   : > { %10477 = vmatprep.mubr.f32.mxu1 %v2767_v38  ;;  %v9503_v38 = vld [vmem:[%s15744_s14 + $0x2e8] sm:$0xff] }
 0x2ad   : > { %v12836_v34 = vpop.permute.xlu0 %3043  ;;  %v12849_v49 = vpop.permute.xlu1 %2807 }
 0x2ae   : > { %3690 = vperm.xlu0 %11492, %v9511_v43   ;;  %3804 = vperm.xlu1 %11493, %v9524_v58   ;;  %v9518_v43 = vld [vmem:[%s15744_s14 + $0x4e0] sm:$0xff] }
 0x2af   : > { %10478 = vmatmul.mubr.f32.gmra.mrb[20].mxu1 %v2768_v16 }
 0x2b0   : > { %10480 = vmatprep.mubr.f32.mxu1 %v2769_v61  ;;  %v9519_v61 = vld [vmem:[%s15744_s14 + $0x4e8] sm:$0xff] }
 0x2b1   : > { %v12845_v37 = vpop.permute.xlu0 %2812  ;;  %v12859_v5 = vpop.permute.xlu1 %3150 }
 0x2b2   : > { %3809 = vperm.xlu0 %11492, %v9525_v10   ;;  %3389 = vperm.xlu1 %11493, %v9480_v51   ;;  %v9532_v10 = vld [vmem:[%s11825_s19 + $0xd0] sm:$0xff] }
 0x2b3   : > { %10481 = vmatmul.mubr.f32.gmra.mrb[22].mxu1 %v2770_v26  ;;  %v9533_v26 = vld [vmem:[%s11825_s19 + $0xd8] sm:$0xff] }
 0x2b4   : > { %10483 = vmatprep.mubr.f32.mxu1 %v2771_v3  ;;  %v9488_v3 = vld [vmem:[%s15744_s14 + $0xf0] sm:$0xff] }
 0x2b5   : > { %v12856_v8 = vpop.permute.xlu0 %3155  ;;  %v12869_v28 = vpop.permute.xlu1 %3048 }
 0x2b6   : > { %3394 = vperm.xlu0 %11492, %v9481_v7   ;;  %3502 = vperm.xlu1 %11493, %v9496_v40   ;;  %v9489_v40 = vld [vmem:[%s15744_s14 + $0xf8] sm:$0xff] }
 0x2b7   : > { %10484 = vmatmul.mubr.f32.gmra.mrb[24].mxu1 %v2772_v32  ;;  %v9504_v32 = vld [vmem:[%s15744_s14 + $0x2f0] sm:$0xff] }
 0x2b8   : > { %10486 = vmatprep.mubr.f32.mxu1 %v2773_v12 }
 0x2b9   : > { %v12865_v6 = vpop.permute.xlu0 %3053  ;;  %v12876_v56 = vpop.permute.xlu1 %2817 }
 0x2ba   : > { %3507 = vperm.xlu0 %11492, %v9497_v23   ;;  %3695 = vperm.xlu1 %11493, %v9512_v19   ;;  %v9505_v19 = vld [vmem:[%s15744_s14 + $0x2f8] sm:$0xff] }
 0x2bb   : > { %10487 = vmatmul.mubr.f32.gmra.mrb[26].mxu1 %v2774_v50  ;;  %v9520_v50 = vld [vmem:[%s15744_s14 + $0x4f0] sm:$0xff] }
 0x2bc   : > { %10489 = vmatprep.mubr.f32.mxu1 %v2775_v52 }
 0x2bd   : > { %v12874_v60 = vpop.permute.xlu0 %2822  ;;  %v12884_v46 = vpop.permute.xlu1 %3160 }
 0x2be   : > { %3700 = vperm.xlu0 %11492, %v9513_v4   ;;  %3814 = vperm.xlu1 %11493, %v9526_v41   ;;  %v9521_v4 = vld [vmem:[%s15744_s14 + $0x4f8] sm:$0xff]  ;;  %v9534_v41 = vld [vmem:[%s11825_s19 + $0xe0] sm:$0xff] }
 0x2bf   : > { %10490 = vmatmul.mubr.f32.gmra.mrb[28].mxu1 %v2776_v17 }
 0x2c0   : > { %10492 = vmatprep.mubr.f32.mxu1 %v2777_v57 }
 0x2c1   : > { %v12880_v48 = vpop.permute.xlu0 %3165  ;;  %v12890_v54 = vpop.permute.xlu1 %3058 }
 0x2c2   : > { %3819 = vperm.xlu0 %11492, %v9527_v44   ;;  %3399 = vperm.xlu1 %11493, %v9482_v9   ;;  %v9535_v9 = vld [vmem:[%s11825_s19 + $0xe8] sm:$0xff] }
 0x2c3   : > { %10493 = vmatmul.mubr.f32.gmra.mrb[30].mxu1 %v2778_v59  ;;  %v9536_v59 = vld [vmem:[%s11825_s19 + $0xf0] sm:$0xff] }
 0x2c5   : > { %v12888_v63 = vpop.permute.xlu0 %3063  ;;  %v12898_v25 = vpop.permute.xlu1 %2827 }
 0x2c6   : > { %3404 = vperm.xlu0 %11492, %v9483_v47   ;;  %3512 = vperm.xlu1 %11493, %v9498_v21  }
 0x2c9   : > { %v12894_v1 = vpop.permute.xlu0 %2832  ;;  %v12904_v29 = vpop.permute.xlu1 %3170 }
 0x2ca   : > { %3517 = vperm.xlu0 %11492, %v9499_v62   ;;  %3705 = vperm.xlu1 %11493, %v9514_v33  }
 0x2cd   : > { %v12902_v42 = vpop.permute.xlu0 %3175  ;;  %v12912_v22 = vpop.permute.xlu1 %3068 }
 0x2ce   : > { %3710 = vperm.xlu0 %11492, %v9515_v11   ;;  %3824 = vperm.xlu1 %11493, %v9528_v18   ;;  %v9537_v11 = vld [vmem:[%s11825_s19 + $0xf8] sm:$0xff] }
 0x2d1   : > { %v12908_v24 = vpop.permute.xlu0 %3073  ;;  %v12918_v16 = vpop.permute.xlu1 %2837 }
 0x2d2   : > { %3829 = vperm.xlu0 %11492, %v9529_v20   ;;  %3409 = vperm.xlu1 %11493, %v9484_v39  }
 0x2d5   : > { %v12916_v58 = vpop.permute.xlu0 %2842  ;;  %v12926_v7 = vpop.permute.xlu1 %3180 }
 0x2d6   : > { %3414 = vperm.xlu0 %11492, %v9485_v15   ;;  %3522 = vperm.xlu1 %11493, %v9500_v27  }
 0x2d9   : > { %v12922_v51 = vpop.permute.xlu0 %3185  ;;  %v12932_v23 = vpop.permute.xlu1 %3078 }
 0x2da   : > { %3527 = vperm.xlu0 %11492, %v9501_v45   ;;  %3715 = vperm.xlu1 %11493, %v9516_v2  }
 0x2dd   : > { %v12930_v12 = vpop.permute.xlu0 %3083  ;;  %v12942_v57 = vpop.permute.xlu1 %2847 }
 0x2de   : > { %3720 = vperm.xlu0 %11492, %v9517_v14   ;;  %3834 = vperm.xlu1 %11493, %v9530_v0  }
 0x2e1   : > { %v12936_v52 = vpop.permute.xlu0 %2852  ;;  %v12954_v33 = vpop.permute.xlu1 %3190 }
 0x2e2   : > { %3839 = vperm.xlu0 %11492, %v9531_v13   ;;  %3419 = vperm.xlu1 %11493, %v9486_v31  }
 0x2e5   : > { %v12952_v62 = vpop.permute.xlu0 %3195  ;;  %v12965_v27 = vpop.permute.xlu1 %3088 }
 0x2e6   : > { %3424 = vperm.xlu0 %11492, %v9487_v30   ;;  %3532 = vperm.xlu1 %11493, %v9502_v36  }
 0x2e9   : > { %v12961_v39 = vpop.permute.xlu0 %3093  ;;  %v12975_v13 = vpop.permute.xlu1 %2857 }
 0x2ea   : > { %3537 = vperm.xlu0 %11492, %v9503_v38   ;;  %3725 = vperm.xlu1 %11493, %v9518_v43  }
 0x2ed   : > { %v12973_v0 = vpop.permute.xlu0 %2862  ;;  %v12985_v43 = vpop.permute.xlu1 %3200 }
 0x2ee   : > { %3730 = vperm.xlu0 %11492, %v9519_v61   ;;  %3844 = vperm.xlu1 %11493, %v9532_v10  }
 0x2f1   : > { %v12981_v36 = vpop.permute.xlu0 %3205 }
 0x2f2   : > { %3849 = vperm.xlu0 %11492, %v9533_v26   ;;  %3429 = vperm.xlu1 %11493, %v9488_v3  }
 0x2f5   : > { %v12993_v3 = vpop.permute.xlu0 %3103 }
 0x2f6   : > { %3434 = vperm.xlu0 %11492, %v9489_v40   ;;  %3542 = vperm.xlu1 %11493, %v9504_v32   ;;  %v12995_v40 = vpop.permute.xlu1 %3098 }
 0x2f9   : > { %v12997_v32 = vpop.permute.xlu0 %2872 }
 0x2fa   : > { %3547 = vperm.xlu0 %11492, %v9505_v19   ;;  %3735 = vperm.xlu1 %11493, %v9520_v50   ;;  %v12999_v19 = vpop.permute.xlu1 %2867 }
 0x2fb   : > { %v12940_v17 = vpop.f32.mrb[0].mxu1 }
 0x2fc   : > { %15825 = vst [vmem:[#allocation30_spill] sm:$0xff] %v12940_v17  ;;  %v12944_v44 = vpop.f32.mrb[1].mxu1 }
 0x2fd   : > { %15826 = vst [vmem:[#allocation29_spill] sm:$0xff] %v12944_v44  ;;  %v13001_v50 = vpop.permute.xlu0 %3215 }
 0x2fe   : > { %3740 = vperm.xlu0 %11492, %v9521_v4   ;;  %3854 = vperm.xlu1 %11493, %v9534_v41   ;;  %v13003_v4 = vpop.permute.xlu1 %3210 }
 0x2ff   : > { %v12948_v47 = vpop.f32.mrb[2].mxu1 }
 0x300   : > { %15827 = vst [vmem:[#allocation31_spill] sm:$0xff] %v12948_v47  ;;  %v12950_v21 = vpop.f32.mrb[3].mxu1 }
 0x301   : > { %15828 = vst [vmem:[#allocation32_spill] sm:$0xff] %v12950_v21  ;;  %v13005_v41 = vpop.permute.xlu0 %3113 }
 0x302   : > { %3859 = vperm.xlu0 %11492, %v9535_v9   ;;  %3864 = vperm.xlu1 %11493, %v9536_v59   ;;  %v13007_v9 = vpop.permute.xlu1 %3108 }
 0x303   : > { %v12957_v18 = vpop.f32.mrb[4].mxu1 }
 0x304   : > { %15829 = vst [vmem:[#allocation34_spill] sm:$0xff] %v12957_v18  ;;  %v12959_v20 = vpop.f32.mrb[5].mxu1 }
 0x305   : > { %15830 = vst [vmem:[#allocation38_spill] sm:$0xff] %v12959_v20  ;;  %v13009_v59 = vpop.permute.xlu0 %3225 }
 0x306   : > { %3869 = vperm.xlu0 %11492, %v9537_v11   ;;  %v13011_v11 = vpop.permute.xlu1 %3220 }
 0x307   : > { %v12963_v15 = vpop.f32.mrb[6].mxu1 }
 0x308   : > { %15831 = vst [vmem:[#allocation33_spill] sm:$0xff] %v12963_v15  ;;  %v12967_v45 = vpop.f32.mrb[7].mxu1 }
 0x309   : > { %15832 = vst [vmem:[#allocation36_spill] sm:$0xff] %v12967_v45 }
 0x30b   : > { %v12969_v2 = vpop.f32.mrb[8].mxu1 }
 0x30c   : > { %15833 = vst [vmem:[#allocation39_spill] sm:$0xff] %v12969_v2  ;;  %v12971_v14 = vpop.f32.mrb[9].mxu1 }
 0x30d   : > { %15834 = vst [vmem:[#allocation35_spill] sm:$0xff] %v12971_v14 }
 0x30f   : > { %v12977_v31 = vpop.f32.mrb[10].mxu1 }
 0x310   : > { %15835 = vst [vmem:[#allocation37_spill] sm:$0xff] %v12977_v31  ;;  %v12979_v30 = vpop.f32.mrb[11].mxu1 }
 0x311   : > { %15836 = vst [vmem:[#allocation40_spill] sm:$0xff] %v12979_v30 }
 0x313   : > { %v12983_v38 = vpop.f32.mrb[12].mxu1 }
 0x314   : > { %15837 = vst [vmem:[#allocation42_spill] sm:$0xff] %v12983_v38  ;;  %v12987_v61 = vpop.f32.mrb[13].mxu1 }
 0x315   : > { %15838 = vst [vmem:[#allocation46_spill] sm:$0xff] %v12987_v61 }
 0x317   : > { %v12989_v10 = vpop.f32.mrb[14].mxu1 }
 0x318   : > { %15839 = vst [vmem:[#allocation41_spill] sm:$0xff] %v12989_v10  ;;  %v12991_v26 = vpop.f32.mrb[15].mxu1  ;;  %v13015_v10 = vpop.permute.xlu1 %3359 }
 0x319   : > { %15840 = vst [vmem:[#allocation44_spill] sm:$0xff] %v12991_v26  ;;  %v13013_v26 = vpop.permute.xlu0 %3364 }
 0x31c   : > { %v13019_v38 = vpop.permute.xlu1 %3472 }
 0x31d   : > { %v13017_v61 = vpop.permute.xlu0 %3477  ;;  %15841 = vst [vmem:[#allocation47_spill] sm:$0xff] %v13019_v38 }
 0x320   : > { %v13023_v31 = vpop.permute.xlu1 %3665 }
 0x321   : > { %v13021_v30 = vpop.permute.xlu0 %3670  ;;  %15843 = vst [vmem:[#allocation45_spill] sm:$0xff] %v13023_v31 }
 0x322   : > { %15842 = vst [vmem:[#allocation43_spill] sm:$0xff] %v13021_v30 }
 0x324   : > { %v13027_v2 = vpop.permute.xlu1 %3369 }
 0x325   : > { %v13025_v14 = vpop.permute.xlu0 %3374  ;;  %15845 = vst [vmem:[#allocation51_spill] sm:$0xff] %v13027_v2 }
 0x326   : > { %15844 = vst [vmem:[#allocation48_spill] sm:$0xff] %v13025_v14 }
 0x328   : > { %v13031_v15 = vpop.permute.xlu1 %3482 }
 0x329   : > { %v13029_v45 = vpop.permute.xlu0 %3487  ;;  %15847 = vst [vmem:[#allocation53_spill] sm:$0xff] %v13031_v15 }
 0x32a   : > { %15846 = vst [vmem:[#allocation52_spill] sm:$0xff] %v13029_v45 }
 0x32c   : > { %v13035_v18 = vpop.permute.xlu1 %3675 }
 0x32d   : > { %v13033_v20 = vpop.permute.xlu0 %3680  ;;  %15849 = vst [vmem:[#allocation55_spill] sm:$0xff] %v13035_v18 }
 0x32e   : > { %15848 = vst [vmem:[#allocation49_spill] sm:$0xff] %v13033_v20 }
 0x330   : > { %v13039_v47 = vpop.permute.xlu1 %3794 }
 0x331   : > { %v13037_v21 = vpop.permute.xlu0 %3799  ;;  %15851 = vst [vmem:[#allocation54_spill] sm:$0xff] %v13039_v47 }
 0x332   : > { %15850 = vst [vmem:[#allocation59_spill] sm:$0xff] %v13037_v21 }
 0x334   : > { %v13043_v44 = vpop.permute.xlu1 %3379 }
 0x335   : > { %v13041_v17 = vpop.permute.xlu0 %3384  ;;  %15853 = vst [vmem:[#allocation60_spill] sm:$0xff] %v13043_v44 }
 0x336   : > { %15852 = vst [vmem:[#allocation57_spill] sm:$0xff] %v13041_v17 }
 0x338   : > { %v13047_v14 = vpop.permute.xlu1 %3492 }
 0x339   : > { %v13045_v31 = vpop.permute.xlu0 %3497  ;;  %15855 = vst [vmem:[#allocation56_spill] sm:$0xff] %v13047_v14 }
 0x33a   : > { %15854 = vst [vmem:[#allocation50_spill] sm:$0xff] %v13045_v31 }
 0x33c   : > { %v13051_v45 = vpop.permute.xlu1 %3685 }
 0x33d   : > { %v13049_v2 = vpop.permute.xlu0 %3690  ;;  %15857 = vst [vmem:[#allocation61_spill] sm:$0xff] %v13051_v45 }
 0x33e   : > { %15856 = vst [vmem:[#allocation58_spill] sm:$0xff] %v13049_v2 }
 0x340   : > { %v13055_v20 = vpop.permute.xlu1 %3804 }
 0x341   : > { %v13053_v15 = vpop.permute.xlu0 %3809  ;;  %15859 = vst [vmem:[#allocation63_spill] sm:$0xff] %v13055_v20 }
 0x342   : > { %15858 = vst [vmem:[#allocation62_spill] sm:$0xff] %v13053_v15 }
 0x344   : > { %v13059_v21 = vpop.permute.xlu1 %3389 }
 0x345   : > { %v13057_v18 = vpop.permute.xlu0 %3394  ;;  %15861 = vst [vmem:[#allocation65_spill] sm:$0xff] %v13059_v21 }
 0x346   : > { %15860 = vst [vmem:[#allocation64_spill] sm:$0xff] %v13057_v18 }
 0x348   : > { %v13069_v38 = vpop.permute.xlu1 %3502 }
 0x349   : > { %v13065_v45 = vpop.permute.xlu0 %3507 }
 0x37a   : > { %v10473_v47 = vpop.f32.mrb[16].mxu1 }
 0x37b   : > { %v2947_v17 = vadd.f32 %v10473_v47, %v12830_v53  ;;  %v2941_v44 = vpop.f32.mrb[17].mxu1 }
 0x37c   : > { %v2942_v31 = vadd.f32 %v2941_v44, %v12827_v55  ;;  %v13087_v44 = vpop.permute.xlu1 %3695 }
 0x37d   : > { %v3117_v14 = vmul.f32 %v12836_v34, %v2947_v17 }
 0x37e   : > { %v3116_v2 = vmul.f32 %v12839_v35, %v2942_v31  ;;  %v10476_v30 = vpop.f32.mrb[18].mxu1 }
 0x37f   : > { %v3229_v15 = vadd.f32 %v12856_v8, %v3117_v14  ;;  %v2957_v20 = vadd.f32 %v10476_v30, %v12845_v37  ;;  %v2951_v18 = vpop.f32.mrb[19].mxu1  ;;  %v13083_v8 = vpop.permute.xlu0 %3700 }
 0x380   : > { %v3228_v21 = vadd.f32 %v12859_v5, %v3116_v2  ;;  %v2952_v53 = vadd.f32 %v2951_v18, %v12849_v49  ;;  %v13105_v14 = vpop.permute.xlu1 %3814 }
 0x381   : > { %v13073_v47 = vmax.f32 %v3229_v15, 0.0  ;;  %v3119_v55 = vmul.f32 %v12865_v6, %v2957_v20 }
 0x382   : > { %v13076_v34 = vmax.f32 %v3228_v21, 0.0  ;;  %v3118_v35 = vmul.f32 %v12869_v28, %v2952_v53  ;;  %v10479_v17 = vpop.f32.mrb[20].mxu1 }
 0x383   : > { %3295 = vrot.lane.b32.xlu0 %v13073_v47, %s15657_s23  ;;  %v2961_v37 = vpop.f32.mrb[21].mxu1  ;;  %v3231_v49 = vadd.f32 %v12880_v48, %v3119_v55  ;;  %v2967_v5 = vadd.f32 %v10479_v17, %v12874_v60 }
 0x384   : > { %3293 = vrot.lane.b32.xlu1 %v13076_v34, %s15657_s23  ;;  %v3230_v6 = vadd.f32 %v12884_v46, %v3118_v35  ;;  %v2962_v28 = vadd.f32 %v2961_v37, %v12876_v56  ;;  %v13101_v46 = vpop.permute.xlu0 %3819  ;;  %v13122_v37 = vpop.permute.xlu1 %3399 }
 0x385   : > { %v13095_v20 = vmax.f32 %v3231_v49, 0.0  ;;  %v3121_v48 = vmul.f32 %v12888_v63, %v2967_v5 }
 0x386   : > { %v10482_v21 = vpop.f32.mrb[22].mxu1  ;;  %v13098_v15 = vmax.f32 %v3230_v6, 0.0  ;;  %v3120_v60 = vmul.f32 %v12890_v54, %v2962_v28 }
 0x387   : > { %3601 = vrot.lane.b32.xlu0 %v13073_v47, %s15655_s2  ;;  %v2971_v18 = vpop.f32.mrb[23].mxu1  ;;  %v3233_v31 = vadd.f32 %v12902_v42, %v3121_v48  ;;  %v2977_v63 = vadd.f32 %v10482_v21, %v12894_v1 }
 0x388   : > { %3599 = vrot.lane.b32.xlu1 %v13076_v34, %s15655_s2  ;;  %v3232_v30 = vadd.f32 %v12904_v29, %v3120_v60  ;;  %v2972_v54 = vadd.f32 %v2971_v18, %v12898_v25  ;;  %v13117_v35 = vpop.permute.xlu0 %3404  ;;  %v13139_v48 = vpop.permute.xlu1 %3512 }
 0x389   : > { %v13119_v17 = vmax.f32 %v3233_v31, 0.0  ;;  %v3123_v42 = vmul.f32 %v12908_v24, %v2977_v63 }
 0x38a   : > { %v10485_v2 = vpop.f32.mrb[24].mxu1  ;;  %v13124_v1 = vmax.f32 %v3232_v30, 0.0  ;;  %v3122_v25 = vmul.f32 %v12912_v22, %v2972_v54 }
 0x38b   : > { %3299 = vrot.lane.b32.xlu0 %v13095_v20, %s15657_s23  ;;  %v2981_v56 = vpop.f32.mrb[25].mxu1  ;;  %v3235_v5 = vadd.f32 %v12922_v51, %v3123_v42  ;;  %v2987_v6 = vadd.f32 %v10485_v2, %v12916_v58 }
 0x38c   : > { %3297 = vrot.lane.b32.xlu1 %v13098_v15, %s15657_s23  ;;  %v3234_v24 = vadd.f32 %v12926_v7, %v3122_v25  ;;  %v2982_v28 = vadd.f32 %v2981_v56, %v12918_v16  ;;  %v13135_v18 = vpop.permute.xlu0 %3517  ;;  %v13157_v31 = vpop.permute.xlu1 %3705 }
 0x38d   : > { %v13143_v60 = vmax.f32 %v3235_v5, 0.0  ;;  %v3125_v58 = vmul.f32 %v12930_v12, %v2987_v6 }
 0x38e   : > { %v10488_v53 = vpop.f32.mrb[26].mxu1  ;;  %v13146_v51 = vmax.f32 %v3234_v24, 0.0  ;;  %v3124_v16 = vmul.f32 %v12932_v23, %v2982_v28 }
 0x38f   : > { %3605 = vrot.lane.b32.xlu0 %v13095_v20, %s15655_s2  ;;  %v2991_v55 = vpop.f32.mrb[27].mxu1  ;;  %v3237_v2 = vadd.f32 %v12952_v62, %v3125_v58  ;;  %v2997_v56 = vadd.f32 %v10488_v53, %v12936_v52  ;;  %v9555_v58 = vld [vmem:[%s11835_s30 + $0x88] sm:$0xff] }
 0x390   : > { %3603 = vrot.lane.b32.xlu1 %v13098_v15, %s15655_s2  ;;  %v13153_v7 = vpop.permute.xlu0 %3710  ;;  %v3236_v12 = vadd.f32 %v12954_v33, %v3124_v16  ;;  %v2992_v63 = vadd.f32 %v2991_v55, %v12942_v57  ;;  %v13175_v57 = vpop.permute.xlu1 %3824 }
 0x391   : > { %v13165_v23 = vmax.f32 %v3237_v2, 0.0  ;;  %v3127_v30 = vmul.f32 %v12961_v39, %v2997_v56  ;;  %v9554_v2 = vld [vmem:[%s11835_s30 + $0x80] sm:$0xff] }
 0x392   : > { %v10491_v29 = vpop.f32.mrb[28].mxu1  ;;  %v13168_v54 = vmax.f32 %v3236_v12, 0.0  ;;  %v3126_v52 = vmul.f32 %v12965_v27, %v2992_v63  ;;  %v9571_v12 = vld [vmem:[%s15746_s6 + $0x88] sm:$0xff]  ;;  %v9570_v63 = vld [vmem:[%s15746_s6 + $0x80] sm:$0xff] }
 0x393   : > { %3303 = vrot.lane.b32.xlu0 %v13119_v17, %s15657_s23  ;;  %v3001_v49 = vpop.f32.mrb[29].mxu1  ;;  %v3239_v33 = vadd.f32 %v12981_v36, %v3127_v30  ;;  %v3007_v53 = vadd.f32 %v10491_v29, %v12973_v0 }
 0x394   : > { %3301 = vrot.lane.b32.xlu1 %v13124_v1, %s15657_s23  ;;  %v13171_v62 = vpop.permute.xlu0 %3829  ;;  %v3238_v39 = vadd.f32 %v12985_v43, %v3126_v52  ;;  %v3002_v55 = vadd.f32 %v3001_v49, %v12975_v13  ;;  %v13192_v5 = vpop.permute.xlu1 %3409 }
 0x395   : > { %v13189_v42 = vmax.f32 %v3239_v33, 0.0  ;;  %v3129_v25 = vmul.f32 %v12993_v3, %v3007_v53  ;;  %v9557_v33 = vld [vmem:[%s11835_s30 + $0x98] sm:$0xff]  ;;  %v9556_v53 = vld [vmem:[%s11835_s30 + $0x90] sm:$0xff] }
 0x396   : > { %v10494_v21 = vpop.f32.mrb[30].mxu1  ;;  %v13194_v36 = vmax.f32 %v3238_v39, 0.0  ;;  %v3128_v0 = vmul.f32 %v12995_v40, %v3002_v55  ;;  %v9587_v39 = vld [vmem:[%s15745_s12 + $0x88] sm:$0xff] }
 0x397   : > { %3609 = vrot.lane.b32.xlu0 %v13119_v17, %s15655_s2  ;;  %v3011_v22 = vpop.f32.mrb[31].mxu1  ;;  %v3241_v13 = vadd.f32 %v13001_v50, %v3129_v25  ;;  %v3017_v43 = vadd.f32 %v10494_v21, %v12997_v32  ;;  %v9586_v25 = vld [vmem:[%s15745_s12 + $0x80] sm:$0xff] }
 0x398   : > { %3607 = vrot.lane.b32.xlu1 %v13124_v1, %s15655_s2  ;;  %v13187_v27 = vpop.permute.xlu0 %3414  ;;  %v3240_v29 = vadd.f32 %v13003_v4, %v3128_v0  ;;  %v3012_v3 = vadd.f32 %v3011_v22, %v12999_v19  ;;  %v13209_v40 = vpop.permute.xlu1 %3522 }
 0x399   : > { %v13213_v6 = vmax.f32 %v3241_v13, 0.0  ;;  %v3131_v50 = vmul.f32 %v13005_v41, %v3017_v43  ;;  %v9573_v13 = vld [vmem:[%s15746_s6 + $0x98] sm:$0xff]  ;;  %v9572_v43 = vld [vmem:[%s15746_s6 + $0x90] sm:$0xff] }
 0x39a   : > { %v13216_v24 = vmax.f32 %v3240_v29, 0.0  ;;  %v3130_v32 = vmul.f32 %v13007_v9, %v3012_v3 }
 0x39b   : > { %3307 = vrot.lane.b32.xlu0 %v13143_v60, %s15657_s23  ;;  %v3243_v4 = vadd.f32 %v13009_v59, %v3131_v50  ;;  %v9559_v50 = vld [vmem:[%s11835_s30 + $0xa8] sm:$0xff] }
 0x39c   : > { %3305 = vrot.lane.b32.xlu1 %v13146_v51, %s15657_s23  ;;  %v13205_v49 = vpop.permute.xlu0 %3527  ;;  %v13226_v28 = vpop.permute.xlu1 %3715  ;;  %v3242_v41 = vadd.f32 %v13011_v11, %v3130_v32  ;;  %v9538_v11 = vld [vmem:[%s11830_s24 + $0x80] sm:$0xff] }
 0x39d   : > { %v13233_v9 = vmax.f32 %v3243_v4, 0.0  ;;  %10527 = vmatprep.mubr.f32.mxu1 %v9538_v11  ;;  %v9558_v32 = vld [vmem:[%s11835_s30 + $0xa0] sm:$0xff]  ;;  %v9589_v4 = vld [vmem:[%s15745_s12 + $0x98] sm:$0xff]  ;;  %v9588_v11 = vld [vmem:[%s15745_s12 + $0x90] sm:$0xff] }
 0x39e   : > { %v13235_v21 = vmax.f32 %v3242_v41, 0.0 }
 0x39f   : > { %3613 = vrot.lane.b32.xlu0 %v13143_v60, %s15655_s2  ;;  %15862 = vst [vmem:[#allocation66_spill] sm:$0xff] %v13233_v9 }
 0x3a0   : > { %3611 = vrot.lane.b32.xlu1 %v13146_v51, %s15655_s2  ;;  %v13223_v19 = vpop.permute.xlu0 %3720  ;;  %15863 = vst [vmem:[#allocation67_spill] sm:$0xff] %v13235_v21  ;;  %v13241_v59 = vpop.permute.xlu1 %3834 }
 0x3a3   : > { %3311 = vrot.lane.b32.xlu0 %v13165_v23, %s15657_s23 }
 0x3a4   : > { %3309 = vrot.lane.b32.xlu1 %v13168_v54, %s15657_s23  ;;  %v13237_v22 = vpop.permute.xlu0 %3839  ;;  %v13254_v56 = vpop.permute.xlu1 %3419 }
 0x3a7   : > { %3617 = vrot.lane.b32.xlu0 %v13165_v23, %s15655_s2 }
 0x3a8   : > { %3615 = vrot.lane.b32.xlu1 %v13168_v54, %s15655_s2  ;;  %v13251_v16 = vpop.permute.xlu0 %3424  ;;  %v13260_v52 = vpop.permute.xlu1 %3532 }
 0x3ab   : > { %3315 = vrot.lane.b32.xlu0 %v13189_v42, %s15657_s23 }
 0x3ac   : > { %3313 = vrot.lane.b32.xlu1 %v13194_v36, %s15657_s23  ;;  %v13258_v30 = vpop.permute.xlu0 %3537  ;;  %v13268_v0 = vpop.permute.xlu1 %3725 }
 0x3af   : > { %3621 = vrot.lane.b32.xlu0 %v13189_v42, %s15655_s2 }
 0x3b0   : > { %3619 = vrot.lane.b32.xlu1 %v13194_v36, %s15655_s2  ;;  %v13265_v55 = vpop.permute.xlu0 %3730  ;;  %v13274_v3 = vpop.permute.xlu1 %3844 }
 0x3b3   : > { %3319 = vrot.lane.b32.xlu0 %v13213_v6, %s15657_s23 }
 0x3b4   : > { %3317 = vrot.lane.b32.xlu1 %v13216_v24, %s15657_s23  ;;  %v13272_v29 = vpop.permute.xlu0 %3849 }
 0x3b7   : > { %3625 = vrot.lane.b32.xlu0 %v13213_v6, %s15655_s2 }
 0x3b8   : > { %3623 = vrot.lane.b32.xlu1 %v13216_v24, %s15655_s2  ;;  %v13279_v41 = vpop.permute.xlu0 %3434 }
 0x3b9   : > { %15864 = vst [vmem:[#allocation68_spill] sm:$0xff] %v13279_v41  ;;  %v9594_v41 = vld [vmem:[%s15745_s12 + $0xc0] sm:$0xff] }
 0x3bb   : > { %3323 = vrot.lane.b32.xlu0 %v13233_v9, %s15657_s23 }
 0x3bc   : > { %3321 = vrot.lane.b32.xlu1 %v13235_v21, %s15657_s23  ;;  %s15917_s23 = sld [smem:[#allocation14_spill]] }
 0x3bf   : > { %3629 = vrot.lane.b32.xlu0 %v13233_v9, %s15655_s2  ;;  %v15874_v9 = vld [vmem:[#allocation47_spill] sm:$0xff] }
 0x3c0   : > { %3627 = vrot.lane.b32.xlu1 %v13235_v21, %s15655_s2  ;;  %s15916_s2 = sld [smem:[#allocation15_spill]] }
 0x3c3   : > { %3929 = vperm.xlu0 %11492, %v9555_v58   ;;  %v13282_v58 = vpop.permute.xlu1 %3429 }
 0x3c4   : > { %3924 = vperm.xlu1 %11493, %v9554_v2   ;;  %15865 = vst [vmem:[#allocation69_spill] sm:$0xff] %v13282_v58  ;;  %v9575_v2 = vld [vmem:[%s15746_s6 + $0xa8] sm:$0xff] }
 0x3c7   : > { %4171 = vperm.xlu0 %11492, %v9571_v12   ;;  %v9574_v12 = vld [vmem:[%s15746_s6 + $0xa0] sm:$0xff] }
 0x3c8   : > { %4166 = vperm.xlu1 %11493, %v9570_v63   ;;  %v13286_v63 = vpop.permute.xlu0 %3547 }
 0x3c9   : > { %15866 = vst [vmem:[#allocation70_spill] sm:$0xff] %v13286_v63 }
 0x3cb   : > { %3939 = vperm.xlu0 %11492, %v9557_v33   ;;  %v13288_v33 = vpop.permute.xlu1 %3542 }
 0x3cc   : > { %3934 = vperm.xlu1 %11493, %v9556_v53   ;;  %15867 = vst [vmem:[#allocation71_spill] sm:$0xff] %v13288_v33  ;;  %v9561_v53 = vld [vmem:[%s11835_s30 + $0xb8] sm:$0xff] }
 0x3cf   : > { %4284 = vperm.xlu0 %11492, %v9587_v39   ;;  %v9560_v39 = vld [vmem:[%s11835_s30 + $0xb0] sm:$0xff] }
 0x3d0   : > { %4279 = vperm.xlu1 %11493, %v9586_v25   ;;  %v9591_v25 = vld [vmem:[%s15745_s12 + $0xa8] sm:$0xff] }
 0x3d3   : > { %4181 = vperm.xlu0 %11492, %v9573_v13   ;;  %v13293_v13 = vpop.permute.xlu0 %3740 }
 0x3d4   : > { %4176 = vperm.xlu1 %11493, %v9572_v43   ;;  %15868 = vst [vmem:[#allocation72_spill] sm:$0xff] %v13293_v13  ;;  %v9590_v43 = vld [vmem:[%s15745_s12 + $0xa0] sm:$0xff] }
 0x3d7   : > { %3949 = vperm.xlu0 %11492, %v9559_v50   ;;  %v13296_v50 = vpop.permute.xlu1 %3735 }
 0x3d8   : > { %3944 = vperm.xlu1 %11493, %v9558_v32   ;;  %15869 = vst [vmem:[#allocation73_spill] sm:$0xff] %v13296_v50  ;;  %v9577_v32 = vld [vmem:[%s15746_s6 + $0xb8] sm:$0xff]  ;;  %v9579_v50 = vld [vmem:[%s15746_s6 + $0xc8] sm:$0xff] }
 0x3db   : > { %4294 = vperm.xlu0 %11492, %v9589_v4   ;;  %v9576_v4 = vld [vmem:[%s15746_s6 + $0xb0] sm:$0xff] }
 0x3dc   : > { %4289 = vperm.xlu1 %11493, %v9588_v11   ;;  %v13300_v11 = vpop.permute.xlu0 %3859 }
 0x3dd   : > { %15870 = vst [vmem:[#allocation74_spill] sm:$0xff] %v13300_v11 }
 0x3df   : > { %4191 = vperm.xlu0 %11492, %v9575_v2   ;;  %v13302_v2 = vpop.permute.xlu1 %3854 }
 0x3e0   : > { %4186 = vperm.xlu1 %11493, %v9574_v12   ;;  %15871 = vst [vmem:[#allocation75_spill] sm:$0xff] %v13302_v2  ;;  %v9563_v12 = vld [vmem:[%s11835_s30 + $0xc8] sm:$0xff]  ;;  %v13307_v13 = vpop.permute.xlu0 %3869 }
 0x3e1   : > { %15872 = vst [vmem:[#allocation76_spill] sm:$0xff] %v13307_v13  ;;  %v9565_v13 = vld [vmem:[%s11835_s30 + $0xd8] sm:$0xff] }
 0x3e3   : > { %3959 = vperm.xlu0 %11492, %v9561_v53   ;;  %v9562_v53 = vld [vmem:[%s11835_s30 + $0xc0] sm:$0xff] }
 0x3e4   : > { %3954 = vperm.xlu1 %11493, %v9560_v39   ;;  %v9593_v39 = vld [vmem:[%s15745_s12 + $0xb8] sm:$0xff] }
 0x3e7   : > { %4304 = vperm.xlu0 %11492, %v9591_v25   ;;  %v9592_v25 = vld [vmem:[%s15745_s12 + $0xb0] sm:$0xff] }
 0x3e8   : > { %4299 = vperm.xlu1 %11493, %v9590_v43   ;;  %v13310_v43 = vpop.permute.xlu1 %3864 }
 0x3e9   : > { %15873 = vst [vmem:[#allocation77_spill] sm:$0xff] %v13310_v43  ;;  %v9564_v43 = vld [vmem:[%s11835_s30 + $0xd0] sm:$0xff] }
 0x3eb   : > { %4201 = vperm.xlu0 %11492, %v9577_v32   ;;  %v9578_v32 = vld [vmem:[%s15746_s6 + $0xc0] sm:$0xff] }
 0x3ec   : > { %4196 = vperm.xlu1 %11493, %v9576_v4  }
 0x3ef   : > { %3969 = vperm.xlu0 %11492, %v9563_v12  }
 0x3f0   : > { %3964 = vperm.xlu1 %11493, %v9562_v53  }
 0x3f3   : > { %4314 = vperm.xlu0 %11492, %v9593_v39   ;;  %v3551_v39 = vmul.f32 %v13017_v61, %v13073_v47  ;;  %v9595_v61 = vld [vmem:[%s15745_s12 + $0xc8] sm:$0xff] }
 0x3f4   : > { %4309 = vperm.xlu1 %11493, %v9592_v25  }
 0x3f5   : > { %v3296_v33 = vpop.permute.xlu0 %3295 }
 0x3f6   : > { %v3342_v21 = vsel %vm1052_vm1, 0.0, %v3296_v33  ;;  %v3294_v4 = vpop.permute.xlu1 %3293  ;;  %v3550_v33 = vmul.f32 %v15874_v9, %v13076_v34 }
 0x3f7   : > { %v3438_v63 = vmul.f32 %v13013_v26, %v3342_v21  ;;  %v3341_v12 = vsel %vm1052_vm1, 0.0, %v3294_v4  ;;  %4211 = vperm.xlu0 %11492, %v9579_v50   ;;  %v15875_v4 = vld [vmem:[#allocation43_spill] sm:$0xff] }
 0x3f8   : > { %v3437_v53 = vmul.f32 %v13015_v10, %v3341_v12  ;;  %4206 = vperm.xlu1 %11493, %v9578_v32   ;;  %v15876_v12 = vld [vmem:[#allocation45_spill] sm:$0xff] }
 0x3f9   : > { %v3602_v25 = vpop.permute.xlu0 %3601  ;;  %v3567_v21 = vadd.f32 %v3551_v39, %v3438_v63  ;;  %v15877_v63 = vld [vmem:[#allocation48_spill] sm:$0xff] }
 0x3fa   : > { %v3648_v2 = vsel %vm1085_vm4, %v3602_v25, 0.0  ;;  %v3600_v26 = vpop.permute.xlu1 %3599  ;;  %v3566_v32 = vadd.f32 %v3550_v33, %v3437_v53  ;;  %v15879_v33 = vld [vmem:[#allocation51_spill] sm:$0xff] }
 0x3fb   : > { %v3744_v50 = vmul.f32 %v15875_v4, %v3648_v2  ;;  %v3647_v10 = vsel %vm1085_vm4, %v3600_v26, 0.0  ;;  %3979 = vperm.xlu0 %11492, %v9565_v13   ;;  %v15878_v13 = vld [vmem:[#allocation59_spill] sm:$0xff]  ;;  %v15880_v4 = vld [vmem:[#allocation54_spill] sm:$0xff] }
 0x3fc   : > { %v3743_v58 = vmul.f32 %v15876_v12, %v3647_v10  ;;  %3974 = vperm.xlu1 %11493, %v9564_v43   ;;  %v9581_v43 = vld [vmem:[%s15746_s6 + $0xd8] sm:$0xff] }
 0x3fd   : > { %v3760_v47 = vadd.f32 %v3744_v50, %v3567_v21  ;;  %v3300_v11 = vpop.permute.xlu0 %3299  ;;  %v15881_v50 = vld [vmem:[#allocation52_spill] sm:$0xff] }
 0x3fe   : > { %v3759_v34 = vadd.f32 %v3743_v58, %v3566_v32  ;;  %v3344_v9 = vsel %vm1052_vm1, 0.0, %v3300_v11  ;;  %v3298_v25 = vpop.permute.xlu1 %3297  ;;  %v3553_v58 = vmul.f32 %v15881_v50, %v13095_v20  ;;  %v9580_v11 = vld [vmem:[%s15746_s6 + $0xd0] sm:$0xff]  ;;  %v15882_v32 = vld [vmem:[#allocation53_spill] sm:$0xff] }
 0x3ff   : > { %v3440_v39 = vmul.f32 %v15877_v63, %v3344_v9  ;;  %v3343_v2 = vsel %vm1052_vm1, 0.0, %v3298_v25  ;;  %4324 = vperm.xlu0 %11492, %v9595_v61   ;;  %v3873_v53 = vadd.f32 %v15878_v13, %v3760_v47  ;;  %v3552_v12 = vmul.f32 %v15882_v32, %v13098_v15  ;;  %v15883_v63 = vld [vmem:[#allocation49_spill] sm:$0xff]  ;;  %v15884_v13 = vld [vmem:[#allocation55_spill] sm:$0xff] }
 0x400   : > { %v3439_v26 = vmul.f32 %v15879_v33, %v3343_v2  ;;  %4319 = vperm.xlu1 %11493, %v9594_v41   ;;  %v3872_v21 = vadd.f32 %v15880_v4, %v3759_v34  ;;  %v9567_v20 = vld [vmem:[%s11835_s30 + $0xe8] sm:$0xff]  ;;  %v9566_v50 = vld [vmem:[%s11835_s30 + $0xe0] sm:$0xff] }
 0x401   : > { %v3606_v10 = vpop.permute.xlu0 %3605  ;;  %v3569_v25 = vadd.f32 %v3553_v58, %v3440_v39 }
 0x402   : > { %v3650_v61 = vsel %vm1085_vm4, %v3606_v10, 0.0  ;;  %v3604_v9 = vpop.permute.xlu1 %3603  ;;  %v11093_v47 = vpack.c.bf16 %v3873_v53, %v3872_v21  ;;  %v3568_v34 = vadd.f32 %v3552_v12, %v3439_v26  ;;  %v15885_v21 = vld [vmem:[#allocation57_spill] sm:$0xff]  ;;  %v15886_v26 = vld [vmem:[#allocation62_spill] sm:$0xff] }
 0x403   : > { %v3746_v41 = vmul.f32 %v15883_v63, %v3650_v61  ;;  %v3649_v2 = vsel %vm1085_vm4, %v3604_v9, 0.0  ;;  %4221 = vperm.xlu0 %11492, %v9581_v43   ;;  %v9597_v61 = vld [vmem:[%s15745_s12 + $0xd8] sm:$0xff] }
 0x404   : > { %v3745_v33 = vmul.f32 %v15884_v13, %v3649_v2  ;;  %4216 = vperm.xlu1 %11493, %v9580_v11   ;;  %11094 = vmatprep.subr.bf16.mxu1 %v11093_v47  ;;  %v15887_v11 = vld [vmem:[#allocation60_spill] sm:$0xff]  ;;  %v15888_v9 = vld [vmem:[#allocation63_spill] sm:$0xff] }
 0x405   : > { %v3762_v4 = vadd.f32 %v3746_v41, %v3569_v25  ;;  %v3304_v15 = vpop.permute.xlu0 %3303  ;;  %11096 = vmatpush3.bf16.msra.mxu1 %v11093_v47  ;;  %v15889_v47 = vld [vmem:[#allocation50_spill] sm:$0xff] }
 0x406   : > { %v3761_v10 = vadd.f32 %v3745_v33, %v3568_v34  ;;  %v3346_v39 = vsel %vm1052_vm1, 0.0, %v3304_v15  ;;  %v3302_v53 = vpop.permute.xlu1 %3301  ;;  %v3555_v63 = vmul.f32 %v15889_v47, %v13119_v17  ;;  %v9596_v2 = vld [vmem:[%s15745_s12 + $0xd0] sm:$0xff]  ;;  %v15890_v34 = vld [vmem:[#allocation56_spill] sm:$0xff]  ;;  %v9583_v17 = vld [vmem:[%s15746_s6 + $0xe8] sm:$0xff] }
 0x407   : > { %v3442_v58 = vmul.f32 %v15885_v21, %v3346_v39  ;;  %v3345_v43 = vsel %vm1052_vm1, 0.0, %v3302_v53  ;;  %3989 = vperm.xlu0 %11492, %v9567_v20   ;;  %v3875_v32 = vadd.f32 %v15886_v26, %v3762_v4  ;;  %v3554_v13 = vmul.f32 %v15890_v34, %v13124_v1  ;;  %v15891_v39 = vld [vmem:[#allocation58_spill] sm:$0xff]  ;;  %v15892_v21 = vld [vmem:[#allocation61_spill] sm:$0xff] }
 0x408   : > { %v3441_v12 = vmul.f32 %v15887_v11, %v3345_v43  ;;  %3984 = vperm.xlu1 %11493, %v9566_v50   ;;  %v3874_v25 = vadd.f32 %v15888_v9, %v3761_v10  ;;  %v9582_v11 = vld [vmem:[%s15746_s6 + $0xe0] sm:$0xff] }
 0x409   : > { %v3610_v41 = vpop.permute.xlu0 %3609  ;;  %v3571_v15 = vadd.f32 %v3555_v63, %v3442_v58  ;;  %v15894_v63 = vld [vmem:[#allocation65_spill] sm:$0xff] }
 0x40a   : > { %v3652_v33 = vsel %vm1085_vm4, %v3610_v41, 0.0  ;;  %v3608_v20 = vpop.permute.xlu1 %3607  ;;  %v11097_v4 = vpack.c.bf16 %v3875_v32, %v3874_v25  ;;  %v3570_v10 = vadd.f32 %v3554_v13, %v3441_v12  ;;  %v15893_v25 = vld [vmem:[#allocation64_spill] sm:$0xff]  ;;  %v3557_v13 = vmul.f32 %v13065_v45, %v13143_v60  ;;  %v9599_v45 = vld [vmem:[%s15745_s12 + $0xe8] sm:$0xff] }
 0x40b   : > { %v3748_v50 = vmul.f32 %v15891_v39, %v3652_v33  ;;  %v3651_v53 = vsel %vm1085_vm4, %v3608_v20, 0.0  ;;  %4334 = vperm.xlu0 %11492, %v9597_v61   ;;  %v9568_v20 = vld [vmem:[%s11835_s30 + $0xf0] sm:$0xff] }
 0x40c   : > { %v3747_v43 = vmul.f32 %v15892_v21, %v3651_v53  ;;  %4329 = vperm.xlu1 %11493, %v9596_v2   ;;  %11098 = vmatprep.subr.bf16.mxu1 %v11097_v4  ;;  %v9569_v2 = vld [vmem:[%s11835_s30 + $0xf8] sm:$0xff] }
 0x40d   : > { %v3764_v26 = vadd.f32 %v3748_v50, %v3571_v15  ;;  %v3308_v1 = vpop.permute.xlu0 %3307  ;;  %11100 = vmatpush3.bf16.msra.mxu1 %v11097_v4  ;;  %v3556_v4 = vmul.f32 %v13069_v38, %v13146_v51  ;;  %v9598_v51 = vld [vmem:[%s15745_s12 + $0xe0] sm:$0xff] }
 0x40e   : > { %v3763_v9 = vadd.f32 %v3747_v43, %v3570_v10  ;;  %v3348_v58 = vsel %vm1052_vm1, 0.0, %v3308_v1  ;;  %v3306_v32 = vpop.permute.xlu1 %3305 }
 0x40f   : > { %v3444_v47 = vmul.f32 %v15893_v25, %v3348_v58  ;;  %v3347_v61 = vsel %vm1052_vm1, 0.0, %v3306_v32  ;;  %4231 = vperm.xlu0 %11492, %v9583_v17   ;;  %v3877_v12 = vadd.f32 %v13101_v46, %v3764_v26  ;;  %v3559_v32 = vmul.f32 %v13135_v18, %v13165_v23  ;;  %v9601_v18 = vld [vmem:[%s15745_s12 + $0xf8] sm:$0xff] }
 0x410   : > { %v3443_v41 = vmul.f32 %v15894_v63, %v3347_v61  ;;  %4226 = vperm.xlu1 %11493, %v9582_v11   ;;  %v3876_v34 = vadd.f32 %v13105_v14, %v3763_v9  ;;  %v9585_v9 = vld [vmem:[%s15746_s6 + $0xf8] sm:$0xff] }
 0x411   : > { %v3614_v33 = vpop.permute.xlu0 %3613  ;;  %v3573_v50 = vadd.f32 %v3557_v13, %v3444_v47  ;;  %v9584_v47 = vld [vmem:[%s15746_s6 + $0xf0] sm:$0xff] }
 0x412   : > { %v3654_v15 = vsel %vm1085_vm4, %v3614_v33, 0.0  ;;  %v3612_v39 = vpop.permute.xlu1 %3611  ;;  %v11101_v46 = vpack.c.bf16 %v3877_v12, %v3876_v34  ;;  %v3572_v14 = vadd.f32 %v3556_v4, %v3443_v41 }
 0x413   : > { %v3750_v53 = vmul.f32 %v13083_v8, %v3654_v15  ;;  %v3653_v10 = vsel %vm1085_vm4, %v3612_v39, 0.0  ;;  %3999 = vperm.xlu0 %11492, %v9569_v2   ;;  %v3561_v39 = vmul.f32 %v13205_v49, %v13189_v42 }
 0x414   : > { %v3749_v21 = vmul.f32 %v13087_v44, %v3653_v10  ;;  %3994 = vperm.xlu1 %11493, %v9568_v20   ;;  %11102 = vmatprep.subr.bf16.mxu1 %v11101_v46 }
 0x415   : > { %v3766_v60 = vadd.f32 %v3750_v53, %v3573_v50  ;;  %v3312_v38 = vpop.permute.xlu0 %3311  ;;  %11104 = vmatpush3.bf16.msra.mxu1 %v11101_v46  ;;  %v3560_v50 = vmul.f32 %v13209_v40, %v13194_v36 }
 0x416   : > { %v3765_v43 = vadd.f32 %v3749_v21, %v3572_v14  ;;  %v3350_v17 = vsel %vm1052_vm1, 0.0, %v3312_v38  ;;  %v3310_v26 = vpop.permute.xlu1 %3309 }
 0x417   : > { %v3446_v8 = vmul.f32 %v13117_v35, %v3350_v17  ;;  %v3349_v1 = vsel %vm1052_vm1, 0.0, %v3310_v26  ;;  %4344 = vperm.xlu0 %11492, %v9599_v45   ;;  %v3879_v44 = vadd.f32 %v13171_v62, %v3766_v60  ;;  %v3558_v35 = vmul.f32 %v13139_v48, %v13168_v54  ;;  %v9600_v48 = vld [vmem:[%s15745_s12 + $0xf0] sm:$0xff] }
 0x418   : > { %v3445_v11 = vmul.f32 %v13122_v37, %v3349_v1  ;;  %4339 = vperm.xlu1 %11493, %v9598_v51   ;;  %v3878_v58 = vadd.f32 %v13175_v57, %v3765_v43  ;;  %v3562_v26 = vmul.f32 %v13260_v52, %v13216_v24  ;;  %v15895_v52 = vld [vmem:[#allocation68_spill] sm:$0xff] }
 0x419   : > { %v3618_v25 = vpop.permute.xlu0 %3617  ;;  %v3575_v63 = vadd.f32 %v3559_v32, %v3446_v8 }
 0x41a   : > { %v3656_v61 = vsel %vm1085_vm4, %v3618_v25, 0.0  ;;  %v3616_v12 = vpop.permute.xlu1 %3615  ;;  %v11105_v62 = vpack.c.bf16 %v3879_v44, %v3878_v58  ;;  %v3574_v57 = vadd.f32 %v3558_v35, %v3445_v11 }
 0x41b   : > { %v3752_v37 = vmul.f32 %v13153_v7, %v3656_v61  ;;  %v3655_v41 = vsel %vm1085_vm4, %v3616_v12, 0.0  ;;  %4241 = vperm.xlu0 %11492, %v9585_v9   ;;  %v15898_v12 = vld [vmem:[#allocation75_spill] sm:$0xff] }
 0x41c   : > { %v3751_v2 = vmul.f32 %v13157_v31, %v3655_v41  ;;  %4236 = vperm.xlu1 %11493, %v9584_v47   ;;  %11106 = vmatprep.subr.bf16.mxu1 %v11105_v62  ;;  %v15896_v47 = vld [vmem:[#allocation74_spill] sm:$0xff] }
 0x41d   : > { %v3768_v23 = vadd.f32 %v3752_v37, %v3575_v63  ;;  %v3316_v34 = vpop.permute.xlu0 %3315  ;;  %11108 = vmatpush3.bf16.msra.mxu1 %v11105_v62  ;;  %v15899_v63 = vld [vmem:[#allocation66_spill] sm:$0xff] }
 0x41e   : > { %v3767_v54 = vadd.f32 %v3751_v2, %v3574_v57  ;;  %v3352_v13 = vsel %vm1052_vm1, 0.0, %v3316_v34  ;;  %v3314_v33 = vpop.permute.xlu1 %3313  ;;  %v15901_v57 = vld [vmem:[#allocation67_spill] sm:$0xff] }
 0x41f   : > { %v3448_v20 = vmul.f32 %v13187_v27, %v3352_v13  ;;  %v3351_v7 = vsel %vm1052_vm1, 0.0, %v3314_v33  ;;  %4354 = vperm.xlu0 %11492, %v9601_v18   ;;  %v3881_v4 = vadd.f32 %v13237_v22, %v3768_v23  ;;  %v15902_v2 = vld [vmem:[#allocation71_spill] sm:$0xff]  ;;  %v15903_v13 = vld [vmem:[#allocation72_spill] sm:$0xff] }
 0x420   : > { %v3447_v31 = vmul.f32 %v13192_v5, %v3351_v7  ;;  %4349 = vperm.xlu1 %11493, %v9600_v48   ;;  %v3880_v15 = vadd.f32 %v13241_v59, %v3767_v54  ;;  %v3564_v18 = vmul.f32 %v15902_v2, %v15901_v57 }
 0x421   : > { %v3622_v46 = vpop.permute.xlu0 %3621  ;;  %v3577_v14 = vadd.f32 %v3561_v39, %v3448_v20 }
 0x422   : > { %v3658_v53 = vsel %vm1085_vm4, %v3622_v46, 0.0  ;;  %v3620_v27 = vpop.permute.xlu1 %3619  ;;  %v11109_v10 = vpack.c.bf16 %v3881_v4, %v3880_v15  ;;  %v3576_v5 = vadd.f32 %v3560_v50, %v3447_v31  ;;  %v15904_v4 = vld [vmem:[#allocation73_spill] sm:$0xff]  ;;  %v15905_v46 = vld [vmem:[#allocation76_spill] sm:$0xff] }
 0x423   : > { %v3754_v21 = vmul.f32 %v13223_v19, %v3658_v53  ;;  %v3657_v22 = vsel %vm1085_vm4, %v3620_v27, 0.0  ;;  %v15906_v53 = vld [vmem:[#allocation77_spill] sm:$0xff] }
 0x424   : > { %v3753_v45 = vmul.f32 %v13226_v28, %v3657_v22  ;;  %11110 = vmatprep.subr.bf16.mxu1 %v11109_v10  ;;  %v3563_v28 = vmul.f32 %v13258_v30, %v13213_v6  ;;  %v9541_v22 = vld [vmem:[%s11830_s24 + $0x98] sm:$0xff] }
 0x425   : > { %v3770_v59 = vadd.f32 %v3754_v21, %v3577_v14  ;;  %v3320_v60 = vpop.permute.xlu0 %3319  ;;  %11112 = vmatpush3.bf16.msra.mxu1 %v11109_v10  ;;  %v9539_v14 = vld [vmem:[%s11830_s24 + $0x88] sm:$0xff]  ;;  %v9540_v21 = vld [vmem:[%s11830_s24 + $0x90] sm:$0xff] }
 0x426   : > { %v3769_v42 = vadd.f32 %v3753_v45, %v3576_v5  ;;  %v3354_v49 = vsel %vm1052_vm1, 0.0, %v3320_v60  ;;  %v3318_v36 = vpop.permute.xlu1 %3317  ;;  %v9542_v5 = vld [vmem:[%s11830_s24 + $0xa0] sm:$0xff]  ;;  %v9543_v45 = vld [vmem:[%s11830_s24 + $0xa8] sm:$0xff]  ;;  %v9545_v60 = vld [vmem:[%s11830_s24 + $0xb8] sm:$0xff] }
 0x427   : > { %v3450_v40 = vmul.f32 %v13251_v16, %v3354_v49  ;;  %v3353_v38 = vsel %vm1052_vm1, 0.0, %v3318_v36  ;;  %v3883_v51 = vadd.f32 %v13272_v29, %v3770_v59  ;;  %v9544_v59 = vld [vmem:[%s11830_s24 + $0xb0] sm:$0xff]  ;;  %v9547_v49 = vld [vmem:[%s11830_s24 + $0xc8] sm:$0xff] }
 0x428   : > { %v3449_v19 = vmul.f32 %v13254_v56, %v3353_v38  ;;  %v3882_v43 = vadd.f32 %v13274_v3, %v3769_v42  ;;  %v9546_v42 = vld [vmem:[%s11830_s24 + $0xc0] sm:$0xff]  ;;  %v9548_v36 = vld [vmem:[%s11830_s24 + $0xd0] sm:$0xff] }
 0x429   : > { %v3626_v17 = vpop.permute.xlu0 %3625  ;;  %v3579_v16 = vadd.f32 %v3563_v28, %v3450_v40  ;;  %v9549_v40 = vld [vmem:[%s11830_s24 + $0xd8] sm:$0xff]  ;;  %v9550_v38 = vld [vmem:[%s11830_s24 + $0xe0] sm:$0xff] }
 0x42a   : > { %v3660_v8 = vsel %vm1085_vm4, %v3626_v17, 0.0  ;;  %v3624_v1 = vpop.permute.xlu1 %3623  ;;  %v11113_v44 = vpack.c.bf16 %v3883_v51, %v3882_v43  ;;  %v3578_v9 = vadd.f32 %v3562_v26, %v3449_v19  ;;  %v9551_v51 = vld [vmem:[%s11830_s24 + $0xe8] sm:$0xff]  ;;  %v9552_v19 = vld [vmem:[%s11830_s24 + $0xf0] sm:$0xff]  ;;  %v9553_v43 = vld [vmem:[%s11830_s24 + $0xf8] sm:$0xff] }
 0x42b   : > { %v3756_v11 = vmul.f32 %v13265_v55, %v3660_v8  ;;  %v3659_v29 = vsel %vm1085_vm4, %v3624_v1, 0.0  ;;  %v15897_v55 = vld [vmem:[#allocation69_spill] sm:$0xff] }
 0x42c   : > { %v3755_v56 = vmul.f32 %v13268_v0, %v3659_v29  ;;  %11114 = vmatprep.subr.bf16.mxu1 %v11113_v44  ;;  %v15900_v0 = vld [vmem:[#allocation70_spill] sm:$0xff] }
 0x42d   : > { %v3772_v3 = vadd.f32 %v3756_v11, %v3579_v16  ;;  %v3324_v58 = vpop.permute.xlu0 %3323  ;;  %11116 = vmatpush3.bf16.msra.mxu1 %v11113_v44  ;;  %v3565_v37 = vmul.f32 %v15900_v0, %v15899_v63 }
 0x42e   : > { %v3771_v6 = vadd.f32 %v3755_v56, %v3578_v9  ;;  %v3356_v30 = vsel %vm1052_vm1, 0.0, %v3324_v58  ;;  %v3322_v24 = vpop.permute.xlu1 %3321 }
 0x42f   : > { %v3452_v32 = vmul.f32 %v15895_v52, %v3356_v30  ;;  %v3355_v25 = vsel %vm1052_vm1, 0.0, %v3322_v24  ;;  %v3885_v35 = vadd.f32 %v15896_v47, %v3772_v3 }
 0x430   : > { %v3451_v61 = vmul.f32 %v15897_v55, %v3355_v25  ;;  %v3884_v62 = vadd.f32 %v15898_v12, %v3771_v6 }
 0x431   : > { %v3630_v41 = vpop.permute.xlu0 %3629  ;;  %v3581_v54 = vadd.f32 %v3565_v37, %v3452_v32 }
 0x432   : > { %v3662_v23 = vsel %vm1085_vm4, %v3630_v41, 0.0  ;;  %v3628_v34 = vpop.permute.xlu1 %3627  ;;  %v11117_v48 = vpack.c.bf16 %v3885_v35, %v3884_v62  ;;  %v3580_v7 = vadd.f32 %v3564_v18, %v3451_v61 }
 0x433   : > { %v3758_v33 = vmul.f32 %v15903_v13, %v3662_v23  ;;  %v3661_v20 = vsel %vm1085_vm4, %v3628_v34, 0.0 }
 0x434   : > { %v3757_v31 = vmul.f32 %v15904_v4, %v3661_v20  ;;  %11118 = vmatprep.subr.bf16.mxu1 %v11117_v48 }
 0x435   : > { %v3774_v15 = vadd.f32 %v3758_v33, %v3581_v54  ;;  %11120 = vmatpush3.bf16.msra.mxu1 %v11117_v48 }
 0x436   : > { %v3773_v39 = vadd.f32 %v3757_v31, %v3580_v7 }
 0x437   : > { %v3887_v50 = vadd.f32 %v15905_v46, %v3774_v15 }
 0x438   : > { %v3886_v27 = vadd.f32 %v15906_v53, %v3773_v39 }
 0x43a   : > { %v11121_v10 = vpack.c.bf16 %v3887_v50, %v3886_v27 }
 0x43c   : > { %11122 = vmatprep.subr.bf16.mxu1 %v11121_v10 }
 0x43d   : > { %11124 = vmatpush3.bf16.msra.mxu1 %v11121_v10 }
 0x440   : > { %10528 = vmatmul.mubr.f32.vlgmr.msra.gmra.mrb[32].mxu1 %v9539_v14 }
 0x441   : > { %10530 = vmatprep.mubr.f32.mxu1 %v9540_v21 }
 0x442   : > { %v3930_v28 = vpop.permute.xlu0 %3929 }
 0x443   : > { %v3925_v17 = vpop.permute.xlu1 %3924 }
 0x444   : > { %10531 = vmatmul.mubr.f32.gmra.mrb[34].mxu1 %v9541_v22 }
 0x445   : > { %10533 = vmatprep.mubr.f32.mxu1 %v9542_v5 }
 0x446   : > { %v4172_v26 = vpop.permute.xlu0 %4171 }
 0x447   : > { %v4167_v8 = vpop.permute.xlu1 %4166 }
 0x448   : > { %10534 = vmatmul.mubr.f32.gmra.mrb[36].mxu1 %v9543_v45 }
 0x449   : > { %10536 = vmatprep.mubr.f32.mxu1 %v9544_v59 }
 0x44a   : > { %v3940_v1 = vpop.permute.xlu0 %3939 }
 0x44b   : > { %v3935_v44 = vpop.permute.xlu1 %3934 }
 0x44c   : > { %10537 = vmatmul.mubr.f32.gmra.mrb[38].mxu1 %v9545_v60 }
 0x44d   : > { %10539 = vmatprep.mubr.f32.mxu1 %v9546_v42 }
 0x44e   : > { %v4285_v16 = vpop.permute.xlu0 %4284 }
 0x44f   : > { %v4280_v11 = vpop.permute.xlu1 %4279 }
 0x450   : > { %10540 = vmatmul.mubr.f32.gmra.mrb[40].mxu1 %v9547_v49 }
 0x451   : > { %10542 = vmatprep.mubr.f32.mxu1 %v9548_v36 }
 0x452   : > { %v4182_v29 = vpop.permute.xlu0 %4181 }
 0x453   : > { %v4177_v9 = vpop.permute.xlu1 %4176 }
 0x454   : > { %10543 = vmatmul.mubr.f32.gmra.mrb[42].mxu1 %v9549_v40 }
 0x455   : > { %10545 = vmatprep.mubr.f32.mxu1 %v9550_v38 }
 0x456   : > { %v3950_v56 = vpop.permute.xlu0 %3949 }
 0x457   : > { %v3945_v3 = vpop.permute.xlu1 %3944 }
 0x458   : > { %10546 = vmatmul.mubr.f32.gmra.mrb[44].mxu1 %v9551_v51 }
 0x459   : > { %10548 = vmatprep.mubr.f32.mxu1 %v9552_v19 }
 0x45a   : > { %v4295_v58 = vpop.permute.xlu0 %4294 }
 0x45b   : > { %v4290_v6 = vpop.permute.xlu1 %4289 }
 0x45c   : > { %10549 = vmatmul.mubr.f32.gmra.mrb[46].mxu1 %v9553_v43 }
 0x45e   : > { %v4192_v30 = vpop.permute.xlu0 %4191 }
 0x45f   : > { %v4187_v24 = vpop.permute.xlu1 %4186 }
 0x462   : > { %v3960_v52 = vpop.permute.xlu0 %3959 }
 0x463   : > { %v3955_v32 = vpop.permute.xlu1 %3954 }
 0x466   : > { %v4305_v25 = vpop.permute.xlu0 %4304 }
 0x467   : > { %v4300_v47 = vpop.permute.xlu1 %4299 }
 0x46a   : > { %v4202_v35 = vpop.permute.xlu0 %4201 }
 0x46b   : > { %v4197_v55 = vpop.permute.xlu1 %4196 }
 0x46e   : > { %v3970_v61 = vpop.permute.xlu0 %3969 }
 0x46f   : > { %v13461_v12 = vpop.permute.xlu1 %3964 }
 0x472   : > { %v4315_v62 = vpop.permute.xlu0 %4314 }
 0x473   : > { %v13463_v63 = vpop.permute.xlu1 %4309 }
 0x476   : > { %v13465_v0 = vpop.permute.xlu0 %4211 }
 0x477   : > { %v13467_v37 = vpop.permute.xlu1 %4206 }
 0x47a   : > { %v13469_v41 = vpop.permute.xlu0 %3979 }
 0x47b   : > { %v13471_v57 = vpop.permute.xlu1 %3974 }
 0x47e   : > { %v13473_v2 = vpop.permute.xlu0 %4324 }
 0x47f   : > { %v13475_v18 = vpop.permute.xlu1 %4319 }
 0x482   : > { %v13477_v23 = vpop.permute.xlu0 %4221 }
 0x483   : > { %v13479_v34 = vpop.permute.xlu1 %4216 }
 0x486   : > { %v13481_v48 = vpop.permute.xlu0 %3989 }
 0x487   : > { %v13483_v54 = vpop.permute.xlu1 %3984 }
 0x48a   : > { %v13485_v7 = vpop.permute.xlu0 %4334 }
 0x48b   : > { %v13487_v31 = vpop.permute.xlu1 %4329 }
 0x48e   : > { %v13494_v5 = vpop.permute.xlu0 %4231 }
 0x48f   : > { %v13497_v42 = vpop.permute.xlu1 %4226 }
 0x513   : > { %v10529_v13 = vpop.f32.mrb[32].mxu1 }
 0x514   : > { %v4074_v33 = vadd.f32 %v10529_v13, %v3930_v28  ;;  %v4068_v20 = vpop.f32.mrb[33].mxu1 }
 0x515   : > { %v4069_v4 = vadd.f32 %v4068_v20, %v3925_v17 }
 0x516   : > { %v4245_v15 = vmul.f32 %v4172_v26, %v4074_v33 }
 0x517   : > { %v4244_v39 = vmul.f32 %v4167_v8, %v4069_v4  ;;  %v10532_v46 = vpop.f32.mrb[34].mxu1 }
 0x518   : > { %v4084_v50 = vadd.f32 %v10532_v46, %v3940_v1  ;;  %v4078_v53 = vpop.f32.mrb[35].mxu1  ;;  %v13489_v27 = vadd.f32 %v4285_v16, %v4245_v15  ;;  %v4000_v16 = vpop.permute.xlu0 %3999 }
 0x519   : > { %v4079_v10 = vadd.f32 %v4078_v53, %v3935_v44  ;;  %v13491_v14 = vadd.f32 %v4280_v11, %v4244_v39 }
 0x51a   : > { %v4247_v21 = vmul.f32 %v4182_v29, %v4084_v50  ;;  %v15675_v22 = vmax.f32 %v13489_v27, 0.0 }
 0x51b   : > { %v4246_v45 = vmul.f32 %v4177_v9, %v4079_v10  ;;  %v10535_v59 = vpop.f32.mrb[36].mxu1  ;;  %v15674_v60 = vmax.f32 %v13491_v14, 0.0  ;;  %v3995_v9 = vpop.permute.xlu1 %3994 }
 0x51c   : > { %v4094_v49 = vadd.f32 %v10535_v59, %v3950_v56  ;;  %4391 = vadd.xlane.f32.xlu0 %v15675_v22  ;;  %v4088_v36 = vpop.f32.mrb[37].mxu1  ;;  %v13501_v40 = vadd.f32 %v4295_v58, %v4247_v21  ;;  %v4345_v13 = vpop.permute.xlu0 %4344 }
 0x51d   : > { %v4089_v38 = vadd.f32 %v4088_v36, %v3945_v3  ;;  %4389 = vadd.xlane.f32.xlu1 %v15674_v60  ;;  %v13505_v51 = vadd.f32 %v4290_v6, %v4246_v45 }
 0x51e   : > { %v4249_v19 = vmul.f32 %v4192_v30, %v4094_v49  ;;  %v15673_v43 = vmax.f32 %v13501_v40, 0.0 }
 0x51f   : > { %v4248_v28 = vmul.f32 %v4187_v24, %v4089_v38  ;;  %v10538_v17 = vpop.f32.mrb[38].mxu1  ;;  %v15672_v26 = vmax.f32 %v13505_v51, 0.0 }
 0x520   : > { %v4104_v8 = vadd.f32 %v10538_v17, %v3960_v52  ;;  %v4098_v1 = vpop.f32.mrb[39].mxu1  ;;  %v13509_v44 = vadd.f32 %v4305_v25, %v4249_v19  ;;  %v4242_v10 = vpop.permute.xlu0 %4241 }
 0x521   : > { %v4099_v11 = vadd.f32 %v4098_v1, %v3955_v32  ;;  %4393 = vadd.xlane.f32.xlu0 %v15672_v26  ;;  %4395 = vadd.xlane.f32.xlu1 %v15673_v43  ;;  %v13515_v29 = vadd.f32 %v4300_v47, %v4248_v28 }
 0x522   : > { %v4251_v56 = vmul.f32 %v4202_v35, %v4104_v8  ;;  %v15671_v3 = vmax.f32 %v13509_v44, 0.0 }
 0x523   : > { %v4250_v58 = vmul.f32 %v4197_v55, %v4099_v11  ;;  %v10541_v6 = vpop.f32.mrb[40].mxu1  ;;  %v15670_v30 = vmax.f32 %v13515_v29, 0.0 }
 0x524   : > { %v4114_v24 = vadd.f32 %v10541_v6, %v3970_v61  ;;  %v4108_v52 = vpop.f32.mrb[41].mxu1  ;;  %v13519_v25 = vadd.f32 %v4315_v62, %v4251_v56  ;;  %v4355_v19 = vpop.permute.xlu0 %4354  ;;  %v1673_v56 = vld [vmem:[%s11805_s29 + $0x8] sm:$0xff]  ;;  %v1672_v6 = vld [vmem:[%s11805_s29] sm:$0xff] }
 0x525   : > { %v4109_v32 = vadd.f32 %v4108_v52, %v13461_v12  ;;  %4397 = vadd.xlane.f32.xlu0 %v15670_v30  ;;  %4399 = vadd.xlane.f32.xlu1 %v15671_v3  ;;  %v13527_v47 = vadd.f32 %v13463_v63, %v4250_v58  ;;  %v4340_v12 = vpop.permute.xlu1 %4339  ;;  %v1913_v58 = vld [vmem:[%s15747_s3] sm:$0xff]  ;;  %v1674_v52 = vld [vmem:[%s11805_s29 + $0x10] sm:$0xff] }
 0x526   : > { %v4253_v35 = vmul.f32 %v13465_v0, %v4114_v24  ;;  %v15669_v55 = vmax.f32 %v13519_v25, 0.0  ;;  %v15659_v24 = vmov 0.0  }
 0x527   : > { %v4252_v61 = vmul.f32 %v13467_v37, %v4109_v32  ;;  %v10544_v62 = vpop.f32.mrb[42].mxu1  ;;  %v15668_v33 = vmax.f32 %v13527_v47, 0.0  ;;  %10583 = vmatprep.mubr.msk.f32.mxu0 %vm11763_vm6, %v15659_v24  ;;  %v1914_v32 = vld [vmem:[%s15747_s3 + $0x8] sm:$0xff] }
 0x528   : > { %v4124_v20 = vadd.f32 %v10544_v62, %v13469_v41  ;;  %v4118_v4 = vpop.f32.mrb[43].mxu1  ;;  %v13535_v15 = vadd.f32 %v13473_v2, %v4253_v35  ;;  %v2025_v35 = vld [vmem:[%s15913_s16] sm:$0xff]  ;;  %v2026_v62 = vld [vmem:[%s15913_s16 + $0x8] sm:$0xff] }
 0x529   : > { %v4119_v63 = vadd.f32 %v4118_v4, %v13471_v57  ;;  %4401 = vadd.xlane.f32.xlu0 %v15668_v33  ;;  %4403 = vadd.xlane.f32.xlu1 %v15669_v55  ;;  %v13543_v0 = vadd.f32 %v13475_v18, %v4252_v61  ;;  %v1915_v61 = vld [vmem:[%s15747_s3 + $0x10] sm:$0xff] }
 0x52a   : > { %v4255_v37 = vmul.f32 %v13477_v23, %v4124_v20  ;;  %v15667_v39 = vmax.f32 %v13535_v15, 0.0  ;;  %v4237_v23 = vpop.permute.xlu1 %4236  ;;  %v1916_v20 = vld [vmem:[%s15747_s3 + $0x18] sm:$0xff]  ;;  %v2027_v4 = vld [vmem:[%s15913_s16 + $0x10] sm:$0xff] }
 0x52b   : > { %v4254_v41 = vmul.f32 %v13479_v34, %v4119_v63  ;;  %v10547_v46 = vpop.f32.mrb[44].mxu1  ;;  %v15666_v2 = vmax.f32 %v13543_v0, 0.0  ;;  %v1677_v63 = vld [vmem:[%s11805_s29 + $0x28] sm:$0xff] }
 0x52c   : > { %v4134_v57 = vadd.f32 %v10547_v46, %v13481_v48  ;;  %v4128_v50 = vpop.f32.mrb[45].mxu1  ;;  %v13551_v53 = vadd.f32 %v13485_v7, %v4255_v37  ;;  %v1917_v37 = vld [vmem:[%s15747_s3 + $0x20] sm:$0xff]  ;;  %v1678_v46 = vld [vmem:[%s11805_s29 + $0x30] sm:$0xff] }
 0x52d   : > { %v4129_v21 = vadd.f32 %v4128_v50, %v13483_v54  ;;  %4405 = vadd.xlane.f32.xlu0 %v15666_v2  ;;  %4407 = vadd.xlane.f32.xlu1 %v15667_v39  ;;  %v13559_v18 = vadd.f32 %v13487_v31, %v4254_v41  ;;  %v2028_v41 = vld [vmem:[%s15913_s16 + $0x18] sm:$0xff]  ;;  %v2029_v50 = vld [vmem:[%s15913_s16 + $0x20] sm:$0xff] }
 0x52e   : > { %15907 = vst [vmem:[#allocation47_spill] sm:$0xff] %v13551_v53  ;;  %v4257_v34 = vmul.f32 %v13494_v5, %v4134_v57  ;;  %v15665_v48 = vmax.f32 %v13551_v53, 0.0  ;;  %v4350_v8 = vpop.permute.xlu1 %4349  ;;  %v1918_v57 = vld [vmem:[%s15747_s3 + $0x28] sm:$0xff] }
 0x52f   : > { %15908 = vst [vmem:[#allocation43_spill] sm:$0xff] %v13559_v18  ;;  %v4256_v7 = vmul.f32 %v13497_v42, %v4129_v21  ;;  %v10550_v45 = vpop.f32.mrb[46].mxu1  ;;  %v15664_v59 = vmax.f32 %v13559_v18, 0.0  ;;  %v1919_v21 = vld [vmem:[%s15747_s3 + $0x30] sm:$0xff] }
 0x530   : > { %v4144_v54 = vadd.f32 %v10550_v45, %v4000_v16  ;;  %v4138_v49 = vpop.f32.mrb[47].mxu1  ;;  %v13565_v36 = vadd.f32 %v4345_v13, %v4257_v34  ;;  %v1675_v13 = vld [vmem:[%s11805_s29 + $0x18] sm:$0xff]  ;;  %v1680_v34 = vld [vmem:[%s11805_s29 + $0x40] sm:$0xff]  ;;  %v2031_v45 = vld [vmem:[%s15913_s16 + $0x30] sm:$0xff] }
 0x531   : > { %v4139_v38 = vadd.f32 %v4138_v49, %v3995_v9  ;;  %4409 = vadd.xlane.f32.xlu0 %v15664_v59  ;;  %4411 = vadd.xlane.f32.xlu1 %v15665_v48  ;;  %v13571_v31 = vadd.f32 %v4340_v12, %v4256_v7  ;;  %v1676_v12 = vld [vmem:[%s11805_s29 + $0x20] sm:$0xff]  ;;  %v1920_v7 = vld [vmem:[%s15747_s3 + $0x38] sm:$0xff]  ;;  %v4529_v18 = vld [vmem:[%s15924_s5 + $0x10] sm:$0xff] }
 0x532   : > { %15909 = vst [vmem:[#allocation45_spill] sm:$0xff] %v13565_v36  ;;  %v4259_v5 = vmul.f32 %v4242_v10, %v4144_v54  ;;  %v15663_v42 = vmax.f32 %v13565_v36, 0.0  ;;  %v1679_v10 = vld [vmem:[%s11805_s29 + $0x38] sm:$0xff]  ;;  %v1681_v54 = vld [vmem:[%s11805_s29 + $0x48] sm:$0xff]  ;;  %v1921_v49 = vld [vmem:[%s15747_s3 + $0x40] sm:$0xff] }
 0x533   : > { %15910 = vst [vmem:[#allocation48_spill] sm:$0xff] %v13571_v31  ;;  %v4258_v28 = vmul.f32 %v4237_v23, %v4139_v38  ;;  %v15662_v17 = vmax.f32 %v13571_v31, 0.0  ;;  %v2030_v23 = vld [vmem:[%s15913_s16 + $0x28] sm:$0xff]  ;;  %v2032_v38 = vld [vmem:[%s15913_s16 + $0x38] sm:$0xff] }
 0x534   : > { %v13575_v1 = vadd.f32 %v4355_v19, %v4259_v5  ;;  %v1682_v5 = vld [vmem:[%s11805_s29 + $0x50] sm:$0xff]  ;;  %v1922_v19 = vld [vmem:[%s15747_s3 + $0x48] sm:$0xff] }
 0x535   : > { %4413 = vadd.xlane.f32.xlu0 %v15662_v17  ;;  %4415 = vadd.xlane.f32.xlu1 %v15663_v42  ;;  %v13581_v16 = vadd.f32 %v4350_v8, %v4258_v28  ;;  %v2033_v28 = vld [vmem:[%s15913_s16 + $0x40] sm:$0xff]  ;;  %v1683_v8 = vld [vmem:[%s11805_s29 + $0x58] sm:$0xff] }
 0x536   : > { %15911 = vst [vmem:[#allocation59_spill] sm:$0xff] %v13575_v1  ;;  %v15661_v11 = vmax.f32 %v13575_v1, 0.0 }
 0x537   : > { %15912 = vst [vmem:[#allocation51_spill] sm:$0xff] %v13581_v16  ;;  %v15660_v9 = vmax.f32 %v13581_v16, 0.0 }
 0x539   : > { %4417 = vadd.xlane.f32.xlu0 %v15660_v9  ;;  %4419 = vadd.xlane.f32.xlu1 %v15661_v11 }
 0x54a   : > { %1695 = vperm.xlu1 %11493, %v1673_v56   ;;  %v1923_v56 = vld [vmem:[%s15747_s3 + $0x50] sm:$0xff] }
 0x54e   : > { %1931 = vperm.xlu1 %11493, %v1913_v58   ;;  %v2034_v58 = vld [vmem:[%s15913_s16 + $0x48] sm:$0xff] }
 0x54f   : > { %1690 = vperm.xlu0 %11492, %v1672_v6   ;;  %v1684_v6 = vld [vmem:[%s11805_s29 + $0x60] sm:$0xff] }
 0x552   : > { %1700 = vperm.xlu1 %11493, %v1674_v52   ;;  %v1924_v52 = vld [vmem:[%s15747_s3 + $0x58] sm:$0xff] }
 0x553   : > { %1936 = vperm.xlu0 %11492, %v1914_v32   ;;  %v2035_v32 = vld [vmem:[%s15913_s16 + $0x50] sm:$0xff] }
 0x556   : > { %2043 = vperm.xlu1 %11493, %v2025_v35   ;;  %v1685_v35 = vld [vmem:[%s11805_s29 + $0x68] sm:$0xff] }
 0x557   : > { %1705 = vperm.xlu0 %11492, %v1675_v13   ;;  %v1925_v13 = vld [vmem:[%s15747_s3 + $0x60] sm:$0xff] }
 0x55a   : > { %1941 = vperm.xlu1 %11493, %v1915_v61   ;;  %v2036_v61 = vld [vmem:[%s15913_s16 + $0x58] sm:$0xff] }
 0x55b   : > { %2048 = vperm.xlu0 %11492, %v2026_v62   ;;  %v1686_v62 = vld [vmem:[%s11805_s29 + $0x70] sm:$0xff] }
 0x55e   : > { %1710 = vperm.xlu1 %11493, %v1676_v12   ;;  %v1926_v12 = vld [vmem:[%s15747_s3 + $0x68] sm:$0xff] }
 0x55f   : > { %1946 = vperm.xlu0 %11492, %v1916_v20   ;;  %v2037_v20 = vld [vmem:[%s15913_s16 + $0x60] sm:$0xff] }
 0x562   : > { %2053 = vperm.xlu1 %11493, %v2027_v4   ;;  %v1687_v4 = vld [vmem:[%s11805_s29 + $0x78] sm:$0xff] }
 0x563   : > { %1715 = vperm.xlu0 %11492, %v1677_v63   ;;  %v1927_v63 = vld [vmem:[%s15747_s3 + $0x70] sm:$0xff] }
 0x566   : > { %1951 = vperm.xlu1 %11493, %v1917_v37   ;;  %v2038_v37 = vld [vmem:[%s15913_s16 + $0x68] sm:$0xff] }
 0x567   : > { %2058 = vperm.xlu0 %11492, %v2028_v41   ;;  %v2039_v41 = vld [vmem:[%s15913_s16 + $0x70] sm:$0xff] }
 0x56a   : > { %1720 = vperm.xlu1 %11493, %v1678_v46   ;;  %v1928_v46 = vld [vmem:[%s15747_s3 + $0x78] sm:$0xff] }
 0x56b   : > { %1956 = vperm.xlu0 %11492, %v1918_v57   ;;  %v9698_v57 = vld [vmem:[%s15744_s14 + $0x100] sm:$0xff] }
 0x56e   : > { %2063 = vperm.xlu1 %11493, %v2029_v50   ;;  %v2040_v50 = vld [vmem:[%s15913_s16 + $0x78] sm:$0xff] }
 0x56f   : > { %1725 = vperm.xlu0 %11492, %v1679_v10  }
 0x572   : > { %1961 = vperm.xlu1 %11493, %v1919_v21  }
 0x573   : > { %2068 = vperm.xlu0 %11492, %v2030_v23  }
 0x576   : > { %1730 = vperm.xlu1 %11493, %v1680_v34  }
 0x577   : > { %1966 = vperm.xlu0 %11492, %v1920_v7   ;;  %v9714_v7 = vld [vmem:[%s15744_s14 + $0x300] sm:$0xff] }
 0x57a   : > { %2073 = vperm.xlu1 %11493, %v2031_v45   ;;  %v9699_v45 = vld [vmem:[%s15744_s14 + $0x108] sm:$0xff] }
 0x57b   : > { %1735 = vperm.xlu0 %11492, %v1681_v54  }
 0x57e   : > { %1971 = vperm.xlu1 %11493, %v1921_v49  }
 0x57f   : > { %2078 = vperm.xlu0 %11492, %v2032_v38  }
 0x582   : > { %1740 = vperm.xlu1 %11493, %v1682_v5  }
 0x583   : > { %1976 = vperm.xlu0 %11492, %v1922_v19  }
 0x586   : > { %2083 = vperm.xlu1 %11493, %v2033_v28   ;;  %v9730_v28 = vld [vmem:[%s15744_s14 + $0x500] sm:$0xff] }
 0x587   : > { %1745 = vperm.xlu0 %11492, %v1683_v8   ;;  %v15914_v8 = vmov 0.0|0.0  }
 0x58a   : > { %1981 = vperm.xlu1 %11493, %v1923_v56   ;;  %v9715_v56 = vld [vmem:[%s15744_s14 + $0x308] sm:$0xff] }
 0x58b   : > { %2088 = vperm.xlu0 %11492, %v2034_v58  }
 0x58e   : > { %1750 = vperm.xlu1 %11493, %v1684_v6  }
 0x58f   : > { %1986 = vperm.xlu0 %11492, %v1924_v52  }
 0x592   : > { %2093 = vperm.xlu1 %11493, %v2035_v32  }
 0x593   : > { %1755 = vperm.xlu0 %11492, %v1685_v35  }
 0x596   : > { %1991 = vperm.xlu1 %11493, %v1925_v13   ;;  %v9700_v13 = vld [vmem:[%s15744_s14 + $0x110] sm:$0xff] }
 0x597   : > { %2098 = vperm.xlu0 %11492, %v2036_v61   ;;  %v9731_v61 = vld [vmem:[%s15744_s14 + $0x508] sm:$0xff] }
 0x59a   : > { %1760 = vperm.xlu1 %11493, %v1686_v62  }
 0x59b   : > { %1996 = vperm.xlu0 %11492, %v1926_v12  }
 0x59e   : > { %2103 = vperm.xlu1 %11493, %v2037_v20  }
 0x59f   : > { %1765 = vperm.xlu0 %11492, %v1687_v4  }
 0x5a2   : > { %2001 = vperm.xlu1 %11493, %v1927_v63  }
 0x5a3   : > { %2108 = vperm.xlu0 %11492, %v2038_v37   ;;  %v9716_v37 = vld [vmem:[%s15744_s14 + $0x310] sm:$0xff] }
 0x5a6   : > { %2113 = vperm.xlu1 %11493, %v2039_v41   ;;  %v9701_v41 = vld [vmem:[%s15744_s14 + $0x118] sm:$0xff] }
 0x5a7   : > { %2006 = vperm.xlu0 %11492, %v1928_v46  }
 0x5a9   : > { %v4392_v10 = vpop.xlane.xlu0 %4391 }
 0x5aa   : > { %v4423_v21 = vmul.f32 0.0078125, %v4392_v10  ;;  %5545 = vperm.xlu1 %11493, %v9698_v57   ;;  %v4390_v23 = vpop.xlane.xlu1 %4389 }
 0x5ab   : > { %v4422_v34 = vmul.f32 0.0078125, %v4390_v23  ;;  %2118 = vperm.xlu0 %11492, %v2040_v50   ;;  %v9732_v23 = vld [vmem:[%s15744_s14 + $0x510] sm:$0xff] }
 0x5ad   : > { %v11126_v54 = vpack.c.bf16 %v4423_v21, %v4422_v34  ;;  %v9717_v34 = vld [vmem:[%s15744_s14 + $0x318] sm:$0xff] }
 0x5ae   : > { %v4394_v49 = vpop.xlane.xlu0 %4393  ;;  %5658 = vperm.xlu1 %11493, %v9714_v7   ;;  %v4396_v38 = vpop.xlane.xlu1 %4395 }
 0x5af   : > { %v4424_v5 = vmul.f32 0.0078125, %v4394_v49  ;;  %v4425_v19 = vmul.f32 0.0078125, %v4396_v38  ;;  %5550 = vperm.xlu0 %11492, %v9699_v45   ;;  %11127 = vmatpush3.bf16.msra.mxu0 %v11126_v54 }
 0x5b0   : > { %11128 = vmatprep.subr.bf16.mxu0 %v15914_v8 }
 0x5b1   : > { %v11129_v58 = vpack.c.bf16 %v4425_v19, %v4424_v5  ;;  %v9746_v5 = vld [vmem:[%s11825_s19 + $0x100] sm:$0xff]  ;;  %v9733_v19 = vld [vmem:[%s15744_s14 + $0x518] sm:$0xff] }
 0x5b2   : > { %v4398_v6 = vpop.xlane.xlu0 %4397  ;;  %5851 = vperm.xlu1 %11493, %v9730_v28   ;;  %v4400_v52 = vpop.xlane.xlu1 %4399 }
 0x5b3   : > { %v4426_v32 = vmul.f32 0.0078125, %v4398_v6  ;;  %v4427_v35 = vmul.f32 0.0078125, %v4400_v52  ;;  %5663 = vperm.xlu0 %11492, %v9715_v56   ;;  %11130 = vmatpush3.bf16.msra.mxu0 %v11129_v58 }
 0x5b4   : > { %11131 = vmatprep.subr.bf16.mxu0 %v15914_v8 }
 0x5b5   : > { %v11132_v62 = vpack.c.bf16 %v4427_v35, %v4426_v32  ;;  %v9702_v32 = vld [vmem:[%s15744_s14 + $0x120] sm:$0xff]  ;;  %v9747_v35 = vld [vmem:[%s11825_s19 + $0x108] sm:$0xff] }
 0x5b6   : > { %v4402_v12 = vpop.xlane.xlu0 %4401  ;;  %5555 = vperm.xlu1 %11493, %v9700_v13   ;;  %v4404_v20 = vpop.xlane.xlu1 %4403 }
 0x5b7   : > { %v4428_v4 = vmul.f32 0.0078125, %v4402_v12  ;;  %v4429_v63 = vmul.f32 0.0078125, %v4404_v20  ;;  %5856 = vperm.xlu0 %11492, %v9731_v61   ;;  %11133 = vmatpush3.bf16.msra.mxu0 %v11132_v62 }
 0x5b8   : > { %11134 = vmatprep.subr.bf16.mxu0 %v15914_v8 }
 0x5b9   : > { %v11135_v46 = vpack.c.bf16 %v4429_v63, %v4428_v4  ;;  %v9718_v4 = vld [vmem:[%s15744_s14 + $0x320] sm:$0xff]  ;;  %v9703_v63 = vld [vmem:[%s15744_s14 + $0x128] sm:$0xff] }
 0x5ba   : > { %v4406_v57 = vpop.xlane.xlu0 %4405  ;;  %5668 = vperm.xlu1 %11493, %v9716_v37   ;;  %v4408_v50 = vpop.xlane.xlu1 %4407 }
 0x5bb   : > { %v4430_v10 = vmul.f32 0.0078125, %v4406_v57  ;;  %v4431_v21 = vmul.f32 0.0078125, %v4408_v50  ;;  %5560 = vperm.xlu0 %11492, %v9701_v41   ;;  %11136 = vmatpush3.bf16.msra.mxu0 %v11135_v46  ;;  %v9734_v41 = vld [vmem:[%s15744_s14 + $0x520] sm:$0xff]  ;;  %v9719_v57 = vld [vmem:[%s15744_s14 + $0x328] sm:$0xff]  ;;  %v9748_v50 = vld [vmem:[%s11825_s19 + $0x110] sm:$0xff] }
 0x5bc   : > { %11137 = vmatprep.subr.bf16.mxu0 %v15914_v8  ;;  %v4438_v46 = vld [vmem:[%s15915_s22] sm:$0xff] }
 0x5bd   : > { %v11138_v7 = vpack.c.bf16 %v4431_v21, %v4430_v10  ;;  %v9735_v10 = vld [vmem:[%s15744_s14 + $0x528] sm:$0xff]  ;;  %v9704_v21 = vld [vmem:[%s15744_s14 + $0x130] sm:$0xff] }
 0x5be   : > { %v4410_v45 = vpop.xlane.xlu0 %4409  ;;  %5861 = vperm.xlu1 %11493, %v9732_v23   ;;  %v4412_v54 = vpop.xlane.xlu1 %4411  ;;  %v9749_v23 = vld [vmem:[%s11825_s19 + $0x118] sm:$0xff] }
 0x5bf   : > { %v4432_v49 = vmul.f32 0.0078125, %v4410_v45  ;;  %v4433_v38 = vmul.f32 0.0078125, %v4412_v54  ;;  %5673 = vperm.xlu0 %11492, %v9717_v34   ;;  %11139 = vmatpush3.bf16.msra.mxu0 %v11138_v7  ;;  %v9720_v34 = vld [vmem:[%s15744_s14 + $0x330] sm:$0xff]  ;;  %v9705_v7 = vld [vmem:[%s15744_s14 + $0x138] sm:$0xff] }
 0x5c0   : > { %11140 = vmatprep.subr.bf16.mxu0 %v15914_v8  ;;  %v9736_v45 = vld [vmem:[%s15744_s14 + $0x530] sm:$0xff]  ;;  %v9721_v54 = vld [vmem:[%s15744_s14 + $0x338] sm:$0xff] }
 0x5c1   : > { %v11141_v28 = vpack.c.bf16 %v4433_v38, %v4432_v49  ;;  %v9750_v49 = vld [vmem:[%s11825_s19 + $0x120] sm:$0xff]  ;;  %v9737_v38 = vld [vmem:[%s15744_s14 + $0x538] sm:$0xff] }
 0x5c2   : > { %v4414_v56 = vpop.xlane.xlu0 %4413  ;;  %5980 = vperm.xlu1 %11493, %v9746_v5   ;;  %v4416_v58 = vpop.xlane.xlu1 %4415  ;;  %v9706_v5 = vld [vmem:[%s15744_s14 + $0x140] sm:$0xff] }
 0x5c3   : > { %v4434_v6 = vmul.f32 0.0078125, %v4414_v56  ;;  %v4435_v52 = vmul.f32 0.0078125, %v4416_v58  ;;  %5866 = vperm.xlu0 %11492, %v9733_v19   ;;  %11142 = vmatpush3.bf16.msra.mxu0 %v11141_v28  ;;  %v9751_v19 = vld [vmem:[%s11825_s19 + $0x128] sm:$0xff]  ;;  %v9722_v28 = vld [vmem:[%s15744_s14 + $0x340] sm:$0xff] }
 0x5c4   : > { %11143 = vmatprep.subr.bf16.mxu0 %v15914_v8  ;;  %v9707_v56 = vld [vmem:[%s15744_s14 + $0x148] sm:$0xff]  ;;  %v9738_v58 = vld [vmem:[%s15744_s14 + $0x540] sm:$0xff] }
 0x5c5   : > { %v11144_v13 = vpack.c.bf16 %v4435_v52, %v4434_v6  ;;  %v9723_v6 = vld [vmem:[%s15744_s14 + $0x348] sm:$0xff]  ;;  %v9752_v52 = vld [vmem:[%s11825_s19 + $0x130] sm:$0xff] }
 0x5c6   : > { %v4418_v61 = vpop.xlane.xlu0 %4417  ;;  %5565 = vperm.xlu1 %11493, %v9702_v32   ;;  %v4420_v62 = vpop.xlane.xlu1 %4419  ;;  %v9739_v32 = vld [vmem:[%s15744_s14 + $0x548] sm:$0xff] }
 0x5c7   : > { %v4436_v12 = vmul.f32 0.0078125, %v4418_v61  ;;  %v4437_v20 = vmul.f32 0.0078125, %v4420_v62  ;;  %5985 = vperm.xlu0 %11492, %v9747_v35   ;;  %11145 = vmatpush3.bf16.msra.mxu0 %v11144_v13  ;;  %v9708_v35 = vld [vmem:[%s15744_s14 + $0x150] sm:$0xff]  ;;  %v9753_v13 = vld [vmem:[%s11825_s19 + $0x138] sm:$0xff] }
 0x5c8   : > { %11146 = vmatprep.subr.bf16.mxu0 %v15914_v8  ;;  %v9724_v61 = vld [vmem:[%s15744_s14 + $0x350] sm:$0xff]  ;;  %v9709_v62 = vld [vmem:[%s15744_s14 + $0x158] sm:$0xff] }
 0x5c9   : > { %v11147_v37 = vpack.c.bf16 %v4437_v20, %v4436_v12  ;;  %v9740_v12 = vld [vmem:[%s15744_s14 + $0x550] sm:$0xff]  ;;  %v9725_v20 = vld [vmem:[%s15744_s14 + $0x358] sm:$0xff] }
 0x5ca   : > { %5678 = vperm.xlu1 %11493, %v9718_v4   ;;  %v9754_v4 = vld [vmem:[%s11825_s19 + $0x140] sm:$0xff] }
 0x5cb   : > { %5570 = vperm.xlu0 %11492, %v9703_v63   ;;  %11148 = vmatpush3.bf16.msra.mxu0 %v11147_v37  ;;  %v9741_v63 = vld [vmem:[%s15744_s14 + $0x558] sm:$0xff]  ;;  %v9710_v37 = vld [vmem:[%s15744_s14 + $0x160] sm:$0xff] }
 0x5ce   : > { %5871 = vperm.xlu1 %11493, %v9734_v41   ;;  %10584 = vmatmul.mubr.f32.vlgmr.msra.gmra.mrb[32].mxu0 %v4438_v46  ;;  %v9755_v41 = vld [vmem:[%s11825_s19 + $0x148] sm:$0xff]  ;;  %v9726_v46 = vld [vmem:[%s15744_s14 + $0x360] sm:$0xff] }
 0x5cf   : > { %5683 = vperm.xlu0 %11492, %v9719_v57   ;;  %v13695_v57 = vpop.permute.xlu1 %1695 }
 0x5d2   : > { %5990 = vperm.xlu1 %11493, %v9748_v50   ;;  %v9711_v50 = vld [vmem:[%s15744_s14 + $0x168] sm:$0xff] }
 0x5d3   : > { %5876 = vperm.xlu0 %11492, %v9735_v10   ;;  %v9742_v10 = vld [vmem:[%s15744_s14 + $0x560] sm:$0xff] }
 0x5d6   : > { %5575 = vperm.xlu1 %11493, %v9704_v21   ;;  %v9727_v21 = vld [vmem:[%s15744_s14 + $0x368] sm:$0xff] }
 0x5d7   : > { %5995 = vperm.xlu0 %11492, %v9749_v23   ;;  %v13700_v23 = vpop.permute.xlu0 %1690 }
 0x5da   : > { %5688 = vperm.xlu1 %11493, %v9720_v34   ;;  %v13702_v34 = vpop.permute.xlu1 %1931 }
 0x5db   : > { %5580 = vperm.xlu0 %11492, %v9705_v7   ;;  %v9756_v7 = vld [vmem:[%s11825_s19 + $0x150] sm:$0xff] }
 0x5de   : > { %5881 = vperm.xlu1 %11493, %v9736_v45   ;;  %v9743_v45 = vld [vmem:[%s15744_s14 + $0x568] sm:$0xff] }
 0x5df   : > { %5693 = vperm.xlu0 %11492, %v9721_v54   ;;  %v13706_v54 = vpop.permute.xlu0 %1936 }
 0x5e2   : > { %6000 = vperm.xlu1 %11493, %v9750_v49   ;;  %v9712_v49 = vld [vmem:[%s15744_s14 + $0x170] sm:$0xff] }
 0x5e3   : > { %5886 = vperm.xlu0 %11492, %v9737_v38   ;;  %v13709_v38 = vpop.permute.xlu1 %1700 }
 0x5e6   : > { %5585 = vperm.xlu1 %11493, %v9706_v5   ;;  %v9757_v5 = vld [vmem:[%s11825_s19 + $0x158] sm:$0xff] }
 0x5e7   : > { %6005 = vperm.xlu0 %11492, %v9751_v19   ;;  %v9728_v19 = vld [vmem:[%s15744_s14 + $0x370] sm:$0xff] }
 0x5ea   : > { %5698 = vperm.xlu1 %11493, %v9722_v28   ;;  %v9713_v28 = vld [vmem:[%s15744_s14 + $0x178] sm:$0xff] }
 0x5eb   : > { %5590 = vperm.xlu0 %11492, %v9707_v56   ;;  %v13714_v56 = vpop.permute.xlu0 %1705 }
 0x5ee   : > { %5891 = vperm.xlu1 %11493, %v9738_v58   ;;  %v13716_v58 = vpop.permute.xlu1 %2043 }
 0x5ef   : > { %5703 = vperm.xlu0 %11492, %v9723_v6   ;;  %v9729_v6 = vld [vmem:[%s15744_s14 + $0x378] sm:$0xff] }
 0x5f2   : > { %6010 = vperm.xlu1 %11493, %v9752_v52   ;;  %v13719_v52 = vpop.permute.xlu0 %2048 }
 0x5f3   : > { %5896 = vperm.xlu0 %11492, %v9739_v32   ;;  %v4511_v32 = vld [vmem:[%s15916_s2] sm:$0xff] }
 0x5f4   : > { %10588 = vmatprep.mubr.msk.f32.mxu0 %vm4543_vm7, %v4511_v32  ;;  %v13756_v32 = vpop.permute.xlu1 %1941 }
 0x5f6   : > { %5595 = vperm.xlu1 %11493, %v9708_v35   ;;  %v4439_v35 = vld [vmem:[%s15917_s23] sm:$0xff] }
 0x5f7   : > { %6015 = vperm.xlu0 %11492, %v9753_v13  }
 0x5fa   : > { %5708 = vperm.xlu1 %11493, %v9724_v61  }
 0x5fb   : > { %5600 = vperm.xlu0 %11492, %v9709_v62  }
 0x5fe   : > { %5901 = vperm.xlu1 %11493, %v9740_v12  }
 0x5ff   : > { %5713 = vperm.xlu0 %11492, %v9725_v20   ;;  %v4512_v20 = vld [vmem:[%s15916_s2 + $0x8] sm:$0xff] }
 0x602   : > { %6020 = vperm.xlu1 %11493, %v9754_v4   ;;  %v4513_v4 = vld [vmem:[%s15916_s2 + $0x10] sm:$0xff] }
 0x603   : > { %5906 = vperm.xlu0 %11492, %v9741_v63   ;;  %v4514_v63 = vld [vmem:[%s15916_s2 + $0x18] sm:$0xff] }
 0x606   : > { %5605 = vperm.xlu1 %11493, %v9710_v37   ;;  %v4515_v37 = vld [vmem:[%s15916_s2 + $0x20] sm:$0xff] }
 0x607   : > { %6025 = vperm.xlu0 %11492, %v9755_v41   ;;  %v4516_v41 = vld [vmem:[%s15916_s2 + $0x28] sm:$0xff] }
 0x60a   : > { %5718 = vperm.xlu1 %11493, %v9726_v46   ;;  %v4517_v46 = vld [vmem:[%s15916_s2 + $0x30] sm:$0xff] }
 0x60b   : > { %5610 = vperm.xlu0 %11492, %v9711_v50   ;;  %v4518_v50 = vld [vmem:[%s15916_s2 + $0x38] sm:$0xff] }
 0x60e   : > { %5911 = vperm.xlu1 %11493, %v9742_v10   ;;  %v4519_v10 = vld [vmem:[%s15916_s2 + $0x40] sm:$0xff] }
 0x60f   : > { %5723 = vperm.xlu0 %11492, %v9727_v21   ;;  %v4520_v21 = vld [vmem:[%s15916_s2 + $0x48] sm:$0xff] }
 0x612   : > { %6030 = vperm.xlu1 %11493, %v9756_v7   ;;  %v4521_v7 = vld [vmem:[%s15916_s2 + $0x50] sm:$0xff] }
 0x613   : > { %5916 = vperm.xlu0 %11492, %v9743_v45   ;;  %v4522_v45 = vld [vmem:[%s15916_s2 + $0x58] sm:$0xff] }
 0x616   : > { %5615 = vperm.xlu1 %11493, %v9712_v49   ;;  %v4523_v49 = vld [vmem:[%s15916_s2 + $0x60] sm:$0xff] }
 0x617   : > { %6035 = vperm.xlu0 %11492, %v9757_v5   ;;  %v4524_v5 = vld [vmem:[%s15916_s2 + $0x68] sm:$0xff] }
 0x61a   : > { %5728 = vperm.xlu1 %11493, %v9728_v19   ;;  %v4525_v19 = vld [vmem:[%s15916_s2 + $0x70] sm:$0xff] }
 0x61b   : > { %5620 = vperm.xlu0 %11492, %v9713_v28   ;;  %v4526_v28 = vld [vmem:[%s15916_s2 + $0x78] sm:$0xff] }
 0x61f   : > { %5733 = vperm.xlu0 %11492, %v9729_v6   ;;  %v13754_v6 = vpop.permute.xlu0 %1946 }
 0x6a1   : > { %v4506_v13 = vpop.f32.mrb[32].mxu0 }
 0x6a2   : > { %v4507_v61 = vadd.f32 %v4506_v13, %v4439_v35  ;;  %v10585_v62 = vpop.f32.mrb[33].mxu0  ;;  %v13758_v35 = vpop.permute.xlu0 %1715 }
 0x6a3   : > { %v13760_v13 = vpop.permute.xlu1 %1710 }
 0x6a4   : > { %v4510_v12 = vmax.f32 %v4507_v61, 0.0 }
 0x6a6   : > { %10586 = vmatprep.subr.mxu0 %v4510_v12  ;;  %v13762_v61 = vpop.permute.xlu0 %2058 }
 0x6a7   : > { %10587 = vmatpush3.msra.mxu0 %v4510_v12  ;;  %v13764_v62 = vpop.permute.xlu1 %2053 }
 0x6a8   : > { %10589 = vmatmul.mubr.msk.f32.vlgmr.msra.gmra.mrb[34].mxu0 %vm4543_vm7, %v4512_v20 }
 0x6a9   : > { %10591 = vmatprep.mubr.msk.f32.mxu0 %vm4543_vm7, %v4513_v4 }
 0x6aa   : > { %v13766_v12 = vpop.permute.xlu0 %1956 }
 0x6ab   : > { %v13768_v20 = vpop.permute.xlu1 %1951 }
 0x6ac   : > { %10592 = vmatmul.mubr.msk.f32.gmra.mrb[36].mxu0 %vm4543_vm7, %v4514_v63 }
 0x6ad   : > { %10594 = vmatprep.mubr.msk.f32.mxu0 %vm4543_vm7, %v4515_v37 }
 0x6ae   : > { %v13770_v4 = vpop.permute.xlu0 %1725 }
 0x6af   : > { %v13772_v63 = vpop.permute.xlu1 %1720 }
 0x6b0   : > { %10595 = vmatmul.mubr.msk.f32.gmra.mrb[38].mxu0 %vm4543_vm7, %v4516_v41 }
 0x6b1   : > { %10597 = vmatprep.mubr.msk.f32.mxu0 %vm4543_vm7, %v4517_v46 }
 0x6b2   : > { %v13774_v37 = vpop.permute.xlu0 %2068 }
 0x6b3   : > { %v13776_v41 = vpop.permute.xlu1 %2063 }
 0x6b4   : > { %10598 = vmatmul.mubr.msk.f32.gmra.mrb[40].mxu0 %vm4543_vm7, %v4518_v50 }
 0x6b5   : > { %10600 = vmatprep.mubr.msk.f32.mxu0 %vm4543_vm7, %v4519_v10 }
 0x6b6   : > { %v13778_v46 = vpop.permute.xlu0 %1966 }
 0x6b7   : > { %v13780_v50 = vpop.permute.xlu1 %1961 }
 0x6b8   : > { %10601 = vmatmul.mubr.msk.f32.gmra.mrb[42].mxu0 %vm4543_vm7, %v4520_v21 }
 0x6b9   : > { %10603 = vmatprep.mubr.msk.f32.mxu0 %vm4543_vm7, %v4521_v7 }
 0x6ba   : > { %v13782_v10 = vpop.permute.xlu0 %1735 }
 0x6bb   : > { %v13784_v21 = vpop.permute.xlu1 %1730 }
 0x6bc   : > { %10604 = vmatmul.mubr.msk.f32.gmra.mrb[44].mxu0 %vm4543_vm7, %v4522_v45 }
 0x6bd   : > { %10606 = vmatprep.mubr.msk.f32.mxu0 %vm4543_vm7, %v4523_v49 }
 0x6be   : > { %v13786_v7 = vpop.permute.xlu0 %2078 }
 0x6bf   : > { %v13788_v45 = vpop.permute.xlu1 %2073 }
 0x6c0   : > { %10607 = vmatmul.mubr.msk.f32.gmra.mrb[46].mxu0 %vm4543_vm7, %v4524_v5 }
 0x6c1   : > { %10609 = vmatprep.mubr.msk.f32.mxu0 %vm4543_vm7, %v4525_v19 }
 0x6c2   : > { %v13790_v49 = vpop.permute.xlu0 %1976 }
 0x6c3   : > { %v13792_v5 = vpop.permute.xlu1 %1971 }
 0x6c4   : > { %10610 = vmatmul.mubr.msk.f32.gmra.mrb[48].mxu0 %vm4543_vm7, %v4526_v28 }
 0x6c6   : > { %v13794_v19 = vpop.permute.xlu0 %1745 }
 0x6c7   : > { %v13796_v28 = vpop.permute.xlu1 %1740 }
 0x6ca   : > { %v13798_v24 = vpop.permute.xlu0 %2088 }
 0x6cb   : > { %v13800_v9 = vpop.permute.xlu1 %2083 }
 0x6ce   : > { %v13802_v11 = vpop.permute.xlu0 %1986 }
 0x6cf   : > { %v13804_v17 = vpop.permute.xlu1 %1981 }
 0x6d0   : > { %15918 = vst [vmem:[#allocation54_spill] sm:$0xff] %v13804_v17 }
 0x6d2   : > { %v13806_v42 = vpop.permute.xlu0 %1755 }
 0x6d3   : > { %15919 = vst [vmem:[#allocation52_spill] sm:$0xff] %v13806_v42  ;;  %v13808_v59 = vpop.permute.xlu1 %1750 }
 0x6d4   : > { %15920 = vst [vmem:[#allocation53_spill] sm:$0xff] %v13808_v59 }
 0x6d6   : > { %v13810_v48 = vpop.permute.xlu0 %2098 }
 0x6d7   : > { %15921 = vst [vmem:[#allocation49_spill] sm:$0xff] %v13810_v48  ;;  %v13812_v2 = vpop.permute.xlu1 %2093 }
 0x6d8   : > { %15922 = vst [vmem:[#allocation55_spill] sm:$0xff] %v13812_v2 }
 0x6da   : > { %v13814_v39 = vpop.permute.xlu0 %1996 }
 0x6db   : > { %15923 = vst [vmem:[#allocation57_spill] sm:$0xff] %v13814_v39  ;;  %v13816_v33 = vpop.permute.xlu1 %1991  ;;  %v4531_v39 = vld [vmem:[%s15924_s5 + $0x20] sm:$0xff] }
 0x6dc   : > { %15925 = vst [vmem:[#allocation62_spill] sm:$0xff] %v13816_v33 }
 0x6de   : > { %v13818_v55 = vpop.permute.xlu0 %1765 }
 0x6df   : > { %15926 = vst [vmem:[#allocation60_spill] sm:$0xff] %v13818_v55  ;;  %v13820_v30 = vpop.permute.xlu1 %1760 }
 0x6e0   : > { %15927 = vst [vmem:[#allocation63_spill] sm:$0xff] %v13820_v30 }
 0x6e2   : > { %v13822_v3 = vpop.permute.xlu0 %2108 }
 0x6e3   : > { %15928 = vst [vmem:[#allocation50_spill] sm:$0xff] %v13822_v3  ;;  %v13824_v26 = vpop.permute.xlu1 %2103  ;;  %v4530_v3 = vld [vmem:[%s15924_s5 + $0x18] sm:$0xff] }
 0x6e4   : > { %15929 = vst [vmem:[#allocation56_spill] sm:$0xff] %v13824_v26 }
 0x6e6   : > { %v13826_v43 = vpop.permute.xlu0 %2006 }
 0x6e7   : > { %15930 = vst [vmem:[#allocation58_spill] sm:$0xff] %v13826_v43  ;;  %v13828_v60 = vpop.permute.xlu1 %2001  ;;  %v4528_v43 = vld [vmem:[%s15924_s5 + $0x8] sm:$0xff] }
 0x6e8   : > { %15931 = vst [vmem:[#allocation61_spill] sm:$0xff] %v13828_v60  ;;  %v4527_v60 = vld [vmem:[%s15924_s5] sm:$0xff] }
 0x6ea   : > { %v13830_v22 = vpop.permute.xlu0 %2118 }
 0x6eb   : > { %15932 = vst [vmem:[#allocation64_spill] sm:$0xff] %v13830_v22  ;;  %v13832_v8 = vpop.permute.xlu1 %2113 }
 0x6ec   : > { %15933 = vst [vmem:[#allocation65_spill] sm:$0xff] %v13832_v8 }
 0x6ee   : > { %v13834_v16 = vpop.permute.xlu0 %5550 }
 0x6ef   : > { %15934 = vst [vmem:[#allocation68_spill] sm:$0xff] %v13834_v16  ;;  %v13836_v1 = vpop.permute.xlu1 %5545 }
 0x6f0   : > { %15935 = vst [vmem:[#allocation74_spill] sm:$0xff] %v13836_v1 }
 0x6f2   : > { %v13838_v31 = vpop.permute.xlu0 %5663 }
 0x6f3   : > { %15936 = vst [vmem:[#allocation69_spill] sm:$0xff] %v13838_v31  ;;  %v13840_v30 = vpop.permute.xlu1 %5658 }
 0x6f4   : > { %15937 = vst [vmem:[#allocation75_spill] sm:$0xff] %v13840_v30 }
 0x6f6   : > { %v13842_v55 = vpop.permute.xlu0 %5856 }
 0x6f7   : > { %15938 = vst [vmem:[#allocation66_spill] sm:$0xff] %v13842_v55  ;;  %v13844_v26 = vpop.permute.xlu1 %5851 }
 0x6f8   : > { %15939 = vst [vmem:[#allocation70_spill] sm:$0xff] %v13844_v26 }
 0x6fa   : > { %v13848_v8 = vpop.permute.xlu0 %5560 }
 0x6fb   : > { %15940 = vst [vmem:[#allocation67_spill] sm:$0xff] %v13848_v8  ;;  %v13851_v1 = vpop.permute.xlu1 %5555 }
 0x6fc   : > { %15941 = vst [vmem:[#allocation71_spill] sm:$0xff] %v13851_v1 }
 0x6fe   : > { %v13856_v17 = vpop.permute.xlu0 %5673 }
 0x6ff   : > { %15942 = vst [vmem:[#allocation72_spill] sm:$0xff] %v13856_v17  ;;  %v13858_v8 = vpop.permute.xlu1 %5668 }
 0x700   : > { %15943 = vst [vmem:[#allocation73_spill] sm:$0xff] %v13858_v8 }
 0x702   : > { %v13862_v17 = vpop.permute.xlu0 %5866 }
 0x703   : > { %15944 = vst [vmem:[#allocation76_spill] sm:$0xff] %v13862_v17  ;;  %v4537_v17 = vld [vmem:[%s15924_s5 + $0x50] sm:$0xff] }
 0x77b   : > { %v10590_v33 = vpop.f32.mrb[34].mxu0 }
 0x77c   : > { %v4664_v22 = vadd.f32 %v10590_v33, %v4528_v43  ;;  %v4658_v36 = vpop.f32.mrb[35].mxu0  ;;  %v4532_v43 = vld [vmem:[%s15924_s5 + $0x28] sm:$0xff] }
 0x77d   : > { %v4659_v16 = vadd.f32 %v4658_v36, %v4527_v60 }
 0x77e   : > { %v9619_v31 = vmul.f32 -1.442695, %v4664_v22 }
 0x77f   : > { %v9618_v30 = vmul.f32 -1.442695, %v4659_v16  ;;  %v10593_v2 = vpop.f32.mrb[36].mxu0 }
 0x780   : > { %11494 = vpow2.f32 %v9619_v31  ;;  %v4674_v55 = vadd.f32 %v10593_v2, %v4530_v3  ;;  %v4668_v26 = vpop.f32.mrb[37].mxu0  ;;  %v4534_v2 = vld [vmem:[%s15924_s5 + $0x38] sm:$0xff]  ;;  %v4533_v31 = vld [vmem:[%s15924_s5 + $0x30] sm:$0xff] }
 0x781   : > { %11496 = vpow2.f32 %v9618_v30  ;;  %v4669_v59 = vadd.f32 %v4668_v26, %v4529_v18 }
 0x782   : > { %v9621_v33 = vmul.f32 -1.442695, %v4674_v55 }
 0x783   : > { %v9620_v60 = vmul.f32 -1.442695, %v4669_v59  ;;  %v10596_v36 = vpop.f32.mrb[38].mxu0 }
 0x784   : > { %11498 = vpow2.f32 %v9621_v33  ;;  %v4684_v22 = vadd.f32 %v10596_v36, %v4532_v43  ;;  %v4678_v16 = vpop.f32.mrb[39].mxu0  ;;  %v4536_v33 = vld [vmem:[%s15924_s5 + $0x48] sm:$0xff]  ;;  %v13865_v43 = vpop.permute.xlu1 %5861 }
 0x785   : > { %11500 = vpow2.f32 %v9620_v60  ;;  %v4679_v3 = vadd.f32 %v4678_v16, %v4531_v39  ;;  %15945 = vst [vmem:[#allocation77_spill] sm:$0xff] %v13865_v43  ;;  %v4535_v39 = vld [vmem:[%s15924_s5 + $0x40] sm:$0xff] }
 0x786   : > { %v9623_v30 = vmul.f32 -1.442695, %v4684_v22 }
 0x787   : > { %v9622_v26 = vmul.f32 -1.442695, %v4679_v3  ;;  %v10599_v18 = vpop.f32.mrb[40].mxu0 }
 0x788   : > { %11502 = vpow2.f32 %v9623_v30  ;;  %v4694_v55 = vadd.f32 %v10599_v18, %v4534_v2  ;;  %v4688_v1 = vpop.f32.mrb[41].mxu0 }
 0x789   : > { %11504 = vpow2.f32 %v9622_v26  ;;  %v4689_v59 = vadd.f32 %v4688_v1, %v4533_v31  ;;  %v4538_v26 = vld [vmem:[%s15924_s5 + $0x58] sm:$0xff] }
 0x78a   : > { %v11495_v8 = vpop.eup %11494  ;;  %v9625_v60 = vmul.f32 -1.442695, %v4694_v55  ;;  %v13870_v55 = vpop.permute.xlu0 %5985 }
 0x78b   : > { %v11497_v36 = vpop.eup %11496  ;;  %v4786_v22 = vadd.f32 1.0, %v11495_v8  ;;  %v9624_v16 = vmul.f32 -1.442695, %v4689_v59  ;;  %v10602_v3 = vpop.f32.mrb[42].mxu0  ;;  %15946 = vst [vmem:[#allocation78_spill] sm:$0xff] %v13870_v55 }
 0x78c   : > { %v4785_v53 = vadd.f32 1.0, %v11497_v36  ;;  %11506 = vpow2.f32 %v9625_v60  ;;  %v4704_v2 = vadd.f32 %v10602_v3, %v4536_v33  ;;  %v4698_v30 = vpop.f32.mrb[43].mxu0  ;;  %v13872_v36 = vpop.permute.xlu1 %5980 }
 0x78d   : > { %11508 = vrcp.f32 %v4786_v22  ;;  %v4699_v18 = vadd.f32 %v4698_v30, %v4535_v39  ;;  %15947 = vst [vmem:[#allocation79_spill] sm:$0xff] %v13872_v36  ;;  %v4539_v30 = vld [vmem:[%s15924_s5 + $0x60] sm:$0xff] }
 0x78e   : > { %v11499_v1 = vpop.eup %11498  ;;  %11510 = vrcp.f32 %v4785_v53  ;;  %v9627_v31 = vmul.f32 -1.442695, %v4704_v2  ;;  %v4540_v53 = vld [vmem:[%s15924_s5 + $0x68] sm:$0xff] }
 0x78f   : > { %v11501_v43 = vpop.eup %11500  ;;  %v4788_v48 = vadd.f32 1.0, %v11499_v1  ;;  %11512 = vpow2.f32 %v9624_v16  ;;  %v9626_v8 = vmul.f32 -1.442695, %v4699_v18  ;;  %v10605_v59 = vpop.f32.mrb[44].mxu0 }
 0x790   : > { %v4787_v33 = vadd.f32 1.0, %v11501_v43  ;;  %11514 = vpow2.f32 %v9627_v31  ;;  %v4714_v60 = vadd.f32 %v10605_v59, %v4538_v26  ;;  %v4708_v39 = vpop.f32.mrb[45].mxu0  ;;  %v13876_v26 = vpop.permute.xlu0 %5570 }
 0x791   : > { %11516 = vrcp.f32 %v4788_v48  ;;  %v4709_v22 = vadd.f32 %v4708_v39, %v4537_v17  ;;  %15948 = vst [vmem:[#allocation80_spill] sm:$0xff] %v13876_v26  ;;  %v4542_v17 = vld [vmem:[%s15924_s5 + $0x78] sm:$0xff]  ;;  %v13879_v39 = vpop.permute.xlu1 %5565 }
 0x792   : > { %v11503_v3 = vpop.eup %11502  ;;  %11518 = vrcp.f32 %v4787_v33  ;;  %v9629_v2 = vmul.f32 -1.442695, %v4714_v60  ;;  %15949 = vst [vmem:[#allocation81_spill] sm:$0xff] %v13879_v39  ;;  %v4541_v60 = vld [vmem:[%s15924_s5 + $0x70] sm:$0xff] }
 0x793   : > { %v11505_v55 = vpop.eup %11504  ;;  %v4790_v42 = vadd.f32 1.0, %v11503_v3  ;;  %11520 = vpow2.f32 %v9626_v8  ;;  %v9628_v16 = vmul.f32 -1.442695, %v4709_v22  ;;  %v10608_v18 = vpop.f32.mrb[46].mxu0 }
 0x794   : > { %v4789_v1 = vadd.f32 1.0, %v11505_v55  ;;  %11522 = vpow2.f32 %v9629_v2  ;;  %v4724_v43 = vadd.f32 %v10608_v18, %v4540_v53  ;;  %v4718_v31 = vpop.f32.mrb[47].mxu0  ;;  %v13882_v39 = vpop.permute.xlu0 %5683 }
 0x795   : > { %11524 = vrcp.f32 %v4790_v42  ;;  %v4719_v48 = vadd.f32 %v4718_v31, %v4539_v30  ;;  %v13884_v26 = vpop.permute.xlu1 %5678 }
 0x796   : > { %v11507_v59 = vpop.eup %11506  ;;  %11526 = vrcp.f32 %v4789_v1  ;;  %v9631_v33 = vmul.f32 -1.442695, %v4724_v43 }
 0x797   : > { %v11509_v3 = vpop.eup %11508  ;;  %v4792_v36 = vadd.f32 1.0, %v11507_v59  ;;  %11528 = vpow2.f32 %v9628_v16  ;;  %v9630_v8 = vmul.f32 -1.442695, %v4719_v48  ;;  %v10611_v22 = vpop.f32.mrb[48].mxu0 }
 0x798   : > { %v11511_v55 = vpop.eup %11510  ;;  %11530 = vpow2.f32 %v9631_v33  ;;  %v4734_v53 = vadd.f32 %v10611_v22, %v4542_v17  ;;  %4840 = vperm.xlu0 %11492, %v11509_v3   ;;  %v4728_v2 = vpop.f32.mrb[49].mxu0 }
 0x799   : > { %v11513_v18 = vpop.eup %11512  ;;  %11532 = vrcp.f32 %v4792_v36  ;;  %v4729_v42 = vadd.f32 %v4728_v2, %v4541_v60  ;;  %4835 = vperm.xlu1 %11493, %v11511_v55   ;;  %v13886_v55 = vpop.permute.xlu0 %5876 }
 0x79a   : > { %v11515_v30 = vpop.eup %11514  ;;  %v4791_v31 = vadd.f32 1.0, %v11513_v18  ;;  %11534 = vpow2.f32 %v9630_v8  ;;  %v9633_v1 = vmul.f32 -1.442695, %v4734_v53  ;;  %v13888_v2 = vpop.permute.xlu1 %5871 }
 0x79b   : > { %v11517_v43 = vpop.eup %11516  ;;  %v4794_v59 = vadd.f32 1.0, %v11515_v30  ;;  %v9632_v16 = vmul.f32 -1.442695, %v4729_v42 }
 0x79c   : > { %v11519_v48 = vpop.eup %11518  ;;  %11536 = vrcp.f32 %v4791_v31  ;;  %4850 = vperm.xlu0 %11492, %v11517_v43  }
 0x79d   : > { %v11521_v17 = vpop.eup %11520  ;;  %11538 = vrcp.f32 %v4794_v59  ;;  %4845 = vperm.xlu1 %11493, %v11519_v48  }
 0x79e   : > { %v11523_v36 = vpop.eup %11522  ;;  %v4793_v33 = vadd.f32 1.0, %v11521_v17  ;;  %11540 = vpow2.f32 %v9633_v1  ;;  %v13892_v17 = vpop.permute.xlu1 %5990 }
 0x79f   : > { %v11525_v60 = vpop.eup %11524  ;;  %v4796_v3 = vadd.f32 1.0, %v11523_v36  ;;  %11542 = vpow2.f32 %v9632_v16  ;;  %v13890_v16 = vpop.permute.xlu0 %5995 }
 0x7a0   : > { %v11527_v8 = vpop.eup %11526  ;;  %11544 = vrcp.f32 %v4793_v33  ;;  %4860 = vperm.xlu0 %11492, %v11525_v60  }
 0x7a1   : > { %v11529_v22 = vpop.eup %11528  ;;  %11546 = vrcp.f32 %v4796_v3  ;;  %4855 = vperm.xlu1 %11493, %v11527_v8  }
 0x7a2   : > { %v11531_v53 = vpop.eup %11530  ;;  %v4795_v18 = vadd.f32 1.0, %v11529_v22 }
 0x7a3   : > { %v11533_v42 = vpop.eup %11532  ;;  %v4798_v30 = vadd.f32 1.0, %v11531_v53  ;;  %v13894_v22 = vpop.permute.xlu0 %5580 }
 0x7a4   : > { %v11535_v31 = vpop.eup %11534  ;;  %11548 = vrcp.f32 %v4795_v18  ;;  %4870 = vperm.xlu0 %11492, %v11533_v42   ;;  %v13896_v18 = vpop.permute.xlu1 %5575 }
 0x7a5   : > { %11550 = vrcp.f32 %v4798_v30  ;;  %v4797_v1 = vadd.f32 1.0, %v11535_v31  ;;  %15950 = vst [vmem:[#allocation82_spill] sm:$0xff] %v13896_v18  ;;  %v15987_v18 = vmax.f32 %v13489_v27, 0.0 }
 0x7a6   : > { %v11537_v43 = vpop.eup %11536 }
 0x7a7   : > { %v11539_v59 = vpop.eup %11538  ;;  %11552 = vrcp.f32 %v4797_v1  ;;  %4865 = vperm.xlu1 %11493, %v11537_v43   ;;  %v13898_v31 = vpop.permute.xlu0 %5693 }
 0x7a8   : > { %v11541_v48 = vpop.eup %11540  ;;  %4880 = vperm.xlu0 %11492, %v11539_v59   ;;  %15951 = vst [vmem:[#allocation83_spill] sm:$0xff] %v13898_v31  ;;  %v13900_v1 = vpop.permute.xlu1 %5688 }
 0x7a9   : > { %v11543_v36 = vpop.eup %11542  ;;  %v4800_v33 = vadd.f32 1.0, %v11541_v48  ;;  %15952 = vst [vmem:[#allocation84_spill] sm:$0xff] %v13900_v1  ;;  %v9745_v48 = vld [vmem:[%s15744_s14 + $0x578] sm:$0xff]  ;;  %v9760_v1 = vld [vmem:[%s11825_s19 + $0x170] sm:$0xff] }
 0x7aa   : > { %v11545_v60 = vpop.eup %11544  ;;  %v4799_v3 = vadd.f32 1.0, %v11543_v36  ;;  %v9744_v36 = vld [vmem:[%s15744_s14 + $0x570] sm:$0xff] }
 0x7ab   : > { %v11547_v8 = vpop.eup %11546  ;;  %11554 = vrcp.f32 %v4800_v33  ;;  %4875 = vperm.xlu1 %11493, %v11545_v60   ;;  %v13904_v33 = vpop.permute.xlu0 %5886 }
 0x7ac   : > { %11556 = vrcp.f32 %v4799_v3  ;;  %4890 = vperm.xlu0 %11492, %v11547_v8   ;;  %15953 = vst [vmem:[#allocation85_spill] sm:$0xff] %v13904_v33  ;;  %v13906_v60 = vpop.permute.xlu1 %5881  ;;  %v9759_v3 = vld [vmem:[%s11825_s19 + $0x168] sm:$0xff]  ;;  %v9758_v8 = vld [vmem:[%s11825_s19 + $0x160] sm:$0xff] }
 0x7ad   : > { %15954 = vst [vmem:[#allocation86_spill] sm:$0xff] %v13906_v60 }
 0x7ae   : > { %v11549_v53 = vpop.eup %11548 }
 0x7af   : > { %v11551_v42 = vpop.eup %11550  ;;  %4885 = vperm.xlu1 %11493, %v11549_v53   ;;  %v13910_v53 = vpop.permute.xlu0 %6005 }
 0x7b0   : > { %4900 = vperm.xlu0 %11492, %v11551_v42   ;;  %15955 = vst [vmem:[#allocation87_spill] sm:$0xff] %v13910_v53  ;;  %v9761_v42 = vld [vmem:[%s11825_s19 + $0x178] sm:$0xff] }
 0x7b1   : > { %v11553_v30 = vpop.eup %11552 }
 0x7b3   : > { %4895 = vperm.xlu1 %11493, %v11553_v30   ;;  %v13913_v30 = vpop.permute.xlu1 %6000 }
 0x7b4   : > { %15956 = vst [vmem:[#allocation88_spill] sm:$0xff] %v13913_v30 }
 0x7b5   : > { %v11555_v43 = vpop.eup %11554 }
 0x7b6   : > { %v11557_v59 = vpop.eup %11556  ;;  %4910 = vperm.xlu0 %11492, %v11555_v43   ;;  %v13916_v43 = vpop.permute.xlu0 %5590 }
 0x7b7   : > { %4905 = vperm.xlu1 %11493, %v11557_v59   ;;  %15957 = vst [vmem:[#allocation89_spill] sm:$0xff] %v13916_v43  ;;  %v13918_v59 = vpop.permute.xlu1 %5585 }
 0x7b8   : > { %15958 = vst [vmem:[#allocation90_spill] sm:$0xff] %v13918_v59 }
 0x7ba   : > { %5926 = vperm.xlu0 %11492, %v9745_v48   ;;  %v13920_v33 = vpop.permute.xlu0 %5703 }
 0x7bb   : > { %5921 = vperm.xlu1 %11493, %v9744_v36   ;;  %15959 = vst [vmem:[#allocation91_spill] sm:$0xff] %v13920_v33  ;;  %v13922_v48 = vpop.permute.xlu1 %5698 }
 0x7bc   : > { %15960 = vst [vmem:[#allocation92_spill] sm:$0xff] %v13922_v48 }
 0x7be   : > { %6045 = vperm.xlu0 %11492, %v9759_v3   ;;  %v13924_v36 = vpop.permute.xlu0 %5896 }
 0x7bf   : > { %6040 = vperm.xlu1 %11493, %v9758_v8   ;;  %15961 = vst [vmem:[#allocation93_spill] sm:$0xff] %v13924_v36  ;;  %v13926_v3 = vpop.permute.xlu1 %5891 }
 0x7c0   : > { %15962 = vst [vmem:[#allocation94_spill] sm:$0xff] %v13926_v3 }
 0x7c2   : > { %6055 = vperm.xlu0 %11492, %v9761_v42   ;;  %v13928_v60 = vpop.permute.xlu0 %6015 }
 0x7c3   : > { %6050 = vperm.xlu1 %11493, %v9760_v1   ;;  %15963 = vst [vmem:[#allocation95_spill] sm:$0xff] %v13928_v60  ;;  %v13930_v8 = vpop.permute.xlu1 %6010 }
 0x7c4   : > { %15964 = vst [vmem:[#allocation96_spill] sm:$0xff] %v13930_v8 }
 0x7c6   : > { %v13932_v31 = vpop.permute.xlu0 %5600 }
 0x7c7   : > { %15965 = vst [vmem:[#allocation97_spill] sm:$0xff] %v13932_v31  ;;  %v13934_v42 = vpop.permute.xlu1 %5595 }
 0x7c8   : > { %15966 = vst [vmem:[#allocation98_spill] sm:$0xff] %v13934_v42 }
 0x7ca   : > { %v13936_v1 = vpop.permute.xlu0 %5713 }
 0x7cb   : > { %15967 = vst [vmem:[#allocation99_spill] sm:$0xff] %v13936_v1  ;;  %v13938_v43 = vpop.permute.xlu1 %5708 }
 0x7cc   : > { %15968 = vst [vmem:[#allocation100_spill] sm:$0xff] %v13938_v43 }
 0x7ce   : > { %v13940_v59 = vpop.permute.xlu0 %5906 }
 0x7cf   : > { %15969 = vst [vmem:[#allocation101_spill] sm:$0xff] %v13940_v59  ;;  %v13942_v33 = vpop.permute.xlu1 %5901 }
 0x7d0   : > { %15970 = vst [vmem:[#allocation102_spill] sm:$0xff] %v13942_v33 }
 0x7d2   : > { %v13944_v48 = vpop.permute.xlu0 %6025 }
 0x7d3   : > { %15971 = vst [vmem:[#allocation103_spill] sm:$0xff] %v13944_v48  ;;  %v13946_v36 = vpop.permute.xlu1 %6020 }
 0x7d4   : > { %15972 = vst [vmem:[#allocation104_spill] sm:$0xff] %v13946_v36 }
 0x7d6   : > { %v13948_v3 = vpop.permute.xlu0 %5610 }
 0x7d7   : > { %15973 = vst [vmem:[#allocation105_spill] sm:$0xff] %v13948_v3  ;;  %v13950_v60 = vpop.permute.xlu1 %5605  ;;  %v15983_v3 = vld [vmem:[#allocation29_spill] sm:$0xff] }
 0x7d8   : > { %15974 = vst [vmem:[#allocation106_spill] sm:$0xff] %v13950_v60  ;;  %v1835_v36 = vadd.f32 %v15983_v3, %v13700_v23 }
 0x7da   : > { %v13952_v8 = vpop.permute.xlu0 %5723 }
 0x7db   : > { %15975 = vst [vmem:[#allocation107_spill] sm:$0xff] %v13952_v8  ;;  %v13954_v31 = vpop.permute.xlu1 %5718  ;;  %v15985_v8 = vld [vmem:[#allocation30_spill] sm:$0xff] }
 0x7dc   : > { %15976 = vst [vmem:[#allocation108_spill] sm:$0xff] %v13954_v31  ;;  %v1840_v31 = vadd.f32 %v15985_v8, %v13695_v57  ;;  %v15989_v8 = vmax.f32 %v13491_v14, 0.0  ;;  %v15992_v14 = vld [vmem:[#allocation38_spill] sm:$0xff] }
 0x7de   : > { %v13956_v42 = vpop.permute.xlu0 %5916 }
 0x7df   : > { %15977 = vst [vmem:[#allocation109_spill] sm:$0xff] %v13956_v42  ;;  %v13958_v1 = vpop.permute.xlu1 %5911  ;;  %v2009_v42 = vmul.f32 %v13702_v34, %v1835_v36 }
 0x7e0   : > { %15978 = vst [vmem:[#allocation110_spill] sm:$0xff] %v13958_v1  ;;  %v2010_v1 = vmul.f32 %v13706_v54, %v1840_v31 }
 0x7e1   : > { %v2121_v57 = vadd.f32 %v13716_v58, %v2009_v42  ;;  %v1855_v42 = vadd.f32 %v15992_v14, %v13760_v13 }
 0x7e2   : > { %v13960_v43 = vpop.permute.xlu0 %6035 }
 0x7e3   : > { %15979 = vst [vmem:[#allocation111_spill] sm:$0xff] %v13960_v43  ;;  %v13962_v59 = vpop.permute.xlu1 %6030 }
 0x7e4   : > { %15980 = vst [vmem:[#allocation112_spill] sm:$0xff] %v13962_v59  ;;  %v15986_v59 = vld [vmem:[#allocation31_spill] sm:$0xff] }
 0x7e6   : > { %v13964_v33 = vpop.permute.xlu0 %5620 }
 0x7e7   : > { %15981 = vst [vmem:[#allocation113_spill] sm:$0xff] %v13964_v33  ;;  %v13966_v48 = vpop.permute.xlu1 %5615  ;;  %v1850_v33 = vadd.f32 %v15986_v59, %v13714_v56 }
 0x7e8   : > { %15982 = vst [vmem:[#allocation114_spill] sm:$0xff] %v13966_v48  ;;  %v2122_v48 = vadd.f32 %v13719_v52, %v2010_v1  ;;  %v15990_v52 = vld [vmem:[#allocation34_spill] sm:$0xff] }
 0x7e9   : > { %v2012_v34 = vmul.f32 %v13754_v6, %v1850_v33  ;;  %v1860_v27 = vadd.f32 %v15990_v52, %v13758_v35 }
 0x7ea   : > { %v13970_v60 = vpop.permute.xlu0 %5733 }
 0x7eb   : > { %15984 = vst [vmem:[#allocation29_spill] sm:$0xff] %v13970_v60  ;;  %v13974_v30 = vpop.permute.xlu1 %5728  ;;  %v15988_v60 = vld [vmem:[#allocation32_spill] sm:$0xff]  ;;  %v2014_v35 = vmul.f32 %v13766_v12, %v1860_v27 }
 0x7ec   : > { %v1845_v53 = vadd.f32 %v15988_v60, %v13709_v38  ;;  %v15991_v38 = vmax.f32 %v13501_v40, 0.0  ;;  %v2013_v40 = vmul.f32 %v13768_v20, %v1855_v42 }
 0x7ee   : > { %v2011_v36 = vmul.f32 %v13756_v32, %v1845_v53  ;;  %v15993_v32 = vmax.f32 %v13505_v51, 0.0  ;;  %v2125_v20 = vadd.f32 %v13776_v41, %v2013_v40  ;;  %v16000_v41 = vld [vmem:[#allocation39_spill] sm:$0xff]  ;;  %v16005_v40 = vmax.f32 %v13535_v15, 0.0 }
 0x7ef   : > { %v1880_v52 = vadd.f32 %v16000_v41, %v13782_v10  ;;  %v16002_v10 = vld [vmem:[#allocation35_spill] sm:$0xff] }
 0x7f0   : > { %v2123_v6 = vadd.f32 %v13764_v62, %v2011_v36  ;;  %v15995_v62 = vld [vmem:[#allocation33_spill] sm:$0xff] }
 0x7f1   : > { %v1870_v51 = vadd.f32 %v15995_v62, %v13770_v4  ;;  %v15999_v4 = vld [vmem:[#allocation36_spill] sm:$0xff] }
 0x7f3   : > { %v2016_v36 = vmul.f32 %v13778_v46, %v1870_v51 }
 0x7f5   : > { %v2128_v46 = vadd.f32 %v13786_v7, %v2016_v36  ;;  %v1875_v7 = vadd.f32 %v16002_v10, %v13784_v21 }
 0x817   : > { %v4841_v43 = vpop.permute.xlu0 %4840 }
 0x818   : > { %v4914_v23 = vmul.f32 %v4841_v43, %v15987_v18  ;;  %v4836_v3 = vpop.permute.xlu1 %4835  ;;  %v2124_v18 = vadd.f32 %v13762_v61, %v2012_v34  ;;  %v15997_v34 = vmax.f32 %v13515_v29, 0.0 }
 0x819   : > { %v4913_v54 = vmul.f32 %v4836_v3, %v15989_v8  ;;  %v15996_v3 = vmax.f32 %v13509_v44, 0.0  ;;  %v1865_v44 = vadd.f32 %v15999_v4, %v13772_v63 }
 0x81a   : > { %v4930_v31 = vadd.f32 %v4914_v23, %v2122_v48  ;;  %v2126_v23 = vadd.f32 %v13774_v37, %v2014_v35 }
 0x81b   : > { %v4929_v56 = vadd.f32 %v4913_v54, %v2121_v57  ;;  %v4851_v59 = vpop.permute.xlu0 %4850  ;;  %v2015_v63 = vmul.f32 %v13780_v50, %v1865_v44 }
 0x81c   : > { %v13993_v43 = vmax.f32 %v4930_v31, 0.0  ;;  %v4916_v58 = vmul.f32 %v4851_v59, %v15991_v38  ;;  %v4846_v60 = vpop.permute.xlu1 %4845 }
 0x81d   : > { %v14000_v33 = vmax.f32 %v4929_v56, 0.0  ;;  %v4915_v53 = vmul.f32 %v4846_v60, %v15993_v32  ;;  %v2018_v60 = vmul.f32 %v13790_v49, %v1880_v52  ;;  %v16015_v52 = vld [vmem:[#allocation53_spill] sm:$0xff] }
 0x81e   : > { %v4932_v48 = vadd.f32 %v4916_v58, %v2124_v18  ;;  %5481 = vrot.lane.b32.xlu0 %v13993_v43, %s15994_s9  ;;  %v16001_v18 = vmax.f32 %v13519_v25, 0.0  ;;  %v16003_v25 = vmax.f32 %v13527_v47, 0.0 }
 0x81f   : > { %v4931_v61 = vadd.f32 %v4915_v53, %v2123_v6  ;;  %v4861_v1 = vpop.permute.xlu0 %4860  ;;  %5479 = vrot.lane.b32.xlu1 %v14000_v33, %s15994_s9  ;;  %v11149_v13 = vpack.c.bf16 %v13993_v43, %v14000_v33  ;;  %v2127_v6 = vadd.f32 %v13788_v45, %v2015_v63  ;;  %v16004_v53 = vld [vmem:[#allocation37_spill] sm:$0xff]  ;;  %v2017_v45 = vmul.f32 %v13792_v5, %v1875_v7 }
 0x820   : > { %v14015_v12 = vmax.f32 %v4932_v48, 0.0  ;;  %v4918_v57 = vmul.f32 %v4861_v1, %v15996_v3  ;;  %v4856_v8 = vpop.permute.xlu1 %4855  ;;  %v1890_v35 = vadd.f32 %v16004_v53, %v13794_v19  ;;  %v2130_v48 = vadd.f32 %v13798_v24, %v2018_v60  ;;  %v16006_v19 = vld [vmem:[#allocation40_spill] sm:$0xff]  ;;  %v16023_v53 = vld [vmem:[#allocation62_spill] sm:$0xff] }
 0x821   : > { %v14020_v54 = vmax.f32 %v4931_v61, 0.0  ;;  %v4917_v31 = vmul.f32 %v4856_v8, %v15997_v34  ;;  %11150 = vmatprep.subr.bf16.mxu1 %v11149_v13  ;;  %v1885_v24 = vadd.f32 %v16006_v19, %v13796_v28  ;;  %v2129_v15 = vadd.f32 %v13800_v9, %v2017_v45  ;;  %v16013_v28 = vld [vmem:[#allocation54_spill] sm:$0xff]  ;;  %v16024_v45 = vld [vmem:[#allocation60_spill] sm:$0xff]  ;;  %v16026_v19 = vld [vmem:[#allocation63_spill] sm:$0xff] }
 0x822   : > { %v4934_v56 = vadd.f32 %v4918_v57, %v2126_v23  ;;  %5787 = vrot.lane.b32.xlu0 %v13993_v43, %s15998_s13  ;;  %11152 = vmatpush3.bf16.msra.mxu1 %v11149_v13  ;;  %v2020_v1 = vmul.f32 %v13802_v11, %v1890_v35  ;;  %v16007_v5 = vmax.f32 %v13543_v0, 0.0  ;;  %v16008_v11 = vld [vmem:[#allocation52_spill] sm:$0xff]  ;;  %v16009_v57 = vld [vmem:[#allocation42_spill] sm:$0xff] }
 0x823   : > { %v4933_v37 = vadd.f32 %v4917_v31, %v2125_v20  ;;  %v4871_v59 = vpop.permute.xlu0 %4870  ;;  %5785 = vrot.lane.b32.xlu1 %v14000_v33, %s15998_s13  ;;  %v11153_v29 = vpack.c.bf16 %v14015_v12, %v14020_v54  ;;  %v1900_v8 = vadd.f32 %v16009_v57, %v16008_v11  ;;  %v16010_v20 = vld [vmem:[#allocation49_spill] sm:$0xff]  ;;  %v16011_v31 = vld [vmem:[#allocation47_spill] sm:$0xff]  ;;  %v2019_v4 = vmul.f32 %v16013_v28, %v1885_v24  ;;  %v16027_v24 = vld [vmem:[#allocation44_spill] sm:$0xff] }
 0x824   : > { %v14036_v27 = vmax.f32 %v4934_v56, 0.0  ;;  %v4920_v38 = vmul.f32 %v4871_v59, %v16001_v18  ;;  %v2132_v34 = vadd.f32 %v16010_v20, %v2020_v1  ;;  %v16012_v36 = vmax.f32 %v16011_v31, 0.0  ;;  %v16029_v11 = vld [vmem:[#allocation48_spill] sm:$0xff]  ;;  %v16031_v20 = vld [vmem:[#allocation58_spill] sm:$0xff]  ;;  %v16032_v31 = vld [vmem:[#allocation61_spill] sm:$0xff] }
 0x825   : > { %v14041_v58 = vmax.f32 %v4933_v37, 0.0  ;;  %11154 = vmatprep.subr.bf16.mxu1 %v11153_v29  ;;  %v16014_v37 = vld [vmem:[#allocation57_spill] sm:$0xff]  ;;  %v16030_v57 = vmax.f32 %v16029_v11, 0.0 }
 0x826   : > { %v4936_v14 = vadd.f32 %v4920_v38, %v2128_v46  ;;  %v4866_v42 = vpop.permute.xlu1 %4865  ;;  %5485 = vrot.lane.b32.xlu0 %v14015_v12, %s15994_s9  ;;  %11156 = vmatpush3.bf16.msra.mxu1 %v11153_v29  ;;  %v2022_v59 = vmul.f32 %v16014_v37, %v1900_v8  ;;  %v16016_v46 = vld [vmem:[#allocation46_spill] sm:$0xff]  ;;  %v16017_v38 = vld [vmem:[#allocation55_spill] sm:$0xff] }
 0x827   : > { %v4919_v32 = vmul.f32 %v4866_v42, %v16003_v25  ;;  %v4881_v50 = vpop.permute.xlu0 %4880  ;;  %5483 = vrot.lane.b32.xlu1 %v14020_v54, %s15994_s9  ;;  %v11157_v49 = vpack.c.bf16 %v14036_v27, %v14041_v58  ;;  %v1895_v18 = vadd.f32 %v16016_v46, %v16015_v52  ;;  %v2131_v63 = vadd.f32 %v16017_v38, %v2019_v4  ;;  %v16036_v46 = vld [vmem:[#allocation65_spill] sm:$0xff] }
 0x828   : > { %v4922_v21 = vmul.f32 %v4881_v50, %v16005_v40  ;;  %v14061_v61 = vmax.f32 %v4936_v14, 0.0  ;;  %v16018_v14 = vld [vmem:[#allocation43_spill] sm:$0xff]  ;;  %v9799_v11 = vld [vmem:[%s15746_s6 + $0x128] sm:$0xff] }
 0x829   : > { %v4935_v47 = vadd.f32 %v4919_v32, %v2127_v6  ;;  %11158 = vmatprep.subr.bf16.mxu1 %v11157_v49  ;;  %v16019_v42 = vmax.f32 %v16018_v14, 0.0  ;;  %v16020_v6 = vld [vmem:[#allocation50_spill] sm:$0xff]  ;;  %v16021_v32 = vld [vmem:[#allocation45_spill] sm:$0xff]  ;;  %v2021_v35 = vmul.f32 %v16023_v53, %v1895_v18 }
 0x82a   : > { %v4938_v13 = vadd.f32 %v4922_v21, %v2130_v48  ;;  %v4876_v62 = vpop.permute.xlu1 %4875  ;;  %5791 = vrot.lane.b32.xlu0 %v14015_v12, %s15998_s13  ;;  %11160 = vmatpush3.bf16.msra.mxu1 %v11157_v49  ;;  %v2134_v25 = vadd.f32 %v16020_v6, %v2022_v59  ;;  %v16022_v50 = vmax.f32 %v16021_v32, 0.0  ;;  %v16034_v59 = vld [vmem:[#allocation59_spill] sm:$0xff]  ;;  %v9779_v53 = vld [vmem:[%s11835_s30 + $0x108] sm:$0xff] }
 0x82b   : > { %v14069_v51 = vmax.f32 %v4935_v47, 0.0  ;;  %v4921_v23 = vmul.f32 %v4876_v62, %v16007_v5  ;;  %v4891_v3 = vpop.permute.xlu0 %4890  ;;  %5789 = vrot.lane.b32.xlu1 %v14020_v54, %s15998_s13  ;;  %v16025_v47 = vld [vmem:[#allocation41_spill] sm:$0xff]  ;;  %v16028_v5 = vld [vmem:[#allocation56_spill] sm:$0xff] }
 0x82c   : > { %v4924_v56 = vmul.f32 %v4891_v3, %v16012_v36  ;;  %v14081_v9 = vmax.f32 %v4938_v13, 0.0  ;;  %v1910_v1 = vadd.f32 %v16025_v47, %v16024_v45  ;;  %v9781_v45 = vld [vmem:[%s11835_s30 + $0x118] sm:$0xff]  ;;  %v9780_v47 = vld [vmem:[%s11835_s30 + $0x110] sm:$0xff] }
 0x82d   : > { %v4937_v44 = vadd.f32 %v4921_v23, %v2129_v15  ;;  %v11161_v0 = vpack.c.bf16 %v14061_v61, %v14069_v51  ;;  %v1905_v15 = vadd.f32 %v16027_v24, %v16026_v19  ;;  %v2133_v23 = vadd.f32 %v16028_v5, %v2021_v35  ;;  %v9778_v35 = vld [vmem:[%s11835_s30 + $0x100] sm:$0xff]  ;;  %v9796_v19 = vld [vmem:[%s15746_s6 + $0x110] sm:$0xff]  ;;  %v9783_v24 = vld [vmem:[%s11835_s30 + $0x128] sm:$0xff] }
 0x82e   : > { %v4940_v29 = vadd.f32 %v4924_v56, %v2132_v34  ;;  %v4886_v41 = vpop.permute.xlu1 %4885  ;;  %5489 = vrot.lane.b32.xlu0 %v14036_v27, %s15994_s9  ;;  %v2024_v34 = vmul.f32 %v16031_v20, %v1910_v1  ;;  %v9811_v1 = vld [vmem:[%s15745_s12 + $0x108] sm:$0xff]  ;;  %v9813_v5 = vld [vmem:[%s15745_s12 + $0x118] sm:$0xff]  ;;  %v9784_v20 = vld [vmem:[%s11835_s30 + $0x130] sm:$0xff] }
 0x82f   : > { %v14091_v60 = vmax.f32 %v4937_v44, 0.0  ;;  %v4923_v10 = vmul.f32 %v4886_v41, %v16019_v42  ;;  %11162 = vmatprep.subr.bf16.mxu1 %v11161_v0  ;;  %v4901_v7 = vpop.permute.xlu0 %4900  ;;  %5487 = vrot.lane.b32.xlu1 %v14041_v58, %s15994_s9  ;;  %v2023_v36 = vmul.f32 %v16032_v31, %v1905_v15  ;;  %v9782_v15 = vld [vmem:[%s11835_s30 + $0x120] sm:$0xff] }
 0x830   : > { %11164 = vmatpush3.bf16.msra.mxu1 %v11161_v0  ;;  %v4926_v49 = vmul.f32 %v4901_v7, %v16022_v50  ;;  %v14101_v48 = vmax.f32 %v4940_v29, 0.0  ;;  %v16033_v0 = vld [vmem:[#allocation64_spill] sm:$0xff]  ;;  %v16035_v29 = vmax.f32 %v16034_v59, 0.0  ;;  %v9787_v59 = vld [vmem:[%s11835_s30 + $0x148] sm:$0xff] }
 0x831   : > { %v4939_v40 = vadd.f32 %v4923_v10, %v2131_v63  ;;  %v11165_v21 = vpack.c.bf16 %v14081_v9, %v14091_v60  ;;  %v2136_v37 = vadd.f32 %v16033_v0, %v2024_v34  ;;  %v2135_v18 = vadd.f32 %v16036_v46, %v2023_v36  ;;  %v16037_v63 = vld [vmem:[#allocation51_spill] sm:$0xff]  ;;  %v9815_v34 = vld [vmem:[%s15745_s12 + $0x128] sm:$0xff]  ;;  %v9814_v36 = vld [vmem:[%s15745_s12 + $0x120] sm:$0xff] }
 0x832   : > { %v4942_v13 = vadd.f32 %v4926_v49, %v2134_v25  ;;  %v4896_v62 = vpop.permute.xlu1 %4895  ;;  %5795 = vrot.lane.b32.xlu0 %v14036_v27, %s15998_s13  ;;  %v16038_v14 = vmax.f32 %v16037_v63, 0.0  ;;  %v9762_v49 = vld [vmem:[%s11830_s24 + $0x100] sm:$0xff]  ;;  %v9816_v46 = vld [vmem:[%s15745_s12 + $0x130] sm:$0xff]  ;;  %v9803_v63 = vld [vmem:[%s15746_s6 + $0x148] sm:$0xff] }
 0x833   : > { %v14112_v3 = vmax.f32 %v4939_v40, 0.0  ;;  %v4925_v8 = vmul.f32 %v4896_v62, %v16030_v57  ;;  %11166 = vmatprep.subr.bf16.mxu1 %v11165_v21  ;;  %5793 = vrot.lane.b32.xlu1 %v14041_v58, %s15998_s13  ;;  %v9795_v40 = vld [vmem:[%s15746_s6 + $0x108] sm:$0xff]  ;;  %v9797_v62 = vld [vmem:[%s15746_s6 + $0x118] sm:$0xff]  ;;  %v9798_v57 = vld [vmem:[%s15746_s6 + $0x120] sm:$0xff] }
 0x834   : > { %11168 = vmatpush3.bf16.msra.mxu1 %v11165_v21  ;;  %v14120_v56 = vmax.f32 %v4942_v13, 0.0  ;;  %10700 = vmatprep.mubr.f32.mxu0 %v9762_v49  ;;  %v9794_v21 = vld [vmem:[%s15746_s6 + $0x100] sm:$0xff] }
 0x835   : > { %v4941_v28 = vadd.f32 %v4925_v8, %v2133_v23  ;;  %v4911_v4 = vpop.permute.xlu0 %4910  ;;  %v11169_v44 = vpack.c.bf16 %v14101_v48, %v14112_v3  ;;  %v9810_v13 = vld [vmem:[%s15745_s12 + $0x100] sm:$0xff]  ;;  %v9812_v23 = vld [vmem:[%s15745_s12 + $0x110] sm:$0xff]  ;;  %v9785_v8 = vld [vmem:[%s11835_s30 + $0x138] sm:$0xff] }
 0x836   : > { %v4928_v41 = vmul.f32 %v4911_v4, %v16035_v29  ;;  %v4906_v52 = vpop.permute.xlu1 %4905  ;;  %5493 = vrot.lane.b32.xlu0 %v14061_v61, %s15994_s9  ;;  %v9801_v4 = vld [vmem:[%s15746_s6 + $0x138] sm:$0xff]  ;;  %v9786_v29 = vld [vmem:[%s11835_s30 + $0x140] sm:$0xff] }
 0x837   : > { %v14130_v38 = vmax.f32 %v4941_v28, 0.0  ;;  %v4927_v42 = vmul.f32 %v4906_v52, %v16038_v14  ;;  %11170 = vmatprep.subr.bf16.mxu1 %v11169_v44  ;;  %5491 = vrot.lane.b32.xlu1 %v14069_v51, %s15994_s9 }
 0x838   : > { %v4944_v10 = vadd.f32 %v4928_v41, %v2136_v37  ;;  %11172 = vmatpush3.bf16.msra.mxu1 %v11169_v44  ;;  %v9800_v44 = vld [vmem:[%s15746_s6 + $0x130] sm:$0xff]  ;;  %v9817_v41 = vld [vmem:[%s15745_s12 + $0x138] sm:$0xff] }
 0x839   : > { %v4943_v7 = vadd.f32 %v4927_v42, %v2135_v18  ;;  %v11173_v6 = vpack.c.bf16 %v14120_v56, %v14130_v38  ;;  %v14200_v31 = vpop.permute.xlu0 %5926  ;;  %v9802_v42 = vld [vmem:[%s15746_s6 + $0x140] sm:$0xff] }
 0x83a   : > { %v14138_v25 = vmax.f32 %v4944_v10, 0.0  ;;  %5799 = vrot.lane.b32.xlu0 %v14061_v61, %s15998_s13  ;;  %v14203_v28 = vpop.permute.xlu1 %5921 }
 0x83b   : > { %v14142_v32 = vmax.f32 %v4943_v7, 0.0  ;;  %11174 = vmatprep.subr.bf16.mxu1 %v11173_v6  ;;  %5797 = vrot.lane.b32.xlu1 %v14069_v51, %s15998_s13 }
 0x83c   : > { %11176 = vmatpush3.bf16.msra.mxu1 %v11173_v6  ;;  %v16039_v6 = vld [vmem:[#allocation68_spill] sm:$0xff] }
 0x83d   : > { %v11177_v50 = vpack.c.bf16 %v14138_v25, %v14142_v32  ;;  %v14207_v0 = vpop.permute.xlu0 %6045 }
 0x83e   : > { %5497 = vrot.lane.b32.xlu0 %v14081_v9, %s15994_s9  ;;  %v14209_v37 = vpop.permute.xlu1 %6040 }
 0x83f   : > { %11178 = vmatprep.subr.bf16.mxu1 %v11177_v50  ;;  %5495 = vrot.lane.b32.xlu1 %v14091_v60, %s15994_s9 }
 0x840   : > { %11180 = vmatpush3.bf16.msra.mxu1 %v11177_v50 }
 0x841   : > { %v14214_v52 = vpop.permute.xlu0 %6055 }
 0x842   : > { %5803 = vrot.lane.b32.xlu0 %v14081_v9, %s15998_s13  ;;  %v14217_v18 = vpop.permute.xlu1 %6050 }
 0x843   : > { %5801 = vrot.lane.b32.xlu1 %v14091_v60, %s15998_s13 }
 0x846   : > { %5501 = vrot.lane.b32.xlu0 %v14101_v48, %s15994_s9 }
 0x847   : > { %5499 = vrot.lane.b32.xlu1 %v14112_v3, %s15994_s9 }
 0x84a   : > { %5807 = vrot.lane.b32.xlu0 %v14101_v48, %s15998_s13 }
 0x84b   : > { %5805 = vrot.lane.b32.xlu1 %v14112_v3, %s15998_s13 }
 0x84e   : > { %5505 = vrot.lane.b32.xlu0 %v14120_v56, %s15994_s9 }
 0x84f   : > { %5503 = vrot.lane.b32.xlu1 %v14130_v38, %s15994_s9 }
 0x852   : > { %5811 = vrot.lane.b32.xlu0 %v14120_v56, %s15998_s13 }
 0x853   : > { %5809 = vrot.lane.b32.xlu1 %v14130_v38, %s15998_s13 }
 0x856   : > { %5509 = vrot.lane.b32.xlu0 %v14138_v25, %s15994_s9 }
 0x857   : > { %5507 = vrot.lane.b32.xlu1 %v14142_v32, %s15994_s9 }
 0x85a   : > { %5815 = vrot.lane.b32.xlu0 %v14138_v25, %s15998_s13 }
 0x85b   : > { %5813 = vrot.lane.b32.xlu1 %v14142_v32, %s15998_s13 }
 0x85e   : > { %6115 = vperm.xlu0 %11492, %v9779_v53   ;;  %v16040_v53 = vld [vmem:[#allocation74_spill] sm:$0xff] }
 0x85f   : > { %6110 = vperm.xlu1 %11493, %v9778_v35  }
 0x862   : > { %6357 = vperm.xlu0 %11492, %v9795_v40   ;;  %v9789_v40 = vld [vmem:[%s11835_s30 + $0x158] sm:$0xff] }
 0x863   : > { %6352 = vperm.xlu1 %11493, %v9794_v21   ;;  %v16041_v21 = vld [vmem:[#allocation69_spill] sm:$0xff] }
 0x866   : > { %6125 = vperm.xlu0 %11492, %v9781_v45   ;;  %v5737_v45 = vmul.f32 %v16041_v21, %v13993_v43  ;;  %v9819_v43 = vld [vmem:[%s15745_s12 + $0x148] sm:$0xff] }
 0x867   : > { %6120 = vperm.xlu1 %11493, %v9780_v47   ;;  %v16050_v21 = vld [vmem:[#allocation73_spill] sm:$0xff] }
 0x86a   : > { %6470 = vperm.xlu0 %11492, %v9811_v1   ;;  %v9788_v1 = vld [vmem:[%s11835_s30 + $0x150] sm:$0xff] }
 0x86b   : > { %6465 = vperm.xlu1 %11493, %v9810_v13   ;;  %v16042_v13 = vld [vmem:[#allocation75_spill] sm:$0xff] }
 0x86e   : > { %6367 = vperm.xlu0 %11492, %v9797_v62   ;;  %v5736_v62 = vmul.f32 %v16042_v13, %v14000_v33 }
 0x86f   : > { %6362 = vperm.xlu1 %11493, %v9796_v19  }
 0x872   : > { %6135 = vperm.xlu0 %11492, %v9783_v24  }
 0x873   : > { %6130 = vperm.xlu1 %11493, %v9782_v15  }
 0x876   : > { %6480 = vperm.xlu0 %11492, %v9813_v5   ;;  %v16043_v5 = vld [vmem:[#allocation66_spill] sm:$0xff] }
 0x877   : > { %6475 = vperm.xlu1 %11493, %v9812_v23  }
 0x87a   : > { %6377 = vperm.xlu0 %11492, %v9799_v11  }
 0x87b   : > { %6372 = vperm.xlu1 %11493, %v9798_v57  }
 0x87e   : > { %6145 = vperm.xlu0 %11492, %v9785_v8   ;;  %v16044_v8 = vld [vmem:[#allocation70_spill] sm:$0xff] }
 0x87f   : > { %6140 = vperm.xlu1 %11493, %v9784_v20  }
 0x882   : > { %6490 = vperm.xlu0 %11492, %v9815_v34  }
 0x883   : > { %6485 = vperm.xlu1 %11493, %v9814_v36  }
 0x886   : > { %6387 = vperm.xlu0 %11492, %v9801_v4   ;;  %v9818_v4 = vld [vmem:[%s15745_s12 + $0x140] sm:$0xff] }
 0x887   : > { %6382 = vperm.xlu1 %11493, %v9800_v44  }
 0x88a   : > { %6155 = vperm.xlu0 %11492, %v9787_v59  }
 0x88b   : > { %6150 = vperm.xlu1 %11493, %v9786_v29   ;;  %v16045_v29 = vld [vmem:[#allocation67_spill] sm:$0xff] }
 0x88e   : > { %6500 = vperm.xlu0 %11492, %v9817_v41  }
 0x88f   : > { %6495 = vperm.xlu1 %11493, %v9816_v46  }
 0x890   : > { %v5482_v14 = vpop.permute.xlu0 %5481 }
 0x891   : > { %v5528_v10 = vsel %vm1052_vm1, 0.0, %v5482_v14  ;;  %v5480_v7 = vpop.permute.xlu1 %5479 }
 0x892   : > { %v5624_v50 = vmul.f32 %v16039_v6, %v5528_v10  ;;  %v5527_v49 = vsel %vm1052_vm1, 0.0, %v5480_v7  ;;  %6397 = vperm.xlu0 %11492, %v9803_v63   ;;  %v16046_v63 = vld [vmem:[#allocation78_spill] sm:$0xff]  ;;  %v9805_v7 = vld [vmem:[%s15746_s6 + $0x158] sm:$0xff] }
 0x893   : > { %v5623_v35 = vmul.f32 %v16040_v53, %v5527_v49  ;;  %6392 = vperm.xlu1 %11493, %v9802_v42   ;;  %v16047_v42 = vld [vmem:[#allocation71_spill] sm:$0xff]  ;;  %v16049_v49 = vld [vmem:[#allocation72_spill] sm:$0xff] }
 0x894   : > { %v5788_v47 = vpop.permute.xlu0 %5787  ;;  %v5753_v15 = vadd.f32 %v5737_v45, %v5624_v50  ;;  %v16048_v6 = vld [vmem:[#allocation79_spill] sm:$0xff]  ;;  %v5739_v53 = vmul.f32 %v16049_v49, %v14015_v12  ;;  %v5738_v45 = vmul.f32 %v16050_v21, %v14020_v54  ;;  %v9791_v12 = vld [vmem:[%s11835_s30 + $0x168] sm:$0xff] }
 0x895   : > { %v5834_v19 = vsel %vm1085_vm4, %v5788_v47, 0.0  ;;  %v5786_v24 = vpop.permute.xlu1 %5785  ;;  %v5752_v57 = vadd.f32 %v5736_v62, %v5623_v35 }
 0x896   : > { %v5930_v23 = vmul.f32 %v16043_v5, %v5834_v19  ;;  %v5833_v11 = vsel %vm1085_vm4, %v5786_v24, 0.0  ;;  %6165 = vperm.xlu0 %11492, %v9789_v40   ;;  %v9804_v40 = vld [vmem:[%s15746_s6 + $0x150] sm:$0xff]  ;;  %v16051_v19 = vld [vmem:[#allocation76_spill] sm:$0xff] }
 0x897   : > { %v5929_v20 = vmul.f32 %v16044_v8, %v5833_v11  ;;  %6160 = vperm.xlu1 %11493, %v9788_v1   ;;  %v9790_v8 = vld [vmem:[%s11835_s30 + $0x160] sm:$0xff] }
 0x898   : > { %v5946_v34 = vadd.f32 %v5930_v23, %v5753_v15  ;;  %v5486_v36 = vpop.permute.xlu0 %5485  ;;  %v16052_v23 = vld [vmem:[#allocation77_spill] sm:$0xff] }
 0x899   : > { %v5945_v33 = vadd.f32 %v5929_v20, %v5752_v57  ;;  %v5530_v44 = vsel %vm1052_vm1, 0.0, %v5486_v36  ;;  %v5484_v59 = vpop.permute.xlu1 %5483  ;;  %v16053_v36 = vld [vmem:[#allocation80_spill] sm:$0xff] }
 0x89a   : > { %v5626_v41 = vmul.f32 %v16045_v29, %v5530_v44  ;;  %v5529_v46 = vsel %vm1052_vm1, 0.0, %v5484_v59  ;;  %6510 = vperm.xlu0 %11492, %v9819_v43   ;;  %v6059_v14 = vadd.f32 %v16046_v63, %v5946_v34  ;;  %v16054_v59 = vld [vmem:[#allocation81_spill] sm:$0xff]  ;;  %v5741_v63 = vmul.f32 %v13882_v39, %v14036_v27 }
 0x89b   : > { %v5625_v10 = vmul.f32 %v16047_v42, %v5529_v46  ;;  %6505 = vperm.xlu1 %11493, %v9818_v4   ;;  %v6058_v50 = vadd.f32 %v16048_v6, %v5945_v33  ;;  %v9820_v42 = vld [vmem:[%s15745_s12 + $0x150] sm:$0xff]  ;;  %v9807_v39 = vld [vmem:[%s15746_s6 + $0x168] sm:$0xff] }
 0x89c   : > { %v5792_v35 = vpop.permute.xlu0 %5791  ;;  %v5755_v62 = vadd.f32 %v5739_v53, %v5626_v41  ;;  %v9821_v41 = vld [vmem:[%s15745_s12 + $0x158] sm:$0xff] }
 0x89d   : > { %v5836_v47 = vsel %vm1085_vm4, %v5792_v35, 0.0  ;;  %v5790_v1 = vpop.permute.xlu1 %5789  ;;  %v11181_v13 = vpack.c.bf16 %v6059_v14, %v6058_v50  ;;  %v5754_v5 = vadd.f32 %v5738_v45, %v5625_v10  ;;  %v5740_v10 = vmul.f32 %v13884_v26, %v14041_v58  ;;  %v9806_v58 = vld [vmem:[%s15746_s6 + $0x160] sm:$0xff] }
 0x89e   : > { %v5932_v24 = vmul.f32 %v16051_v19, %v5836_v47  ;;  %v5835_v15 = vsel %vm1085_vm4, %v5790_v1, 0.0  ;;  %6407 = vperm.xlu0 %11492, %v9805_v7   ;;  %v16055_v1 = vld [vmem:[#allocation87_spill] sm:$0xff] }
 0x89f   : > { %v5931_v11 = vmul.f32 %v16052_v23, %v5835_v15  ;;  %6402 = vperm.xlu1 %11493, %v9804_v40   ;;  %11182 = vmatprep.subr.bf16.mxu0 %v11181_v13  ;;  %v9793_v19 = vld [vmem:[%s11835_s30 + $0x178] sm:$0xff] }
 0x8a0   : > { %v5948_v57 = vadd.f32 %v5932_v24, %v5755_v62  ;;  %v5490_v54 = vpop.permute.xlu0 %5489  ;;  %11184 = vmatpush3.bf16.msra.mxu0 %v11181_v13  ;;  %v16056_v13 = vld [vmem:[#allocation82_spill] sm:$0xff]  ;;  %v16057_v24 = vld [vmem:[#allocation88_spill] sm:$0xff] }
 0x8a1   : > { %v5947_v20 = vadd.f32 %v5931_v11, %v5754_v5  ;;  %v5532_v43 = vsel %vm1052_vm1, 0.0, %v5490_v54  ;;  %v5488_v34 = vpop.permute.xlu1 %5487  ;;  %v16058_v5 = vld [vmem:[#allocation83_spill] sm:$0xff] }
 0x8a2   : > { %v5628_v4 = vmul.f32 %v16053_v36, %v5532_v43  ;;  %v5531_v33 = vsel %vm1052_vm1, 0.0, %v5488_v34  ;;  %6175 = vperm.xlu0 %11492, %v9791_v12   ;;  %v6061_v44 = vadd.f32 %v13890_v16, %v5948_v57  ;;  %v5743_v23 = vmul.f32 %v16058_v5, %v14061_v61  ;;  %v9792_v12 = vld [vmem:[%s11835_s30 + $0x170] sm:$0xff]  ;;  %v16059_v57 = vld [vmem:[#allocation84_spill] sm:$0xff]  ;;  %v16060_v34 = vld [vmem:[#allocation85_spill] sm:$0xff] }
 0x8a3   : > { %v5627_v29 = vmul.f32 %v16054_v59, %v5531_v33  ;;  %6170 = vperm.xlu1 %11493, %v9790_v8   ;;  %v6060_v46 = vadd.f32 %v13892_v17, %v5947_v20  ;;  %v9823_v61 = vld [vmem:[%s15745_s12 + $0x168] sm:$0xff] }
 0x8a4   : > { %v5796_v14 = vpop.permute.xlu0 %5795  ;;  %v5757_v50 = vadd.f32 %v5741_v63, %v5628_v4 }
 0x8a5   : > { %v5838_v7 = vsel %vm1085_vm4, %v5796_v14, 0.0  ;;  %v5794_v6 = vpop.permute.xlu1 %5793  ;;  %v11185_v16 = vpack.c.bf16 %v6061_v44, %v6060_v46  ;;  %v5756_v17 = vadd.f32 %v5740_v10, %v5627_v29  ;;  %v16061_v44 = vld [vmem:[#allocation86_spill] sm:$0xff] }
 0x8a6   : > { %v5934_v49 = vmul.f32 %v13886_v55, %v5838_v7  ;;  %v5837_v53 = vsel %vm1085_vm4, %v5794_v6, 0.0  ;;  %6520 = vperm.xlu0 %11492, %v9821_v41   ;;  %v9822_v41 = vld [vmem:[%s15745_s12 + $0x160] sm:$0xff]  ;;  %v16063_v6 = vld [vmem:[#allocation95_spill] sm:$0xff] }
 0x8a7   : > { %v5933_v35 = vmul.f32 %v13888_v2, %v5837_v53  ;;  %6515 = vperm.xlu1 %11493, %v9820_v42   ;;  %11186 = vmatprep.subr.bf16.mxu0 %v11185_v16  ;;  %v16062_v42 = vld [vmem:[#allocation89_spill] sm:$0xff]  ;;  %v9809_v53 = vld [vmem:[%s15746_s6 + $0x178] sm:$0xff] }
 0x8a8   : > { %v5950_v27 = vadd.f32 %v5934_v49, %v5757_v50  ;;  %v5494_v26 = vpop.permute.xlu0 %5493  ;;  %11188 = vmatpush3.bf16.msra.mxu0 %v11185_v16  ;;  %v16064_v50 = vld [vmem:[#allocation90_spill] sm:$0xff] }
 0x8a9   : > { %v5949_v40 = vadd.f32 %v5933_v35, %v5756_v17  ;;  %v5534_v21 = vsel %vm1052_vm1, 0.0, %v5494_v26  ;;  %v5492_v45 = vpop.permute.xlu1 %5491  ;;  %v16065_v17 = vld [vmem:[#allocation96_spill] sm:$0xff] }
 0x8aa   : > { %v5630_v55 = vmul.f32 %v13894_v22, %v5534_v21  ;;  %v5533_v47 = vsel %vm1052_vm1, 0.0, %v5492_v45  ;;  %6417 = vperm.xlu0 %11492, %v9807_v39   ;;  %v6063_v2 = vadd.f32 %v16055_v1, %v5950_v27  ;;  %v5742_v22 = vmul.f32 %v16059_v57, %v14069_v51  ;;  %v16066_v39 = vld [vmem:[#allocation91_spill] sm:$0xff] }
 0x8ab   : > { %v5629_v62 = vmul.f32 %v16056_v13, %v5533_v47  ;;  %6412 = vperm.xlu1 %11493, %v9806_v58   ;;  %v6062_v15 = vadd.f32 %v16057_v24, %v5949_v40  ;;  %v5745_v27 = vmul.f32 %v16066_v39, %v14081_v9  ;;  %v9808_v58 = vld [vmem:[%s15746_s6 + $0x170] sm:$0xff]  ;;  %v16067_v40 = vld [vmem:[#allocation92_spill] sm:$0xff] }
 0x8ac   : > { %v5800_v11 = vpop.permute.xlu0 %5799  ;;  %v5759_v43 = vadd.f32 %v5743_v23, %v5630_v55  ;;  %v5744_v21 = vmul.f32 %v16067_v40, %v14091_v60  ;;  %v16069_v24 = vld [vmem:[#allocation94_spill] sm:$0xff]  ;;  %v9825_v9 = vld [vmem:[%s15745_s12 + $0x178] sm:$0xff] }
 0x8ad   : > { %v5840_v54 = vsel %vm1085_vm4, %v5800_v11, 0.0  ;;  %v5798_v8 = vpop.permute.xlu1 %5797  ;;  %v11189_v20 = vpack.c.bf16 %v6063_v2, %v6062_v15  ;;  %v5758_v33 = vadd.f32 %v5742_v22, %v5629_v62  ;;  %v16068_v2 = vld [vmem:[#allocation93_spill] sm:$0xff]  ;;  %v9824_v23 = vld [vmem:[%s15745_s12 + $0x170] sm:$0xff] }
 0x8ae   : > { %v5936_v36 = vmul.f32 %v16060_v34, %v5840_v54  ;;  %v5839_v4 = vsel %vm1085_vm4, %v5798_v8, 0.0  ;;  %6185 = vperm.xlu0 %11492, %v9793_v19   ;;  %v16070_v22 = vld [vmem:[#allocation97_spill] sm:$0xff]  ;;  %v16072_v34 = vld [vmem:[#allocation98_spill] sm:$0xff] }
 0x8af   : > { %v5935_v59 = vmul.f32 %v16061_v44, %v5839_v4  ;;  %6180 = vperm.xlu1 %11493, %v9792_v12   ;;  %11190 = vmatprep.subr.bf16.mxu0 %v11189_v20  ;;  %v9827_v4 = vld [vmem:[%s15744_s14 + $0x188] sm:$0xff] }
 0x8b0   : > { %v5952_v29 = vadd.f32 %v5936_v36, %v5759_v43  ;;  %v5498_v51 = vpop.permute.xlu0 %5497  ;;  %11192 = vmatpush3.bf16.msra.mxu0 %v11189_v20  ;;  %v16071_v20 = vld [vmem:[#allocation103_spill] sm:$0xff] }
 0x8b1   : > { %v5951_v46 = vadd.f32 %v5935_v59, %v5758_v33  ;;  %v5536_v63 = vsel %vm1052_vm1, 0.0, %v5498_v51  ;;  %v5496_v14 = vpop.permute.xlu1 %5495  ;;  %v16073_v33 = vld [vmem:[#allocation104_spill] sm:$0xff]  ;;  %v16074_v59 = vld [vmem:[#allocation99_spill] sm:$0xff] }
 0x8b2   : > { %v5632_v10 = vmul.f32 %v16062_v42, %v5536_v63  ;;  %v5535_v7 = vsel %vm1052_vm1, 0.0, %v5496_v14  ;;  %6530 = vperm.xlu0 %11492, %v9823_v61   ;;  %v6065_v16 = vadd.f32 %v16063_v6, %v5952_v29  ;;  %v5747_v61 = vmul.f32 %v16074_v59, %v14101_v48  ;;  %v9826_v51 = vld [vmem:[%s15744_s14 + $0x180] sm:$0xff]  ;;  %v9843_v48 = vld [vmem:[%s15744_s14 + $0x388] sm:$0xff] }
 0x8b3   : > { %v5631_v49 = vmul.f32 %v16064_v50, %v5535_v7  ;;  %6525 = vperm.xlu1 %11493, %v9822_v41   ;;  %v6064_v35 = vadd.f32 %v16065_v17, %v5951_v46  ;;  %v16075_v41 = vld [vmem:[#allocation100_spill] sm:$0xff]  ;;  %v16076_v7 = vld [vmem:[#allocation101_spill] sm:$0xff] }
 0x8b4   : > { %v5804_v26 = vpop.permute.xlu0 %5803  ;;  %v5761_v1 = vadd.f32 %v5745_v27, %v5632_v10  ;;  %v5746_v46 = vmul.f32 %v16075_v41, %v14112_v3 }
 0x8b5   : > { %v5842_v45 = vsel %vm1085_vm4, %v5804_v26, 0.0  ;;  %v5802_v55 = vpop.permute.xlu1 %5801  ;;  %v11193_v47 = vpack.c.bf16 %v6065_v16, %v6064_v35  ;;  %v5760_v19 = vadd.f32 %v5744_v21, %v5631_v49  ;;  %v16077_v49 = vld [vmem:[#allocation102_spill] sm:$0xff]  ;;  %v9842_v35 = vld [vmem:[%s15744_s14 + $0x380] sm:$0xff] }
 0x8b6   : > { %v5938_v13 = vmul.f32 %v16068_v2, %v5842_v45  ;;  %v5841_v62 = vsel %vm1085_vm4, %v5802_v55, 0.0  ;;  %6427 = vperm.xlu0 %11492, %v9809_v53   ;;  %v16079_v45 = vld [vmem:[#allocation111_spill] sm:$0xff]  ;;  %v9859_v2 = vld [vmem:[%s15744_s14 + $0x588] sm:$0xff] }
 0x8b7   : > { %v5937_v15 = vmul.f32 %v16069_v24, %v5841_v62  ;;  %6422 = vperm.xlu1 %11493, %v9808_v58   ;;  %11194 = vmatprep.subr.bf16.mxu0 %v11193_v47  ;;  %v16078_v58 = vld [vmem:[#allocation105_spill] sm:$0xff] }
 0x8b8   : > { %v5954_v5 = vadd.f32 %v5938_v13, %v5761_v1  ;;  %v5502_v60 = vpop.permute.xlu0 %5501  ;;  %11196 = vmatpush3.bf16.msra.mxu0 %v11193_v47  ;;  %v16080_v47 = vld [vmem:[#allocation106_spill] sm:$0xff]  ;;  %v16081_v13 = vld [vmem:[#allocation112_spill] sm:$0xff] }
 0x8b9   : > { %v5953_v11 = vadd.f32 %v5937_v15, %v5760_v19  ;;  %v5538_v12 = vsel %vm1052_vm1, 0.0, %v5502_v60  ;;  %v5500_v57 = vpop.permute.xlu1 %5499  ;;  %v16082_v19 = vld [vmem:[#allocation107_spill] sm:$0xff] }
 0x8ba   : > { %v5634_v54 = vmul.f32 %v16070_v22, %v5538_v12  ;;  %v5537_v8 = vsel %vm1052_vm1, 0.0, %v5500_v57  ;;  %6540 = vperm.xlu0 %11492, %v9825_v9   ;;  %v6067_v43 = vadd.f32 %v16071_v20, %v5954_v5  ;;  %v5749_v24 = vmul.f32 %v16082_v19, %v14120_v56  ;;  %v9858_v9 = vld [vmem:[%s15744_s14 + $0x580] sm:$0xff]  ;;  %v9829_v56 = vld [vmem:[%s15744_s14 + $0x198] sm:$0xff]  ;;  %v9863_v19 = vld [vmem:[%s15744_s14 + $0x5a8] sm:$0xff] }
 0x8bb   : > { %v5633_v36 = vmul.f32 %v16072_v34, %v5537_v8  ;;  %6535 = vperm.xlu1 %11493, %v9824_v23   ;;  %v6066_v44 = vadd.f32 %v16073_v33, %v5953_v11  ;;  %v16083_v5 = vld [vmem:[#allocation108_spill] sm:$0xff]  ;;  %v16084_v22 = vld [vmem:[#allocation109_spill] sm:$0xff] }
 0x8bc   : > { %v5808_v29 = vpop.permute.xlu0 %5807  ;;  %v5763_v10 = vadd.f32 %v5747_v61, %v5634_v54  ;;  %v5748_v60 = vmul.f32 %v16083_v5, %v14130_v38  ;;  %v16086_v61 = vld [vmem:[#allocation113_spill] sm:$0xff]  ;;  %v9768_v5 = vld [vmem:[%s11830_s24 + $0x130] sm:$0xff] }
 0x8bd   : > { %v5844_v63 = vsel %vm1085_vm4, %v5808_v29, 0.0  ;;  %v5806_v14 = vpop.permute.xlu1 %5805  ;;  %v11197_v42 = vpack.c.bf16 %v6067_v43, %v6066_v44  ;;  %v5762_v50 = vadd.f32 %v5746_v46, %v5633_v36  ;;  %v16085_v43 = vld [vmem:[#allocation110_spill] sm:$0xff] }
 0x8be   : > { %v5940_v6 = vmul.f32 %v16076_v7, %v5844_v63  ;;  %v5843_v16 = vsel %vm1085_vm4, %v5806_v14, 0.0  ;;  %6679 = vperm.xlu0 %11492, %v9827_v4   ;;  %v9828_v4 = vld [vmem:[%s15744_s14 + $0x190] sm:$0xff]  ;;  %v9845_v14 = vld [vmem:[%s15744_s14 + $0x398] sm:$0xff] }
 0x8bf   : > { %v5939_v53 = vmul.f32 %v16077_v49, %v5843_v16  ;;  %6674 = vperm.xlu1 %11493, %v9826_v51   ;;  %11198 = vmatprep.subr.bf16.mxu0 %v11197_v42  ;;  %v16087_v46 = vld [vmem:[#allocation114_spill] sm:$0xff] }
 0x8c0   : > { %v5956_v17 = vadd.f32 %v5940_v6, %v5763_v10  ;;  %v5506_v3 = vpop.permute.xlu0 %5505  ;;  %11200 = vmatpush3.bf16.msra.mxu0 %v11197_v42  ;;  %v16088_v10 = vld [vmem:[#allocation29_spill] sm:$0xff]  ;;  %v9844_v16 = vld [vmem:[%s15744_s14 + $0x390] sm:$0xff] }
 0x8c1   : > { %v5955_v39 = vadd.f32 %v5939_v53, %v5762_v50  ;;  %v5540_v27 = vsel %vm1052_vm1, 0.0, %v5506_v3  ;;  %v5504_v26 = vpop.permute.xlu1 %5503  ;;  %v5751_v7 = vmul.f32 %v16088_v10, %v14138_v25  ;;  %v5750_v50 = vmul.f32 %v13974_v30, %v14142_v32  ;;  %v9860_v32 = vld [vmem:[%s15744_s14 + $0x590] sm:$0xff]  ;;  %v9835_v10 = vld [vmem:[%s15744_s14 + $0x1c8] sm:$0xff] }
 0x8c2   : > { %v5636_v40 = vmul.f32 %v16078_v58, %v5540_v27  ;;  %v5539_v21 = vsel %vm1052_vm1, 0.0, %v5504_v26  ;;  %6792 = vperm.xlu0 %11492, %v9843_v48   ;;  %v6069_v55 = vadd.f32 %v16079_v45, %v5956_v17  ;;  %v9875_v27 = vld [vmem:[%s11825_s19 + $0x188] sm:$0xff] }
 0x8c3   : > { %v5635_v1 = vmul.f32 %v16080_v47, %v5539_v21  ;;  %6787 = vperm.xlu1 %11493, %v9842_v35   ;;  %v6068_v62 = vadd.f32 %v16081_v13, %v5955_v39  ;;  %v9861_v35 = vld [vmem:[%s15744_s14 + $0x598] sm:$0xff]  ;;  %v9830_v21 = vld [vmem:[%s15744_s14 + $0x1a0] sm:$0xff]  ;;  %v9763_v45 = vld [vmem:[%s11830_s24 + $0x108] sm:$0xff] }
 0x8c4   : > { %v5812_v15 = vpop.permute.xlu0 %5811  ;;  %v5765_v57 = vadd.f32 %v5749_v24, %v5636_v40  ;;  %v9831_v40 = vld [vmem:[%s15744_s14 + $0x1a8] sm:$0xff]  ;;  %v9846_v47 = vld [vmem:[%s15744_s14 + $0x3a0] sm:$0xff] }
 0x8c5   : > { %v5846_v23 = vsel %vm1085_vm4, %v5812_v15, 0.0  ;;  %v5810_v11 = vpop.permute.xlu1 %5809  ;;  %v11201_v12 = vpack.c.bf16 %v6069_v55, %v6068_v62  ;;  %v5764_v20 = vadd.f32 %v5748_v60, %v5635_v1  ;;  %v9764_v55 = vld [vmem:[%s11830_s24 + $0x110] sm:$0xff]  ;;  %v9765_v1 = vld [vmem:[%s11830_s24 + $0x118] sm:$0xff]  ;;  %v9766_v13 = vld [vmem:[%s11830_s24 + $0x120] sm:$0xff] }
 0x8c6   : > { %v5942_v54 = vmul.f32 %v16084_v22, %v5846_v23  ;;  %v5845_v8 = vsel %vm1085_vm4, %v5810_v11, 0.0  ;;  %6985 = vperm.xlu0 %11492, %v9859_v2   ;;  %v9862_v24 = vld [vmem:[%s15744_s14 + $0x5a0] sm:$0xff]  ;;  %v9767_v15 = vld [vmem:[%s11830_s24 + $0x128] sm:$0xff]  ;;  %v9877_v23 = vld [vmem:[%s11825_s19 + $0x198] sm:$0xff] }
 0x8c7   : > { %v5941_v34 = vmul.f32 %v16085_v43, %v5845_v8  ;;  %6980 = vperm.xlu1 %11493, %v9858_v9   ;;  %11202 = vmatprep.subr.bf16.mxu0 %v11201_v12  ;;  %v9876_v11 = vld [vmem:[%s11825_s19 + $0x190] sm:$0xff]  ;;  %v9771_v43 = vld [vmem:[%s11830_s24 + $0x148] sm:$0xff] }
 0x8c8   : > { %v5958_v36 = vadd.f32 %v5942_v54, %v5765_v57  ;;  %v5510_v38 = vpop.permute.xlu0 %5509  ;;  %11204 = vmatpush3.bf16.msra.mxu0 %v11201_v12  ;;  %v9769_v12 = vld [vmem:[%s11830_s24 + $0x138] sm:$0xff]  ;;  %v9770_v57 = vld [vmem:[%s11830_s24 + $0x140] sm:$0xff] }
 0x8c9   : > { %v5957_v33 = vadd.f32 %v5941_v34, %v5764_v20  ;;  %v5542_v44 = vsel %vm1052_vm1, 0.0, %v5510_v38  ;;  %v5508_v59 = vpop.permute.xlu1 %5507  ;;  %v9833_v54 = vld [vmem:[%s15744_s14 + $0x1b8] sm:$0xff]  ;;  %v9832_v20 = vld [vmem:[%s15744_s14 + $0x1b0] sm:$0xff] }
 0x8ca   : > { %v5638_v29 = vmul.f32 %v16086_v61, %v5542_v44  ;;  %v5541_v51 = vsel %vm1052_vm1, 0.0, %v5508_v59  ;;  %6689 = vperm.xlu0 %11492, %v9829_v56   ;;  %v6071_v41 = vadd.f32 %v14207_v0, %v5958_v36  ;;  %v9772_v34 = vld [vmem:[%s11830_s24 + $0x150] sm:$0xff]  ;;  %v9849_v56 = vld [vmem:[%s15744_s14 + $0x3b8] sm:$0xff] }
 0x8cb   : > { %v5637_v63 = vmul.f32 %v16087_v46, %v5541_v51  ;;  %6684 = vperm.xlu1 %11493, %v9828_v4   ;;  %v6070_v42 = vadd.f32 %v14209_v37, %v5957_v33  ;;  %v9848_v36 = vld [vmem:[%s15744_s14 + $0x3b0] sm:$0xff]  ;;  %v9773_v38 = vld [vmem:[%s11830_s24 + $0x158] sm:$0xff]  ;;  %v9774_v33 = vld [vmem:[%s11830_s24 + $0x160] sm:$0xff] }
 0x8cc   : > { %v5816_v6 = vpop.permute.xlu0 %5815  ;;  %v5767_v48 = vadd.f32 %v5751_v7, %v5638_v29  ;;  %v9865_v59 = vld [vmem:[%s15744_s14 + $0x5b8] sm:$0xff]  ;;  %v9864_v61 = vld [vmem:[%s15744_s14 + $0x5b0] sm:$0xff]  ;;  %v9775_v29 = vld [vmem:[%s11830_s24 + $0x168] sm:$0xff] }
 0x8cd   : > { %v5848_v49 = vsel %vm1085_vm4, %v5816_v6, 0.0  ;;  %v5814_v53 = vpop.permute.xlu1 %5813  ;;  %v11205_v0 = vpack.c.bf16 %v6071_v41, %v6070_v42  ;;  %v5766_v3 = vadd.f32 %v5750_v50, %v5637_v63  ;;  %v9776_v51 = vld [vmem:[%s11830_s24 + $0x170] sm:$0xff]  ;;  %v9879_v46 = vld [vmem:[%s11825_s19 + $0x1a8] sm:$0xff]  ;;  %v9777_v42 = vld [vmem:[%s11830_s24 + $0x178] sm:$0xff]  ;;  %v16090_v6 = vmov 0.0  }
 0x8ce   : > { %v5944_v17 = vmul.f32 %v14200_v31, %v5848_v49  ;;  %v5847_v37 = vsel %vm1085_vm4, %v5814_v53, 0.0  ;;  %6802 = vperm.xlu0 %11492, %v9845_v14   ;;  %v9878_v14 = vld [vmem:[%s11825_s19 + $0x1a0] sm:$0xff]  ;;  %v9851_v49 = vld [vmem:[%s15744_s14 + $0x3c8] sm:$0xff] }
 0x8cf   : > { %v5943_v25 = vmul.f32 %v14203_v28, %v5847_v37  ;;  %6797 = vperm.xlu1 %11493, %v9844_v16   ;;  %11206 = vmatprep.subr.bf16.mxu0 %v11205_v0  ;;  %v9874_v28 = vld [vmem:[%s11825_s19 + $0x180] sm:$0xff] }
 0x8d0   : > { %v5960_v30 = vadd.f32 %v5944_v17, %v5767_v48  ;;  %11208 = vmatpush3.bf16.msra.mxu0 %v11205_v0  ;;  %v9834_v7 = vld [vmem:[%s15744_s14 + $0x1c0] sm:$0xff]  ;;  %v9867_v48 = vld [vmem:[%s15744_s14 + $0x5c8] sm:$0xff] }
 0x8d1   : > { %v5959_v39 = vadd.f32 %v5943_v25, %v5766_v3  ;;  %v9850_v53 = vld [vmem:[%s15744_s14 + $0x3c0] sm:$0xff]  ;;  %v9881_v3 = vld [vmem:[%s11825_s19 + $0x1b8] sm:$0xff]  ;;  %v9880_v25 = vld [vmem:[%s11825_s19 + $0x1b0] sm:$0xff] }
 0x8d2   : > { %6995 = vperm.xlu0 %11492, %v9861_v35   ;;  %v6073_v31 = vadd.f32 %v14214_v52, %v5960_v30  ;;  %v16089_v52 = vmov 0.0|0.0   ;;  %v9866_v37 = vld [vmem:[%s15744_s14 + $0x5c0] sm:$0xff] }
 0x8d3   : > { %6990 = vperm.xlu1 %11493, %v9860_v32   ;;  %v6072_v26 = vadd.f32 %v14217_v18, %v5959_v39  ;;  %v9847_v18 = vld [vmem:[%s15744_s14 + $0x3a8] sm:$0xff]  ;;  %v9837_v32 = vld [vmem:[%s15744_s14 + $0x1d8] sm:$0xff]  ;;  %v9836_v39 = vld [vmem:[%s15744_s14 + $0x1d0] sm:$0xff] }
 0x8d5   : > { %v11209_v58 = vpack.c.bf16 %v6073_v31, %v6072_v26 }
 0x8d6   : > { %7114 = vperm.xlu0 %11492, %v9875_v27   ;;  %v9853_v27 = vld [vmem:[%s15744_s14 + $0x3d8] sm:$0xff] }
 0x8d7   : > { %7109 = vperm.xlu1 %11493, %v9874_v28   ;;  %11210 = vmatprep.subr.bf16.mxu0 %v11209_v58  ;;  %v9852_v28 = vld [vmem:[%s15744_s14 + $0x3d0] sm:$0xff] }
 0x8d8   : > { %11212 = vmatpush3.bf16.msra.mxu0 %v11209_v58  ;;  %v9869_v58 = vld [vmem:[%s15744_s14 + $0x5d8] sm:$0xff] }
 0x8d9   : > { %11245 = vmatprep.subr.bf16.mxu0 %v16089_v52 }
 0x8da   : > { %6699 = vperm.xlu0 %11492, %v9831_v40   ;;  %v9868_v40 = vld [vmem:[%s15744_s14 + $0x5d0] sm:$0xff] }
 0x8db   : > { %6694 = vperm.xlu1 %11493, %v9830_v21   ;;  %10701 = vmatmul.mubr.f32.vlgmr.msra.gmra.mrb[50].mxu0 %v9763_v45 }
 0x8dc   : > { %10703 = vmatprep.mubr.f32.mxu0 %v9764_v55  ;;  %v9883_v55 = vld [vmem:[%s11825_s19 + $0x1c8] sm:$0xff] }
 0x8dd   : > { %v14375_v2 = vpop.permute.xlu0 %6115 }
 0x8de   : > { %6812 = vperm.xlu0 %11492, %v9847_v18   ;;  %v14378_v62 = vpop.permute.xlu1 %6110  ;;  %v9882_v18 = vld [vmem:[%s11825_s19 + $0x1c0] sm:$0xff] }
 0x8df   : > { %6807 = vperm.xlu1 %11493, %v9846_v47   ;;  %10704 = vmatmul.mubr.f32.gmra.mrb[52].mxu0 %v9765_v1  ;;  %v9839_v1 = vld [vmem:[%s15744_s14 + $0x1e8] sm:$0xff] }
 0x8e0   : > { %10706 = vmatprep.mubr.f32.mxu0 %v9766_v13 }
 0x8e1   : > { %v14383_v9 = vpop.permute.xlu0 %6357 }
 0x8e2   : > { %7005 = vperm.xlu0 %11492, %v9863_v19   ;;  %v14386_v60 = vpop.permute.xlu1 %6352  ;;  %v9838_v19 = vld [vmem:[%s15744_s14 + $0x1e0] sm:$0xff] }
 0x8e3   : > { %7000 = vperm.xlu1 %11493, %v9862_v24   ;;  %10707 = vmatmul.mubr.f32.gmra.mrb[54].mxu0 %v9767_v15  ;;  %v9855_v24 = vld [vmem:[%s15744_s14 + $0x3e8] sm:$0xff]  ;;  %v9854_v15 = vld [vmem:[%s15744_s14 + $0x3e0] sm:$0xff] }
 0x8e4   : > { %10709 = vmatprep.mubr.f32.mxu0 %v9768_v5 }
 0x8e5   : > { %v14392_v22 = vpop.permute.xlu0 %6125 }
 0x8e6   : > { %7124 = vperm.xlu0 %11492, %v9877_v23   ;;  %v14395_v8 = vpop.permute.xlu1 %6120 }
 0x8e7   : > { %7119 = vperm.xlu1 %11493, %v9876_v11   ;;  %10710 = vmatmul.mubr.f32.gmra.mrb[56].mxu0 %v9769_v12  ;;  %v9871_v11 = vld [vmem:[%s15744_s14 + $0x5e8] sm:$0xff]  ;;  %v9870_v12 = vld [vmem:[%s15744_s14 + $0x5e0] sm:$0xff] }
 0x8e8   : > { %10712 = vmatprep.mubr.f32.mxu0 %v9770_v57 }
 0x8e9   : > { %v14403_v4 = vpop.permute.xlu0 %6470 }
 0x8ea   : > { %6709 = vperm.xlu0 %11492, %v9833_v54   ;;  %v14406_v44 = vpop.permute.xlu1 %6465  ;;  %v9885_v54 = vld [vmem:[%s11825_s19 + $0x1d8] sm:$0xff] }
 0x8eb   : > { %6704 = vperm.xlu1 %11493, %v9832_v20   ;;  %10713 = vmatmul.mubr.f32.gmra.mrb[58].mxu0 %v9771_v43  ;;  %v9884_v43 = vld [vmem:[%s11825_s19 + $0x1d0] sm:$0xff] }
 0x8ec   : > { %10715 = vmatprep.mubr.f32.mxu0 %v9772_v34  ;;  %v9841_v34 = vld [vmem:[%s15744_s14 + $0x1f8] sm:$0xff] }
 0x8ed   : > { %v14412_v41 = vpop.permute.xlu0 %6367 }
 0x8ee   : > { %6822 = vperm.xlu0 %11492, %v9849_v56   ;;  %v14415_v63 = vpop.permute.xlu1 %6362  ;;  %v9840_v56 = vld [vmem:[%s15744_s14 + $0x1f0] sm:$0xff] }
 0x8ef   : > { %6817 = vperm.xlu1 %11493, %v9848_v36   ;;  %10716 = vmatmul.mubr.f32.gmra.mrb[60].mxu0 %v9773_v38 }
 0x8f0   : > { %10718 = vmatprep.mubr.f32.mxu0 %v9774_v33  ;;  %v9857_v33 = vld [vmem:[%s15744_s14 + $0x3f8] sm:$0xff] }
 0x8f1   : > { %v14423_v16 = vpop.permute.xlu0 %6135 }
 0x8f2   : > { %7015 = vperm.xlu0 %11492, %v9865_v59   ;;  %v14425_v50 = vpop.permute.xlu1 %6130  ;;  %v9856_v59 = vld [vmem:[%s15744_s14 + $0x3f0] sm:$0xff] }
 0x8f3   : > { %7010 = vperm.xlu1 %11493, %v9864_v61   ;;  %10719 = vmatmul.mubr.f32.gmra.mrb[62].mxu0 %v9775_v29  ;;  %v9873_v29 = vld [vmem:[%s15744_s14 + $0x5f8] sm:$0xff] }
 0x8f4   : > { %10721 = vmatprep.mubr.f32.mxu0 %v9776_v51 }
 0x8f5   : > { %v14429_v0 = vpop.permute.xlu0 %6480 }
 0x8f6   : > { %7134 = vperm.xlu0 %11492, %v9879_v46   ;;  %v14432_v17 = vpop.permute.xlu1 %6475  ;;  %v9872_v46 = vld [vmem:[%s15744_s14 + $0x5f0] sm:$0xff] }
 0x8f7   : > { %7129 = vperm.xlu1 %11493, %v9878_v14   ;;  %10722 = vmatmul.mubr.f32.gmra.mrb[64].mxu0 %v9777_v42  ;;  %v9887_v14 = vld [vmem:[%s11825_s19 + $0x1e8] sm:$0xff]  ;;  %v9886_v42 = vld [vmem:[%s11825_s19 + $0x1e0] sm:$0xff] }
 0x8f8   : > { %10812 = vmatprep.mubr.msk.f32.mxu0 %vm11763_vm6, %v16090_v6  ;;  %v9889_v6 = vld [vmem:[%s11825_s19 + $0x1f8] sm:$0xff] }
 0x8f9   : > { %v14437_v35 = vpop.permute.xlu0 %6377 }
 0x8fa   : > { %6719 = vperm.xlu0 %11492, %v9835_v10   ;;  %v14439_v30 = vpop.permute.xlu1 %6372 }
 0x8fb   : > { %6714 = vperm.xlu1 %11493, %v9834_v7  }
 0x8fd   : > { %v14443_v31 = vpop.permute.xlu0 %6145 }
 0x8fe   : > { %6832 = vperm.xlu0 %11492, %v9851_v49   ;;  %v14446_v26 = vpop.permute.xlu1 %6140  ;;  %v9888_v49 = vld [vmem:[%s11825_s19 + $0x1f0] sm:$0xff] }
 0x8ff   : > { %6827 = vperm.xlu1 %11493, %v9850_v53  }
 0x901   : > { %v14451_v21 = vpop.permute.xlu0 %6490 }
 0x902   : > { %7025 = vperm.xlu0 %11492, %v9867_v48   ;;  %v14453_v45 = vpop.permute.xlu1 %6485 }
 0x903   : > { %7020 = vperm.xlu1 %11493, %v9866_v37  }
 0x905   : > { %v14457_v47 = vpop.permute.xlu0 %6387 }
 0x906   : > { %7144 = vperm.xlu0 %11492, %v9881_v3   ;;  %v14460_v13 = vpop.permute.xlu1 %6382 }
 0x907   : > { %7139 = vperm.xlu1 %11493, %v9880_v25  }
 0x909   : > { %v14465_v5 = vpop.permute.xlu0 %6155 }
 0x90a   : > { %6729 = vperm.xlu0 %11492, %v9837_v32   ;;  %v14467_v23 = vpop.permute.xlu1 %6150 }
 0x90b   : > { %6724 = vperm.xlu1 %11493, %v9836_v39  }
 0x90d   : > { %v14471_v57 = vpop.permute.xlu0 %6500 }
 0x90e   : > { %6842 = vperm.xlu0 %11492, %v9853_v27   ;;  %v14474_v20 = vpop.permute.xlu1 %6495 }
 0x90f   : > { %6837 = vperm.xlu1 %11493, %v9852_v28  }
 0x911   : > { %v14479_v36 = vpop.permute.xlu0 %6397 }
 0x912   : > { %7035 = vperm.xlu0 %11492, %v9869_v58   ;;  %v14481_v38 = vpop.permute.xlu1 %6392 }
 0x913   : > { %7030 = vperm.xlu1 %11493, %v9868_v40  }
 0x915   : > { %v14485_v61 = vpop.permute.xlu0 %6165 }
 0x916   : > { %7154 = vperm.xlu0 %11492, %v9883_v55   ;;  %v14488_v51 = vpop.permute.xlu1 %6160 }
 0x917   : > { %7149 = vperm.xlu1 %11493, %v9882_v18  }
 0x919   : > { %v14493_v10 = vpop.permute.xlu0 %6510 }
 0x91a   : > { %6739 = vperm.xlu0 %11492, %v9839_v1   ;;  %v14495_v7 = vpop.permute.xlu1 %6505 }
 0x91b   : > { %6734 = vperm.xlu1 %11493, %v9838_v19  }
 0x91d   : > { %v14499_v53 = vpop.permute.xlu0 %6407 }
 0x91e   : > { %6852 = vperm.xlu0 %11492, %v9855_v24   ;;  %v14501_v48 = vpop.permute.xlu1 %6402 }
 0x91f   : > { %6847 = vperm.xlu1 %11493, %v9854_v15  }
 0x921   : > { %v14503_v37 = vpop.permute.xlu0 %6175 }
 0x922   : > { %7045 = vperm.xlu0 %11492, %v9871_v11   ;;  %v14505_v3 = vpop.permute.xlu1 %6170 }
 0x923   : > { %7040 = vperm.xlu1 %11493, %v9870_v12  }
 0x925   : > { %v14507_v25 = vpop.permute.xlu0 %6520 }
 0x926   : > { %7164 = vperm.xlu0 %11492, %v9885_v54   ;;  %v14509_v32 = vpop.permute.xlu1 %6515 }
 0x927   : > { %7159 = vperm.xlu1 %11493, %v9884_v43  }
 0x929   : > { %v14511_v39 = vpop.permute.xlu0 %6417 }
 0x92a   : > { %6749 = vperm.xlu0 %11492, %v9841_v34   ;;  %v14513_v27 = vpop.permute.xlu1 %6412 }
 0x92b   : > { %6744 = vperm.xlu1 %11493, %v9840_v56  }
 0x92d   : > { %v14515_v28 = vpop.permute.xlu0 %6185 }
 0x92e   : > { %6862 = vperm.xlu0 %11492, %v9857_v33   ;;  %v14517_v58 = vpop.permute.xlu1 %6180 }
 0x92f   : > { %6857 = vperm.xlu1 %11493, %v9856_v59  }
 0x931   : > { %v14519_v40 = vpop.permute.xlu0 %6530 }
 0x932   : > { %7055 = vperm.xlu0 %11492, %v9873_v29   ;;  %v14521_v55 = vpop.permute.xlu1 %6525 }
 0x933   : > { %7050 = vperm.xlu1 %11493, %v9872_v46  }
 0x935   : > { %v14523_v18 = vpop.permute.xlu0 %6427 }
 0x936   : > { %7174 = vperm.xlu0 %11492, %v9887_v14   ;;  %v14525_v1 = vpop.permute.xlu1 %6422 }
 0x937   : > { %7169 = vperm.xlu1 %11493, %v9886_v42  }
 0x939   : > { %v14527_v19 = vpop.permute.xlu0 %6540 }
 0x93a   : > { %7184 = vperm.xlu0 %11492, %v9889_v6   ;;  %v14529_v24 = vpop.permute.xlu1 %6535 }
 0x93b   : > { %7179 = vperm.xlu1 %11493, %v9888_v49  }
 0x93d   : > { %v14531_v15 = vpop.permute.xlu0 %6679 }
 0x93e   : > { %v14533_v11 = vpop.permute.xlu1 %6674 }
 0x941   : > { %v14535_v12 = vpop.permute.xlu0 %6792 }
 0x942   : > { %v14537_v54 = vpop.permute.xlu1 %6787 }
 0x945   : > { %v14539_v43 = vpop.permute.xlu0 %6985 }
 0x946   : > { %16091 = vst [vmem:[#allocation30_spill] sm:$0xff] %v14539_v43  ;;  %v14541_v34 = vpop.permute.xlu1 %6980 }
 0x947   : > { %16092 = vst [vmem:[#allocation31_spill] sm:$0xff] %v14541_v34 }
 0x949   : > { %v14543_v56 = vpop.permute.xlu0 %6689 }
 0x94a   : > { %16093 = vst [vmem:[#allocation32_spill] sm:$0xff] %v14543_v56  ;;  %v14545_v33 = vpop.permute.xlu1 %6684 }
 0x94b   : > { %16094 = vst [vmem:[#allocation34_spill] sm:$0xff] %v14545_v33 }
 0x94d   : > { %v14547_v59 = vpop.permute.xlu0 %6802 }
 0x94e   : > { %16095 = vst [vmem:[#allocation38_spill] sm:$0xff] %v14547_v59  ;;  %v14549_v29 = vpop.permute.xlu1 %6797 }
 0x94f   : > { %16096 = vst [vmem:[#allocation33_spill] sm:$0xff] %v14549_v29 }
 0x951   : > { %v14551_v46 = vpop.permute.xlu0 %6995 }
 0x952   : > { %16097 = vst [vmem:[#allocation36_spill] sm:$0xff] %v14551_v46  ;;  %v14553_v14 = vpop.permute.xlu1 %6990 }
 0x953   : > { %16098 = vst [vmem:[#allocation39_spill] sm:$0xff] %v14553_v14 }
 0x955   : > { %v14555_v42 = vpop.permute.xlu0 %7114 }
 0x956   : > { %16099 = vst [vmem:[#allocation35_spill] sm:$0xff] %v14555_v42  ;;  %v14557_v6 = vpop.permute.xlu1 %7109 }
 0x957   : > { %16100 = vst [vmem:[#allocation37_spill] sm:$0xff] %v14557_v6 }
 0x959   : > { %v14559_v49 = vpop.permute.xlu0 %6699 }
 0x95a   : > { %16101 = vst [vmem:[#allocation40_spill] sm:$0xff] %v14559_v49  ;;  %v14561_v52 = vpop.permute.xlu1 %6694 }
 0x95b   : > { %16102 = vst [vmem:[#allocation52_spill] sm:$0xff] %v14561_v52 }
 0x95d   : > { %v14563_v34 = vpop.permute.xlu0 %6812 }
 0x95e   : > { %16103 = vst [vmem:[#allocation42_spill] sm:$0xff] %v14563_v34  ;;  %v14565_v56 = vpop.permute.xlu1 %6807 }
 0x95f   : > { %16104 = vst [vmem:[#allocation49_spill] sm:$0xff] %v14565_v56 }
 0x961   : > { %v14567_v33 = vpop.permute.xlu0 %7005 }
 0x962   : > { %16105 = vst [vmem:[#allocation47_spill] sm:$0xff] %v14567_v33  ;;  %v14569_v59 = vpop.permute.xlu1 %7000 }
 0x963   : > { %16106 = vst [vmem:[#allocation54_spill] sm:$0xff] %v14569_v59 }
 0x965   : > { %v14571_v29 = vpop.permute.xlu0 %7124 }
 0x966   : > { %16107 = vst [vmem:[#allocation57_spill] sm:$0xff] %v14571_v29  ;;  %v14573_v46 = vpop.permute.xlu1 %7119 }
 0x967   : > { %16108 = vst [vmem:[#allocation53_spill] sm:$0xff] %v14573_v46 }
 0x969   : > { %v14575_v14 = vpop.permute.xlu0 %6709 }
 0x96a   : > { %16109 = vst [vmem:[#allocation46_spill] sm:$0xff] %v14575_v14  ;;  %v14577_v42 = vpop.permute.xlu1 %6704 }
 0x96b   : > { %16110 = vst [vmem:[#allocation55_spill] sm:$0xff] %v14577_v42 }
 0x96d   : > { %v14583_v59 = vpop.permute.xlu0 %6822 }
 0x96e   : > { %v14587_v42 = vpop.permute.xlu1 %6817 }
 0x9ae   : > { %v10702_v6 = vpop.f32.mrb[50].mxu0 }
 0x9af   : > { %v6260_v49 = vadd.f32 %v10702_v6, %v14375_v2  ;;  %v6254_v52 = vpop.f32.mrb[51].mxu0 }
 0x9b0   : > { %v6255_v34 = vadd.f32 %v6254_v52, %v14378_v62 }
 0x9b1   : > { %v6431_v56 = vmul.f32 %v14383_v9, %v6260_v49 }
 0x9b2   : > { %v6430_v33 = vmul.f32 %v14386_v60, %v6255_v34  ;;  %v10705_v43 = vpop.f32.mrb[52].mxu0  ;;  %v14606_v34 = vpop.permute.xlu1 %7010 }
 0x9b3   : > { %v6544_v29 = vadd.f32 %v14403_v4, %v6431_v56  ;;  %v6270_v46 = vadd.f32 %v10705_v43, %v14392_v22  ;;  %v6264_v14 = vpop.f32.mrb[53].mxu0 }
 0x9b4   : > { %v6543_v2 = vadd.f32 %v14406_v44, %v6430_v33  ;;  %v6265_v6 = vadd.f32 %v6264_v14, %v14395_v8  ;;  %v14601_v44 = vpop.permute.xlu0 %7015 }
 0x9b5   : > { %v14591_v52 = vmax.f32 %v6544_v29, 0.0  ;;  %v6433_v62 = vmul.f32 %v14412_v41, %v6270_v46  ;;  %v9634_v41 = vld [vmem:[%s11800_s25 + $0x80] sm:$0xff]  ;;  %v9635_v29 = vld [vmem:[%s11800_s25 + $0x88] sm:$0xff] }
 0x9b6   : > { %v14594_v9 = vmax.f32 %v6543_v2, 0.0  ;;  %v6432_v60 = vmul.f32 %v14415_v63, %v6265_v6  ;;  %v10708_v4 = vpop.f32.mrb[54].mxu0  ;;  %10644 = vmatprep.mubr.f32.mxu1 %v9634_v41  ;;  %v14625_v6 = vpop.permute.xlu1 %7129 }
 0x9b7   : > { %6610 = vrot.lane.b32.xlu0 %v14591_v52, %s15994_s9  ;;  %v6274_v22 = vpop.f32.mrb[55].mxu0  ;;  %v6546_v8 = vadd.f32 %v14429_v0, %v6433_v62  ;;  %v6280_v43 = vadd.f32 %v10708_v4, %v14423_v16  ;;  %10645 = vmatmul.mubr.f32.vlgmr.msra.gmra.mrb[48].mxu1 %v9635_v29 }
 0x9b8   : > { %6608 = vrot.lane.b32.xlu1 %v14594_v9, %s15994_s9  ;;  %v6545_v56 = vadd.f32 %v14432_v17, %v6432_v60  ;;  %v6275_v63 = vadd.f32 %v6274_v22, %v14425_v50  ;;  %v14621_v49 = vpop.permute.xlu0 %7134 }
 0x9b9   : > { %v14615_v0 = vmax.f32 %v6546_v8, 0.0  ;;  %v6435_v16 = vmul.f32 %v14437_v35, %v6280_v43 }
 0x9ba   : > { %v10711_v33 = vpop.f32.mrb[56].mxu0  ;;  %v14618_v14 = vmax.f32 %v6545_v56, 0.0  ;;  %v6434_v17 = vmul.f32 %v14439_v30, %v6275_v63  ;;  %v14642_v41 = vpop.permute.xlu1 %6714 }
 0x9bb   : > { %6916 = vrot.lane.b32.xlu0 %v14591_v52, %s15998_s13  ;;  %v6284_v46 = vpop.f32.mrb[57].mxu0  ;;  %v6548_v62 = vadd.f32 %v14451_v21, %v6435_v16  ;;  %v6290_v35 = vadd.f32 %v10711_v33, %v14443_v31 }
 0x9bc   : > { %6914 = vrot.lane.b32.xlu1 %v14594_v9, %s15998_s13  ;;  %v6547_v60 = vadd.f32 %v14453_v45, %v6434_v17  ;;  %v6285_v30 = vadd.f32 %v6284_v46, %v14446_v26  ;;  %v14637_v8 = vpop.permute.xlu0 %6719 }
 0x9bd   : > { %v14639_v43 = vmax.f32 %v6548_v62, 0.0  ;;  %v6437_v21 = vmul.f32 %v14457_v47, %v6290_v35 }
 0x9be   : > { %v10714_v50 = vpop.f32.mrb[58].mxu0  ;;  %v14644_v31 = vmax.f32 %v6547_v60, 0.0  ;;  %v6436_v26 = vmul.f32 %v14460_v13, %v6285_v30  ;;  %v14659_v17 = vpop.permute.xlu1 %6827 }
 0x9bf   : > { %6614 = vrot.lane.b32.xlu0 %v14615_v0, %s15994_s9  ;;  %v6294_v2 = vpop.f32.mrb[59].mxu0  ;;  %v6550_v63 = vadd.f32 %v14471_v57, %v6437_v21  ;;  %v6300_v33 = vadd.f32 %v10714_v50, %v14465_v5 }
 0x9c0   : > { %6612 = vrot.lane.b32.xlu1 %v14618_v14, %s15994_s9  ;;  %v6549_v47 = vadd.f32 %v14474_v20, %v6436_v26  ;;  %v6295_v29 = vadd.f32 %v6294_v2, %v14467_v23  ;;  %v14655_v16 = vpop.permute.xlu0 %6832 }
 0x9c1   : > { %v14663_v62 = vmax.f32 %v6550_v63, 0.0  ;;  %v6439_v5 = vmul.f32 %v14479_v36, %v6300_v33  ;;  %v9638_v63 = vld [vmem:[%s11800_s25 + $0xa0] sm:$0xff]  ;;  %v9639_v33 = vld [vmem:[%s11800_s25 + $0xa8] sm:$0xff] }
 0x9c2   : > { %v10717_v4 = vpop.f32.mrb[60].mxu0  ;;  %v14666_v57 = vmax.f32 %v6549_v47, 0.0  ;;  %v6438_v23 = vmul.f32 %v14481_v38, %v6295_v29  ;;  %v14677_v35 = vpop.permute.xlu1 %7020  ;;  %v9641_v29 = vld [vmem:[%s11800_s25 + $0xb8] sm:$0xff] }
 0x9c3   : > { %6920 = vrot.lane.b32.xlu0 %v14615_v0, %s15998_s13  ;;  %v6304_v22 = vpop.f32.mrb[61].mxu0  ;;  %v6552_v50 = vadd.f32 %v14493_v10, %v6439_v5  ;;  %v6310_v2 = vadd.f32 %v10717_v4, %v14485_v61 }
 0x9c4   : > { %6918 = vrot.lane.b32.xlu1 %v14618_v14, %s15998_s13  ;;  %v14673_v20 = vpop.permute.xlu0 %7025  ;;  %v6551_v36 = vadd.f32 %v14495_v7, %v6438_v23  ;;  %v6305_v38 = vadd.f32 %v6304_v22, %v14488_v51  ;;  %v9636_v51 = vld [vmem:[%s11800_s25 + $0x90] sm:$0xff]  ;;  %v9637_v22 = vld [vmem:[%s11800_s25 + $0x98] sm:$0xff] }
 0x9c5   : > { %v14685_v60 = vmax.f32 %v6552_v50, 0.0  ;;  %v6441_v30 = vmul.f32 %v14499_v53, %v6310_v2  ;;  %10647 = vmatprep.mubr.f32.mxu1 %v9636_v51  ;;  %v9642_v2 = vld [vmem:[%s11800_s25 + $0xc0] sm:$0xff] }
 0x9c6   : > { %v10720_v45 = vpop.f32.mrb[62].mxu0  ;;  %v14688_v10 = vmax.f32 %v6551_v36, 0.0  ;;  %v6440_v61 = vmul.f32 %v14501_v48, %v6305_v38  ;;  %v14696_v7 = vpop.permute.xlu1 %7139  ;;  %10648 = vmatmul.mubr.f32.gmra.mrb[50].mxu1 %v9637_v22  ;;  %v9645_v38 = vld [vmem:[%s11800_s25 + $0xd8] sm:$0xff]  ;;  %v9647_v22 = vld [vmem:[%s11800_s25 + $0xe8] sm:$0xff] }
 0x9c7   : > { %6618 = vrot.lane.b32.xlu0 %v14639_v43, %s15994_s9  ;;  %v6314_v56 = vpop.f32.mrb[63].mxu0  ;;  %v6554_v53 = vadd.f32 %v14507_v25, %v6441_v30  ;;  %v6320_v21 = vadd.f32 %v10720_v45, %v14503_v37  ;;  %10650 = vmatprep.mubr.f32.mxu1 %v9638_v63  ;;  %v9890_v63 = vld [vmem:[%s11830_s24 + $0x180] sm:$0xff] }
 0x9c8   : > { %6616 = vrot.lane.b32.xlu1 %v14644_v31, %s15994_s9  ;;  %v14691_v4 = vpop.permute.xlu0 %7144  ;;  %v6553_v48 = vadd.f32 %v14509_v32, %v6440_v61  ;;  %v6315_v26 = vadd.f32 %v6314_v56, %v14505_v3  ;;  %v9640_v56 = vld [vmem:[%s11800_s25 + $0xb0] sm:$0xff] }
 0x9c9   : > { %v14713_v25 = vmax.f32 %v6554_v53, 0.0  ;;  %v6443_v37 = vmul.f32 %v14511_v39, %v6320_v21  ;;  %v9648_v53 = vld [vmem:[%s11800_s25 + $0xf0] sm:$0xff] }
 0x9ca   : > { %v10723_v46 = vpop.f32.mrb[64].mxu0  ;;  %10651 = vmatmul.mubr.f32.gmra.mrb[52].mxu1 %v9639_v33  ;;  %v14716_v32 = vpop.permute.xlu1 %6724  ;;  %v14718_v3 = vmax.f32 %v6553_v48, 0.0  ;;  %v6442_v45 = vmul.f32 %v14513_v27, %v6315_v26  ;;  %v9907_v33 = vld [vmem:[%s11835_s30 + $0x188] sm:$0xff] }
 0x9cb   : > { %6924 = vrot.lane.b32.xlu0 %v14639_v43, %s15998_s13  ;;  %v6324_v13 = vpop.f32.mrb[65].mxu0  ;;  %10653 = vmatprep.mubr.f32.mxu1 %v9640_v56  ;;  %v6556_v39 = vadd.f32 %v14519_v40, %v6443_v37  ;;  %v6330_v5 = vadd.f32 %v10723_v46, %v14515_v28  ;;  %v9643_v28 = vld [vmem:[%s11800_s25 + $0xc8] sm:$0xff] }
 0x9cc   : > { %6922 = vrot.lane.b32.xlu1 %v14644_v31, %s15998_s13  ;;  %v14711_v47 = vpop.permute.xlu0 %6729  ;;  %v6555_v23 = vadd.f32 %v14521_v55, %v6442_v45  ;;  %v6325_v27 = vadd.f32 %v6324_v13, %v14517_v58  ;;  %v9644_v13 = vld [vmem:[%s11800_s25 + $0xd0] sm:$0xff]  ;;  %v9906_v45 = vld [vmem:[%s11835_s30 + $0x180] sm:$0xff] }
 0x9cd   : > { %v14741_v40 = vmax.f32 %v6556_v39, 0.0  ;;  %v6445_v58 = vmul.f32 %v14523_v18, %v6330_v5  ;;  %v9922_v39 = vld [vmem:[%s15746_s6 + $0x180] sm:$0xff] }
 0x9ce   : > { %10654 = vmatmul.mubr.f32.gmra.mrb[54].mxu1 %v9641_v29  ;;  %v14736_v36 = vpop.permute.xlu1 %6837  ;;  %v14744_v55 = vmax.f32 %v6555_v23, 0.0  ;;  %v6444_v46 = vmul.f32 %v14525_v1, %v6325_v27  ;;  %v9646_v1 = vld [vmem:[%s11800_s25 + $0xe0] sm:$0xff]  ;;  %v9923_v29 = vld [vmem:[%s15746_s6 + $0x188] sm:$0xff]  ;;  %v9909_v27 = vld [vmem:[%s11835_s30 + $0x198] sm:$0xff] }
 0x9cf   : > { %6622 = vrot.lane.b32.xlu0 %v14663_v62, %s15994_s9  ;;  %10656 = vmatprep.mubr.f32.mxu1 %v9642_v2  ;;  %v6558_v18 = vadd.f32 %v14527_v19, %v6445_v58  ;;  %v9908_v2 = vld [vmem:[%s11835_s30 + $0x190] sm:$0xff] }
 0x9d0   : > { %6620 = vrot.lane.b32.xlu1 %v14666_v57, %s15994_s9  ;;  %v14731_v50 = vpop.permute.xlu0 %6842  ;;  %v6557_v51 = vadd.f32 %v14529_v24, %v6444_v46  ;;  %v9649_v24 = vld [vmem:[%s11800_s25 + $0xf8] sm:$0xff]  ;;  %v9938_v46 = vld [vmem:[%s15745_s12 + $0x180] sm:$0xff] }
 0x9d1   : > { %v14766_v21 = vmax.f32 %v6558_v18, 0.0  ;;  %v9924_v18 = vld [vmem:[%s15746_s6 + $0x190] sm:$0xff] }
 0x9d2   : > { %10657 = vmatmul.mubr.f32.gmra.mrb[56].mxu1 %v9643_v28  ;;  %v14756_v61 = vpop.permute.xlu1 %7030  ;;  %v14768_v19 = vmax.f32 %v6557_v51, 0.0  ;;  %v9939_v28 = vld [vmem:[%s15745_s12 + $0x188] sm:$0xff] }
 0x9d3   : > { %6928 = vrot.lane.b32.xlu0 %v14663_v62, %s15998_s13  ;;  %10659 = vmatprep.mubr.f32.mxu1 %v9644_v13  ;;  %16111 = vst [vmem:[#allocation43_spill] sm:$0xff] %v14766_v21 }
 0x9d4   : > { %6926 = vrot.lane.b32.xlu1 %v14666_v57, %s15998_s13  ;;  %v14753_v30 = vpop.permute.xlu0 %7035  ;;  %16112 = vst [vmem:[#allocation50_spill] sm:$0xff] %v14768_v19 }
 0x9d6   : > { %10660 = vmatmul.mubr.f32.gmra.mrb[58].mxu1 %v9645_v38  ;;  %v14775_v26 = vpop.permute.xlu1 %7149  ;;  %v9925_v38 = vld [vmem:[%s15746_s6 + $0x198] sm:$0xff] }
 0x9d7   : > { %6626 = vrot.lane.b32.xlu0 %v14685_v60, %s15994_s9  ;;  %10662 = vmatprep.mubr.f32.mxu1 %v9646_v1 }
 0x9d8   : > { %6624 = vrot.lane.b32.xlu1 %v14688_v10, %s15994_s9  ;;  %v14771_v48 = vpop.permute.xlu0 %7154 }
 0x9da   : > { %10663 = vmatmul.mubr.f32.gmra.mrb[60].mxu1 %v9647_v22  ;;  %v14788_v56 = vpop.permute.xlu1 %6734  ;;  %v9911_v22 = vld [vmem:[%s11835_s30 + $0x1a8] sm:$0xff] }
 0x9db   : > { %6932 = vrot.lane.b32.xlu0 %v14685_v60, %s15998_s13  ;;  %10665 = vmatprep.mubr.f32.mxu1 %v9648_v53  ;;  %v9910_v53 = vld [vmem:[%s11835_s30 + $0x1a0] sm:$0xff] }
 0x9dc   : > { %6930 = vrot.lane.b32.xlu1 %v14688_v10, %s15998_s13  ;;  %v14785_v37 = vpop.permute.xlu0 %6739 }
 0x9de   : > { %10666 = vmatmul.mubr.f32.gmra.mrb[62].mxu1 %v9649_v24  ;;  %v14794_v23 = vpop.permute.xlu1 %6847  ;;  %v9941_v24 = vld [vmem:[%s15745_s12 + $0x198] sm:$0xff] }
 0x9df   : > { %6630 = vrot.lane.b32.xlu0 %v14713_v25, %s15994_s9  ;;  %10756 = vmatprep.mubr.f32.mxu1 %v9890_v63 }
 0x9e0   : > { %6628 = vrot.lane.b32.xlu1 %v14718_v3, %s15994_s9  ;;  %v14792_v5 = vpop.permute.xlu0 %6852 }
 0x9e2   : > { %v14802_v13 = vpop.permute.xlu1 %7040 }
 0x9e3   : > { %6936 = vrot.lane.b32.xlu0 %v14713_v25, %s15998_s13 }
 0x9e4   : > { %6934 = vrot.lane.b32.xlu1 %v14718_v3, %s15998_s13  ;;  %v14799_v58 = vpop.permute.xlu0 %7045 }
 0x9e6   : > { %v14808_v1 = vpop.permute.xlu1 %7159 }
 0x9e7   : > { %6634 = vrot.lane.b32.xlu0 %v14741_v40, %s15994_s9 }
 0x9e8   : > { %6632 = vrot.lane.b32.xlu1 %v14744_v55, %s15994_s9  ;;  %v14806_v51 = vpop.permute.xlu0 %7164 }
 0x9eb   : > { %6940 = vrot.lane.b32.xlu0 %v14741_v40, %s15998_s13 }
 0x9ec   : > { %6938 = vrot.lane.b32.xlu1 %v14744_v55, %s15998_s13  ;;  %v14813_v63 = vpop.permute.xlu0 %6749 }
 0x9ed   : > { %16113 = vst [vmem:[#allocation45_spill] sm:$0xff] %v14813_v63  ;;  %v9946_v63 = vld [vmem:[%s15745_s12 + $0x1c0] sm:$0xff] }
 0x9ef   : > { %6638 = vrot.lane.b32.xlu0 %v14766_v21, %s15994_s9 }
 0x9f0   : > { %6636 = vrot.lane.b32.xlu1 %v14768_v19, %s15994_s9  ;;  %s16163_s9 = sld [smem:[#allocation18_spill]] }
 0x9f3   : > { %6944 = vrot.lane.b32.xlu0 %v14766_v21, %s15998_s13 }
 0x9f4   : > { %6942 = vrot.lane.b32.xlu1 %v14768_v19, %s15998_s13  ;;  %s16164_s13 = sld [smem:[#allocation19_spill]] }
 0x9f7   : > { %7244 = vperm.xlu0 %11492, %v9907_v33   ;;  %v9940_v33 = vld [vmem:[%s15745_s12 + $0x190] sm:$0xff] }
 0x9f8   : > { %7239 = vperm.xlu1 %11493, %v9906_v45   ;;  %v14816_v45 = vpop.permute.xlu1 %6744 }
 0x9f9   : > { %16114 = vst [vmem:[#allocation62_spill] sm:$0xff] %v14816_v45 }
 0x9fb   : > { %7486 = vperm.xlu0 %11492, %v9923_v29   ;;  %v9927_v29 = vld [vmem:[%s15746_s6 + $0x1a8] sm:$0xff] }
 0x9fc   : > { %7481 = vperm.xlu1 %11493, %v9922_v39   ;;  %v9926_v39 = vld [vmem:[%s15746_s6 + $0x1a0] sm:$0xff] }
 0x9ff   : > { %7254 = vperm.xlu0 %11492, %v9909_v27   ;;  %v14820_v27 = vpop.permute.xlu0 %6862 }
 0xa00   : > { %7249 = vperm.xlu1 %11493, %v9908_v2   ;;  %16115 = vst [vmem:[#allocation60_spill] sm:$0xff] %v14820_v27  ;;  %v14822_v2 = vpop.permute.xlu1 %6857 }
 0xa01   : > { %16116 = vst [vmem:[#allocation41_spill] sm:$0xff] %v14822_v2 }
 0xa03   : > { %7599 = vperm.xlu0 %11492, %v9939_v28   ;;  %v9913_v28 = vld [vmem:[%s11835_s30 + $0x1b8] sm:$0xff] }
 0xa04   : > { %7594 = vperm.xlu1 %11493, %v9938_v46   ;;  %v9912_v46 = vld [vmem:[%s11835_s30 + $0x1b0] sm:$0xff] }
 0xa07   : > { %7496 = vperm.xlu0 %11492, %v9925_v38   ;;  %v9943_v38 = vld [vmem:[%s15745_s12 + $0x1a8] sm:$0xff] }
 0xa08   : > { %7491 = vperm.xlu1 %11493, %v9924_v18   ;;  %v14827_v18 = vpop.permute.xlu0 %7055 }
 0xa09   : > { %16117 = vst [vmem:[#allocation63_spill] sm:$0xff] %v14827_v18  ;;  %v9945_v18 = vld [vmem:[%s15745_s12 + $0x1b8] sm:$0xff] }
 0xa0b   : > { %7264 = vperm.xlu0 %11492, %v9911_v22   ;;  %v9942_v22 = vld [vmem:[%s15745_s12 + $0x1a0] sm:$0xff] }
 0xa0c   : > { %7259 = vperm.xlu1 %11493, %v9910_v53   ;;  %v14830_v53 = vpop.permute.xlu1 %7050 }
 0xa0d   : > { %16118 = vst [vmem:[#allocation44_spill] sm:$0xff] %v14830_v53  ;;  %v9931_v53 = vld [vmem:[%s15746_s6 + $0x1c8] sm:$0xff] }
 0xa0f   : > { %7609 = vperm.xlu0 %11492, %v9941_v24   ;;  %v9929_v24 = vld [vmem:[%s15746_s6 + $0x1b8] sm:$0xff] }
 0xa10   : > { %7604 = vperm.xlu1 %11493, %v9940_v33   ;;  %v9928_v33 = vld [vmem:[%s15746_s6 + $0x1b0] sm:$0xff] }
 0xa13   : > { %7506 = vperm.xlu0 %11492, %v9927_v29   ;;  %v14834_v29 = vpop.permute.xlu0 %7174 }
 0xa14   : > { %7501 = vperm.xlu1 %11493, %v9926_v39   ;;  %16119 = vst [vmem:[#allocation56_spill] sm:$0xff] %v14834_v29  ;;  %v14836_v39 = vpop.permute.xlu1 %7169 }
 0xa15   : > { %16120 = vst [vmem:[#allocation48_spill] sm:$0xff] %v14836_v39 }
 0xa17   : > { %7274 = vperm.xlu0 %11492, %v9913_v28   ;;  %v9915_v28 = vld [vmem:[%s11835_s30 + $0x1c8] sm:$0xff]  ;;  %v14841_v2 = vpop.permute.xlu0 %7184 }
 0xa18   : > { %7269 = vperm.xlu1 %11493, %v9912_v46   ;;  %v9914_v46 = vld [vmem:[%s11835_s30 + $0x1c0] sm:$0xff]  ;;  %16121 = vst [vmem:[#allocation58_spill] sm:$0xff] %v14841_v2  ;;  %v9917_v2 = vld [vmem:[%s11835_s30 + $0x1d8] sm:$0xff] }
 0xa1b   : > { %7619 = vperm.xlu0 %11492, %v9943_v38   ;;  %v9944_v38 = vld [vmem:[%s15745_s12 + $0x1b0] sm:$0xff] }
 0xa1c   : > { %7614 = vperm.xlu1 %11493, %v9942_v22   ;;  %v14844_v22 = vpop.permute.xlu1 %7179 }
 0xa1d   : > { %16122 = vst [vmem:[#allocation61_spill] sm:$0xff] %v14844_v22  ;;  %v9916_v22 = vld [vmem:[%s11835_s30 + $0x1d0] sm:$0xff] }
 0xa1f   : > { %7516 = vperm.xlu0 %11492, %v9929_v24   ;;  %v9930_v24 = vld [vmem:[%s15746_s6 + $0x1c0] sm:$0xff] }
 0xa20   : > { %7511 = vperm.xlu1 %11493, %v9928_v33  }
 0xa23   : > { %7284 = vperm.xlu0 %11492, %v9915_v28  }
 0xa24   : > { %7279 = vperm.xlu1 %11493, %v9914_v46  }
 0xa27   : > { %7629 = vperm.xlu0 %11492, %v9945_v18   ;;  %v6866_v18 = vmul.f32 %v14535_v12, %v14591_v52  ;;  %v9947_v12 = vld [vmem:[%s15745_s12 + $0x1c8] sm:$0xff] }
 0xa28   : > { %7624 = vperm.xlu1 %11493, %v9944_v38  }
 0xa29   : > { %v6611_v19 = vpop.permute.xlu0 %6610 }
 0xa2a   : > { %v6657_v27 = vsel %vm1052_vm1, 0.0, %v6611_v19  ;;  %v6609_v33 = vpop.permute.xlu1 %6608  ;;  %v6865_v19 = vmul.f32 %v14537_v54, %v14594_v9 }
 0xa2b   : > { %v6753_v21 = vmul.f32 %v14531_v15, %v6657_v27  ;;  %v6656_v28 = vsel %vm1052_vm1, 0.0, %v6609_v33  ;;  %7526 = vperm.xlu0 %11492, %v9931_v53   ;;  %v16123_v33 = vld [vmem:[#allocation30_spill] sm:$0xff] }
 0xa2c   : > { %v6752_v46 = vmul.f32 %v14533_v11, %v6656_v28  ;;  %7521 = vperm.xlu1 %11493, %v9930_v24   ;;  %v16124_v28 = vld [vmem:[#allocation31_spill] sm:$0xff] }
 0xa2d   : > { %v6917_v38 = vpop.permute.xlu0 %6916  ;;  %v6882_v27 = vadd.f32 %v6866_v18, %v6753_v21  ;;  %v16125_v21 = vld [vmem:[#allocation32_spill] sm:$0xff] }
 0xa2e   : > { %v6963_v39 = vsel %vm1085_vm4, %v6917_v38, 0.0  ;;  %v6915_v15 = vpop.permute.xlu1 %6914  ;;  %v6881_v24 = vadd.f32 %v6865_v19, %v6752_v46  ;;  %v16127_v19 = vld [vmem:[#allocation34_spill] sm:$0xff] }
 0xa2f   : > { %v7059_v53 = vmul.f32 %v16123_v33, %v6963_v39  ;;  %v6962_v11 = vsel %vm1085_vm4, %v6915_v15, 0.0  ;;  %7294 = vperm.xlu0 %11492, %v9917_v2   ;;  %v16126_v2 = vld [vmem:[#allocation35_spill] sm:$0xff]  ;;  %v16128_v33 = vld [vmem:[#allocation37_spill] sm:$0xff] }
 0xa30   : > { %v7058_v45 = vmul.f32 %v16124_v28, %v6962_v11  ;;  %7289 = vperm.xlu1 %11493, %v9916_v22   ;;  %v9933_v22 = vld [vmem:[%s15746_s6 + $0x1d8] sm:$0xff] }
 0xa31   : > { %v7075_v52 = vadd.f32 %v7059_v53, %v6882_v27  ;;  %v6615_v29 = vpop.permute.xlu0 %6614  ;;  %v16129_v53 = vld [vmem:[#allocation38_spill] sm:$0xff] }
 0xa32   : > { %v7074_v54 = vadd.f32 %v7058_v45, %v6881_v24  ;;  %v6659_v9 = vsel %vm1052_vm1, 0.0, %v6615_v29  ;;  %v6613_v38 = vpop.permute.xlu1 %6612  ;;  %v6868_v45 = vmul.f32 %v16129_v53, %v14615_v0  ;;  %v9932_v29 = vld [vmem:[%s15746_s6 + $0x1d0] sm:$0xff]  ;;  %v16130_v24 = vld [vmem:[#allocation33_spill] sm:$0xff] }
 0xa33   : > { %v6755_v18 = vmul.f32 %v16125_v21, %v6659_v9  ;;  %v6658_v39 = vsel %vm1052_vm1, 0.0, %v6613_v38  ;;  %7639 = vperm.xlu0 %11492, %v9947_v12   ;;  %v7188_v46 = vadd.f32 %v16126_v2, %v7075_v52  ;;  %v6867_v28 = vmul.f32 %v16130_v24, %v14618_v14  ;;  %v16131_v21 = vld [vmem:[#allocation36_spill] sm:$0xff]  ;;  %v16132_v2 = vld [vmem:[#allocation39_spill] sm:$0xff]  ;;  %v9919_v0 = vld [vmem:[%s11835_s30 + $0x1e8] sm:$0xff] }
 0xa34   : > { %v6754_v15 = vmul.f32 %v16127_v19, %v6658_v39  ;;  %7634 = vperm.xlu1 %11493, %v9946_v63   ;;  %v7187_v27 = vadd.f32 %v16128_v33, %v7074_v54  ;;  %v9918_v53 = vld [vmem:[%s11835_s30 + $0x1e0] sm:$0xff] }
 0xa35   : > { %v6921_v11 = vpop.permute.xlu0 %6920  ;;  %v6884_v38 = vadd.f32 %v6868_v45, %v6755_v18 }
 0xa36   : > { %v6965_v12 = vsel %vm1085_vm4, %v6921_v11, 0.0  ;;  %v6919_v9 = vpop.permute.xlu1 %6918  ;;  %v11213_v52 = vpack.c.bf16 %v7188_v46, %v7187_v27  ;;  %v6883_v54 = vadd.f32 %v6867_v28, %v6754_v15  ;;  %v16133_v27 = vld [vmem:[#allocation40_spill] sm:$0xff]  ;;  %v16134_v15 = vld [vmem:[#allocation57_spill] sm:$0xff] }
 0xa37   : > { %v7061_v63 = vmul.f32 %v16131_v21, %v6965_v12  ;;  %v6964_v39 = vsel %vm1085_vm4, %v6919_v9, 0.0  ;;  %7536 = vperm.xlu0 %11492, %v9933_v22   ;;  %v9949_v12 = vld [vmem:[%s15745_s12 + $0x1d8] sm:$0xff]  ;;  %v16136_v9 = vld [vmem:[#allocation53_spill] sm:$0xff] }
 0xa38   : > { %v7060_v19 = vmul.f32 %v16132_v2, %v6964_v39  ;;  %7531 = vperm.xlu1 %11493, %v9932_v29   ;;  %11214 = vmatprep.subr.bf16.mxu1 %v11213_v52  ;;  %v16135_v29 = vld [vmem:[#allocation52_spill] sm:$0xff]  ;;  %v9948_v39 = vld [vmem:[%s15745_s12 + $0x1d0] sm:$0xff] }
 0xa39   : > { %v7077_v33 = vadd.f32 %v7061_v63, %v6884_v38  ;;  %v6619_v14 = vpop.permute.xlu0 %6618  ;;  %11216 = vmatpush3.bf16.msra.mxu1 %v11213_v52  ;;  %v16137_v52 = vld [vmem:[#allocation42_spill] sm:$0xff] }
 0xa3a   : > { %v7076_v11 = vadd.f32 %v7060_v19, %v6883_v54  ;;  %v6661_v18 = vsel %vm1052_vm1, 0.0, %v6619_v14  ;;  %v6617_v46 = vpop.permute.xlu1 %6616  ;;  %v6870_v21 = vmul.f32 %v16137_v52, %v14639_v43  ;;  %v16138_v54 = vld [vmem:[#allocation49_spill] sm:$0xff] }
 0xa3b   : > { %v6757_v45 = vmul.f32 %v16133_v27, %v6661_v18  ;;  %v6660_v22 = vsel %vm1052_vm1, 0.0, %v6617_v46  ;;  %7304 = vperm.xlu0 %11492, %v9919_v0   ;;  %v7190_v24 = vadd.f32 %v16134_v15, %v7077_v33  ;;  %v6869_v2 = vmul.f32 %v16138_v54, %v14644_v31  ;;  %v16139_v18 = vld [vmem:[#allocation47_spill] sm:$0xff]  ;;  %v16140_v27 = vld [vmem:[#allocation54_spill] sm:$0xff] }
 0xa3c   : > { %v6756_v28 = vmul.f32 %v16135_v29, %v6660_v22  ;;  %7299 = vperm.xlu1 %11493, %v9918_v53   ;;  %v7189_v38 = vadd.f32 %v16136_v9, %v7076_v11  ;;  %v9935_v43 = vld [vmem:[%s15746_s6 + $0x1e8] sm:$0xff]  ;;  %v9934_v29 = vld [vmem:[%s15746_s6 + $0x1e0] sm:$0xff] }
 0xa3d   : > { %v6925_v63 = vpop.permute.xlu0 %6924  ;;  %v6886_v14 = vadd.f32 %v6870_v21, %v6757_v45  ;;  %v16142_v21 = vld [vmem:[#allocation55_spill] sm:$0xff] }
 0xa3e   : > { %v6967_v19 = vsel %vm1085_vm4, %v6925_v63, 0.0  ;;  %v6923_v0 = vpop.permute.xlu1 %6922  ;;  %v11217_v33 = vpack.c.bf16 %v7190_v24, %v7189_v38  ;;  %v6885_v11 = vadd.f32 %v6869_v2, %v6756_v28  ;;  %v16141_v38 = vld [vmem:[#allocation46_spill] sm:$0xff]  ;;  %v6872_v2 = vmul.f32 %v14583_v59, %v14663_v62 }
 0xa3f   : > { %v7063_v53 = vmul.f32 %v16139_v18, %v6967_v19  ;;  %v6966_v46 = vsel %vm1085_vm4, %v6923_v0, 0.0  ;;  %7649 = vperm.xlu0 %11492, %v9949_v12   ;;  %v9920_v0 = vld [vmem:[%s11835_s30 + $0x1f0] sm:$0xff]  ;;  %v9951_v59 = vld [vmem:[%s15745_s12 + $0x1e8] sm:$0xff] }
 0xa40   : > { %v7062_v22 = vmul.f32 %v16140_v27, %v6966_v46  ;;  %7644 = vperm.xlu1 %11493, %v9948_v39   ;;  %11218 = vmatprep.subr.bf16.mxu1 %v11217_v33  ;;  %v9921_v39 = vld [vmem:[%s11835_s30 + $0x1f8] sm:$0xff] }
 0xa41   : > { %v7079_v15 = vadd.f32 %v7063_v53, %v6886_v14  ;;  %v6623_v31 = vpop.permute.xlu0 %6622  ;;  %11220 = vmatpush3.bf16.msra.mxu1 %v11217_v33  ;;  %v6871_v33 = vmul.f32 %v14587_v42, %v14666_v57  ;;  %v9950_v57 = vld [vmem:[%s15745_s12 + $0x1e0] sm:$0xff] }
 0xa42   : > { %v7078_v9 = vadd.f32 %v7062_v22, %v6885_v11  ;;  %v6663_v45 = vsel %vm1052_vm1, 0.0, %v6623_v31  ;;  %v6621_v24 = vpop.permute.xlu1 %6620 }
 0xa43   : > { %v6759_v52 = vmul.f32 %v16141_v38, %v6663_v45  ;;  %v6662_v12 = vsel %vm1052_vm1, 0.0, %v6621_v24  ;;  %7546 = vperm.xlu0 %11492, %v9935_v43   ;;  %v7192_v28 = vadd.f32 %v14621_v49, %v7079_v15  ;;  %v6874_v24 = vmul.f32 %v14655_v16, %v14685_v60  ;;  %v9953_v16 = vld [vmem:[%s15745_s12 + $0x1f8] sm:$0xff] }
 0xa44   : > { %v6758_v63 = vmul.f32 %v16142_v21, %v6662_v12  ;;  %7541 = vperm.xlu1 %11493, %v9934_v29   ;;  %v7191_v54 = vadd.f32 %v14625_v6, %v7078_v9  ;;  %v9937_v9 = vld [vmem:[%s15746_s6 + $0x1f8] sm:$0xff] }
 0xa45   : > { %v6929_v19 = vpop.permute.xlu0 %6928  ;;  %v6888_v53 = vadd.f32 %v6872_v2, %v6759_v52  ;;  %v9936_v52 = vld [vmem:[%s15746_s6 + $0x1f0] sm:$0xff]  ;;  %s16168_s6 = sld [smem:[#allocation24_spill]] }
 0xa46   : > { %v6969_v14 = vsel %vm1085_vm4, %v6929_v19, 0.0  ;;  %v6927_v18 = vpop.permute.xlu1 %6926  ;;  %v11221_v49 = vpack.c.bf16 %v7192_v28, %v7191_v54  ;;  %v6887_v6 = vadd.f32 %v6871_v33, %v6758_v63 }
 0xa47   : > { %v7065_v46 = vmul.f32 %v14601_v44, %v6969_v14  ;;  %v6968_v11 = vsel %vm1085_vm4, %v6927_v18, 0.0  ;;  %7314 = vperm.xlu0 %11492, %v9921_v39   ;;  %v6876_v18 = vmul.f32 %v14731_v50, %v14713_v25 }
 0xa48   : > { %v7064_v27 = vmul.f32 %v14606_v34, %v6968_v11  ;;  %7309 = vperm.xlu1 %11493, %v9920_v0   ;;  %11222 = vmatprep.subr.bf16.mxu1 %v11221_v49 }
 0xa49   : > { %v7081_v62 = vadd.f32 %v7065_v46, %v6888_v53  ;;  %v6627_v42 = vpop.permute.xlu0 %6626  ;;  %11224 = vmatpush3.bf16.msra.mxu1 %v11221_v49  ;;  %v6875_v53 = vmul.f32 %v14736_v36, %v14718_v3 }
 0xa4a   : > { %v7080_v22 = vadd.f32 %v7064_v27, %v6887_v6  ;;  %v6665_v43 = vsel %vm1052_vm1, 0.0, %v6627_v42  ;;  %v6625_v15 = vpop.permute.xlu1 %6624 }
 0xa4b   : > { %v6761_v44 = vmul.f32 %v14637_v8, %v6665_v43  ;;  %v6664_v31 = vsel %vm1052_vm1, 0.0, %v6625_v15  ;;  %7659 = vperm.xlu0 %11492, %v9951_v59   ;;  %v7194_v34 = vadd.f32 %v14691_v4, %v7081_v62  ;;  %v6873_v8 = vmul.f32 %v14659_v17, %v14688_v10  ;;  %v9952_v17 = vld [vmem:[%s15745_s12 + $0x1f0] sm:$0xff] }
 0xa4c   : > { %v6760_v29 = vmul.f32 %v14642_v41, %v6664_v31  ;;  %7654 = vperm.xlu1 %11493, %v9950_v57   ;;  %v7193_v45 = vadd.f32 %v14696_v7, %v7080_v22  ;;  %v6877_v15 = vmul.f32 %v14794_v23, %v14744_v55  ;;  %v16143_v23 = vld [vmem:[#allocation45_spill] sm:$0xff] }
 0xa4d   : > { %v6933_v38 = vpop.permute.xlu0 %6932  ;;  %v6890_v21 = vadd.f32 %v6874_v24, %v6761_v44 }
 0xa4e   : > { %v6971_v12 = vsel %vm1085_vm4, %v6933_v38, 0.0  ;;  %v6931_v28 = vpop.permute.xlu1 %6930  ;;  %v11225_v4 = vpack.c.bf16 %v7194_v34, %v7193_v45  ;;  %v6889_v7 = vadd.f32 %v6873_v8, %v6760_v29 }
 0xa4f   : > { %v7067_v41 = vmul.f32 %v14673_v20, %v6971_v12  ;;  %v6970_v63 = vsel %vm1085_vm4, %v6931_v28, 0.0  ;;  %7556 = vperm.xlu0 %11492, %v9937_v9   ;;  %v16146_v28 = vld [vmem:[#allocation48_spill] sm:$0xff] }
 0xa50   : > { %v7066_v39 = vmul.f32 %v14677_v35, %v6970_v63  ;;  %7551 = vperm.xlu1 %11493, %v9936_v52   ;;  %11226 = vmatprep.subr.bf16.mxu1 %v11225_v4  ;;  %v16144_v52 = vld [vmem:[#allocation56_spill] sm:$0xff] }
 0xa51   : > { %v7083_v60 = vadd.f32 %v7067_v41, %v6890_v21  ;;  %v6631_v54 = vpop.permute.xlu0 %6630  ;;  %11228 = vmatpush3.bf16.msra.mxu1 %v11225_v4  ;;  %v16147_v21 = vld [vmem:[#allocation43_spill] sm:$0xff] }
 0xa52   : > { %v7082_v10 = vadd.f32 %v7066_v39, %v6889_v7  ;;  %v6667_v2 = vsel %vm1052_vm1, 0.0, %v6631_v54  ;;  %v6629_v19 = vpop.permute.xlu1 %6628  ;;  %v16149_v7 = vld [vmem:[#allocation50_spill] sm:$0xff]  ;;  %v16150_v39 = vld [vmem:[#allocation41_spill] sm:$0xff] }
 0xa53   : > { %v6763_v0 = vmul.f32 %v14711_v47, %v6667_v2  ;;  %v6666_v20 = vsel %vm1052_vm1, 0.0, %v6629_v19  ;;  %7669 = vperm.xlu0 %11492, %v9953_v16   ;;  %v7196_v33 = vadd.f32 %v14771_v48, %v7083_v60  ;;  %v6879_v16 = vmul.f32 %v16150_v39, %v16149_v7  ;;  %v16151_v2 = vld [vmem:[#allocation63_spill] sm:$0xff] }
 0xa54   : > { %v6762_v35 = vmul.f32 %v14716_v32, %v6666_v20  ;;  %7664 = vperm.xlu1 %11493, %v9952_v17   ;;  %v7195_v14 = vadd.f32 %v14775_v26, %v7082_v10 }
 0xa55   : > { %v6937_v49 = vpop.permute.xlu0 %6936  ;;  %v6892_v6 = vadd.f32 %v6876_v18, %v6763_v0 }
 0xa56   : > { %v6973_v46 = vsel %vm1085_vm4, %v6937_v49, 0.0  ;;  %v6935_v47 = vpop.permute.xlu1 %6934  ;;  %v11229_v11 = vpack.c.bf16 %v7196_v33, %v7195_v14  ;;  %v6891_v32 = vadd.f32 %v6875_v53, %v6762_v35  ;;  %v16152_v33 = vld [vmem:[#allocation44_spill] sm:$0xff]  ;;  %v16153_v49 = vld [vmem:[#allocation58_spill] sm:$0xff] }
 0xa57   : > { %v7069_v27 = vmul.f32 %v14753_v30, %v6973_v46  ;;  %v6972_v48 = vsel %vm1085_vm4, %v6935_v47, 0.0  ;;  %v16154_v46 = vld [vmem:[#allocation61_spill] sm:$0xff] }
 0xa58   : > { %v7068_v59 = vmul.f32 %v14756_v61, %v6972_v48  ;;  %11230 = vmatprep.subr.bf16.mxu1 %v11229_v11  ;;  %v6878_v61 = vmul.f32 %v14792_v5, %v14741_v40  ;;  %v9893_v48 = vld [vmem:[%s11830_s24 + $0x198] sm:$0xff] }
 0xa59   : > { %v7085_v26 = vadd.f32 %v7069_v27, %v6892_v6  ;;  %v6635_v62 = vpop.permute.xlu0 %6634  ;;  %11232 = vmatpush3.bf16.msra.mxu1 %v11229_v11  ;;  %v9891_v6 = vld [vmem:[%s11830_s24 + $0x188] sm:$0xff]  ;;  %v9892_v27 = vld [vmem:[%s11830_s24 + $0x190] sm:$0xff] }
 0xa5a   : > { %v7084_v25 = vadd.f32 %v7068_v59, %v6891_v32  ;;  %v6669_v50 = vsel %vm1052_vm1, 0.0, %v6635_v62  ;;  %v6633_v3 = vpop.permute.xlu1 %6632  ;;  %v9894_v32 = vld [vmem:[%s11830_s24 + $0x1a0] sm:$0xff]  ;;  %v9895_v59 = vld [vmem:[%s11830_s24 + $0x1a8] sm:$0xff]  ;;  %v9897_v62 = vld [vmem:[%s11830_s24 + $0x1b8] sm:$0xff] }
 0xa5b   : > { %v6765_v36 = vmul.f32 %v14785_v37, %v6669_v50  ;;  %v6668_v42 = vsel %vm1052_vm1, 0.0, %v6633_v3  ;;  %v7198_v57 = vadd.f32 %v14806_v51, %v7085_v26  ;;  %v9896_v26 = vld [vmem:[%s11830_s24 + $0x1b0] sm:$0xff]  ;;  %v9899_v50 = vld [vmem:[%s11830_s24 + $0x1c8] sm:$0xff] }
 0xa5c   : > { %v6764_v30 = vmul.f32 %v14788_v56, %v6668_v42  ;;  %v7197_v22 = vadd.f32 %v14808_v1, %v7084_v25  ;;  %v9898_v25 = vld [vmem:[%s11830_s24 + $0x1c0] sm:$0xff]  ;;  %v9900_v3 = vld [vmem:[%s11830_s24 + $0x1d0] sm:$0xff] }
 0xa5d   : > { %v6941_v43 = vpop.permute.xlu0 %6940  ;;  %v6894_v37 = vadd.f32 %v6878_v61, %v6765_v36  ;;  %v9901_v36 = vld [vmem:[%s11830_s24 + $0x1d8] sm:$0xff]  ;;  %v9902_v42 = vld [vmem:[%s11830_s24 + $0x1e0] sm:$0xff] }
 0xa5e   : > { %v6975_v44 = vsel %vm1085_vm4, %v6941_v43, 0.0  ;;  %v6939_v31 = vpop.permute.xlu1 %6938  ;;  %v11233_v34 = vpack.c.bf16 %v7198_v57, %v7197_v22  ;;  %v6893_v9 = vadd.f32 %v6877_v15, %v6764_v30  ;;  %v9903_v57 = vld [vmem:[%s11830_s24 + $0x1e8] sm:$0xff]  ;;  %v9904_v30 = vld [vmem:[%s11830_s24 + $0x1f0] sm:$0xff]  ;;  %v9905_v22 = vld [vmem:[%s11830_s24 + $0x1f8] sm:$0xff] }
 0xa5f   : > { %v7071_v29 = vmul.f32 %v14799_v58, %v6975_v44  ;;  %v6974_v51 = vsel %vm1085_vm4, %v6939_v31, 0.0  ;;  %v16145_v58 = vld [vmem:[#allocation62_spill] sm:$0xff] }
 0xa60   : > { %v7070_v56 = vmul.f32 %v14802_v13, %v6974_v51  ;;  %11234 = vmatprep.subr.bf16.mxu1 %v11233_v34  ;;  %v16148_v13 = vld [vmem:[#allocation60_spill] sm:$0xff] }
 0xa61   : > { %v7087_v1 = vadd.f32 %v7071_v29, %v6894_v37  ;;  %v6639_v45 = vpop.permute.xlu0 %6638  ;;  %11236 = vmatpush3.bf16.msra.mxu1 %v11233_v34  ;;  %v6880_v41 = vmul.f32 %v16148_v13, %v16147_v21 }
 0xa62   : > { %v7086_v40 = vadd.f32 %v7070_v56, %v6893_v9  ;;  %v6671_v5 = vsel %vm1052_vm1, 0.0, %v6639_v45  ;;  %v6637_v55 = vpop.permute.xlu1 %6636 }
 0xa63   : > { %v6767_v24 = vmul.f32 %v16143_v23, %v6671_v5  ;;  %v6670_v38 = vsel %vm1052_vm1, 0.0, %v6637_v55  ;;  %v7200_v8 = vadd.f32 %v16144_v52, %v7087_v1 }
 0xa64   : > { %v6766_v12 = vmul.f32 %v16145_v58, %v6670_v38  ;;  %v7199_v4 = vadd.f32 %v16146_v28, %v7086_v40 }
 0xa65   : > { %v6945_v63 = vpop.permute.xlu0 %6944  ;;  %v6896_v10 = vadd.f32 %v6880_v41, %v6767_v24 }
 0xa66   : > { %v6977_v60 = vsel %vm1085_vm4, %v6945_v63, 0.0  ;;  %v6943_v54 = vpop.permute.xlu1 %6942  ;;  %v11237_v17 = vpack.c.bf16 %v7200_v8, %v7199_v4  ;;  %v6895_v20 = vadd.f32 %v6879_v16, %v6766_v12 }
 0xa67   : > { %v7073_v19 = vmul.f32 %v16151_v2, %v6977_v60  ;;  %v6976_v0 = vsel %vm1085_vm4, %v6943_v54, 0.0 }
 0xa68   : > { %v7072_v35 = vmul.f32 %v16152_v33, %v6976_v0  ;;  %11238 = vmatprep.subr.bf16.mxu1 %v11237_v17 }
 0xa69   : > { %v7089_v14 = vadd.f32 %v7073_v19, %v6896_v10  ;;  %11240 = vmatpush3.bf16.msra.mxu1 %v11237_v17 }
 0xa6a   : > { %v7088_v18 = vadd.f32 %v7072_v35, %v6895_v20 }
 0xa6b   : > { %v7202_v53 = vadd.f32 %v16153_v49, %v7089_v14 }
 0xa6c   : > { %v7201_v47 = vadd.f32 %v16154_v46, %v7088_v18 }
 0xa6e   : > { %v11241_v11 = vpack.c.bf16 %v7202_v53, %v7201_v47 }
 0xa70   : > { %11242 = vmatprep.subr.bf16.mxu1 %v11241_v11 }
 0xa71   : > { %11244 = vmatpush3.bf16.msra.mxu1 %v11241_v11 }
 0xa74   : > { %10757 = vmatmul.mubr.f32.vlgmr.msra.gmra.mrb[64].mxu1 %v9891_v6 }
 0xa75   : > { %10759 = vmatprep.mubr.f32.mxu1 %v9892_v27 }
 0xa76   : > { %v7245_v23 = vpop.permute.xlu0 %7244 }
 0xa77   : > { %v7240_v24 = vpop.permute.xlu1 %7239 }
 0xa78   : > { %10760 = vmatmul.mubr.f32.gmra.mrb[66].mxu1 %v9893_v48 }
 0xa79   : > { %10762 = vmatprep.mubr.f32.mxu1 %v9894_v32 }
 0xa7a   : > { %v7487_v38 = vpop.permute.xlu0 %7486 }
 0xa7b   : > { %v7482_v52 = vpop.permute.xlu1 %7481 }
 0xa7c   : > { %10763 = vmatmul.mubr.f32.gmra.mrb[68].mxu1 %v9895_v59 }
 0xa7d   : > { %10765 = vmatprep.mubr.f32.mxu1 %v9896_v26 }
 0xa7e   : > { %v7255_v8 = vpop.permute.xlu0 %7254 }
 0xa7f   : > { %v7250_v58 = vpop.permute.xlu1 %7249 }
 0xa80   : > { %10766 = vmatmul.mubr.f32.gmra.mrb[70].mxu1 %v9897_v62 }
 0xa81   : > { %10768 = vmatprep.mubr.f32.mxu1 %v9898_v25 }
 0xa82   : > { %v7600_v12 = vpop.permute.xlu0 %7599 }
 0xa83   : > { %v7595_v28 = vpop.permute.xlu1 %7594 }
 0xa84   : > { %10769 = vmatmul.mubr.f32.gmra.mrb[72].mxu1 %v9899_v50 }
 0xa85   : > { %10771 = vmatprep.mubr.f32.mxu1 %v9900_v3 }
 0xa86   : > { %v7497_v4 = vpop.permute.xlu0 %7496 }
 0xa87   : > { %v7492_v21 = vpop.permute.xlu1 %7491 }
 0xa88   : > { %10772 = vmatmul.mubr.f32.gmra.mrb[74].mxu1 %v9901_v36 }
 0xa89   : > { %10774 = vmatprep.mubr.f32.mxu1 %v9902_v42 }
 0xa8a   : > { %v14995_v61 = vpop.f32.mrb[48].mxu1  ;;  %v7265_v13 = vpop.permute.xlu0 %7264 }
 0xa8b   : > { %v14997_v43 = vpop.f32.mrb[49].mxu1  ;;  %v7260_v41 = vpop.permute.xlu1 %7259 }
 0xa8c   : > { %10775 = vmatmul.mubr.f32.gmra.mrb[76].mxu1 %v9903_v57 }
 0xa8d   : > { %10777 = vmatprep.mubr.f32.mxu1 %v9904_v30 }
 0xa8e   : > { %v7610_v63 = vpop.permute.xlu0 %7609 }
 0xa8f   : > { %v7605_v7 = vpop.permute.xlu1 %7604 }
 0xa90   : > { %10778 = vmatmul.mubr.f32.gmra.mrb[78].mxu1 %v9905_v22 }
 0xa92   : > { %v7507_v39 = vpop.permute.xlu0 %7506 }
 0xa93   : > { %v7502_v16 = vpop.permute.xlu1 %7501 }
 0xa96   : > { %v7275_v60 = vpop.permute.xlu0 %7274 }
 0xa97   : > { %v7270_v54 = vpop.permute.xlu1 %7269 }
 0xa99   : > { %v14999_v15 = vpop.f32.mrb[50].mxu1 }
 0xa9a   : > { %v15001_v44 = vpop.f32.mrb[51].mxu1  ;;  %v7620_v17 = vpop.permute.xlu0 %7619 }
 0xa9b   : > { %v7615_v10 = vpop.permute.xlu1 %7614 }
 0xa9d   : > { %v15003_v31 = vpop.f32.mrb[52].mxu1 }
 0xa9e   : > { %v15005_v34 = vpop.f32.mrb[53].mxu1  ;;  %v7517_v2 = vpop.permute.xlu0 %7516 }
 0xa9f   : > { %v7512_v19 = vpop.permute.xlu1 %7511 }
 0xaa1   : > { %v15007_v37 = vpop.f32.mrb[54].mxu1 }
 0xaa2   : > { %v15009_v29 = vpop.f32.mrb[55].mxu1  ;;  %v7285_v0 = vpop.permute.xlu0 %7284 }
 0xaa3   : > { %v15027_v20 = vpop.permute.xlu1 %7279 }
 0xaa5   : > { %v15011_v51 = vpop.f32.mrb[56].mxu1 }
 0xaa6   : > { %v15013_v9 = vpop.f32.mrb[57].mxu1  ;;  %v7630_v33 = vpop.permute.xlu0 %7629 }
 0xaa7   : > { %v15029_v35 = vpop.permute.xlu1 %7624 }
 0xaa9   : > { %v15015_v56 = vpop.f32.mrb[58].mxu1 }
 0xaaa   : > { %v15017_v1 = vpop.f32.mrb[59].mxu1  ;;  %v15031_v14 = vpop.permute.xlu0 %7526 }
 0xaab   : > { %16155 = vst [vmem:[#allocation64_spill] sm:$0xff] %v15017_v1  ;;  %v15033_v18 = vpop.permute.xlu1 %7521 }
 0xaad   : > { %v15019_v45 = vpop.f32.mrb[60].mxu1 }
 0xaae   : > { %16156 = vst [vmem:[#allocation59_spill] sm:$0xff] %v15019_v45  ;;  %v15021_v40 = vpop.f32.mrb[61].mxu1  ;;  %v15035_v49 = vpop.permute.xlu0 %7294 }
 0xaaf   : > { %16157 = vst [vmem:[#allocation65_spill] sm:$0xff] %v15021_v40  ;;  %v15037_v53 = vpop.permute.xlu1 %7289 }
 0xab1   : > { %v15023_v5 = vpop.f32.mrb[62].mxu1 }
 0xab2   : > { %16158 = vst [vmem:[#allocation51_spill] sm:$0xff] %v15023_v5  ;;  %v15025_v55 = vpop.f32.mrb[63].mxu1  ;;  %v15039_v46 = vpop.permute.xlu0 %7639 }
 0xab3   : > { %16159 = vst [vmem:[#allocation68_spill] sm:$0xff] %v15025_v55  ;;  %v15041_v47 = vpop.permute.xlu1 %7634 }
 0xab6   : > { %v15043_v11 = vpop.permute.xlu0 %7536 }
 0xab7   : > { %v15045_v6 = vpop.permute.xlu1 %7531 }
 0xaba   : > { %v15047_v27 = vpop.permute.xlu0 %7304 }
 0xabb   : > { %v15049_v48 = vpop.permute.xlu1 %7299 }
 0xabe   : > { %v15051_v62 = vpop.permute.xlu0 %7649 }
 0xabf   : > { %v15053_v50 = vpop.permute.xlu1 %7644 }
 0xb47   : > { %v10758_v32 = vpop.f32.mrb[64].mxu1 }
 0xb48   : > { %v7389_v59 = vadd.f32 %v10758_v32, %v7245_v23  ;;  %v7383_v26 = vpop.f32.mrb[65].mxu1  ;;  %v15060_v23 = vpop.permute.xlu0 %7546 }
 0xb49   : > { %v7384_v25 = vadd.f32 %v7383_v26, %v7240_v24  ;;  %v15063_v26 = vpop.permute.xlu1 %7541 }
 0xb4a   : > { %v7560_v3 = vmul.f32 %v7487_v38, %v7389_v59 }
 0xb4b   : > { %v7559_v36 = vmul.f32 %v7482_v52, %v7384_v25  ;;  %v10761_v42 = vpop.f32.mrb[66].mxu1 }
 0xb4c   : > { %v7399_v57 = vadd.f32 %v10761_v42, %v7255_v8  ;;  %v7393_v30 = vpop.f32.mrb[67].mxu1  ;;  %v15055_v22 = vadd.f32 %v7600_v12, %v7560_v3  ;;  %v7315_v3 = vpop.permute.xlu0 %7314 }
 0xb4d   : > { %v7394_v55 = vadd.f32 %v7393_v30, %v7250_v58  ;;  %v15057_v5 = vadd.f32 %v7595_v28, %v7559_v36 }
 0xb4e   : > { %v7562_v40 = vmul.f32 %v7497_v4, %v7399_v57  ;;  %v15707_v45 = vmax.f32 %v15055_v22, 0.0 }
 0xb4f   : > { %v7561_v32 = vmul.f32 %v7492_v21, %v7394_v55  ;;  %v10764_v1 = vpop.f32.mrb[68].mxu1  ;;  %v15706_v24 = vmax.f32 %v15057_v5, 0.0 }
 0xb50   : > { %v7409_v38 = vadd.f32 %v10764_v1, %v7265_v13  ;;  %7706 = vadd.xlane.f32.xlu0 %v15707_v45  ;;  %v7403_v52 = vpop.f32.mrb[69].mxu1  ;;  %v15067_v8 = vadd.f32 %v7610_v63, %v7562_v40  ;;  %v7310_v63 = vpop.permute.xlu1 %7309 }
 0xb51   : > { %v7404_v58 = vadd.f32 %v7403_v52, %v7260_v41  ;;  %7704 = vadd.xlane.f32.xlu1 %v15706_v24  ;;  %v15071_v12 = vadd.f32 %v7605_v7, %v7561_v32  ;;  %v7660_v30 = vpop.permute.xlu0 %7659 }
 0xb52   : > { %v7564_v28 = vmul.f32 %v7507_v39, %v7409_v38  ;;  %v15705_v55 = vmax.f32 %v15067_v8, 0.0 }
 0xb53   : > { %v7563_v4 = vmul.f32 %v7502_v16, %v7404_v58  ;;  %v10767_v21 = vpop.f32.mrb[70].mxu1  ;;  %v15704_v59 = vmax.f32 %v15071_v12, 0.0 }
 0xb54   : > { %v7419_v1 = vadd.f32 %v10767_v21, %v7275_v60  ;;  %v7413_v13 = vpop.f32.mrb[71].mxu1  ;;  %v15075_v25 = vadd.f32 %v7620_v17, %v7564_v28 }
 0xb55   : > { %v7414_v40 = vadd.f32 %v7413_v13, %v7270_v54  ;;  %7710 = vadd.xlane.f32.xlu1 %v15705_v55  ;;  %7708 = vadd.xlane.f32.xlu0 %v15704_v59  ;;  %v15081_v41 = vadd.f32 %v7615_v10, %v7563_v4  ;;  %v7557_v13 = vpop.permute.xlu0 %7556 }
 0xb56   : > { %v7566_v7 = vmul.f32 %v7517_v2, %v7419_v1  ;;  %v15703_v39 = vmax.f32 %v15075_v25, 0.0 }
 0xb57   : > { %v7565_v16 = vmul.f32 %v7512_v19, %v7414_v40  ;;  %v10770_v36 = vpop.f32.mrb[72].mxu1  ;;  %v15702_v60 = vmax.f32 %v15081_v41, 0.0 }
 0xb58   : > { %v7429_v17 = vadd.f32 %v10770_v36, %v7285_v0  ;;  %v7423_v42 = vpop.f32.mrb[73].mxu1  ;;  %v15085_v57 = vadd.f32 %v7630_v33, %v7566_v7 }
 0xb59   : > { %v7424_v54 = vadd.f32 %v7423_v42, %v15027_v20  ;;  %7714 = vadd.xlane.f32.xlu1 %v15703_v39  ;;  %7712 = vadd.xlane.f32.xlu0 %v15702_v60  ;;  %v15093_v10 = vadd.f32 %v15029_v35, %v7565_v16  ;;  %v7655_v20 = vpop.permute.xlu1 %7654 }
 0xb5a   : > { %v7568_v2 = vmul.f32 %v15031_v14, %v7429_v17  ;;  %v15701_v19 = vmax.f32 %v15085_v57, 0.0 }
 0xb5b   : > { %v7567_v0 = vmul.f32 %v15033_v18, %v7424_v54  ;;  %v10773_v33 = vpop.f32.mrb[74].mxu1  ;;  %v15700_v32 = vmax.f32 %v15093_v10, 0.0  ;;  %v7670_v54 = vpop.permute.xlu0 %7669 }
 0xb5c   : > { %v7439_v38 = vadd.f32 %v10773_v33, %v15035_v49  ;;  %v7433_v52 = vpop.f32.mrb[75].mxu1  ;;  %v15101_v58 = vadd.f32 %v15039_v46, %v7568_v2 }
 0xb5d   : > { %v7434_v35 = vadd.f32 %v7433_v52, %v15037_v53  ;;  %7718 = vadd.xlane.f32.xlu1 %v15701_v19  ;;  %7716 = vadd.xlane.f32.xlu0 %v15700_v32  ;;  %v15109_v14 = vadd.f32 %v15041_v47, %v7567_v0  ;;  %v9666_v52 = vld [vmem:[%s15747_s3 + $0x80] sm:$0xff] }
 0xb5e   : > { %v7570_v18 = vmul.f32 %v15043_v11, %v7439_v38  ;;  %v15699_v28 = vmax.f32 %v15101_v58, 0.0  ;;  %v7552_v11 = vpop.permute.xlu1 %7551  ;;  %v9651_v38 = vld [vmem:[%s11805_s29 + $0x88] sm:$0xff] }
 0xb5f   : > { %v7569_v49 = vmul.f32 %v15045_v6, %v7434_v35  ;;  %v10776_v4 = vpop.f32.mrb[76].mxu1  ;;  %v15698_v46 = vmax.f32 %v15109_v14, 0.0  ;;  %v9650_v35 = vld [vmem:[%s11805_s29 + $0x80] sm:$0xff] }
 0xb60   : > { %v7449_v53 = vadd.f32 %v10776_v4, %v15047_v27  ;;  %v7443_v21 = vpop.f32.mrb[77].mxu1  ;;  %v15117_v1 = vadd.f32 %v15051_v62, %v7570_v18  ;;  %v9652_v18 = vld [vmem:[%s11805_s29 + $0x90] sm:$0xff]  ;;  %v9682_v4 = vld [vmem:[%s15913_s16 + $0x80] sm:$0xff] }
 0xb61   : > { %v7444_v40 = vadd.f32 %v7443_v21, %v15049_v48  ;;  %7722 = vadd.xlane.f32.xlu1 %v15699_v28  ;;  %7720 = vadd.xlane.f32.xlu0 %v15698_v46  ;;  %v15125_v47 = vadd.f32 %v15053_v50, %v7569_v49  ;;  %v9667_v49 = vld [vmem:[%s15747_s3 + $0x88] sm:$0xff]  ;;  %v9668_v21 = vld [vmem:[%s15747_s3 + $0x90] sm:$0xff] }
 0xb62   : > { %v7572_v6 = vmul.f32 %v15060_v23, %v7449_v53  ;;  %v15697_v27 = vmax.f32 %v15117_v1, 0.0  ;;  %v9653_v53 = vld [vmem:[%s11805_s29 + $0x98] sm:$0xff] }
 0xb63   : > { %v7571_v62 = vmul.f32 %v15063_v26, %v7444_v40  ;;  %v10779_v7 = vpop.f32.mrb[78].mxu1  ;;  %v15691_v16 = vmax.f32 %v15125_v47, 0.0  ;;  %v9654_v40 = vld [vmem:[%s11805_s29 + $0xa0] sm:$0xff] }
 0xb64   : > { %v7459_v48 = vadd.f32 %v10779_v7, %v7315_v3  ;;  %v7453_v36 = vpop.f32.mrb[79].mxu1  ;;  %v15131_v17 = vadd.f32 %v7660_v30, %v7572_v6  ;;  %v9684_v6 = vld [vmem:[%s15913_s16 + $0x90] sm:$0xff]  ;;  %v9670_v7 = vld [vmem:[%s15747_s3 + $0xa0] sm:$0xff] }
 0xb65   : > { %v7454_v42 = vadd.f32 %v7453_v36, %v7310_v63  ;;  %7726 = vadd.xlane.f32.xlu1 %v15697_v27  ;;  %7724 = vadd.xlane.f32.xlu0 %v15691_v16  ;;  %v15137_v50 = vadd.f32 %v7655_v20, %v7571_v62  ;;  %v7665_v63 = vpop.permute.xlu1 %7664  ;;  %v9655_v62 = vld [vmem:[%s11805_s29 + $0xa8] sm:$0xff]  ;;  %v9656_v36 = vld [vmem:[%s11805_s29 + $0xb0] sm:$0xff] }
 0xb66   : > { %v7574_v23 = vmul.f32 %v7557_v13, %v7459_v48  ;;  %v15690_v26 = vmax.f32 %v15131_v17, 0.0  ;;  %v9683_v13 = vld [vmem:[%s15913_s16 + $0x88] sm:$0xff]  ;;  %v9685_v48 = vld [vmem:[%s15913_s16 + $0x98] sm:$0xff] }
 0xb67   : > { %v7573_v3 = vmul.f32 %v7552_v11, %v7454_v42  ;;  %v15689_v2 = vmax.f32 %v15137_v50, 0.0  ;;  %v9669_v11 = vld [vmem:[%s15747_s3 + $0x98] sm:$0xff]  ;;  %v9671_v42 = vld [vmem:[%s15747_s3 + $0xa8] sm:$0xff] }
 0xb68   : > { %v15141_v30 = vadd.f32 %v7670_v54, %v7574_v23  ;;  %v9686_v23 = vld [vmem:[%s15913_s16 + $0xa0] sm:$0xff]  ;;  %v9657_v54 = vld [vmem:[%s11805_s29 + $0xb8] sm:$0xff] }
 0xb69   : > { %7730 = vadd.xlane.f32.xlu1 %v15690_v26  ;;  %7728 = vadd.xlane.f32.xlu0 %v15689_v2  ;;  %v15147_v0 = vadd.f32 %v7665_v63, %v7573_v3  ;;  %v9672_v3 = vld [vmem:[%s15747_s3 + $0xb0] sm:$0xff]  ;;  %v9687_v63 = vld [vmem:[%s15913_s16 + $0xa8] sm:$0xff] }
 0xb6a   : > { %16160 = vst [vmem:[#allocation74_spill] sm:$0xff] %v15141_v30  ;;  %v15688_v33 = vmax.f32 %v15141_v30, 0.0 }
 0xb6b   : > { %16161 = vst [vmem:[#allocation69_spill] sm:$0xff] %v15147_v0  ;;  %v15687_v20 = vmax.f32 %v15147_v0, 0.0 }
 0xb6d   : > { %7734 = vadd.xlane.f32.xlu1 %v15688_v33  ;;  %7732 = vadd.xlane.f32.xlu0 %v15687_v20 }
 0xb7e   : > { %5002 = vperm.xlu1 %11493, %v9651_v38   ;;  %v9658_v38 = vld [vmem:[%s11805_s29 + $0xc0] sm:$0xff] }
 0xb82   : > { %5239 = vperm.xlu1 %11493, %v9666_v52   ;;  %v9673_v52 = vld [vmem:[%s15747_s3 + $0xb8] sm:$0xff] }
 0xb83   : > { %4997 = vperm.xlu0 %11492, %v9650_v35   ;;  %v9688_v35 = vld [vmem:[%s15913_s16 + $0xb0] sm:$0xff] }
 0xb86   : > { %5007 = vperm.xlu1 %11493, %v9652_v18   ;;  %v9659_v18 = vld [vmem:[%s11805_s29 + $0xc8] sm:$0xff] }
 0xb87   : > { %5244 = vperm.xlu0 %11492, %v9667_v49   ;;  %v9674_v49 = vld [vmem:[%s15747_s3 + $0xc0] sm:$0xff] }
 0xb8a   : > { %5352 = vperm.xlu1 %11493, %v9682_v4   ;;  %v9689_v4 = vld [vmem:[%s15913_s16 + $0xb8] sm:$0xff] }
 0xb8b   : > { %5012 = vperm.xlu0 %11492, %v9653_v53   ;;  %v9660_v53 = vld [vmem:[%s11805_s29 + $0xd0] sm:$0xff] }
 0xb8e   : > { %5249 = vperm.xlu1 %11493, %v9668_v21   ;;  %v9675_v21 = vld [vmem:[%s15747_s3 + $0xc8] sm:$0xff] }
 0xb8f   : > { %5357 = vperm.xlu0 %11492, %v9683_v13   ;;  %v9690_v13 = vld [vmem:[%s15913_s16 + $0xc0] sm:$0xff] }
 0xb92   : > { %5017 = vperm.xlu1 %11493, %v9654_v40   ;;  %v9661_v40 = vld [vmem:[%s11805_s29 + $0xd8] sm:$0xff] }
 0xb93   : > { %5254 = vperm.xlu0 %11492, %v9669_v11   ;;  %v9676_v11 = vld [vmem:[%s15747_s3 + $0xd0] sm:$0xff] }
 0xb96   : > { %5362 = vperm.xlu1 %11493, %v9684_v6   ;;  %v9691_v6 = vld [vmem:[%s15913_s16 + $0xc8] sm:$0xff] }
 0xb97   : > { %5022 = vperm.xlu0 %11492, %v9655_v62   ;;  %v9662_v62 = vld [vmem:[%s11805_s29 + $0xe0] sm:$0xff] }
 0xb9a   : > { %5259 = vperm.xlu1 %11493, %v9670_v7   ;;  %v9677_v7 = vld [vmem:[%s15747_s3 + $0xd8] sm:$0xff] }
 0xb9b   : > { %5367 = vperm.xlu0 %11492, %v9685_v48   ;;  %v9692_v48 = vld [vmem:[%s15913_s16 + $0xd0] sm:$0xff] }
 0xb9e   : > { %5027 = vperm.xlu1 %11493, %v9656_v36   ;;  %v9663_v36 = vld [vmem:[%s11805_s29 + $0xe8] sm:$0xff] }
 0xb9f   : > { %5264 = vperm.xlu0 %11492, %v9671_v42   ;;  %v9678_v42 = vld [vmem:[%s15747_s3 + $0xe0] sm:$0xff] }
 0xba2   : > { %5372 = vperm.xlu1 %11493, %v9686_v23   ;;  %v9693_v23 = vld [vmem:[%s15913_s16 + $0xd8] sm:$0xff] }
 0xba3   : > { %5032 = vperm.xlu0 %11492, %v9657_v54   ;;  %v9664_v54 = vld [vmem:[%s11805_s29 + $0xf0] sm:$0xff] }
 0xba6   : > { %5269 = vperm.xlu1 %11493, %v9672_v3   ;;  %v9679_v3 = vld [vmem:[%s15747_s3 + $0xe8] sm:$0xff] }
 0xba7   : > { %5377 = vperm.xlu0 %11492, %v9687_v63   ;;  %v9694_v63 = vld [vmem:[%s15913_s16 + $0xe0] sm:$0xff] }
 0xbaa   : > { %5037 = vperm.xlu1 %11493, %v9658_v38   ;;  %v9665_v38 = vld [vmem:[%s11805_s29 + $0xf8] sm:$0xff] }
 0xbab   : > { %5274 = vperm.xlu0 %11492, %v9673_v52   ;;  %v9680_v52 = vld [vmem:[%s15747_s3 + $0xf0] sm:$0xff] }
 0xbae   : > { %5382 = vperm.xlu1 %11493, %v9688_v35   ;;  %v9695_v35 = vld [vmem:[%s15913_s16 + $0xe8] sm:$0xff] }
 0xbaf   : > { %5042 = vperm.xlu0 %11492, %v9659_v18   ;;  %v9696_v18 = vld [vmem:[%s15913_s16 + $0xf0] sm:$0xff] }
 0xbb2   : > { %5279 = vperm.xlu1 %11493, %v9674_v49   ;;  %v9681_v49 = vld [vmem:[%s15747_s3 + $0xf8] sm:$0xff]  ;;  %s16166_s3 = sld [smem:[#allocation17_spill]] }
 0xbb3   : > { %5387 = vperm.xlu0 %11492, %v9689_v4   ;;  %v9697_v4 = vld [vmem:[%s15913_s16 + $0xf8] sm:$0xff] }
 0xbb6   : > { %5047 = vperm.xlu1 %11493, %v9660_v53  }
 0xbb7   : > { %5284 = vperm.xlu0 %11492, %v9675_v21  }
 0xbba   : > { %5392 = vperm.xlu1 %11493, %v9690_v13  }
 0xbbb   : > { %5052 = vperm.xlu0 %11492, %v9661_v40  }
 0xbbe   : > { %5289 = vperm.xlu1 %11493, %v9676_v11  }
 0xbbf   : > { %5397 = vperm.xlu0 %11492, %v9691_v6  }
 0xbc2   : > { %5057 = vperm.xlu1 %11493, %v9662_v62  }
 0xbc3   : > { %5294 = vperm.xlu0 %11492, %v9677_v7  }
 0xbc6   : > { %5402 = vperm.xlu1 %11493, %v9692_v48  }
 0xbc7   : > { %5062 = vperm.xlu0 %11492, %v9663_v36   ;;  %v16162_v36 = vmov 0.0|0.0  }
 0xbca   : > { %5299 = vperm.xlu1 %11493, %v9678_v42  }
 0xbcb   : > { %5407 = vperm.xlu0 %11492, %v9693_v23  }
 0xbce   : > { %5067 = vperm.xlu1 %11493, %v9664_v54  }
 0xbcf   : > { %5304 = vperm.xlu0 %11492, %v9679_v3  }
 0xbd2   : > { %5412 = vperm.xlu1 %11493, %v9694_v63  }
 0xbd3   : > { %5072 = vperm.xlu0 %11492, %v9665_v38  }
 0xbd6   : > { %5309 = vperm.xlu1 %11493, %v9680_v52  }
 0xbd7   : > { %5417 = vperm.xlu0 %11492, %v9695_v35  }
 0xbda   : > { %5422 = vperm.xlu1 %11493, %v9696_v18  }
 0xbdb   : > { %5314 = vperm.xlu0 %11492, %v9681_v49  }
 0xbdd   : > { %v7707_v53 = vpop.xlane.xlu0 %7706 }
 0xbde   : > { %v7737_v21 = vmul.f32 0.0078125, %v7707_v53  ;;  %v7705_v13 = vpop.xlane.xlu1 %7704 }
 0xbdf   : > { %v7736_v40 = vmul.f32 0.0078125, %v7705_v13  ;;  %5427 = vperm.xlu0 %11492, %v9697_v4  }
 0xbe1   : > { %v11246_v11 = vpack.c.bf16 %v7737_v21, %v7736_v40 }
 0xbe2   : > { %v7709_v6 = vpop.xlane.xlu0 %7708  ;;  %v7711_v62 = vpop.xlane.xlu1 %7710 }
 0xbe3   : > { %v7738_v7 = vmul.f32 0.0078125, %v7709_v6  ;;  %v7739_v48 = vmul.f32 0.0078125, %v7711_v62  ;;  %11247 = vmatpush3.bf16.msra.mxu0 %v11246_v11 }
 0xbe4   : > { %11248 = vmatprep.subr.bf16.mxu0 %v16162_v36 }
 0xbe5   : > { %v11249_v42 = vpack.c.bf16 %v7739_v48, %v7738_v7 }
 0xbe6   : > { %v7713_v23 = vpop.xlane.xlu0 %7712  ;;  %v7715_v54 = vpop.xlane.xlu1 %7714 }
 0xbe7   : > { %v7740_v3 = vmul.f32 0.0078125, %v7713_v23  ;;  %v7741_v63 = vmul.f32 0.0078125, %v7715_v54  ;;  %11250 = vmatpush3.bf16.msra.mxu0 %v11249_v42 }
 0xbe8   : > { %11251 = vmatprep.subr.bf16.mxu0 %v16162_v36 }
 0xbe9   : > { %v11252_v38 = vpack.c.bf16 %v7741_v63, %v7740_v3 }
 0xbea   : > { %v7717_v52 = vpop.xlane.xlu0 %7716  ;;  %v7719_v35 = vpop.xlane.xlu1 %7718 }
 0xbeb   : > { %v7742_v18 = vmul.f32 0.0078125, %v7717_v52  ;;  %v7743_v49 = vmul.f32 0.0078125, %v7719_v35  ;;  %11253 = vmatpush3.bf16.msra.mxu0 %v11252_v38 }
 0xbec   : > { %11254 = vmatprep.subr.bf16.mxu0 %v16162_v36 }
 0xbed   : > { %v11255_v4 = vpack.c.bf16 %v7743_v49, %v7742_v18 }
 0xbee   : > { %v7721_v53 = vpop.xlane.xlu0 %7720  ;;  %v7723_v21 = vpop.xlane.xlu1 %7722 }
 0xbef   : > { %v7744_v13 = vmul.f32 0.0078125, %v7721_v53  ;;  %v7745_v40 = vmul.f32 0.0078125, %v7723_v21  ;;  %11256 = vmatpush3.bf16.msra.mxu0 %v11255_v4  ;;  %v9954_v21 = vld [vmem:[%s15915_s22 + $0x8] sm:$0xff] }
 0xbf0   : > { %11257 = vmatprep.subr.bf16.mxu0 %v16162_v36 }
 0xbf1   : > { %v11258_v11 = vpack.c.bf16 %v7745_v40, %v7744_v13 }
 0xbf2   : > { %v7725_v6 = vpop.xlane.xlu0 %7724  ;;  %v7727_v62 = vpop.xlane.xlu1 %7726 }
 0xbf3   : > { %v7746_v7 = vmul.f32 0.0078125, %v7725_v6  ;;  %v7747_v48 = vmul.f32 0.0078125, %v7727_v62  ;;  %11259 = vmatpush3.bf16.msra.mxu0 %v11258_v11 }
 0xbf4   : > { %11260 = vmatprep.subr.bf16.mxu0 %v16162_v36 }
 0xbf5   : > { %v11261_v42 = vpack.c.bf16 %v7747_v48, %v7746_v7 }
 0xbf6   : > { %v7729_v23 = vpop.xlane.xlu0 %7728  ;;  %v7731_v54 = vpop.xlane.xlu1 %7730 }
 0xbf7   : > { %v7748_v3 = vmul.f32 0.0078125, %v7729_v23  ;;  %v7749_v63 = vmul.f32 0.0078125, %v7731_v54  ;;  %11262 = vmatpush3.bf16.msra.mxu0 %v11261_v42 }
 0xbf8   : > { %11263 = vmatprep.subr.bf16.mxu0 %v16162_v36 }
 0xbf9   : > { %v11264_v38 = vpack.c.bf16 %v7749_v63, %v7748_v3 }
 0xbfa   : > { %v7733_v52 = vpop.xlane.xlu0 %7732  ;;  %v7735_v35 = vpop.xlane.xlu1 %7734 }
 0xbfb   : > { %v7750_v18 = vmul.f32 0.0078125, %v7733_v52  ;;  %v7751_v49 = vmul.f32 0.0078125, %v7735_v35  ;;  %11265 = vmatpush3.bf16.msra.mxu0 %v11264_v38 }
 0xbfc   : > { %11266 = vmatprep.subr.bf16.mxu0 %v16162_v36 }
 0xbfd   : > { %v11267_v4 = vpack.c.bf16 %v7751_v49, %v7750_v18 }
 0xbfe   : > { %v15210_v53 = vpop.permute.xlu1 %5002 }
 0xbff   : > { %11268 = vmatpush3.bf16.msra.mxu0 %v11267_v4 }
 0xc02   : > { %v4998_v13 = vpop.permute.xlu0 %4997  ;;  %10813 = vmatmul.mubr.f32.vlgmr.msra.gmra.mrb[66].mxu0 %v9954_v21  ;;  %v5240_v40 = vpop.permute.xlu1 %5239 }
 0xc03   : > { %v5142_v11 = vadd.f32 %v14997_v43, %v4998_v13 }
 0xc05   : > { %v5317_v7 = vmul.f32 %v5240_v40, %v5142_v11 }
 0xc06   : > { %v15214_v6 = vpop.permute.xlu0 %5244  ;;  %v5008_v62 = vpop.permute.xlu1 %5007 }
 0xc07   : > { %v5152_v36 = vadd.f32 %v15001_v44, %v5008_v62 }
 0xc0a   : > { %v5013_v48 = vpop.permute.xlu0 %5012  ;;  %v5353_v42 = vpop.permute.xlu1 %5352 }
 0xc0b   : > { %v15216_v23 = vadd.f32 %v5353_v42, %v5317_v7  ;;  %v5157_v49 = vadd.f32 %v14999_v15, %v5013_v48 }
 0xc0e   : > { %v15219_v54 = vpop.permute.xlu0 %5357  ;;  %v5250_v3 = vpop.permute.xlu1 %5249 }
 0xc0f   : > { %v5319_v63 = vmul.f32 %v5250_v3, %v5152_v36 }
 0xc12   : > { %v5255_v38 = vpop.permute.xlu0 %5254  ;;  %v5018_v52 = vpop.permute.xlu1 %5017 }
 0xc13   : > { %v5162_v35 = vadd.f32 %v15005_v34, %v5018_v52  ;;  %v5320_v13 = vmul.f32 %v5255_v38, %v5157_v49 }
 0xc16   : > { %v5023_v18 = vpop.permute.xlu0 %5022  ;;  %v5363_v43 = vpop.permute.xlu1 %5362 }
 0xc17   : > { %v5167_v4 = vadd.f32 %v15003_v31, %v5023_v18  ;;  %v15224_v21 = vadd.f32 %v5363_v43, %v5319_v63 }
 0xc1a   : > { %v5368_v40 = vpop.permute.xlu0 %5367  ;;  %v5260_v11 = vpop.permute.xlu1 %5259 }
 0xc1b   : > { %v15226_v44 = vadd.f32 %v5368_v40, %v5320_v13  ;;  %v5321_v62 = vmul.f32 %v5260_v11, %v5162_v35  ;;  %v9955_v13 = vld [vmem:[%s15917_s23 + $0x8] sm:$0xff] }
 0xc1e   : > { %v5265_v7 = vpop.permute.xlu0 %5264  ;;  %v5028_v42 = vpop.permute.xlu1 %5027 }
 0xc1f   : > { %v5322_v36 = vmul.f32 %v5265_v7, %v5167_v4  ;;  %v15229_v34 = vadd.f32 %v15009_v29, %v5028_v42  ;;  %v9956_v4 = vld [vmem:[%s15916_s2 + $0x80] sm:$0xff]  ;;  %v9958_v42 = vld [vmem:[%s15916_s2 + $0x90] sm:$0xff] }
 0xc20   : > { %10817 = vmatprep.mubr.msk.f32.mxu0 %vm4543_vm7, %v9956_v4  ;;  %v9968_v4 = vld [vmem:[%s15916_s2 + $0xe0] sm:$0xff] }
 0xc22   : > { %v5033_v3 = vpop.permute.xlu0 %5032  ;;  %v5373_v15 = vpop.permute.xlu1 %5372 }
 0xc23   : > { %v5177_v31 = vadd.f32 %v15007_v37, %v5033_v3  ;;  %v15232_v48 = vadd.f32 %v5373_v15, %v5321_v62  ;;  %v9961_v3 = vld [vmem:[%s15916_s2 + $0xa8] sm:$0xff]  ;;  %v9962_v15 = vld [vmem:[%s15916_s2 + $0xb0] sm:$0xff] }
 0xc26   : > { %v5378_v63 = vpop.permute.xlu0 %5377  ;;  %v15234_v38 = vpop.permute.xlu1 %5269 }
 0xc27   : > { %v15236_v52 = vadd.f32 %v5378_v63, %v5322_v36  ;;  %v9960_v36 = vld [vmem:[%s15916_s2 + $0xa0] sm:$0xff] }
 0xc28   : > { %v9964_v63 = vld [vmem:[%s15916_s2 + $0xc0] sm:$0xff] }
 0xc2a   : > { %v5275_v35 = vpop.permute.xlu0 %5274  ;;  %v5038_v18 = vpop.permute.xlu1 %5037 }
 0xc2b   : > { %v15238_v43 = vmul.f32 %v5275_v35, %v5177_v31  ;;  %v15241_v29 = vadd.f32 %v15013_v9, %v5038_v18  ;;  %v9957_v9 = vld [vmem:[%s15916_s2 + $0x88] sm:$0xff]  ;;  %v9963_v31 = vld [vmem:[%s15916_s2 + $0xb8] sm:$0xff]  ;;  %v9966_v18 = vld [vmem:[%s15916_s2 + $0xd0] sm:$0xff] }
 0xc2c   : > { %v9965_v35 = vld [vmem:[%s15916_s2 + $0xc8] sm:$0xff] }
 0xc2e   : > { %v5043_v49 = vpop.permute.xlu0 %5042 }
 0xc2f   : > { %v15244_v37 = vadd.f32 %v15011_v51, %v5043_v49  ;;  %v9959_v51 = vld [vmem:[%s15916_s2 + $0x98] sm:$0xff] }
 0xc30   : > { %v9967_v49 = vld [vmem:[%s15916_s2 + $0xd8] sm:$0xff] }
 0xcd5   : > { %v7822_v40 = vpop.f32.mrb[66].mxu0 }
 0xcd6   : > { %v7823_v11 = vadd.f32 %v9955_v13, %v7822_v40  ;;  %v10814_v62 = vpop.f32.mrb[67].mxu0  ;;  %v9969_v13 = vld [vmem:[%s15916_s2 + $0xe8] sm:$0xff]  ;;  %v9970_v40 = vld [vmem:[%s15916_s2 + $0xf0] sm:$0xff] }
 0xcd7   : > { %v9973_v62 = vld [vmem:[%s15924_s5 + $0x88] sm:$0xff] }
 0xcd8   : > { %v7826_v7 = vmax.f32 %v7823_v11, 0.0  ;;  %v9971_v11 = vld [vmem:[%s15916_s2 + $0xf8] sm:$0xff]  ;;  %s16165_s2 = sld [smem:[#allocation20_spill]] }
 0xcda   : > { %10815 = vmatprep.subr.mxu0 %v7826_v7 }
 0xcdb   : > { %10816 = vmatpush3.msra.mxu0 %v7826_v7  ;;  %v9972_v7 = vld [vmem:[%s15924_s5 + $0x80] sm:$0xff] }
 0xcdc   : > { %10818 = vmatmul.mubr.msk.f32.vlgmr.msra.gmra.mrb[68].mxu0 %vm4543_vm7, %v9957_v9 }
 0xcdd   : > { %10820 = vmatprep.mubr.msk.f32.mxu0 %vm4543_vm7, %v9958_v42 }
 0xce0   : > { %10821 = vmatmul.mubr.msk.f32.gmra.mrb[70].mxu0 %vm4543_vm7, %v9959_v51 }
 0xce1   : > { %10823 = vmatprep.mubr.msk.f32.mxu0 %vm4543_vm7, %v9960_v36 }
 0xce4   : > { %10824 = vmatmul.mubr.msk.f32.gmra.mrb[72].mxu0 %vm4543_vm7, %v9961_v3  ;;  %v9975_v3 = vld [vmem:[%s15924_s5 + $0x98] sm:$0xff] }
 0xce5   : > { %10826 = vmatprep.mubr.msk.f32.mxu0 %vm4543_vm7, %v9962_v15 }
 0xce8   : > { %10827 = vmatmul.mubr.msk.f32.gmra.mrb[74].mxu0 %vm4543_vm7, %v9963_v31  ;;  %v9974_v31 = vld [vmem:[%s15924_s5 + $0x90] sm:$0xff] }
 0xce9   : > { %10829 = vmatprep.mubr.msk.f32.mxu0 %vm4543_vm7, %v9964_v63 }
 0xcec   : > { %10830 = vmatmul.mubr.msk.f32.gmra.mrb[76].mxu0 %vm4543_vm7, %v9965_v35 }
 0xced   : > { %10832 = vmatprep.mubr.msk.f32.mxu0 %vm4543_vm7, %v9966_v18 }
 0xcf0   : > { %10833 = vmatmul.mubr.msk.f32.gmra.mrb[78].mxu0 %vm4543_vm7, %v9967_v49 }
 0xcf1   : > { %10835 = vmatprep.mubr.msk.f32.mxu0 %vm4543_vm7, %v9968_v4 }
 0xcf4   : > { %10836 = vmatmul.mubr.msk.f32.gmra.mrb[80].mxu0 %vm4543_vm7, %v9969_v13  ;;  %v9977_v13 = vld [vmem:[%s15924_s5 + $0xa8] sm:$0xff] }
 0xcf5   : > { %10838 = vmatprep.mubr.msk.f32.mxu0 %vm4543_vm7, %v9970_v40 }
 0xcf8   : > { %10839 = vmatmul.mubr.msk.f32.gmra.mrb[82].mxu0 %vm4543_vm7, %v9971_v11  ;;  %v9976_v11 = vld [vmem:[%s15924_s5 + $0xa0] sm:$0xff] }
 0xdaf   : > { %v10819_v9 = vpop.f32.mrb[68].mxu0 }
 0xdb0   : > { %v7981_v42 = vadd.f32 %v10819_v9, %v9973_v62  ;;  %v7975_v51 = vpop.f32.mrb[69].mxu0 }
 0xdb1   : > { %v7976_v36 = vadd.f32 %v9972_v7, %v7975_v51 }
 0xdb2   : > { %v10005_v15 = vmul.f32 -1.442695, %v7981_v42  ;;  %v9979_v42 = vld [vmem:[%s15924_s5 + $0xb8] sm:$0xff] }
 0xdb3   : > { %v10004_v63 = vmul.f32 -1.442695, %v7976_v36  ;;  %v10822_v35 = vpop.f32.mrb[70].mxu0  ;;  %v9978_v36 = vld [vmem:[%s15924_s5 + $0xb0] sm:$0xff] }
 0xdb4   : > { %11558 = vpow2.f32 %v10005_v15  ;;  %v7991_v18 = vadd.f32 %v10822_v35, %v9975_v3  ;;  %v7985_v49 = vpop.f32.mrb[71].mxu0 }
 0xdb5   : > { %11560 = vpow2.f32 %v10004_v63  ;;  %v7986_v4 = vadd.f32 %v9974_v31, %v7985_v49 }
 0xdb6   : > { %v10007_v40 = vmul.f32 -1.442695, %v7991_v18  ;;  %v9981_v18 = vld [vmem:[%s15924_s5 + $0xc8] sm:$0xff] }
 0xdb7   : > { %v10006_v20 = vmul.f32 -1.442695, %v7986_v4  ;;  %v10825_v33 = vpop.f32.mrb[72].mxu0 }
 0xdb8   : > { %11562 = vpow2.f32 %v10007_v40  ;;  %v8001_v62 = vadd.f32 %v10825_v33, %v9977_v13  ;;  %v7995_v7 = vpop.f32.mrb[73].mxu0  ;;  %v9980_v33 = vld [vmem:[%s15924_s5 + $0xc0] sm:$0xff] }
 0xdb9   : > { %11564 = vpow2.f32 %v10006_v20  ;;  %v7996_v9 = vadd.f32 %v9976_v11, %v7995_v7 }
 0xdba   : > { %v10009_v51 = vmul.f32 -1.442695, %v8001_v62 }
 0xdbb   : > { %v10008_v3 = vmul.f32 -1.442695, %v7996_v9  ;;  %v10828_v15 = vpop.f32.mrb[74].mxu0 }
 0xdbc   : > { %11566 = vpow2.f32 %v10009_v51  ;;  %v8011_v63 = vadd.f32 %v10828_v15, %v9979_v42  ;;  %v8005_v31 = vpop.f32.mrb[75].mxu0  ;;  %v9983_v42 = vld [vmem:[%s15924_s5 + $0xd8] sm:$0xff]  ;;  %v9982_v15 = vld [vmem:[%s15924_s5 + $0xd0] sm:$0xff] }
 0xdbd   : > { %11568 = vpow2.f32 %v10008_v3  ;;  %v8006_v35 = vadd.f32 %v9978_v36, %v8005_v31 }
 0xdbe   : > { %v11559_v49 = vpop.eup %11558  ;;  %v10011_v4 = vmul.f32 -1.442695, %v8011_v63 }
 0xdbf   : > { %v11561_v13 = vpop.eup %11560  ;;  %v8103_v40 = vadd.f32 1.0, %v11559_v49  ;;  %v10010_v20 = vmul.f32 -1.442695, %v8006_v35  ;;  %v10831_v11 = vpop.f32.mrb[76].mxu0 }
 0xdc0   : > { %v8102_v7 = vadd.f32 1.0, %v11561_v13  ;;  %11570 = vpow2.f32 %v10011_v4  ;;  %v8021_v62 = vadd.f32 %v10831_v11, %v9981_v18  ;;  %v8015_v9 = vpop.f32.mrb[77].mxu0 }
 0xdc1   : > { %11572 = vrcp.f32 %v8103_v40  ;;  %v8016_v51 = vadd.f32 %v9980_v33, %v8015_v9  ;;  %v9985_v40 = vld [vmem:[%s15924_s5 + $0xe8] sm:$0xff] }
 0xdc2   : > { %v11563_v3 = vpop.eup %11562  ;;  %11574 = vrcp.f32 %v8102_v7  ;;  %v10013_v36 = vmul.f32 -1.442695, %v8021_v62  ;;  %v9984_v7 = vld [vmem:[%s15924_s5 + $0xe0] sm:$0xff] }
 0xdc3   : > { %v11565_v63 = vpop.eup %11564  ;;  %v8105_v31 = vadd.f32 1.0, %v11563_v3  ;;  %11576 = vpow2.f32 %v10010_v20  ;;  %v10012_v2 = vmul.f32 -1.442695, %v8016_v51  ;;  %v10834_v49 = vpop.f32.mrb[78].mxu0 }
 0xdc4   : > { %v8104_v35 = vadd.f32 1.0, %v11565_v63  ;;  %11578 = vpow2.f32 %v10013_v36  ;;  %v8031_v13 = vadd.f32 %v10834_v49, %v9983_v42  ;;  %v8025_v4 = vpop.f32.mrb[79].mxu0 }
 0xdc5   : > { %11580 = vrcp.f32 %v8105_v31  ;;  %v8026_v18 = vadd.f32 %v9982_v15, %v8025_v4  ;;  %v9987_v31 = vld [vmem:[%s15924_s5 + $0xf8] sm:$0xff]  ;;  %v9986_v4 = vld [vmem:[%s15924_s5 + $0xf0] sm:$0xff]  ;;  %s16167_s5 = sld [smem:[#allocation23_spill]] }
 0xdc6   : > { %v11567_v33 = vpop.eup %11566  ;;  %11582 = vrcp.f32 %v8104_v35  ;;  %v10015_v11 = vmul.f32 -1.442695, %v8031_v13 }
 0xdc7   : > { %v11569_v62 = vpop.eup %11568  ;;  %v8107_v9 = vadd.f32 1.0, %v11567_v33  ;;  %11584 = vpow2.f32 %v10012_v2  ;;  %v10014_v3 = vmul.f32 -1.442695, %v8026_v18  ;;  %v10837_v20 = vpop.f32.mrb[80].mxu0 }
 0xdc8   : > { %v8106_v51 = vadd.f32 1.0, %v11569_v62  ;;  %11586 = vpow2.f32 %v10015_v11  ;;  %v8041_v63 = vadd.f32 %v10837_v20, %v9985_v40  ;;  %v8035_v36 = vpop.f32.mrb[81].mxu0 }
 0xdc9   : > { %11588 = vrcp.f32 %v8107_v9  ;;  %v8036_v42 = vadd.f32 %v9984_v7, %v8035_v36 }
 0xdca   : > { %v11571_v15 = vpop.eup %11570  ;;  %11590 = vrcp.f32 %v8106_v51  ;;  %v10017_v49 = vmul.f32 -1.442695, %v8041_v63 }
 0xdcb   : > { %v11573_v35 = vpop.eup %11572  ;;  %v8109_v13 = vadd.f32 1.0, %v11571_v15  ;;  %11592 = vpow2.f32 %v10014_v3  ;;  %v10016_v26 = vmul.f32 -1.442695, %v8036_v42  ;;  %v10840_v16 = vpop.f32.mrb[82].mxu0 }
 0xdcc   : > { %v11575_v33 = vpop.eup %11574  ;;  %11594 = vpow2.f32 %v10017_v49  ;;  %v8051_v2 = vadd.f32 %v10840_v16, %v9987_v31  ;;  %8157 = vperm.xlu0 %11492, %v11573_v35   ;;  %v8045_v18 = vpop.f32.mrb[83].mxu0 }
 0xdcd   : > { %v11577_v11 = vpop.eup %11576  ;;  %11596 = vrcp.f32 %v8109_v13  ;;  %v8046_v40 = vadd.f32 %v9986_v4, %v8045_v18  ;;  %8152 = vperm.xlu1 %11493, %v11575_v33  }
 0xdce   : > { %v11579_v7 = vpop.eup %11578  ;;  %v8108_v62 = vadd.f32 1.0, %v11577_v11  ;;  %11598 = vpow2.f32 %v10016_v26  ;;  %v10019_v9 = vmul.f32 -1.442695, %v8051_v2 }
 0xdcf   : > { %v11581_v20 = vpop.eup %11580  ;;  %v8111_v51 = vadd.f32 1.0, %v11579_v7  ;;  %v10018_v63 = vmul.f32 -1.442695, %v8046_v40 }
 0xdd0   : > { %v11583_v36 = vpop.eup %11582  ;;  %11600 = vrcp.f32 %v8108_v62  ;;  %8167 = vperm.xlu0 %11492, %v11581_v20  }
 0xdd1   : > { %v11585_v3 = vpop.eup %11584  ;;  %11602 = vrcp.f32 %v8111_v51  ;;  %8162 = vperm.xlu1 %11493, %v11583_v36  }
 0xdd2   : > { %v11587_v16 = vpop.eup %11586  ;;  %v8110_v42 = vadd.f32 1.0, %v11585_v3  ;;  %11604 = vpow2.f32 %v10019_v9 }
 0xdd3   : > { %v11589_v31 = vpop.eup %11588  ;;  %v8113_v15 = vadd.f32 1.0, %v11587_v16  ;;  %11606 = vpow2.f32 %v10018_v63 }
 0xdd4   : > { %v11591_v49 = vpop.eup %11590  ;;  %11608 = vrcp.f32 %v8110_v42  ;;  %8177 = vperm.xlu0 %11492, %v11589_v31  }
 0xdd5   : > { %v11593_v26 = vpop.eup %11592  ;;  %11610 = vrcp.f32 %v8113_v15  ;;  %8172 = vperm.xlu1 %11493, %v11591_v49   ;;  %v8287_v15 = vld [vmem:[%s16163_s9 + $0x8] sm:$0xff]  ;;  %v8286_v49 = vld [vmem:[%s16163_s9] sm:$0xff] }
 0xdd6   : > { %v11595_v4 = vpop.eup %11594  ;;  %v8112_v35 = vadd.f32 1.0, %v11593_v26  ;;  %v8440_v26 = vld [vmem:[%s16164_s13 + $0x8] sm:$0xff] }
 0xdd7   : > { %v11597_v13 = vpop.eup %11596  ;;  %v8115_v33 = vadd.f32 1.0, %v11595_v4  ;;  %v8439_v4 = vld [vmem:[%s16164_s13] sm:$0xff] }
 0xdd8   : > { %v11599_v2 = vpop.eup %11598  ;;  %11612 = vrcp.f32 %v8112_v35  ;;  %8187 = vperm.xlu0 %11492, %v11597_v13   ;;  %v8495_v35 = vld [vmem:[%s16165_s2] sm:$0xff]  ;;  %v8288_v13 = vld [vmem:[%s16163_s9 + $0x10] sm:$0xff] }
 0xdd9   : > { %11614 = vrcp.f32 %v8115_v33  ;;  %v8114_v18 = vadd.f32 1.0, %v11599_v2  ;;  %v8278_v33 = vld [vmem:[%s16166_s3] sm:$0xff]  ;;  %v8496_v2 = vld [vmem:[%s16165_s2 + $0x8] sm:$0xff] }
 0xdda   : > { %v11601_v11 = vpop.eup %11600  ;;  %10873 = vmatprep.mubr.f32.mxu1 %v8278_v33  ;;  %v8445_v33 = vld [vmem:[%s16164_s13 + $0x30] sm:$0xff] }
 0xddb   : > { %v11603_v40 = vpop.eup %11602  ;;  %11616 = vrcp.f32 %v8114_v18  ;;  %8182 = vperm.xlu1 %11493, %v11601_v11   ;;  %v8289_v18 = vld [vmem:[%s16163_s9 + $0x18] sm:$0xff] }
 0xddc   : > { %v11605_v7 = vpop.eup %11604  ;;  %8197 = vperm.xlu0 %11492, %v11603_v40   ;;  %v8442_v11 = vld [vmem:[%s16164_s13 + $0x18] sm:$0xff]  ;;  %v8441_v40 = vld [vmem:[%s16164_s13 + $0x10] sm:$0xff] }
 0xddd   : > { %v11607_v62 = vpop.eup %11606  ;;  %v8117_v9 = vadd.f32 1.0, %v11605_v7  ;;  %v8497_v7 = vld [vmem:[%s16165_s2 + $0x10] sm:$0xff] }
 0xdde   : > { %v11609_v20 = vpop.eup %11608  ;;  %v8116_v51 = vadd.f32 1.0, %v11607_v62  ;;  %v8290_v62 = vld [vmem:[%s16163_s9 + $0x20] sm:$0xff] }
 0xddf   : > { %v11611_v63 = vpop.eup %11610  ;;  %11618 = vrcp.f32 %v8117_v9  ;;  %8192 = vperm.xlu1 %11493, %v11609_v20   ;;  %v8498_v9 = vld [vmem:[%s16165_s2 + $0x18] sm:$0xff]  ;;  %v8291_v20 = vld [vmem:[%s16163_s9 + $0x28] sm:$0xff] }
 0xde0   : > { %11620 = vrcp.f32 %v8116_v51  ;;  %8207 = vperm.xlu0 %11492, %v11611_v63   ;;  %v15310_v51 = vpop.permute.xlu0 %5387  ;;  %v15312_v63 = vpop.permute.xlu1 %5382 }
 0xde2   : > { %v11613_v36 = vpop.eup %11612 }
 0xde3   : > { %v11615_v3 = vpop.eup %11614  ;;  %8202 = vperm.xlu1 %11493, %v11613_v36   ;;  %v8444_v36 = vld [vmem:[%s16164_s13 + $0x28] sm:$0xff] }
 0xde4   : > { %8217 = vperm.xlu0 %11492, %v11615_v3   ;;  %v8443_v3 = vld [vmem:[%s16164_s13 + $0x20] sm:$0xff] }
 0xde5   : > { %v11617_v16 = vpop.eup %11616 }
 0xde7   : > { %8212 = vperm.xlu1 %11493, %v11617_v16   ;;  %v15316_v16 = vpop.permute.xlu0 %5284 }
 0xde9   : > { %v11619_v42 = vpop.eup %11618 }
 0xdea   : > { %v11621_v31 = vpop.eup %11620  ;;  %8227 = vperm.xlu0 %11492, %v11619_v42   ;;  %v8499_v42 = vld [vmem:[%s16165_s2 + $0x20] sm:$0xff] }
 0xdeb   : > { %8222 = vperm.xlu1 %11493, %v11621_v31   ;;  %v15319_v31 = vpop.permute.xlu1 %5279 }
 0xdee   : > { %8301 = vperm.xlu0 %11492, %v8287_v15   ;;  %v8292_v15 = vld [vmem:[%s16163_s9 + $0x30] sm:$0xff] }
 0xdef   : > { %8296 = vperm.xlu1 %11493, %v8286_v49   ;;  %v8500_v49 = vld [vmem:[%s16165_s2 + $0x28] sm:$0xff] }
 0xdf2   : > { %8454 = vperm.xlu0 %11492, %v8440_v26   ;;  %v8293_v26 = vld [vmem:[%s16163_s9 + $0x38] sm:$0xff] }
 0xdf3   : > { %8449 = vperm.xlu1 %11493, %v8439_v4   ;;  %v15324_v4 = vpop.permute.xlu0 %5052 }
 0xdf6   : > { %8505 = vperm.xlu0 %11492, %v8495_v35   ;;  %v15326_v35 = vpop.permute.xlu1 %5047 }
 0xdf7   : > { %8306 = vperm.xlu1 %11493, %v8288_v13   ;;  %v8446_v13 = vld [vmem:[%s16164_s13 + $0x38] sm:$0xff]  ;;  %s11766_s13 = smov [#allocation2]  }
 0xdfa   : > { %8510 = vperm.xlu0 %11492, %v8496_v2   ;;  %v15330_v2 = vpop.permute.xlu0 %5397 }
 0xdfb   : > { %8311 = vperm.xlu1 %11493, %v8289_v18   ;;  %v8502_v18 = vld [vmem:[%s16165_s2 + $0x38] sm:$0xff] }
 0xdfe   : > { %8464 = vperm.xlu0 %11492, %v8442_v11   ;;  %v15333_v11 = vpop.permute.xlu1 %5392 }
 0xdff   : > { %8459 = vperm.xlu1 %11493, %v8441_v40   ;;  %v8501_v40 = vld [vmem:[%s16165_s2 + $0x30] sm:$0xff]  ;;  %s16169_s2 = sld [smem:[#allocation21_spill]] }
 0xe02   : > { %8515 = vperm.xlu0 %11492, %v8497_v7   ;;  %v8688_v7 = vld [vmem:[%s16167_s5 + $0x8] sm:$0xff] }
 0xe03   : > { %8316 = vperm.xlu1 %11493, %v8290_v62   ;;  %v8687_v62 = vld [vmem:[%s16167_s5] sm:$0xff] }
 0xe05   : > { %v8559_v28 = vld [vmem:[%s16169_s2] sm:$0xff]  ;;  %v8560_v32 = vld [vmem:[%s16169_s2 + $0x8] sm:$0xff]  ;;  %v8562_v60 = vld [vmem:[%s16169_s2 + $0x18] sm:$0xff] }
 0xe06   : > { %8520 = vperm.xlu0 %11492, %v8498_v9   ;;  %v15338_v9 = vpop.permute.xlu0 %5294  ;;  %v11301_v19 = vpack.c.bf16 %v8560_v32, %v8559_v28  ;;  %v8565_v55 = vld [vmem:[%s16169_s2 + $0x30] sm:$0xff]  ;;  %v8566_v24 = vld [vmem:[%s16169_s2 + $0x38] sm:$0xff]  ;;  %v8567_v28 = vld [vmem:[%s16169_s2 + $0x40] sm:$0xff] }
 0xe07   : > { %8321 = vperm.xlu1 %11493, %v8291_v20   ;;  %v15340_v20 = vpop.permute.xlu1 %5289  ;;  %v11313_v32 = vpack.c.bf16 %v8566_v24, %v8565_v55  ;;  %v8568_v0 = vld [vmem:[%s16169_s2 + $0x48] sm:$0xff]  ;;  %v8570_v30 = vld [vmem:[%s16169_s2 + $0x58] sm:$0xff] }
 0xe08   : > { %11302 = vmatprep.subr.bf16.mxu0 %v11301_v19 }
 0xe09   : > { %11304 = vmatpush3.bf16.msra.mxu0 %v11301_v19  ;;  %v11317_v19 = vpack.c.bf16 %v8568_v0, %v8567_v28  ;;  %v16175_v0 = vmax.f32 %v15057_v5, 0.0 }
 0xe0a   : > { %8474 = vperm.xlu0 %11492, %v8444_v36   ;;  %v8689_v36 = vld [vmem:[%s16167_s5 + $0x10] sm:$0xff] }
 0xe0b   : > { %8469 = vperm.xlu1 %11493, %v8443_v3   ;;  %v8743_v3 = vld [vmem:[%s16168_s6] sm:$0xff] }
 0xe0e   : > { %8525 = vperm.xlu0 %11492, %v8499_v42   ;;  %v15344_v42 = vpop.permute.xlu0 %5062 }
 0xe0f   : > { %8326 = vperm.xlu1 %11493, %v8292_v15   ;;  %v8690_v15 = vld [vmem:[%s16167_s5 + $0x18] sm:$0xff] }
 0xe12   : > { %8530 = vperm.xlu0 %11492, %v8500_v49   ;;  %v15347_v49 = vpop.permute.xlu1 %5057 }
 0xe13   : > { %8331 = vperm.xlu1 %11493, %v8293_v26   ;;  %v8744_v26 = vld [vmem:[%s16168_s6 + $0x8] sm:$0xff] }
 0xe16   : > { %8484 = vperm.xlu0 %11492, %v8446_v13   ;;  %v8691_v13 = vld [vmem:[%s16167_s5 + $0x20] sm:$0xff] }
 0xe17   : > { %8479 = vperm.xlu1 %11493, %v8445_v33   ;;  %v8745_v33 = vld [vmem:[%s16168_s6 + $0x10] sm:$0xff] }
 0xe1a   : > { %8540 = vperm.xlu0 %11492, %v8502_v18   ;;  %v15352_v18 = vpop.permute.xlu0 %5407 }
 0xe1b   : > { %8535 = vperm.xlu1 %11493, %v8501_v40   ;;  %v15354_v40 = vpop.permute.xlu1 %5402 }
 0xe1e   : > { %8702 = vperm.xlu0 %11492, %v8688_v7   ;;  %v8692_v7 = vld [vmem:[%s16167_s5 + $0x28] sm:$0xff] }
 0xe1f   : > { %8697 = vperm.xlu1 %11493, %v8687_v62   ;;  %v8746_v62 = vld [vmem:[%s16168_s6 + $0x18] sm:$0xff] }
 0xe22   : > { %8707 = vperm.xlu0 %11492, %v8689_v36   ;;  %v15358_v36 = vpop.permute.xlu0 %5304 }
 0xe23   : > { %8753 = vperm.xlu1 %11493, %v8743_v3   ;;  %v8693_v3 = vld [vmem:[%s16167_s5 + $0x30] sm:$0xff] }
 0xe26   : > { %8712 = vperm.xlu0 %11492, %v8690_v15   ;;  %v15361_v15 = vpop.permute.xlu1 %5299  ;;  %v15366_v27 = vpop.permute.xlu0 %5072 }
 0xe27   : > { %8758 = vperm.xlu1 %11493, %v8744_v26   ;;  %v8747_v26 = vld [vmem:[%s16168_s6 + $0x20] sm:$0xff] }
 0xe2a   : > { %8717 = vperm.xlu0 %11492, %v8691_v13   ;;  %v8694_v13 = vld [vmem:[%s16167_s5 + $0x38] sm:$0xff]  ;;  %v15368_v46 = vpop.permute.xlu1 %5067 }
 0xe2b   : > { %8763 = vperm.xlu1 %11493, %v8745_v33   ;;  %v8748_v33 = vld [vmem:[%s16168_s6 + $0x28] sm:$0xff] }
 0xe2e   : > { %8722 = vperm.xlu0 %11492, %v8692_v7   ;;  %v8750_v7 = vld [vmem:[%s16168_s6 + $0x38] sm:$0xff]  ;;  %v15378_v39 = vpop.permute.xlu1 %5412 }
 0xe2f   : > { %8768 = vperm.xlu1 %11493, %v8746_v62   ;;  %v8749_v62 = vld [vmem:[%s16168_s6 + $0x30] sm:$0xff] }
 0xe32   : > { %8727 = vperm.xlu0 %11492, %v8693_v3   ;;  %v8561_v3 = vld [vmem:[%s16169_s2 + $0x10] sm:$0xff] }
 0xe33   : > { %8773 = vperm.xlu1 %11493, %v8747_v26   ;;  %v15375_v26 = vpop.permute.xlu0 %5417  ;;  %v11305_v59 = vpack.c.bf16 %v8562_v60, %v8561_v3  ;;  %v5147_v3 = vadd.f32 %v14995_v61, %v15210_v53 }
 0xe35   : > { %11306 = vmatprep.subr.bf16.mxu0 %v11305_v59 }
 0xe36   : > { %8732 = vperm.xlu0 %11492, %v8694_v13   ;;  %v8563_v13 = vld [vmem:[%s16169_s2 + $0x20] sm:$0xff]  ;;  %11308 = vmatpush3.bf16.msra.mxu0 %v11305_v59 }
 0xe37   : > { %8778 = vperm.xlu1 %11493, %v8748_v33   ;;  %v8564_v33 = vld [vmem:[%s16169_s2 + $0x28] sm:$0xff]  ;;  %v15384_v45 = vpop.permute.xlu0 %5314 }
 0xe38   : > { %16170 = vst [vmem:[#allocation75_spill] sm:$0xff] %v15384_v45  ;;  %v5318_v45 = vmul.f32 %v15214_v6, %v5147_v3 }
 0xe3a   : > { %8788 = vperm.xlu0 %11492, %v8750_v7   ;;  %v11309_v7 = vpack.c.bf16 %v8564_v33, %v8563_v13  ;;  %v8569_v33 = vld [vmem:[%s16169_s2 + $0x50] sm:$0xff]  ;;  %v5431_v55 = vadd.f32 %v15219_v54, %v5318_v45  ;;  %v16177_v45 = vmax.f32 %v15071_v12, 0.0 }
 0xe3b   : > { %8783 = vperm.xlu1 %11493, %v8749_v62   ;;  %v15386_v62 = vpop.permute.xlu1 %5309  ;;  %v15390_v60 = vpop.permute.xlu0 %5427  ;;  %v11321_v24 = vpack.c.bf16 %v8570_v30, %v8569_v33 }
 0xe3c   : > { %16171 = vst [vmem:[#allocation66_spill] sm:$0xff] %v15386_v62  ;;  %11310 = vmatprep.subr.bf16.mxu0 %v11309_v7  ;;  %16172 = vst [vmem:[#allocation70_spill] sm:$0xff] %v15390_v60 }
 0xe3d   : > { %11312 = vmatpush3.bf16.msra.mxu0 %v11309_v7  ;;  %v16174_v7 = vmax.f32 %v15055_v22, 0.0 }
 0xe3e   : > { %11314 = vmatprep.subr.bf16.mxu0 %v11313_v32 }
 0xe3f   : > { %v15394_v13 = vpop.permute.xlu1 %5422 }
 0xe40   : > { %16173 = vst [vmem:[#allocation67_spill] sm:$0xff] %v15394_v13 }
 0xe41   : > { %11316 = vmatpush3.bf16.msra.mxu0 %v11313_v32  ;;  %v16176_v32 = vmax.f32 %v15067_v8, 0.0  ;;  %v16179_v8 = vmax.f32 %v15081_v41, 0.0 }
 0xe42   : > { %11318 = vmatprep.subr.bf16.mxu0 %v11317_v19 }
 0xe45   : > { %11320 = vmatpush3.bf16.msra.mxu0 %v11317_v19 }
 0xe46   : > { %11322 = vmatprep.subr.bf16.mxu0 %v11321_v24 }
 0xe49   : > { %11324 = vmatpush3.bf16.msra.mxu0 %v11321_v24 }
 0xe4b   : > { %v8158_v59 = vpop.permute.xlu0 %8157 }
 0xe4c   : > { %v8231_v60 = vmul.f32 %v8158_v59, %v16174_v7  ;;  %v8153_v62 = vpop.permute.xlu1 %8152 }
 0xe4d   : > { %v8230_v28 = vmul.f32 %v8153_v62, %v16175_v0 }
 0xe4e   : > { %v8247_v61 = vadd.f32 %v8231_v60, %v5431_v55 }
 0xe4f   : > { %v8246_v53 = vadd.f32 %v8230_v28, %v15216_v23  ;;  %v8168_v13 = vpop.permute.xlu0 %8167  ;;  %v16178_v23 = vmax.f32 %v15075_v25, 0.0  ;;  %v16180_v25 = vmax.f32 %v15085_v57, 0.0  ;;  %v5197_v57 = vadd.f32 %v15015_v56, %v15324_v4 }
 0xe50   : > { %v8263_v6 = vmax.f32 %v8247_v61, 0.0  ;;  %v8233_v3 = vmul.f32 %v8168_v13, %v16176_v32  ;;  %v8163_v30 = vpop.permute.xlu1 %8162 }
 0xe51   : > { %v8262_v33 = vmax.f32 %v8246_v53, 0.0  ;;  %v8232_v22 = vmul.f32 %v8163_v30, %v16177_v45  ;;  %v5323_v53 = vmul.f32 %v15234_v38, %v15229_v34  ;;  %v16182_v38 = vmax.f32 %v15101_v58, 0.0 }
 0xe52   : > { %v8249_v54 = vadd.f32 %v8233_v3, %v15226_v44  ;;  %v16181_v3 = vmax.f32 %v15093_v10, 0.0  ;;  %v16184_v58 = vmax.f32 %v15109_v14, 0.0  ;;  %v16187_v14 = vld [vmem:[#allocation65_spill] sm:$0xff] }
 0xe53   : > { %v8248_v5 = vadd.f32 %v8232_v22, %v15224_v21  ;;  %v8178_v62 = vpop.permute.xlu0 %8177  ;;  %v11269_v60 = vpack.c.bf16 %v8263_v6, %v8262_v33  ;;  %v5437_v21 = vadd.f32 %v15310_v51, %v15238_v43 }
 0xe54   : > { %v8265_v19 = vmax.f32 %v8249_v54, 0.0  ;;  %v8235_v59 = vmul.f32 %v8178_v62, %v16178_v23  ;;  %v8173_v55 = vpop.permute.xlu1 %8172  ;;  %v16183_v54 = vld [vmem:[#allocation64_spill] sm:$0xff] }
 0xe55   : > { %v8264_v7 = vmax.f32 %v8248_v5, 0.0  ;;  %v8234_v13 = vmul.f32 %v8173_v55, %v16179_v8  ;;  %11270 = vmatprep.subr.bf16.mxu1 %v11269_v60  ;;  %v5192_v5 = vadd.f32 %v16183_v54, %v15326_v35 }
 0xe56   : > { %v8251_v12 = vadd.f32 %v8235_v59, %v15236_v52  ;;  %11272 = vmatpush3.bf16.msra.mxu1 %v11269_v60  ;;  %v5326_v52 = vmul.f32 %v15316_v16, %v15244_v37  ;;  %v5325_v37 = vmul.f32 %v15319_v31, %v15241_v29  ;;  %v16185_v29 = vld [vmem:[#allocation59_spill] sm:$0xff] }
 0xe57   : > { %v8250_v44 = vadd.f32 %v8234_v13, %v15232_v48  ;;  %v8188_v24 = vpop.permute.xlu0 %8187  ;;  %v11273_v0 = vpack.c.bf16 %v8265_v19, %v8264_v7  ;;  %v5436_v48 = vadd.f32 %v15312_v63, %v5323_v53  ;;  %v5328_v63 = vmul.f32 %v15338_v9, %v5197_v57  ;;  %v16195_v57 = vld [vmem:[#allocation70_spill] sm:$0xff] }
 0xe58   : > { %v8267_v28 = vmax.f32 %v8251_v12, 0.0  ;;  %v8237_v61 = vmul.f32 %v8188_v24, %v16180_v25  ;;  %v5439_v34 = vadd.f32 %v15330_v2, %v5326_v52  ;;  %v5438_v56 = vadd.f32 %v15333_v11, %v5325_v37  ;;  %v16198_v37 = vld [vmem:[#allocation67_spill] sm:$0xff] }
 0xe59   : > { %v8266_v41 = vmax.f32 %v8250_v44, 0.0  ;;  %11274 = vmatprep.subr.bf16.mxu1 %v11273_v0  ;;  %v5207_v31 = vadd.f32 %v16185_v29, %v15344_v42  ;;  %v5441_v60 = vadd.f32 %v15352_v18, %v5328_v63  ;;  %v16186_v9 = vmax.f32 %v15117_v1, 0.0  ;;  %v8281_v29 = vld [vmem:[%s16166_s3 + $0x18] sm:$0xff] }
 0xe5a   : > { %v8253_v6 = vadd.f32 %v8237_v61, %v5437_v21  ;;  %v8183_v32 = vpop.permute.xlu1 %8182  ;;  %11276 = vmatpush3.bf16.msra.mxu1 %v11273_v0  ;;  %v5327_v23 = vmul.f32 %v15340_v20, %v5192_v5  ;;  %v5202_v13 = vadd.f32 %v16187_v14, %v15347_v49  ;;  %v16188_v18 = vmax.f32 %v15125_v47, 0.0  ;;  %v16190_v49 = vld [vmem:[#allocation51_spill] sm:$0xff]  ;;  %v16191_v47 = vld [vmem:[#allocation68_spill] sm:$0xff] }
 0xe5b   : > { %v8236_v43 = vmul.f32 %v8183_v32, %v16181_v3  ;;  %v8198_v51 = vpop.permute.xlu0 %8197  ;;  %v11277_v30 = vpack.c.bf16 %v8267_v28, %v8266_v41  ;;  %v5330_v11 = vmul.f32 %v15358_v36, %v5207_v31  ;;  %v16189_v24 = vmax.f32 %v15131_v17, 0.0  ;;  %v16193_v32 = vld [vmem:[#allocation75_spill] sm:$0xff]  ;;  %v8282_v31 = vld [vmem:[%s16166_s3 + $0x20] sm:$0xff] }
 0xe5c   : > { %v8239_v33 = vmul.f32 %v8198_v51, %v16182_v38  ;;  %v8269_v16 = vmax.f32 %v8253_v6, 0.0  ;;  %v5440_v12 = vadd.f32 %v15354_v40, %v5327_v23  ;;  %v5329_v36 = vmul.f32 %v15361_v15, %v5202_v13  ;;  %v16196_v38 = vld [vmem:[#allocation74_spill] sm:$0xff]  ;;  %v8571_v23 = vld [vmem:[%s16169_s2 + $0x60] sm:$0xff] }
 0xe5d   : > { %v8252_v45 = vadd.f32 %v8236_v43, %v5436_v48  ;;  %11278 = vmatprep.subr.bf16.mxu1 %v11277_v30  ;;  %v5443_v20 = vadd.f32 %v15375_v26, %v5330_v11  ;;  %v5217_v40 = vadd.f32 %v16190_v49, %v15366_v27  ;;  %v5212_v41 = vadd.f32 %v16191_v47, %v15368_v46  ;;  %v16194_v48 = vld [vmem:[#allocation66_spill] sm:$0xff]  ;;  %v8574_v11 = vld [vmem:[%s16169_s2 + $0x78] sm:$0xff] }
 0xe5e   : > { %v8255_v10 = vadd.f32 %v8239_v33, %v5439_v34  ;;  %v8193_v22 = vpop.permute.xlu1 %8192  ;;  %11280 = vmatpush3.bf16.msra.mxu1 %v11277_v30  ;;  %v5442_v52 = vadd.f32 %v15378_v39, %v5329_v36  ;;  %v16192_v6 = vmax.f32 %v15137_v50, 0.0  ;;  %v16197_v46 = vmax.f32 %v16196_v38, 0.0 }
 0xe5f   : > { %v8268_v4 = vmax.f32 %v8252_v45, 0.0  ;;  %v8238_v2 = vmul.f32 %v8193_v22, %v16184_v58  ;;  %v8208_v62 = vpop.permute.xlu0 %8207  ;;  %v5332_v15 = vmul.f32 %v16193_v32, %v5217_v40  ;;  %v5331_v3 = vmul.f32 %v16194_v48, %v5212_v41  ;;  %v16199_v45 = vld [vmem:[#allocation69_spill] sm:$0xff] }
 0xe60   : > { %v8241_v19 = vmul.f32 %v8208_v62, %v16186_v9  ;;  %v8271_v59 = vmax.f32 %v8255_v10, 0.0  ;;  %v16200_v63 = vmax.f32 %v16199_v45, 0.0  ;;  %v8280_v62 = vld [vmem:[%s16166_s3 + $0x10] sm:$0xff] }
 0xe61   : > { %v8254_v55 = vadd.f32 %v8238_v2, %v5438_v56  ;;  %v11281_v35 = vpack.c.bf16 %v8269_v16, %v8268_v4  ;;  %v5445_v34 = vadd.f32 %v16195_v57, %v5332_v15  ;;  %v5444_v50 = vadd.f32 %v16198_v37, %v5331_v3  ;;  %v8279_v2 = vld [vmem:[%s16166_s3 + $0x8] sm:$0xff]  ;;  %v8284_v9 = vld [vmem:[%s16166_s3 + $0x30] sm:$0xff] }
 0xe62   : > { %v8257_v7 = vadd.f32 %v8241_v19, %v5441_v60  ;;  %v8203_v8 = vpop.permute.xlu1 %8202  ;;  %v8283_v60 = vld [vmem:[%s16166_s3 + $0x28] sm:$0xff]  ;;  %v8285_v19 = vld [vmem:[%s16166_s3 + $0x38] sm:$0xff]  ;;  %s16202_s3 = sld [smem:[#allocation22_spill]] }
 0xe63   : > { %v8270_v42 = vmax.f32 %v8254_v55, 0.0  ;;  %v8240_v44 = vmul.f32 %v8203_v8, %v16188_v18  ;;  %11282 = vmatprep.subr.bf16.mxu1 %v11281_v35  ;;  %v8218_v1 = vpop.permute.xlu0 %8217 }
 0xe64   : > { %11284 = vmatpush3.bf16.msra.mxu1 %v11281_v35  ;;  %v8243_v0 = vmul.f32 %v8218_v1, %v16189_v24  ;;  %v8273_v21 = vmax.f32 %v8257_v7, 0.0  ;;  %v8573_v35 = vld [vmem:[%s16169_s2 + $0x70] sm:$0xff] }
 0xe65   : > { %v8256_v28 = vadd.f32 %v8240_v44, %v5440_v12  ;;  %v11285_v25 = vpack.c.bf16 %v8271_v59, %v8270_v42  ;;  %v8572_v59 = vld [vmem:[%s16169_s2 + $0x68] sm:$0xff]  ;;  %v11329_v7 = vpack.c.bf16 %v8574_v11, %v8573_v35  ;;  %s16201_s2 = sld [smem:[#allocation25_spill]] }
 0xe66   : > { %v8259_v61 = vadd.f32 %v8243_v0, %v5443_v20  ;;  %v8213_v53 = vpop.permute.xlu1 %8212  ;;  %v11325_v55 = vpack.c.bf16 %v8572_v59, %v8571_v23 }
 0xe67   : > { %v8272_v26 = vmax.f32 %v8256_v28, 0.0  ;;  %v8242_v17 = vmul.f32 %v8213_v53, %v16192_v6  ;;  %11286 = vmatprep.subr.bf16.mxu1 %v11285_v25 }
 0xe68   : > { %11288 = vmatpush3.bf16.msra.mxu1 %v11285_v25  ;;  %v8275_v43 = vmax.f32 %v8259_v61, 0.0  ;;  %11326 = vmatprep.subr.bf16.mxu0 %v11325_v55 }
 0xe69   : > { %v8258_v51 = vadd.f32 %v8242_v17, %v5442_v52  ;;  %v8228_v27 = vpop.permute.xlu0 %8227  ;;  %v11289_v30 = vpack.c.bf16 %v8273_v21, %v8272_v26  ;;  %11328 = vmatpush3.bf16.msra.mxu0 %v11325_v55 }
 0xe6a   : > { %v8245_v33 = vmul.f32 %v8228_v27, %v16197_v46  ;;  %v8223_v39 = vpop.permute.xlu1 %8222  ;;  %11330 = vmatprep.subr.bf16.mxu0 %v11329_v7 }
 0xe6b   : > { %v8274_v16 = vmax.f32 %v8258_v51, 0.0  ;;  %v8244_v10 = vmul.f32 %v8223_v39, %v16200_v63  ;;  %11290 = vmatprep.subr.bf16.mxu1 %v11289_v30 }
 0xe6c   : > { %v8261_v22 = vadd.f32 %v8245_v33, %v5445_v34  ;;  %11292 = vmatpush3.bf16.msra.mxu1 %v11289_v30 }
 0xe6d   : > { %v8260_v54 = vadd.f32 %v8244_v10, %v5444_v50  ;;  %v11293_v5 = vpack.c.bf16 %v8275_v43, %v8274_v16  ;;  %11332 = vmatpush3.bf16.msra.mxu0 %v11329_v7  ;;  %v8302_v8 = vpop.permute.xlu0 %8301 }
 0xe6e   : > { %v8277_v56 = vmax.f32 %v8261_v22, 0.0  ;;  %v8297_v14 = vpop.permute.xlu1 %8296 }
 0xe6f   : > { %v8276_v4 = vmax.f32 %v8260_v54, 0.0  ;;  %11294 = vmatprep.subr.bf16.mxu1 %v11293_v5 }
 0xe70   : > { %11296 = vmatpush3.bf16.msra.mxu1 %v11293_v5 }
 0xe71   : > { %v11297_v58 = vpack.c.bf16 %v8277_v56, %v8276_v4  ;;  %v8455_v13 = vpop.permute.xlu0 %8454 }
 0xe72   : > { %v8450_v12 = vpop.permute.xlu1 %8449 }
 0xe73   : > { %11298 = vmatprep.subr.bf16.mxu1 %v11297_v58 }
 0xe74   : > { %11300 = vmatpush3.bf16.msra.mxu1 %v11297_v58 }
 0xe75   : > { %v8506_v42 = vpop.permute.xlu0 %8505 }
 0xe76   : > { %v8307_v18 = vpop.permute.xlu1 %8306 }
 0xe77   : > { %10874 = vmatmul.mubr.f32.vlgmr.msra.gmra.mrb[80].mxu1 %v8279_v2 }
 0xe78   : > { %10876 = vmatprep.mubr.f32.mxu1 %v8280_v62 }
 0xe79   : > { %v8511_v44 = vpop.permute.xlu0 %8510 }
 0xe7a   : > { %v8312_v1 = vpop.permute.xlu1 %8311 }
 0xe7b   : > { %10877 = vmatmul.mubr.f32.gmra.mrb[82].mxu1 %v8281_v29 }
 0xe7c   : > { %10879 = vmatprep.mubr.f32.mxu1 %v8282_v31 }
 0xe7d   : > { %v8465_v20 = vpop.permute.xlu0 %8464 }
 0xe7e   : > { %v8460_v24 = vpop.permute.xlu1 %8459 }
 0xe7f   : > { %10880 = vmatmul.mubr.f32.gmra.mrb[84].mxu1 %v8283_v60 }
 0xe80   : > { %10882 = vmatprep.mubr.f32.mxu1 %v8284_v9 }
 0xe81   : > { %v8516_v0 = vpop.permute.xlu0 %8515 }
 0xe82   : > { %v8317_v36 = vpop.permute.xlu1 %8316 }
 0xe83   : > { %10883 = vmatmul.mubr.f32.gmra.mrb[86].mxu1 %v8285_v19 }
 0xe85   : > { %v8521_v21 = vpop.permute.xlu0 %8520 }
 0xe86   : > { %v8322_v28 = vpop.permute.xlu1 %8321 }
 0xe89   : > { %v8475_v25 = vpop.permute.xlu0 %8474 }
 0xe8a   : > { %v8470_v49 = vpop.permute.xlu1 %8469 }
 0xe8d   : > { %v8526_v40 = vpop.permute.xlu0 %8525 }
 0xe8e   : > { %v8327_v61 = vpop.permute.xlu1 %8326 }
 0xe91   : > { %v8531_v6 = vpop.permute.xlu0 %8530 }
 0xe92   : > { %v8332_v15 = vpop.permute.xlu1 %8331 }
 0xe95   : > { %v8485_v50 = vpop.permute.xlu0 %8484 }
 0xe96   : > { %v8480_v63 = vpop.permute.xlu1 %8479 }
 0xe99   : > { %v8541_v60 = vpop.permute.xlu0 %8540 }
 0xe9a   : > { %v8536_v23 = vpop.permute.xlu1 %8535 }
 0xf4a   : > { %v10875_v53 = vpop.f32.mrb[80].mxu1 }
 0xf4b   : > { %v8406_v47 = vadd.f32 %v10875_v53, %v8302_v8  ;;  %v8400_v41 = vpop.f32.mrb[81].mxu1  ;;  %v8698_v8 = vpop.permute.xlu1 %8697 }
 0xf4c   : > { %v8401_v52 = vadd.f32 %v8400_v41, %v8297_v14  ;;  %v8703_v14 = vpop.permute.xlu0 %8702 }
 0xf4d   : > { %v8488_v26 = vmul.f32 %v8455_v13, %v8406_v47 }
 0xf4e   : > { %v8487_v17 = vmul.f32 %v8450_v12, %v8401_v52  ;;  %v10878_v32 = vpop.f32.mrb[82].mxu1  ;;  %v8831_v12 = vld [vmem:[%s16201_s2] sm:$0xff] }
 0xf4f   : > { %v8544_v48 = vadd.f32 %v8511_v44, %v8488_v26  ;;  %v8416_v3 = vadd.f32 %v10878_v32, %v8312_v1  ;;  %v8410_v43 = vpop.f32.mrb[83].mxu1  ;;  %v8754_v13 = vpop.permute.xlu1 %8753  ;;  %v8833_v1 = vld [vmem:[%s16201_s2 + $0x10] sm:$0xff] }
 0xf50   : > { %v8411_v51 = vadd.f32 %v8410_v43, %v8307_v18  ;;  %v8543_v27 = vadd.f32 %v8506_v42, %v8487_v17  ;;  %v8832_v42 = vld [vmem:[%s16201_s2 + $0x8] sm:$0xff]  ;;  %v8708_v44 = vpop.permute.xlu0 %8707 }
 0xf51   : > { %v8490_v30 = vmul.f32 %v8465_v20, %v8416_v3  ;;  %v8552_v46 = vmax.f32 %v8544_v48, 0.0  ;;  %v11333_v18 = vpack.c.bf16 %v8832_v42, %v8831_v12  ;;  %v8834_v20 = vld [vmem:[%s16201_s2 + $0x18] sm:$0xff]  ;;  %v8837_v48 = vld [vmem:[%s16201_s2 + $0x30] sm:$0xff] }
 0xf52   : > { %v8489_v57 = vmul.f32 %v8460_v24, %v8411_v51  ;;  %v10881_v34 = vpop.f32.mrb[84].mxu1  ;;  %v8551_v38 = vmax.f32 %v8543_v27, 0.0  ;;  %v8838_v3 = vld [vmem:[%s16201_s2 + $0x38] sm:$0xff] }
 0xf53   : > { %v8426_v33 = vadd.f32 %v10881_v34, %v8322_v28  ;;  %v8420_v39 = vpop.f32.mrb[85].mxu1  ;;  %v8546_v37 = vadd.f32 %v8521_v21, %v8490_v30  ;;  %11334 = vmatprep.subr.bf16.mxu1 %v11333_v18  ;;  %v8759_v24 = vpop.permute.xlu1 %8758  ;;  %v11345_v43 = vpack.c.bf16 %v8838_v3, %v8837_v48 }
 0xf54   : > { %v8421_v16 = vadd.f32 %v8420_v39, %v8317_v36  ;;  %10917 = vmatprep.mubr.f32.mxu0 %v8551_v38  ;;  %v8545_v45 = vadd.f32 %v8516_v0, %v8489_v57  ;;  %11336 = vmatpush3.bf16.msra.mxu1 %v11333_v18  ;;  %v10020_v0 = vld [vmem:[%s16202_s3] ss:$0 sm:$0xff]  ;;  %v11337_v36 = vpack.c.bf16 %v8834_v20, %v8833_v1  ;;  %v8713_v53 = vpop.permute.xlu0 %8712  ;;  %s16203_s3 = sld [smem:[#allocation27_spill]] }
 0xf55   : > { %v8492_v10 = vmul.f32 %v8475_v25, %v8426_v33  ;;  %10918 = vmatmul.mubr.f32.vlgmr.msra.gmra.mrb[84].mxu0 %v8552_v46  ;;  %v8554_v58 = vmax.f32 %v8546_v37, 0.0 }
 0xf56   : > { %v8491_v22 = vmul.f32 %v8470_v49, %v8421_v16  ;;  %v10884_v54 = vpop.f32.mrb[86].mxu1  ;;  %v8553_v5 = vmax.f32 %v8545_v45, 0.0  ;;  %11338 = vmatprep.subr.bf16.mxu1 %v11337_v36 }
 0xf57   : > { %v8436_v56 = vadd.f32 %v10884_v54, %v8332_v15  ;;  %v8430_v4 = vpop.f32.mrb[87].mxu1  ;;  %v8548_v2 = vadd.f32 %v8531_v6, %v8492_v10  ;;  %v8764_v26 = vpop.permute.xlu1 %8763 }
 0xf58   : > { %v8431_v62 = vadd.f32 %v8430_v4, %v8327_v61  ;;  %10920 = vmatprep.mubr.f32.mxu0 %v8553_v5  ;;  %v8547_v29 = vadd.f32 %v8526_v40, %v8491_v22  ;;  %11340 = vmatpush3.bf16.msra.mxu1 %v11337_v36  ;;  %v8835_v40 = vld [vmem:[%s16201_s2 + $0x20] sm:$0xff]  ;;  %v8836_v61 = vld [vmem:[%s16201_s2 + $0x28] sm:$0xff]  ;;  %v8718_v27 = vpop.permute.xlu0 %8717  ;;  %s16204_s2 = sld [smem:[#allocation26_spill]] }
 0xf59   : > { %v8494_v31 = vmul.f32 %v8485_v50, %v8436_v56  ;;  %10921 = vmatmul.mubr.f32.gmra.mrb[86].mxu0 %v8554_v58  ;;  %v8556_v59 = vmax.f32 %v8548_v2, 0.0  ;;  %v11341_v47 = vpack.c.bf16 %v8836_v61, %v8835_v40 }
 0xf5a   : > { %v8493_v9 = vmul.f32 %v8480_v63, %v8431_v62  ;;  %v8555_v19 = vmax.f32 %v8547_v29, 0.0  ;;  %v8983_v18 = vld [vmem:[%s16203_s3] sm:$0xff]  ;;  %v8985_v20 = vld [vmem:[%s16203_s3 + $0x10] sm:$0xff] }
 0xf5b   : > { %v8550_v55 = vadd.f32 %v8541_v60, %v8494_v31  ;;  %11342 = vmatprep.subr.bf16.mxu1 %v11341_v47  ;;  %v8769_v46 = vpop.permute.xlu1 %8768  ;;  %v8987_v36 = vld [vmem:[%s16203_s3 + $0x20] sm:$0xff] }
 0xf5c   : > { %10923 = vmatprep.mubr.f32.mxu0 %v8555_v19  ;;  %v8549_v35 = vadd.f32 %v8536_v23, %v8493_v9  ;;  %11344 = vmatpush3.bf16.msra.mxu1 %v11341_v47  ;;  %v8723_v45 = vpop.permute.xlu0 %8722 }
 0xf5d   : > { %10924 = vmatmul.mubr.f32.gmra.mrb[88].mxu0 %v8556_v59  ;;  %v8558_v7 = vmax.f32 %v8550_v55, 0.0  ;;  %11346 = vmatprep.subr.bf16.mxu1 %v11345_v43 }
 0xf5e   : > { %v8557_v11 = vmax.f32 %v8549_v35, 0.0  ;;  %v10021_v61 = vld [vmem:[%s16204_s2] ss:$0 sm:$0xff]  ;;  %s11765_s2 = smov 64  }
 0xf5f   : > { %v8774_v63 = vpop.permute.xlu1 %8773 }
 0xf60   : > { %10926 = vmatprep.mubr.f32.mxu0 %v8557_v11  ;;  %11348 = vmatpush3.bf16.msra.mxu1 %v11345_v43  ;;  %v8728_v5 = vpop.permute.xlu0 %8727 }
 0xf61   : > { %10927 = vmatmul.mubr.f32.gmra.mrb[90].mxu0 %v8558_v7 }
 0xf63   : > { %v8779_v2 = vpop.permute.xlu1 %8778 }
 0xf64   : > { %v8733_v60 = vpop.permute.xlu0 %8732 }
 0xf67   : > { %v8784_v9 = vpop.permute.xlu1 %8783 }
 0xf68   : > { %v8789_v59 = vpop.permute.xlu0 %8788 }
0x1028   : > { %v10919_v21 = vpop.f32.mrb[84].mxu0 }
0x1029   : > { %v8648_v28 = vpop.f32.mrb[85].mxu0  ;;  %v8654_v25 = vadd.f32 %v10919_v21, %v10020_v0  ;;  %v8988_v21 = vld [vmem:[%s16203_s3 + $0x28] sm:$0xff] }
0x102a   : > { %v8649_v49 = vadd.f32 %v10020_v0, %v8648_v28  ;;  %v11357_v28 = vpack.c.bf16 %v8988_v21, %v8987_v36 }
0x102b   : > { %v8736_v17 = vmul.f32 %v8703_v14, %v8654_v25  ;;  %v8989_v25 = vld [vmem:[%s16203_s3 + $0x30] sm:$0xff] }
0x102c   : > { %v8735_v41 = vmul.f32 %v8698_v8, %v8649_v49  ;;  %v10922_v52 = vpop.f32.mrb[86].mxu0  ;;  %v8990_v49 = vld [vmem:[%s16203_s3 + $0x38] sm:$0xff] }
0x102d   : > { %v8658_v6 = vpop.f32.mrb[87].mxu0  ;;  %v8792_v57 = vadd.f32 %v8759_v24, %v8736_v17  ;;  %v8664_v34 = vadd.f32 %v10922_v52, %v10020_v0  ;;  %v8986_v24 = vld [vmem:[%s16203_s3 + $0x18] sm:$0xff]  ;;  %v11361_v40 = vpack.c.bf16 %v8990_v49, %v8989_v25 }
0x102e   : > { %v8791_v32 = vadd.f32 %v8754_v13, %v8735_v41  ;;  %v8659_v15 = vadd.f32 %v10020_v0, %v8658_v6 }
0x102f   : > { %v8738_v37 = vmul.f32 %v8713_v53, %v8664_v34 }
0x1030   : > { %v10925_v51 = vpop.f32.mrb[88].mxu0  ;;  %8799 = vxpose.xlu1.b32.start [1/8] (short) (narrow) %v8791_v32, 64  ;;  %v8737_v38 = vmul.f32 %v8708_v44, %v8659_v15  ;;  %v8984_v44 = vld [vmem:[%s16203_s3 + $0x8] sm:$0xff]  ;;  %s10039_s3 = sshll.u32 %s11963_s0, 4  ;;  %s11666_s0 = sshll.u32 %s11766_s13, 4  ;;  %s11667_s0 = int_to_ptr.vmem [resolvable:$false] %s11666_s0 }
0x1031   : > { %v8668_v30 = vpop.f32.mrb[89].mxu0  ;;  %v8794_v10 = vadd.f32 %v8769_v46, %v8738_v37  ;;  %v8674_v22 = vadd.f32 %v10925_v51, %v10020_v0  ;;  %v11349_v1 = vpack.c.bf16 %v8984_v44, %v8983_v18  ;;  %s11668_s14 = scalar_lea.vmem %s11667_s0, 32 }
0x1032   : > { %v8793_v50 = vadd.f32 %v8764_v26, %v8737_v38  ;;  %v8669_v16 = vadd.f32 %v10020_v0, %v8668_v30 }
0x1033   : > { %v8740_v56 = vmul.f32 %v8723_v45, %v8674_v22  ;;  %11365 = vmatprep.subr.bf16.mxu1 %v11349_v1  ;;  %11350 = vmatprep.subr.bf16.mxu0 %v11349_v1 }
0x1034   : > { %v10928_v33 = vpop.f32.mrb[90].mxu0  ;;  %8800 = vxpose.xlu1.b32.cont [2/8] (short) (narrow) %v8792_v57, 64  ;;  %v8739_v54 = vmul.f32 %v8718_v27, %v8669_v16  ;;  %11352 = vmatpush3.bf16.msra.mxu0 %v11349_v1 }
0x1035   : > { %v8678_v39 = vpop.f32.mrb[91].mxu0  ;;  %v8796_v62 = vadd.f32 %v8779_v2, %v8740_v56  ;;  %v8684_v29 = vadd.f32 %v10928_v33, %v10020_v0 }
0x1036   : > { %v8795_v4 = vadd.f32 %v8774_v63, %v8739_v54  ;;  %v8679_v58 = vadd.f32 %v10020_v0, %v8678_v39  ;;  %v11353_v0 = vpack.c.bf16 %v8986_v24, %v8985_v20  ;;  %v10030_v54 = vld [vmem:[%s16205_s8] ss:$0 sm:$0xff]  ;;  %s15596_s8 = scalar_lea.hbm %s11940_s4, %s10039_s3 }
0x1037   : > { %v8742_v19 = vmul.f32 %v8733_v60, %v8684_v29 }
0x1038   : > { %8801 = vxpose.xlu1.b32.cont [3/8] (short) (narrow) %v8793_v50, 64  ;;  %v8741_v31 = vmul.f32 %v8728_v5, %v8679_v58  ;;  %11354 = vmatprep.subr.bf16.mxu0 %v11353_v0 }
0x1039   : > { %v8798_v55 = vadd.f32 %v8789_v59, %v8742_v19  ;;  %11356 = vmatpush3.bf16.msra.mxu0 %v11353_v0 }
0x103a   : > { %v8797_v23 = vadd.f32 %v8784_v9, %v8741_v31  ;;  %11358 = vmatprep.subr.bf16.mxu0 %v11357_v28 }
0x103c   : > { %8802 = vxpose.xlu1.b32.cont [4/8] (short) (narrow) %v8794_v10, 64 }
0x103d   : > { %11360 = vmatpush3.bf16.msra.mxu0 %v11357_v28 }
0x103e   : > { %11362 = vmatprep.subr.bf16.mxu0 %v11361_v40 }
0x1040   : > { %8803 = vxpose.xlu1.b32.cont [5/8] (short) (narrow) %v8795_v4, 64 }
0x1041   : > { %11364 = vmatpush3.bf16.msra.mxu0 %v11361_v40 }
0x1044   : > { %8804 = vxpose.xlu1.b32.cont [6/8] (short) (narrow) %v8796_v62, 64 }
0x1048   : > { %8805 = vxpose.xlu1.b32.cont [7/8] (short) (narrow) %v8797_v23, 64 }
0x104c   : > { %8806 = vxpose.xlu1.b32.end [8/8] (short) (narrow) %v8798_v55, 64 }
0x10b0   : > { %v15492_v35 = vpop.trf.xlu1 }
0x10b1   : > { %10945 = vmatprep.mubr.msk.f32.mxu1 %vm1222_vm0, %v15492_v35 }
0x10b4   : > { %v15496_v11 = vpop.trf.xlu1 }
0x10b5   : > { %10946 = vmatmul.mubr.msk.f32.vlgmr.msra.gmra.mrb[88].mxu1 %vm1222_vm0, %v15496_v11 }
0x10b6   : > { %11369 = vmatpush3.bf16.msra.mxu1 %v11349_v1 }
0x10b7   : > { %11366 = vmatprep.subr.bf16.mxu1 %v11353_v0 }
0x10b8   : > { %v15500_v7 = vpop.trf.xlu1 }
0x10b9   : > { %10948 = vmatprep.mubr.msk.f32.mxu1 %vm1222_vm0, %v15500_v7 }
0x10ba   : > { %11370 = vmatpush3.bf16.msra.mxu1 %v11353_v0 }
0x10bb   : > { %11367 = vmatprep.subr.bf16.mxu1 %v11357_v28 }
0x10bc   : > { %v15504_v8 = vpop.trf.xlu1 }
0x10bd   : > { %10949 = vmatmul.mubr.msk.f32.gmra.mrb[90].mxu1 %vm1222_vm0, %v15504_v8 }
0x10be   : > { %11371 = vmatpush3.bf16.msra.mxu1 %v11357_v28 }
0x10bf   : > { %11368 = vmatprep.subr.bf16.mxu1 %v11361_v40 }
0x10c0   : > { %v15508_v14 = vpop.trf.xlu1 }
0x10c1   : > { %10951 = vmatprep.mubr.msk.f32.mxu1 %vm1222_vm0, %v15508_v14 }
0x10c2   : > { %11372 = vmatpush3.bf16.msra.mxu1 %v11361_v40 }
0x10c4   : > { %v15512_v13 = vpop.trf.xlu1 }
0x10c5   : > { %10952 = vmatmul.mubr.msk.f32.gmra.mrb[92].mxu1 %vm1222_vm0, %v15512_v13 }
0x10c8   : > { %v15516_v12 = vpop.trf.xlu1 }
0x10c9   : > { %10954 = vmatprep.mubr.msk.f32.mxu1 %vm1222_vm0, %v15516_v12 }
0x10cc   : > { %v15520_v42 = vpop.trf.xlu1 }
0x10cd   : > { %10955 = vmatmul.mubr.msk.f32.gmra.mrb[94].mxu1 %vm1222_vm0, %v15520_v42 }
0x1188   : > { %v10947_v53 = vpop.f32.mrb[88].mxu1 }
0x1189   : > { %v8942_v47 = vadd.f32 %v10947_v53, %v10021_v61  ;;  %v8936_v41 = vpop.f32.mrb[89].mxu1 }
0x118a   : > { %v8937_v52 = vadd.f32 %v10021_v61, %v8936_v41 }
0x118c   : > { %11622 = vtanh.f32 %v8937_v52 }
0x118d   : > { %11624 = vtanh.f32 %v8942_v47 }
0x1190   : > { %v10950_v26 = vpop.f32.mrb[90].mxu1 }
0x1191   : > { %v8952_v6 = vadd.f32 %v10950_v26, %v10021_v61  ;;  %v8946_v17 = vpop.f32.mrb[91].mxu1 }
0x1192   : > { %v8947_v32 = vadd.f32 %v10021_v61, %v8946_v17 }
0x1194   : > { %11626 = vtanh.f32 %v8947_v32 }
0x1195   : > { %11628 = vtanh.f32 %v8952_v6 }
0x1196   : > { %v11623_v15 = vpop.eup %11622 }
0x1197   : > { %v11625_v48 = vpop.eup %11624  ;;  %10973 = vmatprep.mubr.msk.f32.mxu0 %vm1222_vm0, %v11623_v15 }
0x1198   : > { %v10953_v3 = vpop.f32.mrb[92].mxu1  ;;  %10974 = vmatmul.mubr.msk.f32.vlgmr.msra.gmra.mrb[92].mxu0 %vm1222_vm0, %v11625_v48 }
0x1199   : > { %v8962_v43 = vadd.f32 %v10953_v3, %v10021_v61  ;;  %v8956_v51 = vpop.f32.mrb[93].mxu1 }
0x119a   : > { %v8957_v27 = vadd.f32 %v10021_v61, %v8956_v51 }
0x119c   : > { %11630 = vtanh.f32 %v8957_v27 }
0x119d   : > { %11632 = vtanh.f32 %v8962_v43 }
0x119e   : > { %v11627_v30 = vpop.eup %11626 }
0x119f   : > { %v11629_v57 = vpop.eup %11628  ;;  %10976 = vmatprep.mubr.msk.f32.mxu1 %vm1222_vm0, %v11627_v30 }
0x11a0   : > { %v10956_v34 = vpop.f32.mrb[94].mxu1  ;;  %10977 = vmatmul.mubr.msk.f32.vlgmr.msra.gmra.mrb[96].mxu1 %vm1222_vm0, %v11629_v57 }
0x11a1   : > { %v8972_v38 = vadd.f32 %v10956_v34, %v10021_v61  ;;  %v8966_v46 = vpop.f32.mrb[95].mxu1 }
0x11a2   : > { %v8967_v33 = vadd.f32 %v10021_v61, %v8966_v46 }
0x11a4   : > { %11634 = vtanh.f32 %v8967_v33 }
0x11a5   : > { %11636 = vtanh.f32 %v8972_v38 }
0x11a6   : > { %v11631_v39 = vpop.eup %11630 }
0x11a7   : > { %v11633_v37 = vpop.eup %11632  ;;  %10979 = vmatprep.mubr.msk.f32.mxu1 %vm1222_vm0, %v11631_v39 }
0x11a8   : > { %10980 = vmatmul.mubr.msk.f32.gmra.mrb[98].mxu1 %vm1222_vm0, %v11633_v37 }
0x11ae   : > { %v11635_v50 = vpop.eup %11634 }
0x11af   : > { %v11637_v16 = vpop.eup %11636  ;;  %10982 = vmatprep.mubr.msk.f32.mxu1 %vm1222_vm0, %v11635_v50 }
0x11b0   : > { %10983 = vmatmul.mubr.msk.f32.gmra.mrb[100].mxu1 %vm1222_vm0, %v11637_v16 }
0x126b   : > { %v10975_v45 = vpop.f32.mrb[92].mxu0 }
0x126c   : > { %v9088_v63 = vpop.f32.mrb[93].mxu0  ;;  %v9094_v5 = vadd.f32 %v10975_v45, %v10030_v54 }
0x126d   : > { %v9089_v4 = vadd.f32 %v10030_v54, %v9088_v63 }
0x126e   : > { %v9128_v31 = vsel %vm1222_vm0, %v9094_v5, -inf }
0x126f   : > { %v9127_v19 = vsel %vm1222_vm0, %v9089_v4, -inf }
0x1273   : > { %v10978_v10 = vpop.f32.mrb[96].mxu1 }
0x1274   : > { %v9098_v22 = vpop.f32.mrb[97].mxu1  ;;  %v9104_v59 = vadd.f32 %v10978_v10, %v10030_v54 }
0x1275   : > { %v9099_v18 = vadd.f32 %v10030_v54, %v9098_v22 }
0x1276   : > { %v9130_v0 = vsel %vm1222_vm0, %v9104_v59, -inf }
0x1277   : > { %v9129_v21 = vsel %vm1222_vm0, %v9099_v18, -inf }
0x127b   : > { %v10981_v56 = vpop.f32.mrb[98].mxu1 }
0x127c   : > { %v9114_v58 = vadd.f32 %v10981_v56, %v10030_v54  ;;  %v9108_v2 = vpop.f32.mrb[99].mxu1 }
0x127d   : > { %v9109_v62 = vadd.f32 %v10030_v54, %v9108_v2 }
0x127e   : > { %v9133_v29 = vsel %vm1222_vm0, %v9114_v58, -inf }
0x127f   : > { %v9131_v60 = vsel %vm1222_vm0, %v9109_v62, -inf  ;;  %v9134_v9 = vmax.f32 %v9128_v31, %v9133_v29 }
0x1280   : > { %v9132_v23 = vmax.f32 %v9127_v19, %v9131_v60 }
0x1282   : > { %v9139_v55 = vmax.f32 %v9132_v23, %v9134_v9 }
0x1283   : > { %v10984_v44 = vpop.f32.mrb[100].mxu1 }
0x1284   : > { %v9124_v1 = vadd.f32 %v10984_v44, %v10030_v54  ;;  %v9118_v20 = vpop.f32.mrb[101].mxu1 }
0x1285   : > { %v9119_v24 = vadd.f32 %v10030_v54, %v9118_v20 }
0x1286   : > { %v9137_v36 = vsel %vm1222_vm0, %v9124_v1, -inf }
0x1287   : > { %v9138_v28 = vmax.f32 %v9130_v0, %v9137_v36  ;;  %v9135_v25 = vsel %vm1222_vm0, %v9119_v24, -inf }
0x1288   : > { %v9136_v49 = vmax.f32 %v9129_v21, %v9135_v25 }
0x128a   : > { %v9140_v40 = vmax.f32 %v9136_v49, %v9138_v28 }
0x128c   : > { %v9141_v61 = vmax.f32 %v9139_v55, %v9140_v40 }
0x128e   : > { %v9142_v53 = vrot.slane %v9141_v61, 4 }
0x1290   : > { %v9143_v47 = vmax.f32 %v9141_v61, %v9142_v53 }
0x1292   : > { %v9144_v41 = vrot.slane %v9143_v47, 2 }
0x1294   : > { %v9145_v52 = vmax.f32 %v9143_v47, %v9144_v41 }
0x1296   : > { %v9146_v26 = vrot.slane %v9145_v52, 1 }
0x1298   : > { %v9147_v6 = vmax.f32 %v9145_v52, %v9146_v26 }
0x129a   : > { %v9148_v17 = vsub.f32 %v9089_v4, %v9147_v6  ;;  %v9149_v32 = vsub.f32 %v9094_v5, %v9147_v6  ;;  %v9150_v15 = vsub.f32 %v9099_v18, %v9147_v6  ;;  %v9151_v48 = vsub.f32 %v9104_v59, %v9147_v6 }
0x129b   : > { %v9152_v3 = vsub.f32 %v9109_v62, %v9147_v6  ;;  %v9153_v43 = vsub.f32 %v9114_v58, %v9147_v6  ;;  %v9154_v51 = vsub.f32 %v9119_v24, %v9147_v6  ;;  %v9155_v27 = vsub.f32 %v9124_v1, %v9147_v6 }
0x129c   : > { %v9156_v30 = vmul.f32 1.442695, %v9148_v17  ;;  %v9158_v57 = vmul.f32 1.442695, %v9149_v32  ;;  %v9160_v34 = vmul.f32 1.442695, %v9150_v15 }
0x129d   : > { %v9162_v38 = vmul.f32 1.442695, %v9151_v48  ;;  %v9164_v46 = vmul.f32 1.442695, %v9152_v3  ;;  %v9166_v33 = vmul.f32 1.442695, %v9153_v43 }
0x129e   : > { %11638 = vpow2.f32 %v9156_v30  ;;  %v9168_v39 = vmul.f32 1.442695, %v9154_v51  ;;  %v9170_v37 = vmul.f32 1.442695, %v9155_v27 }
0x129f   : > { %11640 = vpow2.f32 %v9158_v57 }
0x12a0   : > { %11642 = vpow2.f32 %v9160_v34 }
0x12a1   : > { %11644 = vpow2.f32 %v9162_v38 }
0x12a2   : > { %11646 = vpow2.f32 %v9164_v46 }
0x12a3   : > { %11648 = vpow2.f32 %v9166_v33 }
0x12a4   : > { %11650 = vpow2.f32 %v9168_v39 }
0x12a5   : > { %11652 = vpow2.f32 %v9170_v37 }
0x12a8   : > { %v11639_v50 = vpop.eup %11638 }
0x12a9   : > { %v11641_v16 = vpop.eup %11640  ;;  %v9172_v45 = vsel %vm1222_vm0, %v11639_v50, 0.0 }
0x12aa   : > { %v11643_v63 = vpop.eup %11642  ;;  %v9173_v10 = vsel %vm1222_vm0, %v11641_v16, 0.0 }
0x12ab   : > { %v11645_v22 = vpop.eup %11644  ;;  %v9174_v54 = vadd.f32 %v9173_v10, %v9172_v45  ;;  %v9175_v5 = vsel %vm1222_vm0, %v11643_v63, 0.0 }
0x12ac   : > { %v11647_v56 = vpop.eup %11646  ;;  %v9177_v58 = vsel %vm1222_vm0, %v11645_v22, 0.0 }
0x12ad   : > { %v9176_v4 = vadd.f32 %v9175_v5, %v9174_v54  ;;  %v11649_v2 = vpop.eup %11648  ;;  %v9179_v29 = vsel %vm1222_vm0, %v11647_v56, 0.0 }
0x12ae   : > { %v11651_v31 = vpop.eup %11650  ;;  %v9181_v9 = vsel %vm1222_vm0, %v11649_v2, 0.0 }
0x12af   : > { %v9178_v62 = vadd.f32 %v9177_v58, %v9176_v4  ;;  %v11653_v19 = vpop.eup %11652  ;;  %v9183_v59 = vsel %vm1222_vm0, %v11651_v31, 0.0 }
0x12b0   : > { %v9185_v18 = vsel %vm1222_vm0, %v11653_v19, 0.0 }
0x12b1   : > { %v9180_v60 = vadd.f32 %v9179_v29, %v9178_v62 }
0x12b3   : > { %v9182_v23 = vadd.f32 %v9181_v9, %v9180_v60 }
0x12b5   : > { %v9184_v55 = vadd.f32 %v9183_v59, %v9182_v23 }
0x12b7   : > { %v9186_v44 = vadd.f32 %v9185_v18, %v9184_v55 }
0x12b9   : > { %v9187_v1 = vrot.slane %v9186_v44, 4 }
0x12bb   : > { %v9188_v20 = vadd.f32 %v9187_v1, %v9186_v44 }
0x12bd   : > { %v9189_v24 = vrot.slane %v9188_v20, 2 }
0x12bf   : > { %v9190_v0 = vadd.f32 %v9189_v24, %v9188_v20 }
0x12c1   : > { %v9191_v36 = vrot.slane %v9190_v0, 1 }
0x12c3   : > { %v9192_v21 = vadd.f32 %v9191_v36, %v9190_v0 }
0x12c5   : > { %11654 = vrcp.f32 %v9192_v21 }
0x12cf   : > { %v11655_v28 = vpop.eup %11654 }
0x12d0   : > { %v9194_v25 = vmul.f32 %v11655_v28, %v11639_v50  ;;  %v9195_v49 = vmul.f32 %v11655_v28, %v11641_v16  ;;  %v9196_v40 = vmul.f32 %v11655_v28, %v11643_v63  ;;  %v9197_v61 = vmul.f32 %v11655_v28, %v11645_v22 }
0x12d1   : > { %v9198_v53 = vmul.f32 %v11655_v28, %v11647_v56  ;;  %v9199_v47 = vmul.f32 %v11655_v28, %v11649_v2  ;;  %v9200_v41 = vmul.f32 %v11655_v28, %v11651_v31  ;;  %v9201_v52 = vmul.f32 %v11655_v28, %v11653_v19 }
0x12d2   : > { %v9202_v26 = vmul.f32 %v9194_v25, %v15492_v35  ;;  %v9203_v6 = vmul.f32 %v9195_v49, %v15496_v11  ;;  %v9204_v17 = vmul.f32 %v9196_v40, %v15500_v7  ;;  %v9205_v32 = vmul.f32 %v9197_v61, %v15504_v8 }
0x12d3   : > { %v9206_v3 = vmul.f32 %v9198_v53, %v15508_v14  ;;  %v9207_v34 = vmul.f32 %v9199_v47, %v15512_v13  ;;  %v9208_v45 = vmul.f32 %v9200_v41, %v15516_v12  ;;  %v9209_v22 = vmul.f32 %v9201_v52, %v15520_v42 }
0x12d4   : > { %v9210_v15 = vsel %vm1222_vm0, %v9202_v26, 0.0  ;;  %v9211_v48 = vsel %vm1222_vm0, %v9203_v6, 0.0  ;;  %v9213_v51 = vsel %vm1222_vm0, %v9204_v17, 0.0  ;;  %v9231_v27 = vmul.f32 %v9202_v26, %v15492_v35 }
0x12d5   : > { %v9212_v43 = vadd.f32 %v9211_v48, %v9210_v15  ;;  %v9232_v30 = vmul.f32 %v9203_v6, %v15496_v11  ;;  %v9233_v57 = vmul.f32 %v9204_v17, %v15500_v7  ;;  %v9215_v46 = vsel %vm1222_vm0, %v9205_v32, 0.0  ;;  %v9275_v17 = vld [vmem:[%s11930_s20] sm:$0x1] }
0x12d6   : > { %v9234_v33 = vmul.f32 %v9205_v32, %v15504_v8  ;;  %v9239_v39 = vsel %vm1222_vm0, %v9231_v27, 0.0  ;;  %v9217_v35 = vsel %vm1222_vm0, %v9206_v3, 0.0  ;;  %v9235_v11 = vmul.f32 %v9206_v3, %v15508_v14  ;;  %v9277_v15 = vld [vmem:[%s11935_s27] sm:$0x1] }
0x12d7   : > { %v9214_v38 = vadd.f32 %v9213_v51, %v9212_v43  ;;  %v9240_v37 = vsel %vm1222_vm0, %v9232_v30, 0.0  ;;  %v9242_v7 = vsel %vm1222_vm0, %v9233_v57, 0.0  ;;  %v9219_v8 = vsel %vm1222_vm0, %v9207_v34, 0.0 }
0x12d8   : > { %v9241_v16 = vadd.f32 %v9240_v37, %v9239_v39  ;;  %v9236_v54 = vmul.f32 %v9207_v34, %v15512_v13  ;;  %v9244_v5 = vsel %vm1222_vm0, %v9234_v33, 0.0  ;;  %v9221_v58 = vsel %vm1222_vm0, %v9208_v45, 0.0 }
0x12d9   : > { %v9216_v50 = vadd.f32 %v9215_v46, %v9214_v38  ;;  %v9237_v2 = vmul.f32 %v9208_v45, %v15516_v12  ;;  %v9246_v14 = vsel %vm1222_vm0, %v9235_v11, 0.0  ;;  %v9223_v31 = vsel %vm1222_vm0, %v9209_v22, 0.0 }
0x12da   : > { %v9243_v10 = vadd.f32 %v9242_v7, %v9241_v16  ;;  %v9238_v60 = vmul.f32 %v9209_v22, %v15520_v42  ;;  %v9248_v9 = vsel %vm1222_vm0, %v9236_v54, 0.0 }
0x12db   : > { %v9218_v63 = vadd.f32 %v9217_v35, %v9216_v50  ;;  %v9250_v23 = vsel %vm1222_vm0, %v9237_v2, 0.0 }
0x12dc   : > { %v9245_v4 = vadd.f32 %v9244_v5, %v9243_v10  ;;  %v9252_v18 = vsel %vm1222_vm0, %v9238_v60, 0.0 }
0x12dd   : > { %v9220_v56 = vadd.f32 %v9219_v8, %v9218_v63 }
0x12de   : > { %v9247_v29 = vadd.f32 %v9246_v14, %v9245_v4 }
0x12df   : > { %v9222_v62 = vadd.f32 %v9221_v58, %v9220_v56 }
0x12e0   : > { %v9249_v13 = vadd.f32 %v9248_v9, %v9247_v29 }
0x12e1   : > { %v9224_v19 = vadd.f32 %v9223_v31, %v9222_v62 }
0x12e2   : > { %v9251_v55 = vadd.f32 %v9250_v23, %v9249_v13 }
0x12e3   : > { %v9225_v59 = vrot.slane %v9224_v19, 4 }
0x12e4   : > { %v9253_v12 = vadd.f32 %v9252_v18, %v9251_v55 }
0x12e5   : > { %v9226_v44 = vadd.f32 %v9225_v59, %v9224_v19 }
0x12e6   : > { %v9254_v20 = vrot.slane %v9253_v12, 4 }
0x12e7   : > { %v9227_v1 = vrot.slane %v9226_v44, 2 }
0x12e8   : > { %v9255_v0 = vadd.f32 %v9254_v20, %v9253_v12 }
0x12e9   : > { %v9228_v24 = vadd.f32 %v9227_v1, %v9226_v44 }
0x12ea   : > { %v9256_v21 = vrot.slane %v9255_v0, 2 }
0x12eb   : > { %v9229_v36 = vrot.slane %v9228_v24, 1 }
0x12ec   : > { %v9257_v42 = vadd.f32 %v9256_v21, %v9255_v0 }
0x12ed   : > { %v9230_v28 = vadd.f32 %v9229_v36, %v9228_v24 }
0x12ee   : > { %v9258_v25 = vrot.slane %v9257_v42, 1 }
0x12ef   : > { %v9260_v49 = vmul.f32 %v9230_v28, %v9230_v28 }
0x12f0   : > { %v9259_v40 = vadd.f32 %v9258_v25, %v9257_v42 }
0x12f2   : > { %v9261_v61 = vsub.f32 %v9259_v40, %v9260_v49 }
0x12f4   : > { %v9262_v53 = vmax.f32 %v9261_v61, 1e-06 }
0x12f6   : > { %11656 = vrsqrt.f32 %v9262_v53  ;;  %vm9265_vm8 = vcmp.eq.f32.partialorder %v9262_v53, inf  ;;  %v9268_v52 = vand.u32 2147483648, %v9262_v53  ;;  %vm9267_vm9 = vcmp.eq.f32.partialorder %v9262_v53, 0.0 }
0x1300   : > { %v11657_v47 = vpop.eup %11656 }
0x1301   : > { %v9264_v41 = vmul.f32 %v11657_v47, %v9262_v53 }
0x1303   : > { %v9266_v26 = vsel %vm9265_vm8, %v9262_v53, %v9264_v41 }
0x1304   : > { %v9269_v6 = vsel %vm9267_vm9, %v9268_v52, %v9266_v26 }
0x1305   : > { %9271 = vrot.lane.b32.xlu0 %v9269_v6, %s11765_s2  ;;  %s1005_s2 = sand.u32 1, %s11716_s10  }
0x1306   : > { %s1006_s5 = scalar_lea.vmem [#allocation2], %s1005_s2  ;;  %s9296_s9 = scalar_lea.sflag [#allocation3], %s1005_s2 }
0x1307   : > { %s9308_s6 = sshll.u32 %s1006_s5, 4  ;;  %s15598_s6 = int_to_ptr.vmem [resolvable:$true] %s9308_s6 }
0x1308   : > { %s11662_s12 = scalar_lea.vmem %s15598_s6, 16  ;;  %p11669_p0 = scmp.lt.s32.totalorder %s15598_s6, %s11667_s0 }
0x1309   : > { %p11663_p11 = scmp.ne.s32.totalorder %s15598_s6, %s11662_s12  ;;  %p11670_p1 = scmp.lt.s32.totalorder %s11668_s14, %s11662_s12 }
0x130b   : > { %p11664_p12 = pnand %p11663_p11, %p11980_p5  ;;  %p11671_p2 = por %p11670_p1, %p11669_p0 }
0x130d   : > { %p11665_p13 = pneg %p11664_p12 }
0x130f   : > { %p11672_p3 = pnand %p11671_p2, %p11665_p13 }
0x1377   : > { %v9272_v32 = vpop.permute.xlu0 %9271 }
0x1378   : > { %v9274_v48 = vsel %vm1222_vm0, %v9230_v28, %v9272_v32 }
0x1379   : > { %v9276_v3 = vmul.f32 %v9275_v17, %v9274_v48 }
0x137b   : > { %v9278_v43 = vadd.f32 %v9277_v15, %v9276_v3 }
0x137d   : > { %v9279_v51 = vmul.f32 %v9278_v43, %v9278_v43 }
0x137f   : > { %v9281_v27 = vsel %vm9280_vm10, %v9279_v51, 0.0 }
0x1380   : > { %9282 = vadd.xlane.f32.xlu0 %v9281_v27 }
0x140d   : > { %v9283_v30 = vpop.xlane.xlu0 %9282 }
0x140e   : > { %11658 = vrsqrt.f32 %v9283_v30  ;;  %vm9286_vm11 = vcmp.eq.f32.partialorder %v9283_v30, inf  ;;  %v9289_v38 = vand.u32 2147483648, %v9283_v30  ;;  %vm9288_vm12 = vcmp.eq.f32.partialorder %v9283_v30, 0.0 }
0x1418   : > { %v11659_v57 = vpop.eup %11658 }
0x1419   : > { %v9285_v34 = vmul.f32 %v11659_v57, %v9283_v30 }
0x141b   : > { %v9287_v46 = vsel %vm9286_vm11, %v9283_v30, %v9285_v34 }
0x141c   : > { %v9290_v33 = vsel %vm9288_vm12, %v9289_v38, %v9287_v46 }
0x141d   : > { %v9291_v39 = vmax.f32 %v9290_v33, 1e-12 }
0x141f   : > { %11660 = vrcp.f32 %v9291_v39 }
0x1429   : > { %v11661_v37 = vpop.eup %11660 }
0x142a   : > { %v9293_v50 = vmul.f32 %v11661_v37, %v9278_v43 }
0x142c   : > { %9294 = vst [vmem:[%s1006_s5] sm:$0x1] %v9293_v50 }
0x142d   : > { %11675 = shalt.err (!%p11672_p3)
}
0x142e   : > { %s11676_s5 = scalar_lea.hbm %s15596_s8, 16  ;;  %s11680_s13 = scalar_lea.hbm %s11940_s4, 32 }
0x142f   : > { %p11677_p4 = scmp.ne.s32.totalorder %s15596_s8, %s11676_s5  ;;  %p11681_p9 = scmp.lt.u32.totalorder %s15596_s8, %s11940_s4 }
0x1430   : > { %p11682_p10 = scmp.lt.u32.totalorder %s11680_s13, %s11676_s5  ;;  %p11684_p12 = scmp.lt.u32.totalorder %s11676_s5, %s15596_s8 }
0x1431   : > { %p11678_p7 = pnand %p11677_p4, %p11980_p5 }
0x1432   : > { %p11683_p11 = por %p11682_p10, %p11681_p9 }
0x1433   : > { %p11679_p8 = pneg %p11678_p7 }
0x1434   : > { %p11685_p0 = por %p11684_p12, %p11683_p11 }
0x1436   : > { %p11686_p13 = pnand %p11685_p0, %p11679_p8 }
0x1438   : > { %11689 = shalt.err (!%p11686_p13)
}
0x1439   : > { %11373 = dma.vmem_to_hbm [thread:$0]  (%p11980_p5), %s15598_s6, 16, %s15596_s8, %s9296_s9  }
0x143a PF: > { %p11379_p1 = scmp.ge.s32.totalorder %s11724_s15, 2  ;;  %s9320_s14 = sand.u32 1, %s11712_s7  }
0x143b   : > { %s9321_s12 = scalar_lea.sflag [#allocation3], %s9320_s14 }
0x143c   : > { %p11376_p2 = pnand %p11379_p1, %p11984_p6 }
0x143e   : > { %11707 = dma.done.wait (!%p11376_p2), %s9321_s12, 16  }
0x143f   : > { %11709 = vsyncadd (!%p11376_p2), %s9321_s12, 4294967280  ;;  %p77_p3 = scmp.ge.s32.totalorder %s11967_s18, 4   ;;  %s16206_s7 = smov %s11716_s10 }
0x1440   : > { %s16207_s10 = smov %s11720_s11  ;;  %s16208_s11 = smov %s11978_s26 }
0x1441   : > { %s16209_s15 = smov %s11967_s18  ;;  %79 = sbr.rel (!%p77_p3) target bundleno = 68 (0x44), region = 254 }
0x1448   :  { %9325 = vsyncpa [#allocation3], 1 }
0x1449   :  { %9327 = vsyncpa [#allocation3 + $0x1], 1 }

</bundles_post_ra>
